<compile_context>
chip_gen: v7x
topology: tpu7x:2x2x1
jax: 0.10.0
libtpu: 0.0.40
codegen_flags: <defaults>
</compile_context>

<pallas_src>
import functools

import jax
import jax.numpy as jnp
from jax.experimental import pallas as pl
from jax.experimental.pallas import tpu as pltpu

EPS = 1e-5


# ---------------------------------------------------------------------------
# Fused kernel: one grid step == one block of `batch` samples.
# ---------------------------------------------------------------------------
def _cnn0_kernel(xb1_ref, xb2_ref, w1p_ref, w2p_ref, g1_ref, g2_ref, btile_ref,
                 o_ref, *, batch):
    bf16 = jnp.bfloat16

    # ---- constants, loaded once per grid step ----
    w1a = w1p_ref[0:16, :]            # (16, 8)  bf16: cols 0..5 taps, col 6 bias, col 7 zero
    w1b = w1p_ref[16:32, :]
    w2a = w2p_ref[0:32, :]            # (32, 49) bf16: cols 0..47 taps, col 48 bias
    w2b = w2p_ref[32:64, :]

    ones2_515 = jnp.ones((2, 515), bf16)      # conv1 bias taps (branch 1)
    ones2_172 = jnp.ones((2, 172), bf16)      # conv1 bias taps (branch 2)
    ones1_512 = jnp.ones((1, 512), bf16)      # conv2 bias tap  (branch 1)
    ones1_169 = jnp.ones((1, 169), bf16)      # conv2 bias tap  (branch 2)

    lane = jax.lax.broadcasted_iota(jnp.int32, (8, 128), 1)
    out_acc = btile_ref[...]                  # (8, 128) f32, output bias pre-tiled

    def conv(w, rhs):
        # bf16 MXU dot with f32 accumulation; BN scale + bias already folded into w.
        return jnp.maximum(jnp.dot(w, rhs, preferred_element_type=jnp.float32), 0.0)

    for b in range(batch):
        # ===================== branch 1 (CNN1, reconstructed) =====================
        xa = xb1_ref[b]                       # (4, 517) bf16, conv padding applied on host

        def row_shift(r, _xa=xa):
            # the 3 kw lane-shifts of one padded input row, computed once and reused
            return jnp.concatenate([_xa[r:r + 1, 0:515],
                                    _xa[r:r + 1, 1:516],
                                    _xa[r:r + 1, 2:517]], axis=0)     # (3, 515)

        s0 = jnp.float32(0.0)
        s1 = jnp.float32(0.0)

        prev_shift = row_shift(0)
        prev_taps = None                      # (+0, +1) lane shifts of the previous conv row
        for ho in range(3):                   # streamed: <=2 conv rows live at a time
            cur_shift = row_shift(ho + 1)
            im2col = jnp.concatenate([prev_shift, cur_shift, ones2_515], axis=0)   # (8, 515)
            a1 = conv(w1a, im2col)            # (16, 515) f32  == conv1 + BN + ReLU
            taps = (a1[:, 0:514], a1[:, 1:515])
            if prev_taps is not None:
                hp = ho - 1
                # AvgPool2d(2, stride=1)
                p = (prev_taps[0] + prev_taps[1] + taps[0] + taps[1]) * 0.25        # (16, 514)
                pb = p.astype(bf16)
                rhs = jnp.concatenate([pb[:, 0:512], pb[:, 1:513], pb[:, 2:514],
                                       ones1_512], axis=0)                          # (49, 512)
                a2 = conv(w2a, rhs)           # (32, 512) f32  == conv2 + BN + ReLU
                # final AvgPool2d((1,2),1) + Linear folded into g1 (exact)
                s0 = s0 + jnp.sum(a2 * g1_ref[0 * 2 + hp])
                s1 = s1 + jnp.sum(a2 * g1_ref[1 * 2 + hp])
            prev_taps = taps
            prev_shift = cur_shift

        # ============================ branch 2 (CNN2) =============================
        # conv1 stride (1,3): the 3 kw phases were pre-split on the host, so no strided
        # or shifted lane access is needed here.  Only the rows that reach the
        # (1,2)-stride-2 pool's single output row are computed (exact).
        xb = xb2_ref[b]                       # (4, 3, 172) bf16: [row, kw-phase, wo]
        ph = [xb[r] for r in range(3)]        # (3, 172) each; padded row 3 is dead
        a1_rows = []
        for ho in range(2):
            im2col = jnp.concatenate([ph[ho], ph[ho + 1], ones2_172], axis=0)       # (8, 172)
            a1_rows.append(conv(w1b, im2col))                                       # (16, 172)
        p = (a1_rows[0][:, 0:171] + a1_rows[0][:, 1:172]
             + a1_rows[1][:, 0:171] + a1_rows[1][:, 1:172]) * 0.25                  # (16, 171)
        pb = p.astype(bf16)
        rhs = jnp.concatenate([pb[:, 0:169], pb[:, 1:170], pb[:, 2:171],
                               ones1_169], axis=0)                                  # (49, 169)
        a2 = conv(w2b, rhs)                   # (32, 169) f32
        # AvgPool2d((1,2),2) + h_n scale + Linear folded into g2 (exact)
        s0 = s0 + jnp.sum(a2 * g2_ref[0])
        s1 = s1 + jnp.sum(a2 * g2_ref[1])

        # ---- pack this sample's two logits into lanes (2b, 2b+1) of the block slab ----
        out_acc = (out_acc
                   + jnp.where(lane == 2 * b, s0, 0.0)
                   + jnp.where(lane == 2 * b + 1, s1, 0.0))

    o_ref[...] = out_acc


# ---------------------------------------------------------------------------
# Host-side layout / constant folding (pure jnp, traced under jit).
# ---------------------------------------------------------------------------
def _fold_branch_weights(p):
    """Fold conv bias + eval-mode BatchNorm into im2col-layout matmul weights."""
    # conv1: (16,1,2,3) -> (16,6), tap index k = i*3 + j; bias rides in column 6.
    inv1 = p["bn1"]["gamma"] * jax.lax.rsqrt(p["bn1"]["var"] + EPS)
    w1 = p["c1_w"].reshape(16, 6) * inv1[:, None]
    b1 = p["bn1"]["beta"] + (p["c1_b"] - p["bn1"]["mean"]) * inv1
    w1aug = jnp.concatenate([w1, b1[:, None], jnp.zeros((16, 1), jnp.float32)], axis=1)  # (16, 8)

    # conv2: (32,16,1,3) -> (32,48), column index = j*16 + c; bias in column 48.
    inv2 = p["bn2"]["gamma"] * jax.lax.rsqrt(p["bn2"]["var"] + EPS)
    w2 = jnp.transpose(p["c2_w"][:, :, 0, :], (0, 2, 1)).reshape(32, 48) * inv2[:, None]
    b2 = p["bn2"]["beta"] + (p["c2_b"] - p["bn2"]["mean"]) * inv2
    w2aug = jnp.concatenate([w2, b2[:, None]], axis=1)                                   # (32, 49)
    return w1aug, w2aug


@functools.partial(jax.jit, static_argnames=("block_b",))
def cnn0_forward(x, params, block_b=8):
    N = x.shape[0]
    B = int(max(1, min(block_b, 64)))         # 2*B output lanes must fit in 128
    G = -(-N // B)
    Np = G * B

    # Conv padding=1 applied on the host; inputs go to the kernel in bf16 (MXU operands).
    xpad = jnp.pad(x[:, 0].astype(jnp.float32), ((0, 0), (1, 1), (1, 1)))    # (N, 4, 517)
    if Np != N:
        xpad = jnp.pad(xpad, ((0, Np - N), (0, 0), (0, 0)))
    xb1 = xpad.astype(jnp.bfloat16)                                          # (Np, 4, 517)
    # CNN2 conv1 has stride (1,3): pre-split the three kw phases so the kernel never
    # needs strided lane access: xb2[n, h, j, wo] = xpad[n, h, 3*wo + j].
    xb2 = (xpad[:, :, :516].reshape(Np, 4, 172, 3)
           .transpose(0, 1, 3, 2).astype(jnp.bfloat16))                      # (Np, 4, 3, 172)

    # Conv/BN/bias folds, packed into two bf16 weight slabs (one per conv stage).
    w1a, w2a = _fold_branch_weights(params["cnn1"])
    w1b, w2b = _fold_branch_weights(params["cnn2"])
    w1p = jnp.concatenate([w1a, w1b], axis=0).astype(jnp.bfloat16)           # (32, 8)
    w2p = jnp.concatenate([w2a, w2b], axis=0).astype(jnp.bfloat16)           # (64, 49)

    # Head weights with the final AvgPool of each branch (and h_n) folded in exactly.
    W = params["out_w"]                                                      # (2, 32*2*511 + 32*84)
    k1 = 32 * 2 * 511
    W1 = W[:, :k1].reshape(2, 32, 2, 511)                                    # [o, co, h, w]
    W2 = W[:, k1:].reshape(2, 32, 84)                                        # [o, co, w]
    # branch1: p2[w] = 0.5*(a2[w]+a2[w+1]) (pool (1,2), stride 1) -> coeff of a2[v]:
    g1 = 0.5 * (jnp.pad(W1, ((0, 0), (0, 0), (0, 0), (0, 1)))
                + jnp.pad(W1, ((0, 0), (0, 0), (0, 0), (1, 0))))             # (2, 32, 2, 512)
    g1 = jnp.transpose(g1, (0, 2, 1, 3)).reshape(4, 32, 512)                 # index = o*2 + h
    # branch2: p2[wo] = 0.5*(a2[2wo]+a2[2wo+1]) (pool (1,2), stride 2), then * h_n:
    g2 = 0.5 * params["h_n"][0] * jnp.repeat(W2, 2, axis=-1)                 # (2, 32, 168)
    g2 = jnp.pad(g2, ((0, 0), (0, 0), (0, 1)))                               # (2, 32, 169)
    # output bias tiled over the packed output slab (sample b -> lanes 2b, 2b+1)
    btile = jnp.broadcast_to(jnp.tile(params["out_b"].astype(jnp.float32), 64), (8, 128))

    kernel = functools.partial(_cnn0_kernel, batch=B)

    y = pl.pallas_call(
        kernel,
        grid=(G,),
        in_specs=[
            pl.BlockSpec((B, 4, 517), lambda g: (g, 0, 0)),
            pl.BlockSpec((B, 4, 3, 172), lambda g: (g, 0, 0, 0)),
            pl.BlockSpec((32, 8), lambda g: (0, 0)),
            pl.BlockSpec((64, 49), lambda g: (0, 0)),
            pl.BlockSpec((4, 32, 512), lambda g: (0, 0, 0)),
            pl.BlockSpec((2, 32, 169), lambda g: (0, 0, 0)),
            pl.BlockSpec((8, 128), lambda g: (0, 0)),
        ],
        out_specs=pl.BlockSpec((None, 8, 128), lambda g: (g, 0, 0)),
        out_shape=jax.ShapeDtypeStruct((G, 8, 128), jnp.float32),
        compiler_params=pltpu.CompilerParams(
            dimension_semantics=("parallel",)),   # v7x: grid steps shard across both TCs
    )(xb1, xb2, w1p, w2p, g1, g2, btile)

    # slab layout: block g, sublane 0, lanes [2b, 2b+1] hold sample g*B + b
    return y[:, 0, :2 * B].reshape(Np, 2)[:N]


# ---------------------------------------------------------------------------
# Deterministic parameter init (mirrors the PyTorch module's shapes).
# ---------------------------------------------------------------------------
def _bn_params(c):
    return dict(gamma=jnp.ones((c,), jnp.float32), beta=jnp.zeros((c,), jnp.float32),
                mean=jnp.zeros((c,), jnp.float32), var=jnp.ones((c,), jnp.float32))


def init_params(key):
    ks = jax.random.split(key, 11)

    def randn(k, shape, scale=0.1):
        return scale * jax.random.normal(k, shape, dtype=jnp.float32)

    cnn1 = dict(c1_w=randn(ks[0], (16, 1, 2, 3)), c1_b=randn(ks[1], (16,)), bn1=_bn_params(16),
                c2_w=randn(ks[2], (32, 16, 1, 3)), c2_b=randn(ks[3], (32,)), bn2=_bn_params(32))
    cnn2 = dict(c1_w=randn(ks[4], (16, 1, 2, 3)), c1_b=randn(ks[5], (16,)), bn1=_bn_params(16),
                c2_w=randn(ks[6], (32, 16, 1, 3)), c2_b=randn(ks[7], (32,)), bn2=_bn_params(32))
    k_lin = 32 * 2 * 511 + 32 * 1 * 84                        # 35392 (as in nn.Linear(..., 2))
    return dict(cnn1=cnn1, cnn2=cnn2,
                h_n=jax.random.normal(ks[8], (1,), dtype=jnp.float32),
                out_w=randn(ks[9], (2, k_lin), scale=0.01),
                out_b=randn(ks[10], (2,)))


if __name__ == "__main__":
    key = jax.random.PRNGKey(0)
    k_x, k_p = jax.random.split(key)
    # Input implied by the module: (N, 1, 2, 515) -> CNN1 flatten 32*2*511, CNN2 flatten 32*1*84.
    x = jax.random.normal(k_x, (8, 1, 2, 515), dtype=jnp.float32)
    params = init_params(k_p)

    out = jax.block_until_ready(cnn0_forward(x, params, block_b=4))   # grid = (2,)
    assert out.shape == (8, 2) and out.dtype == jnp.float32
    assert bool(jnp.all(jnp.isfinite(out)))
    print("KERNEL_OK")
</pallas_src>

<mosaic_0001>
module attributes {stable_mosaic.version = 11 : i64} {
  func.func @_cnn0_kernel(%arg0: i32, %arg1: memref<4x4x517xbf16, #tpu.memory_space<vmem>>, %arg2: memref<4x4x3x172xbf16, #tpu.memory_space<vmem>>, %arg3: memref<32x8xbf16, #tpu.memory_space<vmem>>, %arg4: memref<64x49xbf16, #tpu.memory_space<vmem>>, %arg5: memref<4x32x512xf32, #tpu.memory_space<vmem>>, %arg6: memref<2x32x169xf32, #tpu.memory_space<vmem>>, %arg7: memref<8x128xf32, #tpu.memory_space<vmem>>, %arg8: memref<1x8x128xf32, #tpu.memory_space<vmem>>) attributes {dimension_semantics = [#tpu.dimension_semantics<parallel>], iteration_bounds = array<i64: 2>, scalar_prefetch = 0 : i64, scratch_operands = 0 : i64, tpu.core_type = #tpu.core_type<tc>, window_params = [{transform_indices = @transform_0, window_bounds = array<i64: 4, 4, 517>}, {transform_indices = @transform_1, window_bounds = array<i64: 4, 4, 3, 172>}, {pipeline_mode = #tpu.pipeline_mode<synchronous>, transform_indices = @transform_2, window_bounds = array<i64: 32, 8>}, {pipeline_mode = #tpu.pipeline_mode<synchronous>, transform_indices = @transform_3, window_bounds = array<i64: 64, 49>}, {pipeline_mode = #tpu.pipeline_mode<synchronous>, transform_indices = @transform_4, window_bounds = array<i64: 4, 32, 512>}, {pipeline_mode = #tpu.pipeline_mode<synchronous>, transform_indices = @transform_5, window_bounds = array<i64: 2, 32, 169>}, {pipeline_mode = #tpu.pipeline_mode<synchronous>, transform_indices = @transform_6, window_bounds = array<i64: 8, 128>}, {transform_indices = @transform_7, window_bounds = array<i64: 1, 8, 128>}]} {
    %c0 = arith.constant 0 : index
    %c0_0 = arith.constant 0 : index
    %0 = vector.load %arg3[%c0, %c0_0] : memref<32x8xbf16, #tpu.memory_space<vmem>>, vector<16x8xbf16>
    %c16 = arith.constant 16 : index
    %c0_1 = arith.constant 0 : index
    %1 = vector.load %arg3[%c16, %c0_1] : memref<32x8xbf16, #tpu.memory_space<vmem>>, vector<16x8xbf16>
    %c0_2 = arith.constant 0 : index
    %c0_3 = arith.constant 0 : index
    %2 = vector.load %arg4[%c0_2, %c0_3] : memref<64x49xbf16, #tpu.memory_space<vmem>>, vector<32x49xbf16>
    %c32 = arith.constant 32 : index
    %c0_4 = arith.constant 0 : index
    %3 = vector.load %arg4[%c32, %c0_4] : memref<64x49xbf16, #tpu.memory_space<vmem>>, vector<32x49xbf16>
    %cst = arith.constant 1.000000e+00 : bf16
    %4 = vector.broadcast %cst : bf16 to vector<2x515xbf16>
    %cst_5 = arith.constant 1.000000e+00 : bf16
    %5 = vector.broadcast %cst_5 : bf16 to vector<2x172xbf16>
    %cst_6 = arith.constant 1.000000e+00 : bf16
    %6 = vector.broadcast %cst_6 : bf16 to vector<1x512xbf16>
    %cst_7 = arith.constant 1.000000e+00 : bf16
    %7 = vector.broadcast %cst_7 : bf16 to vector<1x169xbf16>
    %8 = tpu.iota {dimensions = array<i32: 1>} : vector<8x128xi32>
    %c0_8 = arith.constant 0 : index
    %c0_9 = arith.constant 0 : index
    %9 = vector.load %arg7[%c0_8, %c0_9] : memref<8x128xf32, #tpu.memory_space<vmem>>, vector<8x128xf32>
    %c0_10 = arith.constant 0 : index
    %c0_11 = arith.constant 0 : index
    %c0_12 = arith.constant 0 : index
    %10 = vector.load %arg1[%c0_10, %c0_11, %c0_12] : memref<4x4x517xbf16, #tpu.memory_space<vmem>>, vector<1x4x517xbf16>
    %11 = vector.shape_cast %10 : vector<1x4x517xbf16> to vector<4x517xbf16>
    %12 = vector.extract_strided_slice %11 {offsets = [0, 0], sizes = [1, 515], strides = [1, 1]} : vector<4x517xbf16> to vector<1x515xbf16>
    %13 = vector.extract_strided_slice %11 {offsets = [0, 1], sizes = [1, 515], strides = [1, 1]} : vector<4x517xbf16> to vector<1x515xbf16>
    %14 = vector.extract_strided_slice %11 {offsets = [0, 2], sizes = [1, 515], strides = [1, 1]} : vector<4x517xbf16> to vector<1x515xbf16>
    %15 = tpu.concatenate %12, %13, %14 in 0 : vector<1x515xbf16>, vector<1x515xbf16>, vector<1x515xbf16> -> vector<3x515xbf16>
    %16 = vector.extract_strided_slice %11 {offsets = [1, 0], sizes = [1, 515], strides = [1, 1]} : vector<4x517xbf16> to vector<1x515xbf16>
    %17 = vector.extract_strided_slice %11 {offsets = [1, 1], sizes = [1, 515], strides = [1, 1]} : vector<4x517xbf16> to vector<1x515xbf16>
    %18 = vector.extract_strided_slice %11 {offsets = [1, 2], sizes = [1, 515], strides = [1, 1]} : vector<4x517xbf16> to vector<1x515xbf16>
    %19 = tpu.concatenate %16, %17, %18 in 0 : vector<1x515xbf16>, vector<1x515xbf16>, vector<1x515xbf16> -> vector<3x515xbf16>
    %20 = tpu.concatenate %15, %19, %4 in 0 : vector<3x515xbf16>, vector<3x515xbf16>, vector<2x515xbf16> -> vector<8x515xbf16>
    %cst_13 = arith.constant dense<0.000000e+00> : vector<16x515xf32>
    %21 = tpu.matmul %0, %20, %cst_13 {dimension_numbers = #tpu.dot_dimension_numbers<[1], [0], [0], [1], [0, 0, 1, 1], [], []>} : vector<16x8xbf16>, vector<8x515xbf16>, vector<16x515xf32> -> vector<16x515xf32>
    %cst_14 = arith.constant 0.000000e+00 : f32
    %22 = vector.broadcast %cst_14 : f32 to vector<16x515xf32>
    %23 = arith.maximumf %21, %22 : vector<16x515xf32>
    %24 = vector.extract_strided_slice %23 {offsets = [0, 0], sizes = [16, 514], strides = [1, 1]} : vector<16x515xf32> to vector<16x514xf32>
    %25 = vector.extract_strided_slice %23 {offsets = [0, 1], sizes = [16, 514], strides = [1, 1]} : vector<16x515xf32> to vector<16x514xf32>
    %26 = vector.extract_strided_slice %11 {offsets = [2, 0], sizes = [1, 515], strides = [1, 1]} : vector<4x517xbf16> to vector<1x515xbf16>
    %27 = vector.extract_strided_slice %11 {offsets = [2, 1], sizes = [1, 515], strides = [1, 1]} : vector<4x517xbf16> to vector<1x515xbf16>
    %28 = vector.extract_strided_slice %11 {offsets = [2, 2], sizes = [1, 515], strides = [1, 1]} : vector<4x517xbf16> to vector<1x515xbf16>
    %29 = tpu.concatenate %26, %27, %28 in 0 : vector<1x515xbf16>, vector<1x515xbf16>, vector<1x515xbf16> -> vector<3x515xbf16>
    %30 = tpu.concatenate %19, %29, %4 in 0 : vector<3x515xbf16>, vector<3x515xbf16>, vector<2x515xbf16> -> vector<8x515xbf16>
    %cst_15 = arith.constant dense<0.000000e+00> : vector<16x515xf32>
    %31 = tpu.matmul %0, %30, %cst_15 {dimension_numbers = #tpu.dot_dimension_numbers<[1], [0], [0], [1], [0, 0, 1, 1], [], []>} : vector<16x8xbf16>, vector<8x515xbf16>, vector<16x515xf32> -> vector<16x515xf32>
    %cst_16 = arith.constant 0.000000e+00 : f32
    %32 = vector.broadcast %cst_16 : f32 to vector<16x515xf32>
    %33 = arith.maximumf %31, %32 : vector<16x515xf32>
    %34 = vector.extract_strided_slice %33 {offsets = [0, 0], sizes = [16, 514], strides = [1, 1]} : vector<16x515xf32> to vector<16x514xf32>
    %35 = vector.extract_strided_slice %33 {offsets = [0, 1], sizes = [16, 514], strides = [1, 1]} : vector<16x515xf32> to vector<16x514xf32>
    %36 = arith.addf %24, %25 : vector<16x514xf32>
    %37 = arith.addf %36, %34 : vector<16x514xf32>
    %38 = arith.addf %37, %35 : vector<16x514xf32>
    %cst_17 = arith.constant 2.500000e-01 : f32
    %39 = vector.broadcast %cst_17 : f32 to vector<16x514xf32>
    %40 = arith.mulf %38, %39 : vector<16x514xf32>
    %41 = arith.truncf %40 : vector<16x514xf32> to vector<16x514xbf16>
    %42 = vector.extract_strided_slice %41 {offsets = [0, 0], sizes = [16, 512], strides = [1, 1]} : vector<16x514xbf16> to vector<16x512xbf16>
    %43 = vector.extract_strided_slice %41 {offsets = [0, 1], sizes = [16, 512], strides = [1, 1]} : vector<16x514xbf16> to vector<16x512xbf16>
    %44 = vector.extract_strided_slice %41 {offsets = [0, 2], sizes = [16, 512], strides = [1, 1]} : vector<16x514xbf16> to vector<16x512xbf16>
    %45 = tpu.concatenate %42, %43, %44, %6 in 0 : vector<16x512xbf16>, vector<16x512xbf16>, vector<16x512xbf16>, vector<1x512xbf16> -> vector<49x512xbf16>
    %cst_18 = arith.constant dense<0.000000e+00> : vector<32x512xf32>
    %46 = tpu.matmul %2, %45, %cst_18 {dimension_numbers = #tpu.dot_dimension_numbers<[1], [0], [0], [1], [0, 0, 1, 1], [], []>} : vector<32x49xbf16>, vector<49x512xbf16>, vector<32x512xf32> -> vector<32x512xf32>
    %cst_19 = arith.constant 0.000000e+00 : f32
    %47 = vector.broadcast %cst_19 : f32 to vector<32x512xf32>
    %48 = arith.maximumf %46, %47 : vector<32x512xf32>
    %c0_20 = arith.constant 0 : index
    %c0_21 = arith.constant 0 : index
    %c0_22 = arith.constant 0 : index
    %49 = vector.load %arg5[%c0_20, %c0_21, %c0_22] : memref<4x32x512xf32, #tpu.memory_space<vmem>>, vector<1x32x512xf32>
    %50 = vector.shape_cast %49 : vector<1x32x512xf32> to vector<32x512xf32>
    %51 = arith.mulf %48, %50 : vector<32x512xf32>
    %52 = vector.shape_cast %51 : vector<32x512xf32> to vector<1x32x512xf32>
    %cst_23 = arith.constant dense<0.000000e+00> : vector<1xf32>
    %53 = vector.multi_reduction <add>, %52, %cst_23 [1, 2] : vector<1x32x512xf32> to vector<1xf32>
    %54 = vector.shape_cast %53 : vector<1xf32> to vector<1x1x1xf32>
    %55 = vector.extract %54[0, 0, 0] : f32 from vector<1x1x1xf32>
    %cst_24 = arith.constant 0.000000e+00 : f32
    %56 = arith.addf %cst_24, %55 : f32
    %c2 = arith.constant 2 : index
    %c0_25 = arith.constant 0 : index
    %c0_26 = arith.constant 0 : index
    %57 = vector.load %arg5[%c2, %c0_25, %c0_26] : memref<4x32x512xf32, #tpu.memory_space<vmem>>, vector<1x32x512xf32>
    %58 = vector.shape_cast %57 : vector<1x32x512xf32> to vector<32x512xf32>
    %59 = arith.mulf %48, %58 : vector<32x512xf32>
    %60 = vector.shape_cast %59 : vector<32x512xf32> to vector<1x32x512xf32>
    %cst_27 = arith.constant dense<0.000000e+00> : vector<1xf32>
    %61 = vector.multi_reduction <add>, %60, %cst_27 [1, 2] : vector<1x32x512xf32> to vector<1xf32>
    %62 = vector.shape_cast %61 : vector<1xf32> to vector<1x1x1xf32>
    %63 = vector.extract %62[0, 0, 0] : f32 from vector<1x1x1xf32>
    %cst_28 = arith.constant 0.000000e+00 : f32
    %64 = arith.addf %cst_28, %63 : f32
    %65 = vector.extract_strided_slice %11 {offsets = [3, 0], sizes = [1, 515], strides = [1, 1]} : vector<4x517xbf16> to vector<1x515xbf16>
    %66 = vector.extract_strided_slice %11 {offsets = [3, 1], sizes = [1, 515], strides = [1, 1]} : vector<4x517xbf16> to vector<1x515xbf16>
    %67 = vector.extract_strided_slice %11 {offsets = [3, 2], sizes = [1, 515], strides = [1, 1]} : vector<4x517xbf16> to vector<1x515xbf16>
    %68 = tpu.concatenate %65, %66, %67 in 0 : vector<1x515xbf16>, vector<1x515xbf16>, vector<1x515xbf16> -> vector<3x515xbf16>
    %69 = tpu.concatenate %29, %68, %4 in 0 : vector<3x515xbf16>, vector<3x515xbf16>, vector<2x515xbf16> -> vector<8x515xbf16>
    %cst_29 = arith.constant dense<0.000000e+00> : vector<16x515xf32>
    %70 = tpu.matmul %0, %69, %cst_29 {dimension_numbers = #tpu.dot_dimension_numbers<[1], [0], [0], [1], [0, 0, 1, 1], [], []>} : vector<16x8xbf16>, vector<8x515xbf16>, vector<16x515xf32> -> vector<16x515xf32>
    %cst_30 = arith.constant 0.000000e+00 : f32
    %71 = vector.broadcast %cst_30 : f32 to vector<16x515xf32>
    %72 = arith.maximumf %70, %71 : vector<16x515xf32>
    %73 = vector.extract_strided_slice %72 {offsets = [0, 0], sizes = [16, 514], strides = [1, 1]} : vector<16x515xf32> to vector<16x514xf32>
    %74 = vector.extract_strided_slice %72 {offsets = [0, 1], sizes = [16, 514], strides = [1, 1]} : vector<16x515xf32> to vector<16x514xf32>
    %75 = arith.addf %34, %35 : vector<16x514xf32>
    %76 = arith.addf %75, %73 : vector<16x514xf32>
    %77 = arith.addf %76, %74 : vector<16x514xf32>
    %cst_31 = arith.constant 2.500000e-01 : f32
    %78 = vector.broadcast %cst_31 : f32 to vector<16x514xf32>
    %79 = arith.mulf %77, %78 : vector<16x514xf32>
    %80 = arith.truncf %79 : vector<16x514xf32> to vector<16x514xbf16>
    %81 = vector.extract_strided_slice %80 {offsets = [0, 0], sizes = [16, 512], strides = [1, 1]} : vector<16x514xbf16> to vector<16x512xbf16>
    %82 = vector.extract_strided_slice %80 {offsets = [0, 1], sizes = [16, 512], strides = [1, 1]} : vector<16x514xbf16> to vector<16x512xbf16>
    %83 = vector.extract_strided_slice %80 {offsets = [0, 2], sizes = [16, 512], strides = [1, 1]} : vector<16x514xbf16> to vector<16x512xbf16>
    %84 = tpu.concatenate %81, %82, %83, %6 in 0 : vector<16x512xbf16>, vector<16x512xbf16>, vector<16x512xbf16>, vector<1x512xbf16> -> vector<49x512xbf16>
    %cst_32 = arith.constant dense<0.000000e+00> : vector<32x512xf32>
    %85 = tpu.matmul %2, %84, %cst_32 {dimension_numbers = #tpu.dot_dimension_numbers<[1], [0], [0], [1], [0, 0, 1, 1], [], []>} : vector<32x49xbf16>, vector<49x512xbf16>, vector<32x512xf32> -> vector<32x512xf32>
    %cst_33 = arith.constant 0.000000e+00 : f32
    %86 = vector.broadcast %cst_33 : f32 to vector<32x512xf32>
    %87 = arith.maximumf %85, %86 : vector<32x512xf32>
    %c1 = arith.constant 1 : index
    %c0_34 = arith.constant 0 : index
    %c0_35 = arith.constant 0 : index
    %88 = vector.load %arg5[%c1, %c0_34, %c0_35] : memref<4x32x512xf32, #tpu.memory_space<vmem>>, vector<1x32x512xf32>
    %89 = vector.shape_cast %88 : vector<1x32x512xf32> to vector<32x512xf32>
    %90 = arith.mulf %87, %89 : vector<32x512xf32>
    %91 = vector.shape_cast %90 : vector<32x512xf32> to vector<1x32x512xf32>
    %cst_36 = arith.constant dense<0.000000e+00> : vector<1xf32>
    %92 = vector.multi_reduction <add>, %91, %cst_36 [1, 2] : vector<1x32x512xf32> to vector<1xf32>
    %93 = vector.shape_cast %92 : vector<1xf32> to vector<1x1x1xf32>
    %94 = vector.extract %93[0, 0, 0] : f32 from vector<1x1x1xf32>
    %95 = arith.addf %56, %94 : f32
    %c3 = arith.constant 3 : index
    %c0_37 = arith.constant 0 : index
    %c0_38 = arith.constant 0 : index
    %96 = vector.load %arg5[%c3, %c0_37, %c0_38] : memref<4x32x512xf32, #tpu.memory_space<vmem>>, vector<1x32x512xf32>
    %97 = vector.shape_cast %96 : vector<1x32x512xf32> to vector<32x512xf32>
    %98 = arith.mulf %87, %97 : vector<32x512xf32>
    %99 = vector.shape_cast %98 : vector<32x512xf32> to vector<1x32x512xf32>
    %cst_39 = arith.constant dense<0.000000e+00> : vector<1xf32>
    %100 = vector.multi_reduction <add>, %99, %cst_39 [1, 2] : vector<1x32x512xf32> to vector<1xf32>
    %101 = vector.shape_cast %100 : vector<1xf32> to vector<1x1x1xf32>
    %102 = vector.extract %101[0, 0, 0] : f32 from vector<1x1x1xf32>
    %103 = arith.addf %64, %102 : f32
    %c0_40 = arith.constant 0 : index
    %c0_41 = arith.constant 0 : index
    %c0_42 = arith.constant 0 : index
    %c0_43 = arith.constant 0 : index
    %104 = vector.load %arg2[%c0_40, %c0_41, %c0_42, %c0_43] : memref<4x4x3x172xbf16, #tpu.memory_space<vmem>>, vector<1x4x3x172xbf16>
    %105 = vector.shape_cast %104 : vector<1x4x3x172xbf16> to vector<4x3x172xbf16>
    %106 = vector.extract_strided_slice %105 {offsets = [0, 0, 0], sizes = [1, 3, 172], strides = [1, 1, 1]} : vector<4x3x172xbf16> to vector<1x3x172xbf16>
    %107 = vector.shape_cast %106 : vector<1x3x172xbf16> to vector<3x172xbf16>
    %108 = vector.extract_strided_slice %105 {offsets = [1, 0, 0], sizes = [1, 3, 172], strides = [1, 1, 1]} : vector<4x3x172xbf16> to vector<1x3x172xbf16>
    %109 = vector.shape_cast %108 : vector<1x3x172xbf16> to vector<3x172xbf16>
    %110 = vector.extract_strided_slice %105 {offsets = [2, 0, 0], sizes = [1, 3, 172], strides = [1, 1, 1]} : vector<4x3x172xbf16> to vector<1x3x172xbf16>
    %111 = vector.shape_cast %110 : vector<1x3x172xbf16> to vector<3x172xbf16>
    %112 = tpu.concatenate %107, %109, %5 in 0 : vector<3x172xbf16>, vector<3x172xbf16>, vector<2x172xbf16> -> vector<8x172xbf16>
    %cst_44 = arith.constant dense<0.000000e+00> : vector<16x172xf32>
    %113 = tpu.matmul %1, %112, %cst_44 {dimension_numbers = #tpu.dot_dimension_numbers<[1], [0], [0], [1], [0, 0, 1, 1], [], []>} : vector<16x8xbf16>, vector<8x172xbf16>, vector<16x172xf32> -> vector<16x172xf32>
    %cst_45 = arith.constant 0.000000e+00 : f32
    %114 = vector.broadcast %cst_45 : f32 to vector<16x172xf32>
    %115 = arith.maximumf %113, %114 : vector<16x172xf32>
    %116 = tpu.concatenate %109, %111, %5 in 0 : vector<3x172xbf16>, vector<3x172xbf16>, vector<2x172xbf16> -> vector<8x172xbf16>
    %cst_46 = arith.constant dense<0.000000e+00> : vector<16x172xf32>
    %117 = tpu.matmul %1, %116, %cst_46 {dimension_numbers = #tpu.dot_dimension_numbers<[1], [0], [0], [1], [0, 0, 1, 1], [], []>} : vector<16x8xbf16>, vector<8x172xbf16>, vector<16x172xf32> -> vector<16x172xf32>
    %cst_47 = arith.constant 0.000000e+00 : f32
    %118 = vector.broadcast %cst_47 : f32 to vector<16x172xf32>
    %119 = arith.maximumf %117, %118 : vector<16x172xf32>
    %120 = vector.extract_strided_slice %115 {offsets = [0, 0], sizes = [16, 171], strides = [1, 1]} : vector<16x172xf32> to vector<16x171xf32>
    %121 = vector.extract_strided_slice %115 {offsets = [0, 1], sizes = [16, 171], strides = [1, 1]} : vector<16x172xf32> to vector<16x171xf32>
    %122 = arith.addf %120, %121 : vector<16x171xf32>
    %123 = vector.extract_strided_slice %119 {offsets = [0, 0], sizes = [16, 171], strides = [1, 1]} : vector<16x172xf32> to vector<16x171xf32>
    %124 = arith.addf %122, %123 : vector<16x171xf32>
    %125 = vector.extract_strided_slice %119 {offsets = [0, 1], sizes = [16, 171], strides = [1, 1]} : vector<16x172xf32> to vector<16x171xf32>
    %126 = arith.addf %124, %125 : vector<16x171xf32>
    %cst_48 = arith.constant 2.500000e-01 : f32
    %127 = vector.broadcast %cst_48 : f32 to vector<16x171xf32>
    %128 = arith.mulf %126, %127 : vector<16x171xf32>
    %129 = arith.truncf %128 : vector<16x171xf32> to vector<16x171xbf16>
    %130 = vector.extract_strided_slice %129 {offsets = [0, 0], sizes = [16, 169], strides = [1, 1]} : vector<16x171xbf16> to vector<16x169xbf16>
    %131 = vector.extract_strided_slice %129 {offsets = [0, 1], sizes = [16, 169], strides = [1, 1]} : vector<16x171xbf16> to vector<16x169xbf16>
    %132 = vector.extract_strided_slice %129 {offsets = [0, 2], sizes = [16, 169], strides = [1, 1]} : vector<16x171xbf16> to vector<16x169xbf16>
    %133 = tpu.concatenate %130, %131, %132, %7 in 0 : vector<16x169xbf16>, vector<16x169xbf16>, vector<16x169xbf16>, vector<1x169xbf16> -> vector<49x169xbf16>
    %cst_49 = arith.constant dense<0.000000e+00> : vector<32x169xf32>
    %134 = tpu.matmul %3, %133, %cst_49 {dimension_numbers = #tpu.dot_dimension_numbers<[1], [0], [0], [1], [0, 0, 1, 1], [], []>} : vector<32x49xbf16>, vector<49x169xbf16>, vector<32x169xf32> -> vector<32x169xf32>
    %cst_50 = arith.constant 0.000000e+00 : f32
    %135 = vector.broadcast %cst_50 : f32 to vector<32x169xf32>
    %136 = arith.maximumf %134, %135 : vector<32x169xf32>
    %c0_51 = arith.constant 0 : index
    %c0_52 = arith.constant 0 : index
    %c0_53 = arith.constant 0 : index
    %137 = vector.load %arg6[%c0_51, %c0_52, %c0_53] : memref<2x32x169xf32, #tpu.memory_space<vmem>>, vector<1x32x169xf32>
    %138 = vector.shape_cast %137 : vector<1x32x169xf32> to vector<32x169xf32>
    %139 = arith.mulf %136, %138 : vector<32x169xf32>
    %140 = vector.shape_cast %139 : vector<32x169xf32> to vector<1x32x169xf32>
    %cst_54 = arith.constant dense<0.000000e+00> : vector<1xf32>
    %141 = vector.multi_reduction <add>, %140, %cst_54 [1, 2] : vector<1x32x169xf32> to vector<1xf32>
    %142 = vector.shape_cast %141 : vector<1xf32> to vector<1x1x1xf32>
    %143 = vector.extract %142[0, 0, 0] : f32 from vector<1x1x1xf32>
    %144 = arith.addf %95, %143 : f32
    %c1_55 = arith.constant 1 : index
    %c0_56 = arith.constant 0 : index
    %c0_57 = arith.constant 0 : index
    %145 = vector.load %arg6[%c1_55, %c0_56, %c0_57] : memref<2x32x169xf32, #tpu.memory_space<vmem>>, vector<1x32x169xf32>
    %146 = vector.shape_cast %145 : vector<1x32x169xf32> to vector<32x169xf32>
    %147 = arith.mulf %136, %146 : vector<32x169xf32>
    %148 = vector.shape_cast %147 : vector<32x169xf32> to vector<1x32x169xf32>
    %cst_58 = arith.constant dense<0.000000e+00> : vector<1xf32>
    %149 = vector.multi_reduction <add>, %148, %cst_58 [1, 2] : vector<1x32x169xf32> to vector<1xf32>
    %150 = vector.shape_cast %149 : vector<1xf32> to vector<1x1x1xf32>
    %151 = vector.extract %150[0, 0, 0] : f32 from vector<1x1x1xf32>
    %152 = arith.addf %103, %151 : f32
    %c0_i32 = arith.constant 0 : i32
    %153 = vector.broadcast %c0_i32 : i32 to vector<8x128xi32>
    %154 = arith.cmpi eq, %8, %153 : vector<8x128xi32>
    %cst_59 = arith.constant 0.000000e+00 : f32
    %155 = vector.broadcast %144 : f32 to vector<8x128xf32>
    %156 = vector.broadcast %cst_59 : f32 to vector<8x128xf32>
    %157 = arith.select %154, %155, %156 : vector<8x128xi1>, vector<8x128xf32>
    %158 = arith.addf %9, %157 : vector<8x128xf32>
    %c1_i32 = arith.constant 1 : i32
    %159 = vector.broadcast %c1_i32 : i32 to vector<8x128xi32>
    %160 = arith.cmpi eq, %8, %159 : vector<8x128xi32>
    %cst_60 = arith.constant 0.000000e+00 : f32
    %161 = vector.broadcast %152 : f32 to vector<8x128xf32>
    %162 = vector.broadcast %cst_60 : f32 to vector<8x128xf32>
    %163 = arith.select %160, %161, %162 : vector<8x128xi1>, vector<8x128xf32>
    %164 = arith.addf %158, %163 : vector<8x128xf32>
    %c1_61 = arith.constant 1 : index
    %c0_62 = arith.constant 0 : index
    %c0_63 = arith.constant 0 : index
    %165 = vector.load %arg1[%c1_61, %c0_62, %c0_63] : memref<4x4x517xbf16, #tpu.memory_space<vmem>>, vector<1x4x517xbf16>
    %166 = vector.shape_cast %165 : vector<1x4x517xbf16> to vector<4x517xbf16>
    %167 = vector.extract_strided_slice %166 {offsets = [0, 0], sizes = [1, 515], strides = [1, 1]} : vector<4x517xbf16> to vector<1x515xbf16>
    %168 = vector.extract_strided_slice %166 {offsets = [0, 1], sizes = [1, 515], strides = [1, 1]} : vector<4x517xbf16> to vector<1x515xbf16>
    %169 = vector.extract_strided_slice %166 {offsets = [0, 2], sizes = [1, 515], strides = [1, 1]} : vector<4x517xbf16> to vector<1x515xbf16>
    %170 = tpu.concatenate %167, %168, %169 in 0 : vector<1x515xbf16>, vector<1x515xbf16>, vector<1x515xbf16> -> vector<3x515xbf16>
    %171 = vector.extract_strided_slice %166 {offsets = [1, 0], sizes = [1, 515], strides = [1, 1]} : vector<4x517xbf16> to vector<1x515xbf16>
    %172 = vector.extract_strided_slice %166 {offsets = [1, 1], sizes = [1, 515], strides = [1, 1]} : vector<4x517xbf16> to vector<1x515xbf16>
    %173 = vector.extract_strided_slice %166 {offsets = [1, 2], sizes = [1, 515], strides = [1, 1]} : vector<4x517xbf16> to vector<1x515xbf16>
    %174 = tpu.concatenate %171, %172, %173 in 0 : vector<1x515xbf16>, vector<1x515xbf16>, vector<1x515xbf16> -> vector<3x515xbf16>
    %175 = tpu.concatenate %170, %174, %4 in 0 : vector<3x515xbf16>, vector<3x515xbf16>, vector<2x515xbf16> -> vector<8x515xbf16>
    %cst_64 = arith.constant dense<0.000000e+00> : vector<16x515xf32>
    %176 = tpu.matmul %0, %175, %cst_64 {dimension_numbers = #tpu.dot_dimension_numbers<[1], [0], [0], [1], [0, 0, 1, 1], [], []>} : vector<16x8xbf16>, vector<8x515xbf16>, vector<16x515xf32> -> vector<16x515xf32>
    %cst_65 = arith.constant 0.000000e+00 : f32
    %177 = vector.broadcast %cst_65 : f32 to vector<16x515xf32>
    %178 = arith.maximumf %176, %177 : vector<16x515xf32>
    %179 = vector.extract_strided_slice %178 {offsets = [0, 0], sizes = [16, 514], strides = [1, 1]} : vector<16x515xf32> to vector<16x514xf32>
    %180 = vector.extract_strided_slice %178 {offsets = [0, 1], sizes = [16, 514], strides = [1, 1]} : vector<16x515xf32> to vector<16x514xf32>
    %181 = vector.extract_strided_slice %166 {offsets = [2, 0], sizes = [1, 515], strides = [1, 1]} : vector<4x517xbf16> to vector<1x515xbf16>
    %182 = vector.extract_strided_slice %166 {offsets = [2, 1], sizes = [1, 515], strides = [1, 1]} : vector<4x517xbf16> to vector<1x515xbf16>
    %183 = vector.extract_strided_slice %166 {offsets = [2, 2], sizes = [1, 515], strides = [1, 1]} : vector<4x517xbf16> to vector<1x515xbf16>
    %184 = tpu.concatenate %181, %182, %183 in 0 : vector<1x515xbf16>, vector<1x515xbf16>, vector<1x515xbf16> -> vector<3x515xbf16>
    %185 = tpu.concatenate %174, %184, %4 in 0 : vector<3x515xbf16>, vector<3x515xbf16>, vector<2x515xbf16> -> vector<8x515xbf16>
    %cst_66 = arith.constant dense<0.000000e+00> : vector<16x515xf32>
    %186 = tpu.matmul %0, %185, %cst_66 {dimension_numbers = #tpu.dot_dimension_numbers<[1], [0], [0], [1], [0, 0, 1, 1], [], []>} : vector<16x8xbf16>, vector<8x515xbf16>, vector<16x515xf32> -> vector<16x515xf32>
    %cst_67 = arith.constant 0.000000e+00 : f32
    %187 = vector.broadcast %cst_67 : f32 to vector<16x515xf32>
    %188 = arith.maximumf %186, %187 : vector<16x515xf32>
    %189 = vector.extract_strided_slice %188 {offsets = [0, 0], sizes = [16, 514], strides = [1, 1]} : vector<16x515xf32> to vector<16x514xf32>
    %190 = vector.extract_strided_slice %188 {offsets = [0, 1], sizes = [16, 514], strides = [1, 1]} : vector<16x515xf32> to vector<16x514xf32>
    %191 = arith.addf %179, %180 : vector<16x514xf32>
    %192 = arith.addf %191, %189 : vector<16x514xf32>
    %193 = arith.addf %192, %190 : vector<16x514xf32>
    %cst_68 = arith.constant 2.500000e-01 : f32
    %194 = vector.broadcast %cst_68 : f32 to vector<16x514xf32>
    %195 = arith.mulf %193, %194 : vector<16x514xf32>
    %196 = arith.truncf %195 : vector<16x514xf32> to vector<16x514xbf16>
    %197 = vector.extract_strided_slice %196 {offsets = [0, 0], sizes = [16, 512], strides = [1, 1]} : vector<16x514xbf16> to vector<16x512xbf16>
    %198 = vector.extract_strided_slice %196 {offsets = [0, 1], sizes = [16, 512], strides = [1, 1]} : vector<16x514xbf16> to vector<16x512xbf16>
    %199 = vector.extract_strided_slice %196 {offsets = [0, 2], sizes = [16, 512], strides = [1, 1]} : vector<16x514xbf16> to vector<16x512xbf16>
    %200 = tpu.concatenate %197, %198, %199, %6 in 0 : vector<16x512xbf16>, vector<16x512xbf16>, vector<16x512xbf16>, vector<1x512xbf16> -> vector<49x512xbf16>
    %cst_69 = arith.constant dense<0.000000e+00> : vector<32x512xf32>
    %201 = tpu.matmul %2, %200, %cst_69 {dimension_numbers = #tpu.dot_dimension_numbers<[1], [0], [0], [1], [0, 0, 1, 1], [], []>} : vector<32x49xbf16>, vector<49x512xbf16>, vector<32x512xf32> -> vector<32x512xf32>
    %cst_70 = arith.constant 0.000000e+00 : f32
    %202 = vector.broadcast %cst_70 : f32 to vector<32x512xf32>
    %203 = arith.maximumf %201, %202 : vector<32x512xf32>
    %c0_71 = arith.constant 0 : index
    %c0_72 = arith.constant 0 : index
    %c0_73 = arith.constant 0 : index
    %204 = vector.load %arg5[%c0_71, %c0_72, %c0_73] : memref<4x32x512xf32, #tpu.memory_space<vmem>>, vector<1x32x512xf32>
    %205 = vector.shape_cast %204 : vector<1x32x512xf32> to vector<32x512xf32>
    %206 = arith.mulf %203, %205 : vector<32x512xf32>
    %207 = vector.shape_cast %206 : vector<32x512xf32> to vector<1x32x512xf32>
    %cst_74 = arith.constant dense<0.000000e+00> : vector<1xf32>
    %208 = vector.multi_reduction <add>, %207, %cst_74 [1, 2] : vector<1x32x512xf32> to vector<1xf32>
    %209 = vector.shape_cast %208 : vector<1xf32> to vector<1x1x1xf32>
    %210 = vector.extract %209[0, 0, 0] : f32 from vector<1x1x1xf32>
    %cst_75 = arith.constant 0.000000e+00 : f32
    %211 = arith.addf %cst_75, %210 : f32
    %c2_76 = arith.constant 2 : index
    %c0_77 = arith.constant 0 : index
    %c0_78 = arith.constant 0 : index
    %212 = vector.load %arg5[%c2_76, %c0_77, %c0_78] : memref<4x32x512xf32, #tpu.memory_space<vmem>>, vector<1x32x512xf32>
    %213 = vector.shape_cast %212 : vector<1x32x512xf32> to vector<32x512xf32>
    %214 = arith.mulf %203, %213 : vector<32x512xf32>
    %215 = vector.shape_cast %214 : vector<32x512xf32> to vector<1x32x512xf32>
    %cst_79 = arith.constant dense<0.000000e+00> : vector<1xf32>
    %216 = vector.multi_reduction <add>, %215, %cst_79 [1, 2] : vector<1x32x512xf32> to vector<1xf32>
    %217 = vector.shape_cast %216 : vector<1xf32> to vector<1x1x1xf32>
    %218 = vector.extract %217[0, 0, 0] : f32 from vector<1x1x1xf32>
    %cst_80 = arith.constant 0.000000e+00 : f32
    %219 = arith.addf %cst_80, %218 : f32
    %220 = vector.extract_strided_slice %166 {offsets = [3, 0], sizes = [1, 515], strides = [1, 1]} : vector<4x517xbf16> to vector<1x515xbf16>
    %221 = vector.extract_strided_slice %166 {offsets = [3, 1], sizes = [1, 515], strides = [1, 1]} : vector<4x517xbf16> to vector<1x515xbf16>
    %222 = vector.extract_strided_slice %166 {offsets = [3, 2], sizes = [1, 515], strides = [1, 1]} : vector<4x517xbf16> to vector<1x515xbf16>
    %223 = tpu.concatenate %220, %221, %222 in 0 : vector<1x515xbf16>, vector<1x515xbf16>, vector<1x515xbf16> -> vector<3x515xbf16>
    %224 = tpu.concatenate %184, %223, %4 in 0 : vector<3x515xbf16>, vector<3x515xbf16>, vector<2x515xbf16> -> vector<8x515xbf16>
    %cst_81 = arith.constant dense<0.000000e+00> : vector<16x515xf32>
    %225 = tpu.matmul %0, %224, %cst_81 {dimension_numbers = #tpu.dot_dimension_numbers<[1], [0], [0], [1], [0, 0, 1, 1], [], []>} : vector<16x8xbf16>, vector<8x515xbf16>, vector<16x515xf32> -> vector<16x515xf32>
    %cst_82 = arith.constant 0.000000e+00 : f32
    %226 = vector.broadcast %cst_82 : f32 to vector<16x515xf32>
    %227 = arith.maximumf %225, %226 : vector<16x515xf32>
    %228 = vector.extract_strided_slice %227 {offsets = [0, 0], sizes = [16, 514], strides = [1, 1]} : vector<16x515xf32> to vector<16x514xf32>
    %229 = vector.extract_strided_slice %227 {offsets = [0, 1], sizes = [16, 514], strides = [1, 1]} : vector<16x515xf32> to vector<16x514xf32>
    %230 = arith.addf %189, %190 : vector<16x514xf32>
    %231 = arith.addf %230, %228 : vector<16x514xf32>
    %232 = arith.addf %231, %229 : vector<16x514xf32>
    %cst_83 = arith.constant 2.500000e-01 : f32
    %233 = vector.broadcast %cst_83 : f32 to vector<16x514xf32>
    %234 = arith.mulf %232, %233 : vector<16x514xf32>
    %235 = arith.truncf %234 : vector<16x514xf32> to vector<16x514xbf16>
    %236 = vector.extract_strided_slice %235 {offsets = [0, 0], sizes = [16, 512], strides = [1, 1]} : vector<16x514xbf16> to vector<16x512xbf16>
    %237 = vector.extract_strided_slice %235 {offsets = [0, 1], sizes = [16, 512], strides = [1, 1]} : vector<16x514xbf16> to vector<16x512xbf16>
    %238 = vector.extract_strided_slice %235 {offsets = [0, 2], sizes = [16, 512], strides = [1, 1]} : vector<16x514xbf16> to vector<16x512xbf16>
    %239 = tpu.concatenate %236, %237, %238, %6 in 0 : vector<16x512xbf16>, vector<16x512xbf16>, vector<16x512xbf16>, vector<1x512xbf16> -> vector<49x512xbf16>
    %cst_84 = arith.constant dense<0.000000e+00> : vector<32x512xf32>
    %240 = tpu.matmul %2, %239, %cst_84 {dimension_numbers = #tpu.dot_dimension_numbers<[1], [0], [0], [1], [0, 0, 1, 1], [], []>} : vector<32x49xbf16>, vector<49x512xbf16>, vector<32x512xf32> -> vector<32x512xf32>
    %cst_85 = arith.constant 0.000000e+00 : f32
    %241 = vector.broadcast %cst_85 : f32 to vector<32x512xf32>
    %242 = arith.maximumf %240, %241 : vector<32x512xf32>
    %c1_86 = arith.constant 1 : index
    %c0_87 = arith.constant 0 : index
    %c0_88 = arith.constant 0 : index
    %243 = vector.load %arg5[%c1_86, %c0_87, %c0_88] : memref<4x32x512xf32, #tpu.memory_space<vmem>>, vector<1x32x512xf32>
    %244 = vector.shape_cast %243 : vector<1x32x512xf32> to vector<32x512xf32>
    %245 = arith.mulf %242, %244 : vector<32x512xf32>
    %246 = vector.shape_cast %245 : vector<32x512xf32> to vector<1x32x512xf32>
    %cst_89 = arith.constant dense<0.000000e+00> : vector<1xf32>
    %247 = vector.multi_reduction <add>, %246, %cst_89 [1, 2] : vector<1x32x512xf32> to vector<1xf32>
    %248 = vector.shape_cast %247 : vector<1xf32> to vector<1x1x1xf32>
    %249 = vector.extract %248[0, 0, 0] : f32 from vector<1x1x1xf32>
    %250 = arith.addf %211, %249 : f32
    %c3_90 = arith.constant 3 : index
    %c0_91 = arith.constant 0 : index
    %c0_92 = arith.constant 0 : index
    %251 = vector.load %arg5[%c3_90, %c0_91, %c0_92] : memref<4x32x512xf32, #tpu.memory_space<vmem>>, vector<1x32x512xf32>
    %252 = vector.shape_cast %251 : vector<1x32x512xf32> to vector<32x512xf32>
    %253 = arith.mulf %242, %252 : vector<32x512xf32>
    %254 = vector.shape_cast %253 : vector<32x512xf32> to vector<1x32x512xf32>
    %cst_93 = arith.constant dense<0.000000e+00> : vector<1xf32>
    %255 = vector.multi_reduction <add>, %254, %cst_93 [1, 2] : vector<1x32x512xf32> to vector<1xf32>
    %256 = vector.shape_cast %255 : vector<1xf32> to vector<1x1x1xf32>
    %257 = vector.extract %256[0, 0, 0] : f32 from vector<1x1x1xf32>
    %258 = arith.addf %219, %257 : f32
    %c1_94 = arith.constant 1 : index
    %c0_95 = arith.constant 0 : index
    %c0_96 = arith.constant 0 : index
    %c0_97 = arith.constant 0 : index
    %259 = vector.load %arg2[%c1_94, %c0_95, %c0_96, %c0_97] : memref<4x4x3x172xbf16, #tpu.memory_space<vmem>>, vector<1x4x3x172xbf16>
    %260 = vector.shape_cast %259 : vector<1x4x3x172xbf16> to vector<4x3x172xbf16>
    %261 = vector.extract_strided_slice %260 {offsets = [0, 0, 0], sizes = [1, 3, 172], strides = [1, 1, 1]} : vector<4x3x172xbf16> to vector<1x3x172xbf16>
    %262 = vector.shape_cast %261 : vector<1x3x172xbf16> to vector<3x172xbf16>
    %263 = vector.extract_strided_slice %260 {offsets = [1, 0, 0], sizes = [1, 3, 172], strides = [1, 1, 1]} : vector<4x3x172xbf16> to vector<1x3x172xbf16>
    %264 = vector.shape_cast %263 : vector<1x3x172xbf16> to vector<3x172xbf16>
    %265 = vector.extract_strided_slice %260 {offsets = [2, 0, 0], sizes = [1, 3, 172], strides = [1, 1, 1]} : vector<4x3x172xbf16> to vector<1x3x172xbf16>
    %266 = vector.shape_cast %265 : vector<1x3x172xbf16> to vector<3x172xbf16>
    %267 = tpu.concatenate %262, %264, %5 in 0 : vector<3x172xbf16>, vector<3x172xbf16>, vector<2x172xbf16> -> vector<8x172xbf16>
    %cst_98 = arith.constant dense<0.000000e+00> : vector<16x172xf32>
    %268 = tpu.matmul %1, %267, %cst_98 {dimension_numbers = #tpu.dot_dimension_numbers<[1], [0], [0], [1], [0, 0, 1, 1], [], []>} : vector<16x8xbf16>, vector<8x172xbf16>, vector<16x172xf32> -> vector<16x172xf32>
    %cst_99 = arith.constant 0.000000e+00 : f32
    %269 = vector.broadcast %cst_99 : f32 to vector<16x172xf32>
    %270 = arith.maximumf %268, %269 : vector<16x172xf32>
    %271 = tpu.concatenate %264, %266, %5 in 0 : vector<3x172xbf16>, vector<3x172xbf16>, vector<2x172xbf16> -> vector<8x172xbf16>
    %cst_100 = arith.constant dense<0.000000e+00> : vector<16x172xf32>
    %272 = tpu.matmul %1, %271, %cst_100 {dimension_numbers = #tpu.dot_dimension_numbers<[1], [0], [0], [1], [0, 0, 1, 1], [], []>} : vector<16x8xbf16>, vector<8x172xbf16>, vector<16x172xf32> -> vector<16x172xf32>
    %cst_101 = arith.constant 0.000000e+00 : f32
    %273 = vector.broadcast %cst_101 : f32 to vector<16x172xf32>
    %274 = arith.maximumf %272, %273 : vector<16x172xf32>
    %275 = vector.extract_strided_slice %270 {offsets = [0, 0], sizes = [16, 171], strides = [1, 1]} : vector<16x172xf32> to vector<16x171xf32>
    %276 = vector.extract_strided_slice %270 {offsets = [0, 1], sizes = [16, 171], strides = [1, 1]} : vector<16x172xf32> to vector<16x171xf32>
    %277 = arith.addf %275, %276 : vector<16x171xf32>
    %278 = vector.extract_strided_slice %274 {offsets = [0, 0], sizes = [16, 171], strides = [1, 1]} : vector<16x172xf32> to vector<16x171xf32>
    %279 = arith.addf %277, %278 : vector<16x171xf32>
    %280 = vector.extract_strided_slice %274 {offsets = [0, 1], sizes = [16, 171], strides = [1, 1]} : vector<16x172xf32> to vector<16x171xf32>
    %281 = arith.addf %279, %280 : vector<16x171xf32>
    %cst_102 = arith.constant 2.500000e-01 : f32
    %282 = vector.broadcast %cst_102 : f32 to vector<16x171xf32>
    %283 = arith.mulf %281, %282 : vector<16x171xf32>
    %284 = arith.truncf %283 : vector<16x171xf32> to vector<16x171xbf16>
    %285 = vector.extract_strided_slice %284 {offsets = [0, 0], sizes = [16, 169], strides = [1, 1]} : vector<16x171xbf16> to vector<16x169xbf16>
    %286 = vector.extract_strided_slice %284 {offsets = [0, 1], sizes = [16, 169], strides = [1, 1]} : vector<16x171xbf16> to vector<16x169xbf16>
    %287 = vector.extract_strided_slice %284 {offsets = [0, 2], sizes = [16, 169], strides = [1, 1]} : vector<16x171xbf16> to vector<16x169xbf16>
    %288 = tpu.concatenate %285, %286, %287, %7 in 0 : vector<16x169xbf16>, vector<16x169xbf16>, vector<16x169xbf16>, vector<1x169xbf16> -> vector<49x169xbf16>
    %cst_103 = arith.constant dense<0.000000e+00> : vector<32x169xf32>
    %289 = tpu.matmul %3, %288, %cst_103 {dimension_numbers = #tpu.dot_dimension_numbers<[1], [0], [0], [1], [0, 0, 1, 1], [], []>} : vector<32x49xbf16>, vector<49x169xbf16>, vector<32x169xf32> -> vector<32x169xf32>
    %cst_104 = arith.constant 0.000000e+00 : f32
    %290 = vector.broadcast %cst_104 : f32 to vector<32x169xf32>
    %291 = arith.maximumf %289, %290 : vector<32x169xf32>
    %c0_105 = arith.constant 0 : index
    %c0_106 = arith.constant 0 : index
    %c0_107 = arith.constant 0 : index
    %292 = vector.load %arg6[%c0_105, %c0_106, %c0_107] : memref<2x32x169xf32, #tpu.memory_space<vmem>>, vector<1x32x169xf32>
    %293 = vector.shape_cast %292 : vector<1x32x169xf32> to vector<32x169xf32>
    %294 = arith.mulf %291, %293 : vector<32x169xf32>
    %295 = vector.shape_cast %294 : vector<32x169xf32> to vector<1x32x169xf32>
    %cst_108 = arith.constant dense<0.000000e+00> : vector<1xf32>
    %296 = vector.multi_reduction <add>, %295, %cst_108 [1, 2] : vector<1x32x169xf32> to vector<1xf32>
    %297 = vector.shape_cast %296 : vector<1xf32> to vector<1x1x1xf32>
    %298 = vector.extract %297[0, 0, 0] : f32 from vector<1x1x1xf32>
    %299 = arith.addf %250, %298 : f32
    %c1_109 = arith.constant 1 : index
    %c0_110 = arith.constant 0 : index
    %c0_111 = arith.constant 0 : index
    %300 = vector.load %arg6[%c1_109, %c0_110, %c0_111] : memref<2x32x169xf32, #tpu.memory_space<vmem>>, vector<1x32x169xf32>
    %301 = vector.shape_cast %300 : vector<1x32x169xf32> to vector<32x169xf32>
    %302 = arith.mulf %291, %301 : vector<32x169xf32>
    %303 = vector.shape_cast %302 : vector<32x169xf32> to vector<1x32x169xf32>
    %cst_112 = arith.constant dense<0.000000e+00> : vector<1xf32>
    %304 = vector.multi_reduction <add>, %303, %cst_112 [1, 2] : vector<1x32x169xf32> to vector<1xf32>
    %305 = vector.shape_cast %304 : vector<1xf32> to vector<1x1x1xf32>
    %306 = vector.extract %305[0, 0, 0] : f32 from vector<1x1x1xf32>
    %307 = arith.addf %258, %306 : f32
    %c2_i32 = arith.constant 2 : i32
    %308 = vector.broadcast %c2_i32 : i32 to vector<8x128xi32>
    %309 = arith.cmpi eq, %8, %308 : vector<8x128xi32>
    %cst_113 = arith.constant 0.000000e+00 : f32
    %310 = vector.broadcast %299 : f32 to vector<8x128xf32>
    %311 = vector.broadcast %cst_113 : f32 to vector<8x128xf32>
    %312 = arith.select %309, %310, %311 : vector<8x128xi1>, vector<8x128xf32>
    %313 = arith.addf %164, %312 : vector<8x128xf32>
    %c3_i32 = arith.constant 3 : i32
    %314 = vector.broadcast %c3_i32 : i32 to vector<8x128xi32>
    %315 = arith.cmpi eq, %8, %314 : vector<8x128xi32>
    %cst_114 = arith.constant 0.000000e+00 : f32
    %316 = vector.broadcast %307 : f32 to vector<8x128xf32>
    %317 = vector.broadcast %cst_114 : f32 to vector<8x128xf32>
    %318 = arith.select %315, %316, %317 : vector<8x128xi1>, vector<8x128xf32>
    %319 = arith.addf %313, %318 : vector<8x128xf32>
    %c2_115 = arith.constant 2 : index
    %c0_116 = arith.constant 0 : index
    %c0_117 = arith.constant 0 : index
    %320 = vector.load %arg1[%c2_115, %c0_116, %c0_117] : memref<4x4x517xbf16, #tpu.memory_space<vmem>>, vector<1x4x517xbf16>
    %321 = vector.shape_cast %320 : vector<1x4x517xbf16> to vector<4x517xbf16>
    %322 = vector.extract_strided_slice %321 {offsets = [0, 0], sizes = [1, 515], strides = [1, 1]} : vector<4x517xbf16> to vector<1x515xbf16>
    %323 = vector.extract_strided_slice %321 {offsets = [0, 1], sizes = [1, 515], strides = [1, 1]} : vector<4x517xbf16> to vector<1x515xbf16>
    %324 = vector.extract_strided_slice %321 {offsets = [0, 2], sizes = [1, 515], strides = [1, 1]} : vector<4x517xbf16> to vector<1x515xbf16>
    %325 = tpu.concatenate %322, %323, %324 in 0 : vector<1x515xbf16>, vector<1x515xbf16>, vector<1x515xbf16> -> vector<3x515xbf16>
    %326 = vector.extract_strided_slice %321 {offsets = [1, 0], sizes = [1, 515], strides = [1, 1]} : vector<4x517xbf16> to vector<1x515xbf16>
    %327 = vector.extract_strided_slice %321 {offsets = [1, 1], sizes = [1, 515], strides = [1, 1]} : vector<4x517xbf16> to vector<1x515xbf16>
    %328 = vector.extract_strided_slice %321 {offsets = [1, 2], sizes = [1, 515], strides = [1, 1]} : vector<4x517xbf16> to vector<1x515xbf16>
    %329 = tpu.concatenate %326, %327, %328 in 0 : vector<1x515xbf16>, vector<1x515xbf16>, vector<1x515xbf16> -> vector<3x515xbf16>
    %330 = tpu.concatenate %325, %329, %4 in 0 : vector<3x515xbf16>, vector<3x515xbf16>, vector<2x515xbf16> -> vector<8x515xbf16>
    %cst_118 = arith.constant dense<0.000000e+00> : vector<16x515xf32>
    %331 = tpu.matmul %0, %330, %cst_118 {dimension_numbers = #tpu.dot_dimension_numbers<[1], [0], [0], [1], [0, 0, 1, 1], [], []>} : vector<16x8xbf16>, vector<8x515xbf16>, vector<16x515xf32> -> vector<16x515xf32>
    %cst_119 = arith.constant 0.000000e+00 : f32
    %332 = vector.broadcast %cst_119 : f32 to vector<16x515xf32>
    %333 = arith.maximumf %331, %332 : vector<16x515xf32>
    %334 = vector.extract_strided_slice %333 {offsets = [0, 0], sizes = [16, 514], strides = [1, 1]} : vector<16x515xf32> to vector<16x514xf32>
    %335 = vector.extract_strided_slice %333 {offsets = [0, 1], sizes = [16, 514], strides = [1, 1]} : vector<16x515xf32> to vector<16x514xf32>
    %336 = vector.extract_strided_slice %321 {offsets = [2, 0], sizes = [1, 515], strides = [1, 1]} : vector<4x517xbf16> to vector<1x515xbf16>
    %337 = vector.extract_strided_slice %321 {offsets = [2, 1], sizes = [1, 515], strides = [1, 1]} : vector<4x517xbf16> to vector<1x515xbf16>
    %338 = vector.extract_strided_slice %321 {offsets = [2, 2], sizes = [1, 515], strides = [1, 1]} : vector<4x517xbf16> to vector<1x515xbf16>
    %339 = tpu.concatenate %336, %337, %338 in 0 : vector<1x515xbf16>, vector<1x515xbf16>, vector<1x515xbf16> -> vector<3x515xbf16>
    %340 = tpu.concatenate %329, %339, %4 in 0 : vector<3x515xbf16>, vector<3x515xbf16>, vector<2x515xbf16> -> vector<8x515xbf16>
    %cst_120 = arith.constant dense<0.000000e+00> : vector<16x515xf32>
    %341 = tpu.matmul %0, %340, %cst_120 {dimension_numbers = #tpu.dot_dimension_numbers<[1], [0], [0], [1], [0, 0, 1, 1], [], []>} : vector<16x8xbf16>, vector<8x515xbf16>, vector<16x515xf32> -> vector<16x515xf32>
    %cst_121 = arith.constant 0.000000e+00 : f32
    %342 = vector.broadcast %cst_121 : f32 to vector<16x515xf32>
    %343 = arith.maximumf %341, %342 : vector<16x515xf32>
    %344 = vector.extract_strided_slice %343 {offsets = [0, 0], sizes = [16, 514], strides = [1, 1]} : vector<16x515xf32> to vector<16x514xf32>
    %345 = vector.extract_strided_slice %343 {offsets = [0, 1], sizes = [16, 514], strides = [1, 1]} : vector<16x515xf32> to vector<16x514xf32>
    %346 = arith.addf %334, %335 : vector<16x514xf32>
    %347 = arith.addf %346, %344 : vector<16x514xf32>
    %348 = arith.addf %347, %345 : vector<16x514xf32>
    %cst_122 = arith.constant 2.500000e-01 : f32
    %349 = vector.broadcast %cst_122 : f32 to vector<16x514xf32>
    %350 = arith.mulf %348, %349 : vector<16x514xf32>
    %351 = arith.truncf %350 : vector<16x514xf32> to vector<16x514xbf16>
    %352 = vector.extract_strided_slice %351 {offsets = [0, 0], sizes = [16, 512], strides = [1, 1]} : vector<16x514xbf16> to vector<16x512xbf16>
    %353 = vector.extract_strided_slice %351 {offsets = [0, 1], sizes = [16, 512], strides = [1, 1]} : vector<16x514xbf16> to vector<16x512xbf16>
    %354 = vector.extract_strided_slice %351 {offsets = [0, 2], sizes = [16, 512], strides = [1, 1]} : vector<16x514xbf16> to vector<16x512xbf16>
    %355 = tpu.concatenate %352, %353, %354, %6 in 0 : vector<16x512xbf16>, vector<16x512xbf16>, vector<16x512xbf16>, vector<1x512xbf16> -> vector<49x512xbf16>
    %cst_123 = arith.constant dense<0.000000e+00> : vector<32x512xf32>
    %356 = tpu.matmul %2, %355, %cst_123 {dimension_numbers = #tpu.dot_dimension_numbers<[1], [0], [0], [1], [0, 0, 1, 1], [], []>} : vector<32x49xbf16>, vector<49x512xbf16>, vector<32x512xf32> -> vector<32x512xf32>
    %cst_124 = arith.constant 0.000000e+00 : f32
    %357 = vector.broadcast %cst_124 : f32 to vector<32x512xf32>
    %358 = arith.maximumf %356, %357 : vector<32x512xf32>
    %c0_125 = arith.constant 0 : index
    %c0_126 = arith.constant 0 : index
    %c0_127 = arith.constant 0 : index
    %359 = vector.load %arg5[%c0_125, %c0_126, %c0_127] : memref<4x32x512xf32, #tpu.memory_space<vmem>>, vector<1x32x512xf32>
    %360 = vector.shape_cast %359 : vector<1x32x512xf32> to vector<32x512xf32>
    %361 = arith.mulf %358, %360 : vector<32x512xf32>
    %362 = vector.shape_cast %361 : vector<32x512xf32> to vector<1x32x512xf32>
    %cst_128 = arith.constant dense<0.000000e+00> : vector<1xf32>
    %363 = vector.multi_reduction <add>, %362, %cst_128 [1, 2] : vector<1x32x512xf32> to vector<1xf32>
    %364 = vector.shape_cast %363 : vector<1xf32> to vector<1x1x1xf32>
    %365 = vector.extract %364[0, 0, 0] : f32 from vector<1x1x1xf32>
    %cst_129 = arith.constant 0.000000e+00 : f32
    %366 = arith.addf %cst_129, %365 : f32
    %c2_130 = arith.constant 2 : index
    %c0_131 = arith.constant 0 : index
    %c0_132 = arith.constant 0 : index
    %367 = vector.load %arg5[%c2_130, %c0_131, %c0_132] : memref<4x32x512xf32, #tpu.memory_space<vmem>>, vector<1x32x512xf32>
    %368 = vector.shape_cast %367 : vector<1x32x512xf32> to vector<32x512xf32>
    %369 = arith.mulf %358, %368 : vector<32x512xf32>
    %370 = vector.shape_cast %369 : vector<32x512xf32> to vector<1x32x512xf32>
    %cst_133 = arith.constant dense<0.000000e+00> : vector<1xf32>
    %371 = vector.multi_reduction <add>, %370, %cst_133 [1, 2] : vector<1x32x512xf32> to vector<1xf32>
    %372 = vector.shape_cast %371 : vector<1xf32> to vector<1x1x1xf32>
    %373 = vector.extract %372[0, 0, 0] : f32 from vector<1x1x1xf32>
    %cst_134 = arith.constant 0.000000e+00 : f32
    %374 = arith.addf %cst_134, %373 : f32
    %375 = vector.extract_strided_slice %321 {offsets = [3, 0], sizes = [1, 515], strides = [1, 1]} : vector<4x517xbf16> to vector<1x515xbf16>
    %376 = vector.extract_strided_slice %321 {offsets = [3, 1], sizes = [1, 515], strides = [1, 1]} : vector<4x517xbf16> to vector<1x515xbf16>
    %377 = vector.extract_strided_slice %321 {offsets = [3, 2], sizes = [1, 515], strides = [1, 1]} : vector<4x517xbf16> to vector<1x515xbf16>
    %378 = tpu.concatenate %375, %376, %377 in 0 : vector<1x515xbf16>, vector<1x515xbf16>, vector<1x515xbf16> -> vector<3x515xbf16>
    %379 = tpu.concatenate %339, %378, %4 in 0 : vector<3x515xbf16>, vector<3x515xbf16>, vector<2x515xbf16> -> vector<8x515xbf16>
    %cst_135 = arith.constant dense<0.000000e+00> : vector<16x515xf32>
    %380 = tpu.matmul %0, %379, %cst_135 {dimension_numbers = #tpu.dot_dimension_numbers<[1], [0], [0], [1], [0, 0, 1, 1], [], []>} : vector<16x8xbf16>, vector<8x515xbf16>, vector<16x515xf32> -> vector<16x515xf32>
    %cst_136 = arith.constant 0.000000e+00 : f32
    %381 = vector.broadcast %cst_136 : f32 to vector<16x515xf32>
    %382 = arith.maximumf %380, %381 : vector<16x515xf32>
    %383 = vector.extract_strided_slice %382 {offsets = [0, 0], sizes = [16, 514], strides = [1, 1]} : vector<16x515xf32> to vector<16x514xf32>
    %384 = vector.extract_strided_slice %382 {offsets = [0, 1], sizes = [16, 514], strides = [1, 1]} : vector<16x515xf32> to vector<16x514xf32>
    %385 = arith.addf %344, %345 : vector<16x514xf32>
    %386 = arith.addf %385, %383 : vector<16x514xf32>
    %387 = arith.addf %386, %384 : vector<16x514xf32>
    %cst_137 = arith.constant 2.500000e-01 : f32
    %388 = vector.broadcast %cst_137 : f32 to vector<16x514xf32>
    %389 = arith.mulf %387, %388 : vector<16x514xf32>
    %390 = arith.truncf %389 : vector<16x514xf32> to vector<16x514xbf16>
    %391 = vector.extract_strided_slice %390 {offsets = [0, 0], sizes = [16, 512], strides = [1, 1]} : vector<16x514xbf16> to vector<16x512xbf16>
    %392 = vector.extract_strided_slice %390 {offsets = [0, 1], sizes = [16, 512], strides = [1, 1]} : vector<16x514xbf16> to vector<16x512xbf16>
    %393 = vector.extract_strided_slice %390 {offsets = [0, 2], sizes = [16, 512], strides = [1, 1]} : vector<16x514xbf16> to vector<16x512xbf16>
    %394 = tpu.concatenate %391, %392, %393, %6 in 0 : vector<16x512xbf16>, vector<16x512xbf16>, vector<16x512xbf16>, vector<1x512xbf16> -> vector<49x512xbf16>
    %cst_138 = arith.constant dense<0.000000e+00> : vector<32x512xf32>
    %395 = tpu.matmul %2, %394, %cst_138 {dimension_numbers = #tpu.dot_dimension_numbers<[1], [0], [0], [1], [0, 0, 1, 1], [], []>} : vector<32x49xbf16>, vector<49x512xbf16>, vector<32x512xf32> -> vector<32x512xf32>
    %cst_139 = arith.constant 0.000000e+00 : f32
    %396 = vector.broadcast %cst_139 : f32 to vector<32x512xf32>
    %397 = arith.maximumf %395, %396 : vector<32x512xf32>
    %c1_140 = arith.constant 1 : index
    %c0_141 = arith.constant 0 : index
    %c0_142 = arith.constant 0 : index
    %398 = vector.load %arg5[%c1_140, %c0_141, %c0_142] : memref<4x32x512xf32, #tpu.memory_space<vmem>>, vector<1x32x512xf32>
    %399 = vector.shape_cast %398 : vector<1x32x512xf32> to vector<32x512xf32>
    %400 = arith.mulf %397, %399 : vector<32x512xf32>
    %401 = vector.shape_cast %400 : vector<32x512xf32> to vector<1x32x512xf32>
    %cst_143 = arith.constant dense<0.000000e+00> : vector<1xf32>
    %402 = vector.multi_reduction <add>, %401, %cst_143 [1, 2] : vector<1x32x512xf32> to vector<1xf32>
    %403 = vector.shape_cast %402 : vector<1xf32> to vector<1x1x1xf32>
    %404 = vector.extract %403[0, 0, 0] : f32 from vector<1x1x1xf32>
    %405 = arith.addf %366, %404 : f32
    %c3_144 = arith.constant 3 : index
    %c0_145 = arith.constant 0 : index
    %c0_146 = arith.constant 0 : index
    %406 = vector.load %arg5[%c3_144, %c0_145, %c0_146] : memref<4x32x512xf32, #tpu.memory_space<vmem>>, vector<1x32x512xf32>
    %407 = vector.shape_cast %406 : vector<1x32x512xf32> to vector<32x512xf32>
    %408 = arith.mulf %397, %407 : vector<32x512xf32>
    %409 = vector.shape_cast %408 : vector<32x512xf32> to vector<1x32x512xf32>
    %cst_147 = arith.constant dense<0.000000e+00> : vector<1xf32>
    %410 = vector.multi_reduction <add>, %409, %cst_147 [1, 2] : vector<1x32x512xf32> to vector<1xf32>
    %411 = vector.shape_cast %410 : vector<1xf32> to vector<1x1x1xf32>
    %412 = vector.extract %411[0, 0, 0] : f32 from vector<1x1x1xf32>
    %413 = arith.addf %374, %412 : f32
    %c2_148 = arith.constant 2 : index
    %c0_149 = arith.constant 0 : index
    %c0_150 = arith.constant 0 : index
    %c0_151 = arith.constant 0 : index
    %414 = vector.load %arg2[%c2_148, %c0_149, %c0_150, %c0_151] : memref<4x4x3x172xbf16, #tpu.memory_space<vmem>>, vector<1x4x3x172xbf16>
    %415 = vector.shape_cast %414 : vector<1x4x3x172xbf16> to vector<4x3x172xbf16>
    %416 = vector.extract_strided_slice %415 {offsets = [0, 0, 0], sizes = [1, 3, 172], strides = [1, 1, 1]} : vector<4x3x172xbf16> to vector<1x3x172xbf16>
    %417 = vector.shape_cast %416 : vector<1x3x172xbf16> to vector<3x172xbf16>
    %418 = vector.extract_strided_slice %415 {offsets = [1, 0, 0], sizes = [1, 3, 172], strides = [1, 1, 1]} : vector<4x3x172xbf16> to vector<1x3x172xbf16>
    %419 = vector.shape_cast %418 : vector<1x3x172xbf16> to vector<3x172xbf16>
    %420 = vector.extract_strided_slice %415 {offsets = [2, 0, 0], sizes = [1, 3, 172], strides = [1, 1, 1]} : vector<4x3x172xbf16> to vector<1x3x172xbf16>
    %421 = vector.shape_cast %420 : vector<1x3x172xbf16> to vector<3x172xbf16>
    %422 = tpu.concatenate %417, %419, %5 in 0 : vector<3x172xbf16>, vector<3x172xbf16>, vector<2x172xbf16> -> vector<8x172xbf16>
    %cst_152 = arith.constant dense<0.000000e+00> : vector<16x172xf32>
    %423 = tpu.matmul %1, %422, %cst_152 {dimension_numbers = #tpu.dot_dimension_numbers<[1], [0], [0], [1], [0, 0, 1, 1], [], []>} : vector<16x8xbf16>, vector<8x172xbf16>, vector<16x172xf32> -> vector<16x172xf32>
    %cst_153 = arith.constant 0.000000e+00 : f32
    %424 = vector.broadcast %cst_153 : f32 to vector<16x172xf32>
    %425 = arith.maximumf %423, %424 : vector<16x172xf32>
    %426 = tpu.concatenate %419, %421, %5 in 0 : vector<3x172xbf16>, vector<3x172xbf16>, vector<2x172xbf16> -> vector<8x172xbf16>
    %cst_154 = arith.constant dense<0.000000e+00> : vector<16x172xf32>
    %427 = tpu.matmul %1, %426, %cst_154 {dimension_numbers = #tpu.dot_dimension_numbers<[1], [0], [0], [1], [0, 0, 1, 1], [], []>} : vector<16x8xbf16>, vector<8x172xbf16>, vector<16x172xf32> -> vector<16x172xf32>
    %cst_155 = arith.constant 0.000000e+00 : f32
    %428 = vector.broadcast %cst_155 : f32 to vector<16x172xf32>
    %429 = arith.maximumf %427, %428 : vector<16x172xf32>
    %430 = vector.extract_strided_slice %425 {offsets = [0, 0], sizes = [16, 171], strides = [1, 1]} : vector<16x172xf32> to vector<16x171xf32>
    %431 = vector.extract_strided_slice %425 {offsets = [0, 1], sizes = [16, 171], strides = [1, 1]} : vector<16x172xf32> to vector<16x171xf32>
    %432 = arith.addf %430, %431 : vector<16x171xf32>
    %433 = vector.extract_strided_slice %429 {offsets = [0, 0], sizes = [16, 171], strides = [1, 1]} : vector<16x172xf32> to vector<16x171xf32>
    %434 = arith.addf %432, %433 : vector<16x171xf32>
    %435 = vector.extract_strided_slice %429 {offsets = [0, 1], sizes = [16, 171], strides = [1, 1]} : vector<16x172xf32> to vector<16x171xf32>
    %436 = arith.addf %434, %435 : vector<16x171xf32>
    %cst_156 = arith.constant 2.500000e-01 : f32
    %437 = vector.broadcast %cst_156 : f32 to vector<16x171xf32>
    %438 = arith.mulf %436, %437 : vector<16x171xf32>
    %439 = arith.truncf %438 : vector<16x171xf32> to vector<16x171xbf16>
    %440 = vector.extract_strided_slice %439 {offsets = [0, 0], sizes = [16, 169], strides = [1, 1]} : vector<16x171xbf16> to vector<16x169xbf16>
    %441 = vector.extract_strided_slice %439 {offsets = [0, 1], sizes = [16, 169], strides = [1, 1]} : vector<16x171xbf16> to vector<16x169xbf16>
    %442 = vector.extract_strided_slice %439 {offsets = [0, 2], sizes = [16, 169], strides = [1, 1]} : vector<16x171xbf16> to vector<16x169xbf16>
    %443 = tpu.concatenate %440, %441, %442, %7 in 0 : vector<16x169xbf16>, vector<16x169xbf16>, vector<16x169xbf16>, vector<1x169xbf16> -> vector<49x169xbf16>
    %cst_157 = arith.constant dense<0.000000e+00> : vector<32x169xf32>
    %444 = tpu.matmul %3, %443, %cst_157 {dimension_numbers = #tpu.dot_dimension_numbers<[1], [0], [0], [1], [0, 0, 1, 1], [], []>} : vector<32x49xbf16>, vector<49x169xbf16>, vector<32x169xf32> -> vector<32x169xf32>
    %cst_158 = arith.constant 0.000000e+00 : f32
    %445 = vector.broadcast %cst_158 : f32 to vector<32x169xf32>
    %446 = arith.maximumf %444, %445 : vector<32x169xf32>
    %c0_159 = arith.constant 0 : index
    %c0_160 = arith.constant 0 : index
    %c0_161 = arith.constant 0 : index
    %447 = vector.load %arg6[%c0_159, %c0_160, %c0_161] : memref<2x32x169xf32, #tpu.memory_space<vmem>>, vector<1x32x169xf32>
    %448 = vector.shape_cast %447 : vector<1x32x169xf32> to vector<32x169xf32>
    %449 = arith.mulf %446, %448 : vector<32x169xf32>
    %450 = vector.shape_cast %449 : vector<32x169xf32> to vector<1x32x169xf32>
    %cst_162 = arith.constant dense<0.000000e+00> : vector<1xf32>
    %451 = vector.multi_reduction <add>, %450, %cst_162 [1, 2] : vector<1x32x169xf32> to vector<1xf32>
    %452 = vector.shape_cast %451 : vector<1xf32> to vector<1x1x1xf32>
    %453 = vector.extract %452[0, 0, 0] : f32 from vector<1x1x1xf32>
    %454 = arith.addf %405, %453 : f32
    %c1_163 = arith.constant 1 : index
    %c0_164 = arith.constant 0 : index
    %c0_165 = arith.constant 0 : index
    %455 = vector.load %arg6[%c1_163, %c0_164, %c0_165] : memref<2x32x169xf32, #tpu.memory_space<vmem>>, vector<1x32x169xf32>
    %456 = vector.shape_cast %455 : vector<1x32x169xf32> to vector<32x169xf32>
    %457 = arith.mulf %446, %456 : vector<32x169xf32>
    %458 = vector.shape_cast %457 : vector<32x169xf32> to vector<1x32x169xf32>
    %cst_166 = arith.constant dense<0.000000e+00> : vector<1xf32>
    %459 = vector.multi_reduction <add>, %458, %cst_166 [1, 2] : vector<1x32x169xf32> to vector<1xf32>
    %460 = vector.shape_cast %459 : vector<1xf32> to vector<1x1x1xf32>
    %461 = vector.extract %460[0, 0, 0] : f32 from vector<1x1x1xf32>
    %462 = arith.addf %413, %461 : f32
    %c4_i32 = arith.constant 4 : i32
    %463 = vector.broadcast %c4_i32 : i32 to vector<8x128xi32>
    %464 = arith.cmpi eq, %8, %463 : vector<8x128xi32>
    %cst_167 = arith.constant 0.000000e+00 : f32
    %465 = vector.broadcast %454 : f32 to vector<8x128xf32>
    %466 = vector.broadcast %cst_167 : f32 to vector<8x128xf32>
    %467 = arith.select %464, %465, %466 : vector<8x128xi1>, vector<8x128xf32>
    %468 = arith.addf %319, %467 : vector<8x128xf32>
    %c5_i32 = arith.constant 5 : i32
    %469 = vector.broadcast %c5_i32 : i32 to vector<8x128xi32>
    %470 = arith.cmpi eq, %8, %469 : vector<8x128xi32>
    %cst_168 = arith.constant 0.000000e+00 : f32
    %471 = vector.broadcast %462 : f32 to vector<8x128xf32>
    %472 = vector.broadcast %cst_168 : f32 to vector<8x128xf32>
    %473 = arith.select %470, %471, %472 : vector<8x128xi1>, vector<8x128xf32>
    %474 = arith.addf %468, %473 : vector<8x128xf32>
    %c3_169 = arith.constant 3 : index
    %c0_170 = arith.constant 0 : index
    %c0_171 = arith.constant 0 : index
    %475 = vector.load %arg1[%c3_169, %c0_170, %c0_171] : memref<4x4x517xbf16, #tpu.memory_space<vmem>>, vector<1x4x517xbf16>
    %476 = vector.shape_cast %475 : vector<1x4x517xbf16> to vector<4x517xbf16>
    %477 = vector.extract_strided_slice %476 {offsets = [0, 0], sizes = [1, 515], strides = [1, 1]} : vector<4x517xbf16> to vector<1x515xbf16>
    %478 = vector.extract_strided_slice %476 {offsets = [0, 1], sizes = [1, 515], strides = [1, 1]} : vector<4x517xbf16> to vector<1x515xbf16>
    %479 = vector.extract_strided_slice %476 {offsets = [0, 2], sizes = [1, 515], strides = [1, 1]} : vector<4x517xbf16> to vector<1x515xbf16>
    %480 = tpu.concatenate %477, %478, %479 in 0 : vector<1x515xbf16>, vector<1x515xbf16>, vector<1x515xbf16> -> vector<3x515xbf16>
    %481 = vector.extract_strided_slice %476 {offsets = [1, 0], sizes = [1, 515], strides = [1, 1]} : vector<4x517xbf16> to vector<1x515xbf16>
    %482 = vector.extract_strided_slice %476 {offsets = [1, 1], sizes = [1, 515], strides = [1, 1]} : vector<4x517xbf16> to vector<1x515xbf16>
    %483 = vector.extract_strided_slice %476 {offsets = [1, 2], sizes = [1, 515], strides = [1, 1]} : vector<4x517xbf16> to vector<1x515xbf16>
    %484 = tpu.concatenate %481, %482, %483 in 0 : vector<1x515xbf16>, vector<1x515xbf16>, vector<1x515xbf16> -> vector<3x515xbf16>
    %485 = tpu.concatenate %480, %484, %4 in 0 : vector<3x515xbf16>, vector<3x515xbf16>, vector<2x515xbf16> -> vector<8x515xbf16>
    %cst_172 = arith.constant dense<0.000000e+00> : vector<16x515xf32>
    %486 = tpu.matmul %0, %485, %cst_172 {dimension_numbers = #tpu.dot_dimension_numbers<[1], [0], [0], [1], [0, 0, 1, 1], [], []>} : vector<16x8xbf16>, vector<8x515xbf16>, vector<16x515xf32> -> vector<16x515xf32>
    %cst_173 = arith.constant 0.000000e+00 : f32
    %487 = vector.broadcast %cst_173 : f32 to vector<16x515xf32>
    %488 = arith.maximumf %486, %487 : vector<16x515xf32>
    %489 = vector.extract_strided_slice %488 {offsets = [0, 0], sizes = [16, 514], strides = [1, 1]} : vector<16x515xf32> to vector<16x514xf32>
    %490 = vector.extract_strided_slice %488 {offsets = [0, 1], sizes = [16, 514], strides = [1, 1]} : vector<16x515xf32> to vector<16x514xf32>
    %491 = vector.extract_strided_slice %476 {offsets = [2, 0], sizes = [1, 515], strides = [1, 1]} : vector<4x517xbf16> to vector<1x515xbf16>
    %492 = vector.extract_strided_slice %476 {offsets = [2, 1], sizes = [1, 515], strides = [1, 1]} : vector<4x517xbf16> to vector<1x515xbf16>
    %493 = vector.extract_strided_slice %476 {offsets = [2, 2], sizes = [1, 515], strides = [1, 1]} : vector<4x517xbf16> to vector<1x515xbf16>
    %494 = tpu.concatenate %491, %492, %493 in 0 : vector<1x515xbf16>, vector<1x515xbf16>, vector<1x515xbf16> -> vector<3x515xbf16>
    %495 = tpu.concatenate %484, %494, %4 in 0 : vector<3x515xbf16>, vector<3x515xbf16>, vector<2x515xbf16> -> vector<8x515xbf16>
    %cst_174 = arith.constant dense<0.000000e+00> : vector<16x515xf32>
    %496 = tpu.matmul %0, %495, %cst_174 {dimension_numbers = #tpu.dot_dimension_numbers<[1], [0], [0], [1], [0, 0, 1, 1], [], []>} : vector<16x8xbf16>, vector<8x515xbf16>, vector<16x515xf32> -> vector<16x515xf32>
    %cst_175 = arith.constant 0.000000e+00 : f32
    %497 = vector.broadcast %cst_175 : f32 to vector<16x515xf32>
    %498 = arith.maximumf %496, %497 : vector<16x515xf32>
    %499 = vector.extract_strided_slice %498 {offsets = [0, 0], sizes = [16, 514], strides = [1, 1]} : vector<16x515xf32> to vector<16x514xf32>
    %500 = vector.extract_strided_slice %498 {offsets = [0, 1], sizes = [16, 514], strides = [1, 1]} : vector<16x515xf32> to vector<16x514xf32>
    %501 = arith.addf %489, %490 : vector<16x514xf32>
    %502 = arith.addf %501, %499 : vector<16x514xf32>
    %503 = arith.addf %502, %500 : vector<16x514xf32>
    %cst_176 = arith.constant 2.500000e-01 : f32
    %504 = vector.broadcast %cst_176 : f32 to vector<16x514xf32>
    %505 = arith.mulf %503, %504 : vector<16x514xf32>
    %506 = arith.truncf %505 : vector<16x514xf32> to vector<16x514xbf16>
    %507 = vector.extract_strided_slice %506 {offsets = [0, 0], sizes = [16, 512], strides = [1, 1]} : vector<16x514xbf16> to vector<16x512xbf16>
    %508 = vector.extract_strided_slice %506 {offsets = [0, 1], sizes = [16, 512], strides = [1, 1]} : vector<16x514xbf16> to vector<16x512xbf16>
    %509 = vector.extract_strided_slice %506 {offsets = [0, 2], sizes = [16, 512], strides = [1, 1]} : vector<16x514xbf16> to vector<16x512xbf16>
    %510 = tpu.concatenate %507, %508, %509, %6 in 0 : vector<16x512xbf16>, vector<16x512xbf16>, vector<16x512xbf16>, vector<1x512xbf16> -> vector<49x512xbf16>
    %cst_177 = arith.constant dense<0.000000e+00> : vector<32x512xf32>
    %511 = tpu.matmul %2, %510, %cst_177 {dimension_numbers = #tpu.dot_dimension_numbers<[1], [0], [0], [1], [0, 0, 1, 1], [], []>} : vector<32x49xbf16>, vector<49x512xbf16>, vector<32x512xf32> -> vector<32x512xf32>
    %cst_178 = arith.constant 0.000000e+00 : f32
    %512 = vector.broadcast %cst_178 : f32 to vector<32x512xf32>
    %513 = arith.maximumf %511, %512 : vector<32x512xf32>
    %c0_179 = arith.constant 0 : index
    %c0_180 = arith.constant 0 : index
    %c0_181 = arith.constant 0 : index
    %514 = vector.load %arg5[%c0_179, %c0_180, %c0_181] : memref<4x32x512xf32, #tpu.memory_space<vmem>>, vector<1x32x512xf32>
    %515 = vector.shape_cast %514 : vector<1x32x512xf32> to vector<32x512xf32>
    %516 = arith.mulf %513, %515 : vector<32x512xf32>
    %517 = vector.shape_cast %516 : vector<32x512xf32> to vector<1x32x512xf32>
    %cst_182 = arith.constant dense<0.000000e+00> : vector<1xf32>
    %518 = vector.multi_reduction <add>, %517, %cst_182 [1, 2] : vector<1x32x512xf32> to vector<1xf32>
    %519 = vector.shape_cast %518 : vector<1xf32> to vector<1x1x1xf32>
    %520 = vector.extract %519[0, 0, 0] : f32 from vector<1x1x1xf32>
    %cst_183 = arith.constant 0.000000e+00 : f32
    %521 = arith.addf %cst_183, %520 : f32
    %c2_184 = arith.constant 2 : index
    %c0_185 = arith.constant 0 : index
    %c0_186 = arith.constant 0 : index
    %522 = vector.load %arg5[%c2_184, %c0_185, %c0_186] : memref<4x32x512xf32, #tpu.memory_space<vmem>>, vector<1x32x512xf32>
    %523 = vector.shape_cast %522 : vector<1x32x512xf32> to vector<32x512xf32>
    %524 = arith.mulf %513, %523 : vector<32x512xf32>
    %525 = vector.shape_cast %524 : vector<32x512xf32> to vector<1x32x512xf32>
    %cst_187 = arith.constant dense<0.000000e+00> : vector<1xf32>
    %526 = vector.multi_reduction <add>, %525, %cst_187 [1, 2] : vector<1x32x512xf32> to vector<1xf32>
    %527 = vector.shape_cast %526 : vector<1xf32> to vector<1x1x1xf32>
    %528 = vector.extract %527[0, 0, 0] : f32 from vector<1x1x1xf32>
    %cst_188 = arith.constant 0.000000e+00 : f32
    %529 = arith.addf %cst_188, %528 : f32
    %530 = vector.extract_strided_slice %476 {offsets = [3, 0], sizes = [1, 515], strides = [1, 1]} : vector<4x517xbf16> to vector<1x515xbf16>
    %531 = vector.extract_strided_slice %476 {offsets = [3, 1], sizes = [1, 515], strides = [1, 1]} : vector<4x517xbf16> to vector<1x515xbf16>
    %532 = vector.extract_strided_slice %476 {offsets = [3, 2], sizes = [1, 515], strides = [1, 1]} : vector<4x517xbf16> to vector<1x515xbf16>
    %533 = tpu.concatenate %530, %531, %532 in 0 : vector<1x515xbf16>, vector<1x515xbf16>, vector<1x515xbf16> -> vector<3x515xbf16>
    %534 = tpu.concatenate %494, %533, %4 in 0 : vector<3x515xbf16>, vector<3x515xbf16>, vector<2x515xbf16> -> vector<8x515xbf16>
    %cst_189 = arith.constant dense<0.000000e+00> : vector<16x515xf32>
    %535 = tpu.matmul %0, %534, %cst_189 {dimension_numbers = #tpu.dot_dimension_numbers<[1], [0], [0], [1], [0, 0, 1, 1], [], []>} : vector<16x8xbf16>, vector<8x515xbf16>, vector<16x515xf32> -> vector<16x515xf32>
    %cst_190 = arith.constant 0.000000e+00 : f32
    %536 = vector.broadcast %cst_190 : f32 to vector<16x515xf32>
    %537 = arith.maximumf %535, %536 : vector<16x515xf32>
    %538 = vector.extract_strided_slice %537 {offsets = [0, 0], sizes = [16, 514], strides = [1, 1]} : vector<16x515xf32> to vector<16x514xf32>
    %539 = vector.extract_strided_slice %537 {offsets = [0, 1], sizes = [16, 514], strides = [1, 1]} : vector<16x515xf32> to vector<16x514xf32>
    %540 = arith.addf %499, %500 : vector<16x514xf32>
    %541 = arith.addf %540, %538 : vector<16x514xf32>
    %542 = arith.addf %541, %539 : vector<16x514xf32>
    %cst_191 = arith.constant 2.500000e-01 : f32
    %543 = vector.broadcast %cst_191 : f32 to vector<16x514xf32>
    %544 = arith.mulf %542, %543 : vector<16x514xf32>
    %545 = arith.truncf %544 : vector<16x514xf32> to vector<16x514xbf16>
    %546 = vector.extract_strided_slice %545 {offsets = [0, 0], sizes = [16, 512], strides = [1, 1]} : vector<16x514xbf16> to vector<16x512xbf16>
    %547 = vector.extract_strided_slice %545 {offsets = [0, 1], sizes = [16, 512], strides = [1, 1]} : vector<16x514xbf16> to vector<16x512xbf16>
    %548 = vector.extract_strided_slice %545 {offsets = [0, 2], sizes = [16, 512], strides = [1, 1]} : vector<16x514xbf16> to vector<16x512xbf16>
    %549 = tpu.concatenate %546, %547, %548, %6 in 0 : vector<16x512xbf16>, vector<16x512xbf16>, vector<16x512xbf16>, vector<1x512xbf16> -> vector<49x512xbf16>
    %cst_192 = arith.constant dense<0.000000e+00> : vector<32x512xf32>
    %550 = tpu.matmul %2, %549, %cst_192 {dimension_numbers = #tpu.dot_dimension_numbers<[1], [0], [0], [1], [0, 0, 1, 1], [], []>} : vector<32x49xbf16>, vector<49x512xbf16>, vector<32x512xf32> -> vector<32x512xf32>
    %cst_193 = arith.constant 0.000000e+00 : f32
    %551 = vector.broadcast %cst_193 : f32 to vector<32x512xf32>
    %552 = arith.maximumf %550, %551 : vector<32x512xf32>
    %c1_194 = arith.constant 1 : index
    %c0_195 = arith.constant 0 : index
    %c0_196 = arith.constant 0 : index
    %553 = vector.load %arg5[%c1_194, %c0_195, %c0_196] : memref<4x32x512xf32, #tpu.memory_space<vmem>>, vector<1x32x512xf32>
    %554 = vector.shape_cast %553 : vector<1x32x512xf32> to vector<32x512xf32>
    %555 = arith.mulf %552, %554 : vector<32x512xf32>
    %556 = vector.shape_cast %555 : vector<32x512xf32> to vector<1x32x512xf32>
    %cst_197 = arith.constant dense<0.000000e+00> : vector<1xf32>
    %557 = vector.multi_reduction <add>, %556, %cst_197 [1, 2] : vector<1x32x512xf32> to vector<1xf32>
    %558 = vector.shape_cast %557 : vector<1xf32> to vector<1x1x1xf32>
    %559 = vector.extract %558[0, 0, 0] : f32 from vector<1x1x1xf32>
    %560 = arith.addf %521, %559 : f32
    %c3_198 = arith.constant 3 : index
    %c0_199 = arith.constant 0 : index
    %c0_200 = arith.constant 0 : index
    %561 = vector.load %arg5[%c3_198, %c0_199, %c0_200] : memref<4x32x512xf32, #tpu.memory_space<vmem>>, vector<1x32x512xf32>
    %562 = vector.shape_cast %561 : vector<1x32x512xf32> to vector<32x512xf32>
    %563 = arith.mulf %552, %562 : vector<32x512xf32>
    %564 = vector.shape_cast %563 : vector<32x512xf32> to vector<1x32x512xf32>
    %cst_201 = arith.constant dense<0.000000e+00> : vector<1xf32>
    %565 = vector.multi_reduction <add>, %564, %cst_201 [1, 2] : vector<1x32x512xf32> to vector<1xf32>
    %566 = vector.shape_cast %565 : vector<1xf32> to vector<1x1x1xf32>
    %567 = vector.extract %566[0, 0, 0] : f32 from vector<1x1x1xf32>
    %568 = arith.addf %529, %567 : f32
    %c3_202 = arith.constant 3 : index
    %c0_203 = arith.constant 0 : index
    %c0_204 = arith.constant 0 : index
    %c0_205 = arith.constant 0 : index
    %569 = vector.load %arg2[%c3_202, %c0_203, %c0_204, %c0_205] : memref<4x4x3x172xbf16, #tpu.memory_space<vmem>>, vector<1x4x3x172xbf16>
    %570 = vector.shape_cast %569 : vector<1x4x3x172xbf16> to vector<4x3x172xbf16>
    %571 = vector.extract_strided_slice %570 {offsets = [0, 0, 0], sizes = [1, 3, 172], strides = [1, 1, 1]} : vector<4x3x172xbf16> to vector<1x3x172xbf16>
    %572 = vector.shape_cast %571 : vector<1x3x172xbf16> to vector<3x172xbf16>
    %573 = vector.extract_strided_slice %570 {offsets = [1, 0, 0], sizes = [1, 3, 172], strides = [1, 1, 1]} : vector<4x3x172xbf16> to vector<1x3x172xbf16>
    %574 = vector.shape_cast %573 : vector<1x3x172xbf16> to vector<3x172xbf16>
    %575 = vector.extract_strided_slice %570 {offsets = [2, 0, 0], sizes = [1, 3, 172], strides = [1, 1, 1]} : vector<4x3x172xbf16> to vector<1x3x172xbf16>
    %576 = vector.shape_cast %575 : vector<1x3x172xbf16> to vector<3x172xbf16>
    %577 = tpu.concatenate %572, %574, %5 in 0 : vector<3x172xbf16>, vector<3x172xbf16>, vector<2x172xbf16> -> vector<8x172xbf16>
    %cst_206 = arith.constant dense<0.000000e+00> : vector<16x172xf32>
    %578 = tpu.matmul %1, %577, %cst_206 {dimension_numbers = #tpu.dot_dimension_numbers<[1], [0], [0], [1], [0, 0, 1, 1], [], []>} : vector<16x8xbf16>, vector<8x172xbf16>, vector<16x172xf32> -> vector<16x172xf32>
    %cst_207 = arith.constant 0.000000e+00 : f32
    %579 = vector.broadcast %cst_207 : f32 to vector<16x172xf32>
    %580 = arith.maximumf %578, %579 : vector<16x172xf32>
    %581 = tpu.concatenate %574, %576, %5 in 0 : vector<3x172xbf16>, vector<3x172xbf16>, vector<2x172xbf16> -> vector<8x172xbf16>
    %cst_208 = arith.constant dense<0.000000e+00> : vector<16x172xf32>
    %582 = tpu.matmul %1, %581, %cst_208 {dimension_numbers = #tpu.dot_dimension_numbers<[1], [0], [0], [1], [0, 0, 1, 1], [], []>} : vector<16x8xbf16>, vector<8x172xbf16>, vector<16x172xf32> -> vector<16x172xf32>
    %cst_209 = arith.constant 0.000000e+00 : f32
    %583 = vector.broadcast %cst_209 : f32 to vector<16x172xf32>
    %584 = arith.maximumf %582, %583 : vector<16x172xf32>
    %585 = vector.extract_strided_slice %580 {offsets = [0, 0], sizes = [16, 171], strides = [1, 1]} : vector<16x172xf32> to vector<16x171xf32>
    %586 = vector.extract_strided_slice %580 {offsets = [0, 1], sizes = [16, 171], strides = [1, 1]} : vector<16x172xf32> to vector<16x171xf32>
    %587 = arith.addf %585, %586 : vector<16x171xf32>
    %588 = vector.extract_strided_slice %584 {offsets = [0, 0], sizes = [16, 171], strides = [1, 1]} : vector<16x172xf32> to vector<16x171xf32>
    %589 = arith.addf %587, %588 : vector<16x171xf32>
    %590 = vector.extract_strided_slice %584 {offsets = [0, 1], sizes = [16, 171], strides = [1, 1]} : vector<16x172xf32> to vector<16x171xf32>
    %591 = arith.addf %589, %590 : vector<16x171xf32>
    %cst_210 = arith.constant 2.500000e-01 : f32
    %592 = vector.broadcast %cst_210 : f32 to vector<16x171xf32>
    %593 = arith.mulf %591, %592 : vector<16x171xf32>
    %594 = arith.truncf %593 : vector<16x171xf32> to vector<16x171xbf16>
    %595 = vector.extract_strided_slice %594 {offsets = [0, 0], sizes = [16, 169], strides = [1, 1]} : vector<16x171xbf16> to vector<16x169xbf16>
    %596 = vector.extract_strided_slice %594 {offsets = [0, 1], sizes = [16, 169], strides = [1, 1]} : vector<16x171xbf16> to vector<16x169xbf16>
    %597 = vector.extract_strided_slice %594 {offsets = [0, 2], sizes = [16, 169], strides = [1, 1]} : vector<16x171xbf16> to vector<16x169xbf16>
    %598 = tpu.concatenate %595, %596, %597, %7 in 0 : vector<16x169xbf16>, vector<16x169xbf16>, vector<16x169xbf16>, vector<1x169xbf16> -> vector<49x169xbf16>
    %cst_211 = arith.constant dense<0.000000e+00> : vector<32x169xf32>
    %599 = tpu.matmul %3, %598, %cst_211 {dimension_numbers = #tpu.dot_dimension_numbers<[1], [0], [0], [1], [0, 0, 1, 1], [], []>} : vector<32x49xbf16>, vector<49x169xbf16>, vector<32x169xf32> -> vector<32x169xf32>
    %cst_212 = arith.constant 0.000000e+00 : f32
    %600 = vector.broadcast %cst_212 : f32 to vector<32x169xf32>
    %601 = arith.maximumf %599, %600 : vector<32x169xf32>
    %c0_213 = arith.constant 0 : index
    %c0_214 = arith.constant 0 : index
    %c0_215 = arith.constant 0 : index
    %602 = vector.load %arg6[%c0_213, %c0_214, %c0_215] : memref<2x32x169xf32, #tpu.memory_space<vmem>>, vector<1x32x169xf32>
    %603 = vector.shape_cast %602 : vector<1x32x169xf32> to vector<32x169xf32>
    %604 = arith.mulf %601, %603 : vector<32x169xf32>
    %605 = vector.shape_cast %604 : vector<32x169xf32> to vector<1x32x169xf32>
    %cst_216 = arith.constant dense<0.000000e+00> : vector<1xf32>
    %606 = vector.multi_reduction <add>, %605, %cst_216 [1, 2] : vector<1x32x169xf32> to vector<1xf32>
    %607 = vector.shape_cast %606 : vector<1xf32> to vector<1x1x1xf32>
    %608 = vector.extract %607[0, 0, 0] : f32 from vector<1x1x1xf32>
    %609 = arith.addf %560, %608 : f32
    %c1_217 = arith.constant 1 : index
    %c0_218 = arith.constant 0 : index
    %c0_219 = arith.constant 0 : index
    %610 = vector.load %arg6[%c1_217, %c0_218, %c0_219] : memref<2x32x169xf32, #tpu.memory_space<vmem>>, vector<1x32x169xf32>
    %611 = vector.shape_cast %610 : vector<1x32x169xf32> to vector<32x169xf32>
    %612 = arith.mulf %601, %611 : vector<32x169xf32>
    %613 = vector.shape_cast %612 : vector<32x169xf32> to vector<1x32x169xf32>
    %cst_220 = arith.constant dense<0.000000e+00> : vector<1xf32>
    %614 = vector.multi_reduction <add>, %613, %cst_220 [1, 2] : vector<1x32x169xf32> to vector<1xf32>
    %615 = vector.shape_cast %614 : vector<1xf32> to vector<1x1x1xf32>
    %616 = vector.extract %615[0, 0, 0] : f32 from vector<1x1x1xf32>
    %617 = arith.addf %568, %616 : f32
    %c6_i32 = arith.constant 6 : i32
    %618 = vector.broadcast %c6_i32 : i32 to vector<8x128xi32>
    %619 = arith.cmpi eq, %8, %618 : vector<8x128xi32>
    %cst_221 = arith.constant 0.000000e+00 : f32
    %620 = vector.broadcast %609 : f32 to vector<8x128xf32>
    %621 = vector.broadcast %cst_221 : f32 to vector<8x128xf32>
    %622 = arith.select %619, %620, %621 : vector<8x128xi1>, vector<8x128xf32>
    %623 = arith.addf %474, %622 : vector<8x128xf32>
    %c7_i32 = arith.constant 7 : i32
    %624 = vector.broadcast %c7_i32 : i32 to vector<8x128xi32>
    %625 = arith.cmpi eq, %8, %624 : vector<8x128xi32>
    %cst_222 = arith.constant 0.000000e+00 : f32
    %626 = vector.broadcast %617 : f32 to vector<8x128xf32>
    %627 = vector.broadcast %cst_222 : f32 to vector<8x128xf32>
    %628 = arith.select %625, %626, %627 : vector<8x128xi1>, vector<8x128xf32>
    %629 = arith.addf %623, %628 : vector<8x128xf32>
    %c0_223 = arith.constant 0 : index
    %c0_224 = arith.constant 0 : index
    %c0_225 = arith.constant 0 : index
    %630 = vector.load %arg8[%c0_223, %c0_224, %c0_225] : memref<1x8x128xf32, #tpu.memory_space<vmem>>, vector<1x8x128xf32>
    %631 = vector.shape_cast %630 : vector<1x8x128xf32> to vector<8x128xf32>
    %632 = vector.shape_cast %629 : vector<8x128xf32> to vector<1x8x128xf32>
    tpu.vector_store %arg8[%c0_223, %c0_224, %c0_225], %632 {strides = array<i32>} : memref<1x8x128xf32, #tpu.memory_space<vmem>>, vector<1x8x128xf32>,
    return
  }
  func.func @transform_0(%arg0: i32) -> (i32, i32, i32) {
    %c0_i32 = arith.constant 0 : i32
    %c0_i32_0 = arith.constant 0 : i32
    %c0_i32_1 = arith.constant 0 : i32
    return %arg0, %c0_i32, %c0_i32_0 : i32, i32, i32
  }
  func.func @transform_1(%arg0: i32) -> (i32, i32, i32, i32) {
    %c0_i32 = arith.constant 0 : i32
    %c0_i32_0 = arith.constant 0 : i32
    %c0_i32_1 = arith.constant 0 : i32
    %c0_i32_2 = arith.constant 0 : i32
    return %arg0, %c0_i32, %c0_i32_0, %c0_i32_1 : i32, i32, i32, i32
  }
  func.func @transform_2(%arg0: i32) -> (i32, i32) {
    %c0_i32 = arith.constant 0 : i32
    %c0_i32_0 = arith.constant 0 : i32
    %c0_i32_1 = arith.constant 0 : i32
    return %c0_i32, %c0_i32_0 : i32, i32
  }
  func.func @transform_3(%arg0: i32) -> (i32, i32) {
    %c0_i32 = arith.constant 0 : i32
    %c0_i32_0 = arith.constant 0 : i32
    %c0_i32_1 = arith.constant 0 : i32
    return %c0_i32, %c0_i32_0 : i32, i32
  }
  func.func @transform_4(%arg0: i32) -> (i32, i32, i32) {
    %c0_i32 = arith.constant 0 : i32
    %c0_i32_0 = arith.constant 0 : i32
    %c0_i32_1 = arith.constant 0 : i32
    %c0_i32_2 = arith.constant 0 : i32
    return %c0_i32, %c0_i32_0, %c0_i32_1 : i32, i32, i32
  }
  func.func @transform_5(%arg0: i32) -> (i32, i32, i32) {
    %c0_i32 = arith.constant 0 : i32
    %c0_i32_0 = arith.constant 0 : i32
    %c0_i32_1 = arith.constant 0 : i32
    %c0_i32_2 = arith.constant 0 : i32
    return %c0_i32, %c0_i32_0, %c0_i32_1 : i32, i32, i32
  }
  func.func @transform_6(%arg0: i32) -> (i32, i32) {
    %c0_i32 = arith.constant 0 : i32
    %c0_i32_0 = arith.constant 0 : i32
    %c0_i32_1 = arith.constant 0 : i32
    return %c0_i32, %c0_i32_0 : i32, i32
  }
  func.func @transform_7(%arg0: i32) -> (i32, i32, i32) {
    %c0_i32 = arith.constant 0 : i32
    %c0_i32_0 = arith.constant 0 : i32
    %c0_i32_1 = arith.constant 0 : i32
    return %arg0, %c0_i32, %c0_i32_0 : i32, i32, i32
  }
}

</mosaic_0001>

<bundles_post_ra>
// kernel: tile.8
= control target key start
LH: loop header
LB: loop body
LE: loop exit
PB: predicated region body
PF: predicated region fallthrough
CT: control target
= control target key end

     0   :  { %s64_s0 = inlined_call_operand.vmem [shape: f32[2], index: 0, kind: input, shape index: {}]   ;;  %s65_s1 = inlined_call_operand.vmem [shape: f32[64,2], index: 1, kind: output, shape index: {}]  }
   0x1   :  { %v4_v0 = vld [vmem:[%s64_s0] ss:$0 sm:$0xff] }
   0x2   :  { %5 = vst [vmem:[%s65_s1] sm:$0xff] %v4_v0  ;;  %20 = vst [vmem:[%s65_s1 + $0x8] sm:$0xff] %v4_v0 }
   0x3   :  { %21 = vst [vmem:[%s65_s1 + $0x10] sm:$0xff] %v4_v0  ;;  %22 = vst [vmem:[%s65_s1 + $0x18] sm:$0xff] %v4_v0 }
   0x4   :  { %23 = vst [vmem:[%s65_s1 + $0x20] sm:$0xff] %v4_v0  ;;  %24 = vst [vmem:[%s65_s1 + $0x28] sm:$0xff] %v4_v0 }
   0x5   :  { %25 = vst [vmem:[%s65_s1 + $0x30] sm:$0xff] %v4_v0  ;;  %26 = vst [vmem:[%s65_s1 + $0x38] sm:$0xff] %v4_v0 }

// kernel: tile.9
= control target key start
LH: loop header
LB: loop body
LE: loop exit
PB: predicated region body
PF: predicated region fallthrough
CT: control target
= control target key end

     0   :  { %s515_s10 = smov 126   ;;  %s516_s11 = smov 122   ;;  %vm3_vm0 = vcmask 15360   ;;  %vm9_vm1 = vcmask 1048560   ;;  %vm21_vm2 = vcmask 1015760   ;;  %vm15_vm3 = vcmask 1032160   ;;  %s783_s0 = inlined_call_operand.vmem [shape: f32[64,2], index: 0, kind: input, shape index: {}]   ;;  %s784_s1 = inlined_call_operand.vmem [shape: f32[128], index: 1, kind: output, shape index: {}]  }
   0x1   :  { %v389_v0 = vld [vmem:[%s783_s0 + $0x3f] sm:$0x1]   ;;  %v391_v1 = vld [vmem:[%s783_s0 + $0x3d] sm:$0x1]   ;;  %v390_v2 = vld [vmem:[%s783_s0 + $0x3e] sm:$0x1]  }
   0x2   :  { %7 = vrot.lane.b32.xlu0 %v389_v0, %s515_s10  ;;  %19 = vrot.lane.b32.xlu1 %v391_v1, %s516_s11  ;;  %v392_v3 = vld [vmem:[%s783_s0 + $0x3c] sm:$0x1]   ;;  %s517_s16 = smov 124   ;;  %s518_s17 = smov 120   ;;  %v393_v4 = vld [vmem:[%s783_s0 + $0x3b] sm:$0x1]  }
   0x3   :  { %v394_v5 = vld [vmem:[%s783_s0 + $0x3a] sm:$0x1]   ;;  %s519_s22 = smov 118   ;;  %s520_s23 = smov 116   ;;  %v395_v6 = vld [vmem:[%s783_s0 + $0x39] sm:$0x1]  }
   0x4   :  { %v396_v7 = vld [vmem:[%s783_s0 + $0x38] sm:$0x1]   ;;  %s521_s28 = smov 114   ;;  %s522_s29 = smov 112   ;;  %v397_v8 = vld [vmem:[%s783_s0 + $0x37] sm:$0x1]  }
   0x5   :  { %v398_v9 = vld [vmem:[%s783_s0 + $0x36] sm:$0x1]   ;;  %s523_s5 = smov 110   ;;  %s524_s6 = smov 108   ;;  %v399_v10 = vld [vmem:[%s783_s0 + $0x35] sm:$0x1]  }
   0x6   :  { %13 = vrot.lane.b32.xlu0 %v390_v2, %s517_s16  ;;  %25 = vrot.lane.b32.xlu1 %v392_v3, %s518_s17  ;;  %v400_v11 = vld [vmem:[%s783_s0 + $0x34] sm:$0x1]   ;;  %s525_s11 = smov 106   ;;  %s526_s12 = smov 104   ;;  %v401_v12 = vld [vmem:[%s783_s0 + $0x33] sm:$0x1]  }
   0x7   :  { %v402_v13 = vld [vmem:[%s783_s0 + $0x32] sm:$0x1]   ;;  %s527_s17 = smov 102   ;;  %s528_s18 = smov 100   ;;  %v403_v14 = vld [vmem:[%s783_s0 + $0x31] sm:$0x1]  }
   0x8   :  { %v404_v15 = vld [vmem:[%s783_s0 + $0x30] sm:$0x1]   ;;  %v2_v16 = vld [vmem:[%s783_s0] sm:$0x1]   ;;  %s529_s25 = smov 98   ;;  %s530_s26 = smov 96  }
   0x9   :  { %v405_v17 = vld [vmem:[%s783_s0 + $0x2f] sm:$0x1]   ;;  %v406_v18 = vld [vmem:[%s783_s0 + $0x2e] sm:$0x1]   ;;  %4 = vst.msk [vmem:[#allocation0] sm:$0x1] %vm3_vm0, %v2_v16  }
   0xa   :  { %31 = vrot.lane.b32.xlu0 %v393_v4, %s519_s22  ;;  %37 = vrot.lane.b32.xlu1 %v394_v5, %s520_s23  ;;  %s531_s2 = smov 94   ;;  %s532_s3 = smov 92   ;;  %v407_v19 = vld [vmem:[%s783_s0 + $0x2d] sm:$0x1]   ;;  %v408_v20 = vld [vmem:[%s783_s0 + $0x2c] sm:$0x1]  }
   0xb   :  { %s533_s8 = smov 90   ;;  %s534_s9 = smov 88   ;;  %v409_v21 = vld [vmem:[%s783_s0 + $0x2b] sm:$0x1]   ;;  %v410_v22 = vld [vmem:[%s783_s0 + $0x2a] sm:$0x1]  }
   0xc   :  { %s535_s14 = smov 86   ;;  %s536_s15 = smov 84   ;;  %v411_v23 = vld [vmem:[%s783_s0 + $0x29] sm:$0x1]   ;;  %v412_v24 = vld [vmem:[%s783_s0 + $0x28] sm:$0x1]  }
   0xd   :  { %s537_s20 = smov 82   ;;  %s538_s21 = smov 80   ;;  %v413_v25 = vld [vmem:[%s783_s0 + $0x27] sm:$0x1]   ;;  %v414_v26 = vld [vmem:[%s783_s0 + $0x26] sm:$0x1]  }
   0xe   :  { %43 = vrot.lane.b32.xlu0 %v395_v6, %s521_s28  ;;  %49 = vrot.lane.b32.xlu1 %v396_v7, %s522_s29  ;;  %s540_s27 = smov 76   ;;  %v415_v27 = vld [vmem:[%s783_s0 + $0x25] sm:$0x1]   ;;  %v416_v28 = vld [vmem:[%s783_s0 + $0x24] sm:$0x1]   ;;  %s542_s4 = smov 72  }
   0xf   :  { %v417_v29 = vld [vmem:[%s783_s0 + $0x23] sm:$0x1]   ;;  %v418_v30 = vld [vmem:[%s783_s0 + $0x22] sm:$0x1]   ;;  %s544_s10 = smov 68   ;;  %s546_s16 = smov 64  }
  0x10   :  { %v419_v31 = vld [vmem:[%s783_s0 + $0x21] sm:$0x1]   ;;  %v420_v32 = vld [vmem:[%s783_s0 + $0x20] sm:$0x1]   ;;  %v421_v33 = vld [vmem:[%s783_s0 + $0x1f] sm:$0x1]  }
  0x11   :  { %v422_v34 = vld [vmem:[%s783_s0 + $0x1e] sm:$0x1]   ;;  %s548_s22 = smov 60   ;;  %v423_v35 = vld [vmem:[%s783_s0 + $0x1d] sm:$0x1]   ;;  %s550_s28 = smov 56  }
  0x12   :  { %55 = vrot.lane.b32.xlu0 %v397_v8, %s523_s5  ;;  %61 = vrot.lane.b32.xlu1 %v398_v9, %s524_s6  ;;  %v424_v36 = vld [vmem:[%s783_s0 + $0x1c] sm:$0x1]   ;;  %v425_v37 = vld [vmem:[%s783_s0 + $0x1b] sm:$0x1]   ;;  %s552_s5 = smov 52   ;;  %s558_s23 = smov 40  }
  0x13   :  { %v426_v38 = vld [vmem:[%s783_s0 + $0x1a] sm:$0x1]   ;;  %v427_v39 = vld [vmem:[%s783_s0 + $0x19] sm:$0x1]   ;;  %v428_v40 = vld [vmem:[%s783_s0 + $0x18] sm:$0x1]  }
  0x14   :  { %v429_v41 = vld [vmem:[%s783_s0 + $0x17] sm:$0x1]   ;;  %v430_v42 = vld [vmem:[%s783_s0 + $0x16] sm:$0x1]   ;;  %v431_v43 = vld [vmem:[%s783_s0 + $0x15] sm:$0x1]  }
  0x15   :  { %v432_v44 = vld [vmem:[%s783_s0 + $0x14] sm:$0x1]   ;;  %v433_v45 = vld [vmem:[%s783_s0 + $0x13] sm:$0x1]   ;;  %v434_v46 = vld [vmem:[%s783_s0 + $0x12] sm:$0x1]  }
  0x16   :  { %67 = vrot.lane.b32.xlu0 %v399_v10, %s525_s11  ;;  %73 = vrot.lane.b32.xlu1 %v400_v11, %s526_s12  ;;  %s554_s11 = smov 48   ;;  %s560_s29 = smov 36   ;;  %v435_v47 = vld [vmem:[%s783_s0 + $0x11] sm:$0x1]   ;;  %v436_v48 = vld [vmem:[%s783_s0 + $0x10] sm:$0x1]  }
  0x17   :  { %s562_s6 = smov 32   ;;  %v437_v49 = vld [vmem:[%s783_s0 + $0xf] sm:$0x1]   ;;  %v438_v50 = vld [vmem:[%s783_s0 + $0xe] sm:$0x1]   ;;  %s564_s12 = smov 28  }
  0x18   :  { %v439_v51 = vld [vmem:[%s783_s0 + $0xd] sm:$0x1]   ;;  %v440_v52 = vld [vmem:[%s783_s0 + $0xc] sm:$0x1]   ;;  %v441_v53 = vld [vmem:[%s783_s0 + $0xb] sm:$0x1]  }
  0x19   :  { %v442_v54 = vld [vmem:[%s783_s0 + $0xa] sm:$0x1]   ;;  %s568_s24 = smov 20   ;;  %v443_v55 = vld [vmem:[%s783_s0 + $0x9] sm:$0x1]   ;;  %s570_s30 = smov 16  }
  0x1a   :  { %79 = vrot.lane.b32.xlu0 %v401_v12, %s527_s17  ;;  %85 = vrot.lane.b32.xlu1 %v402_v13, %s528_s18  ;;  %s556_s17 = smov 44   ;;  %s566_s18 = smov 24   ;;  %v444_v56 = vld [vmem:[%s783_s0 + $0x8] sm:$0x1]   ;;  %v445_v57 = vld [vmem:[%s783_s0 + $0x7] sm:$0x1]  }
  0x1b   :  { %v446_v58 = vld [vmem:[%s783_s0 + $0x6] sm:$0x1]   ;;  %s572_s7 = smov 12   ;;  %v447_v59 = vld [vmem:[%s783_s0 + $0x5] sm:$0x1]   ;;  %s574_s13 = smov 8  }
  0x1c   :  { %v448_v60 = vld [vmem:[%s783_s0 + $0x4] sm:$0x1]   ;;  %v449_v63 = vld [vmem:[%s783_s0 + $0x3] sm:$0x1]   ;;  %v450_v0 = vld [vmem:[%s783_s0 + $0x2] sm:$0x1]  }
  0x1d   :  { %vm27_vm4 = vcmask 999360   ;;  %vm33_vm5 = vcmask 982960   ;;  %s576_s19 = smov 4   ;;  %v451_v3 = vld [vmem:[%s783_s0 + $0x1] sm:$0x1]   ;;  %vm39_vm6 = vcmask 966560  }
  0x1e   :  { %91 = vrot.lane.b32.xlu0 %v403_v14, %s529_s25  ;;  %97 = vrot.lane.b32.xlu1 %v404_v15, %s530_s26  ;;  %s539_s26 = smov 78   ;;  %s577_s0 = smov 2   ;;  %vm45_vm7 = vcmask 950160   ;;  %vm51_vm8 = vcmask 933760   ;;  %vm57_vm9 = vcmask 917360   ;;  %vm63_vm10 = vcmask 900960  }
  0x1f   :  { %vm69_vm11 = vcmask 884560   ;;  %vm75_vm12 = vcmask 868160   ;;  %vm81_vm13 = vcmask 851760   ;;  %vm87_vm14 = vcmask 835360  }
  0x20   :  { %vm93_vm15 = vcmask 818960   ;;  %vm99_vm0 = vcmask 802560  }
  0x22   :  { %103 = vrot.lane.b32.xlu0 %v405_v17, %s531_s2  ;;  %109 = vrot.lane.b32.xlu1 %v406_v18, %s532_s3  ;;  %s541_s3 = smov 74  }
  0x26   :  { %115 = vrot.lane.b32.xlu0 %v407_v19, %s533_s8  ;;  %121 = vrot.lane.b32.xlu1 %v408_v20, %s534_s9  ;;  %s543_s9 = smov 70  }
  0x2a   :  { %127 = vrot.lane.b32.xlu0 %v409_v21, %s535_s14  ;;  %133 = vrot.lane.b32.xlu1 %v410_v22, %s536_s15  ;;  %s545_s15 = smov 66  }
  0x2e   :  { %139 = vrot.lane.b32.xlu0 %v411_v23, %s537_s20  ;;  %145 = vrot.lane.b32.xlu1 %v412_v24, %s538_s21  ;;  %s547_s21 = smov 62  }
  0x32   :  { %151 = vrot.lane.b32.xlu0 %v413_v25, %s539_s26  ;;  %157 = vrot.lane.b32.xlu1 %v414_v26, %s540_s27  ;;  %s549_s27 = smov 58  }
  0x36   :  { %163 = vrot.lane.b32.xlu0 %v415_v27, %s541_s3  ;;  %169 = vrot.lane.b32.xlu1 %v416_v28, %s542_s4  ;;  %s551_s4 = smov 54  }
  0x3a   :  { %175 = vrot.lane.b32.xlu0 %v417_v29, %s543_s9  ;;  %181 = vrot.lane.b32.xlu1 %v418_v30, %s544_s10  ;;  %s553_s10 = smov 50  }
  0x3e   :  { %187 = vrot.lane.b32.xlu0 %v419_v31, %s545_s15  ;;  %193 = vrot.lane.b32.xlu1 %v420_v32, %s546_s16  ;;  %s555_s16 = smov 46  }
  0x42   :  { %199 = vrot.lane.b32.xlu0 %v421_v33, %s547_s21  ;;  %205 = vrot.lane.b32.xlu1 %v422_v34, %s548_s22  ;;  %s557_s22 = smov 42  }
  0x46   :  { %211 = vrot.lane.b32.xlu0 %v423_v35, %s549_s27  ;;  %217 = vrot.lane.b32.xlu1 %v424_v36, %s550_s28  ;;  %s559_s28 = smov 38  }
  0x4a   :  { %223 = vrot.lane.b32.xlu0 %v425_v37, %s551_s4  ;;  %229 = vrot.lane.b32.xlu1 %v426_v38, %s552_s5  ;;  %s561_s5 = smov 34  }
  0x4e   :  { %235 = vrot.lane.b32.xlu0 %v427_v39, %s553_s10  ;;  %241 = vrot.lane.b32.xlu1 %v428_v40, %s554_s11  ;;  %s563_s11 = smov 30  }
  0x52   :  { %247 = vrot.lane.b32.xlu0 %v429_v41, %s555_s16  ;;  %253 = vrot.lane.b32.xlu1 %v430_v42, %s556_s17  ;;  %s565_s17 = smov 26  }
  0x56   :  { %259 = vrot.lane.b32.xlu0 %v431_v43, %s557_s22  ;;  %265 = vrot.lane.b32.xlu1 %v432_v44, %s558_s23  ;;  %s567_s23 = smov 22  }
  0x5a   :  { %271 = vrot.lane.b32.xlu0 %v433_v45, %s559_s28  ;;  %277 = vrot.lane.b32.xlu1 %v434_v46, %s560_s29  ;;  %s569_s29 = smov 18  }
  0x5e   :  { %283 = vrot.lane.b32.xlu0 %v435_v47, %s561_s5  ;;  %289 = vrot.lane.b32.xlu1 %v436_v48, %s562_s6  ;;  %s571_s6 = smov 14  }
  0x62   :  { %295 = vrot.lane.b32.xlu0 %v437_v49, %s563_s11  ;;  %301 = vrot.lane.b32.xlu1 %v438_v50, %s564_s12  ;;  %s573_s12 = smov 10  }
  0x66   :  { %307 = vrot.lane.b32.xlu0 %v439_v51, %s565_s17  ;;  %313 = vrot.lane.b32.xlu1 %v440_v52, %s566_s18  ;;  %s575_s18 = smov 6  }
  0x6a   :  { %319 = vrot.lane.b32.xlu0 %v441_v53, %s567_s23  ;;  %325 = vrot.lane.b32.xlu1 %v442_v54, %s568_s24 }
  0x6e   :  { %331 = vrot.lane.b32.xlu0 %v443_v55, %s569_s29  ;;  %337 = vrot.lane.b32.xlu1 %v444_v56, %s570_s30 }
  0x72   :  { %343 = vrot.lane.b32.xlu0 %v445_v57, %s571_s6  ;;  %349 = vrot.lane.b32.xlu1 %v446_v58, %s572_s7 }
  0x74   :  { %v8_v61 = vpop.permute.xlu0 %7   ;;  %v20_v62 = vpop.permute.xlu1 %19  }
  0x75   :  { %10 = vst.msk [vmem:[#allocation0] sm:$0x1] %vm9_vm1, %v8_v61   ;;  %vm105_vm1 = vcmask 786160  }
  0x76   :  { %355 = vrot.lane.b32.xlu0 %v447_v59, %s573_s12  ;;  %361 = vrot.lane.b32.xlu1 %v448_v60, %s574_s13 }
  0x78   :  { %v14_v1 = vpop.permute.xlu0 %13   ;;  %v26_v2 = vpop.permute.xlu1 %25  }
  0x79   :  { %16 = vst.msk [vmem:[#allocation0] sm:$0x1] %vm15_vm3, %v14_v1   ;;  %vm117_vm3 = vcmask 753360  }
  0x7a   :  { %22 = vst.msk [vmem:[#allocation0] sm:$0x1] %vm21_vm2, %v20_v62   ;;  %367 = vrot.lane.b32.xlu0 %v449_v63, %s575_s18  ;;  %373 = vrot.lane.b32.xlu1 %v450_v0, %s576_s19  ;;  %vm111_vm2 = vcmask 769760  }
  0x7b   :  { %28 = vst.msk [vmem:[#allocation0] sm:$0x1] %vm27_vm4, %v26_v2   ;;  %vm123_vm4 = vcmask 736960  }
  0x7c   :  { %v32_v4 = vpop.permute.xlu0 %31   ;;  %v38_v5 = vpop.permute.xlu1 %37  }
  0x7d   :  { %34 = vst.msk [vmem:[#allocation0] sm:$0x1] %vm33_vm5, %v32_v4   ;;  %vm129_vm5 = vcmask 720560  }
  0x7e   :  { %379 = vrot.lane.b32.xlu0 %v451_v3, %s577_s0  ;;  %40 = vst.msk [vmem:[#allocation0] sm:$0x1] %vm39_vm6, %v38_v5   ;;  %vm135_vm6 = vcmask 704160  }
  0x80   :  { %v44_v6 = vpop.permute.xlu0 %43   ;;  %v50_v7 = vpop.permute.xlu1 %49  }
  0x81   :  { %46 = vst.msk [vmem:[#allocation0] sm:$0x1] %vm45_vm7, %v44_v6   ;;  %vm141_vm7 = vcmask 687760  }
  0x82   :  { %52 = vst.msk [vmem:[#allocation0] sm:$0x1] %vm51_vm8, %v50_v7   ;;  %vm147_vm8 = vcmask 671360  }
  0x84   :  { %v56_v8 = vpop.permute.xlu0 %55   ;;  %v62_v9 = vpop.permute.xlu1 %61  }
  0x85   :  { %58 = vst.msk [vmem:[#allocation0] sm:$0x1] %vm57_vm9, %v56_v8   ;;  %vm153_vm9 = vcmask 654960  }
  0x86   :  { %64 = vst.msk [vmem:[#allocation0] sm:$0x1] %vm63_vm10, %v62_v9   ;;  %vm159_vm10 = vcmask 638560  }
  0x88   :  { %v68_v10 = vpop.permute.xlu0 %67   ;;  %v74_v11 = vpop.permute.xlu1 %73  }
  0x89   :  { %70 = vst.msk [vmem:[#allocation0] sm:$0x1] %vm69_vm11, %v68_v10   ;;  %vm165_vm11 = vcmask 622160  }
  0x8a   :  { %76 = vst.msk [vmem:[#allocation0] sm:$0x1] %vm75_vm12, %v74_v11   ;;  %vm171_vm12 = vcmask 605760  }
  0x8c   :  { %v80_v12 = vpop.permute.xlu0 %79   ;;  %v86_v13 = vpop.permute.xlu1 %85  }
  0x8d   :  { %82 = vst.msk [vmem:[#allocation0] sm:$0x1] %vm81_vm13, %v80_v12   ;;  %vm177_vm13 = vcmask 589360  }
  0x8e   :  { %88 = vst.msk [vmem:[#allocation0] sm:$0x1] %vm87_vm14, %v86_v13   ;;  %vm183_vm14 = vcmask 572960  }
  0x90   :  { %v92_v14 = vpop.permute.xlu0 %91   ;;  %v98_v15 = vpop.permute.xlu1 %97  }
  0x91   :  { %94 = vst.msk [vmem:[#allocation0] sm:$0x1] %vm93_vm15, %v92_v14   ;;  %vm189_vm15 = vcmask 556560  }
  0x92   :  { %100 = vst.msk [vmem:[#allocation0] sm:$0x1] %vm99_vm0, %v98_v15   ;;  %vm195_vm0 = vcmask 540160  }
  0x94   :  { %v104_v16 = vpop.permute.xlu0 %103   ;;  %v110_v17 = vpop.permute.xlu1 %109  }
  0x95   :  { %106 = vst.msk [vmem:[#allocation0] sm:$0x1] %vm105_vm1, %v104_v16   ;;  %vm201_vm1 = vcmask 523760  }
  0x96   :  { %112 = vst.msk [vmem:[#allocation0] sm:$0x1] %vm111_vm2, %v110_v17   ;;  %vm207_vm2 = vcmask 507360  }
  0x98   :  { %v116_v18 = vpop.permute.xlu0 %115   ;;  %v122_v19 = vpop.permute.xlu1 %121  }
  0x99   :  { %118 = vst.msk [vmem:[#allocation0] sm:$0x1] %vm117_vm3, %v116_v18   ;;  %vm213_vm3 = vcmask 490960  }
  0x9a   :  { %124 = vst.msk [vmem:[#allocation0] sm:$0x1] %vm123_vm4, %v122_v19   ;;  %vm219_vm4 = vcmask 474560  }
  0x9c   :  { %v128_v20 = vpop.permute.xlu0 %127   ;;  %v134_v21 = vpop.permute.xlu1 %133  }
  0x9d   :  { %130 = vst.msk [vmem:[#allocation0] sm:$0x1] %vm129_vm5, %v128_v20   ;;  %vm225_vm5 = vcmask 458160  }
  0x9e   :  { %136 = vst.msk [vmem:[#allocation0] sm:$0x1] %vm135_vm6, %v134_v21   ;;  %vm231_vm6 = vcmask 441760  }
  0xa0   :  { %v140_v22 = vpop.permute.xlu0 %139   ;;  %v146_v23 = vpop.permute.xlu1 %145  }
  0xa1   :  { %142 = vst.msk [vmem:[#allocation0] sm:$0x1] %vm141_vm7, %v140_v22   ;;  %vm237_vm7 = vcmask 425360  }
  0xa2   :  { %148 = vst.msk [vmem:[#allocation0] sm:$0x1] %vm147_vm8, %v146_v23   ;;  %vm243_vm8 = vcmask 408960  }
  0xa4   :  { %v152_v24 = vpop.permute.xlu0 %151   ;;  %v158_v25 = vpop.permute.xlu1 %157  }
  0xa5   :  { %154 = vst.msk [vmem:[#allocation0] sm:$0x1] %vm153_vm9, %v152_v24   ;;  %vm249_vm9 = vcmask 392560  }
  0xa6   :  { %160 = vst.msk [vmem:[#allocation0] sm:$0x1] %vm159_vm10, %v158_v25   ;;  %vm255_vm10 = vcmask 376160  }
  0xa8   :  { %v164_v26 = vpop.permute.xlu0 %163   ;;  %v170_v27 = vpop.permute.xlu1 %169  }
  0xa9   :  { %166 = vst.msk [vmem:[#allocation0] sm:$0x1] %vm165_vm11, %v164_v26   ;;  %vm261_vm11 = vcmask 359760  }
  0xaa   :  { %172 = vst.msk [vmem:[#allocation0] sm:$0x1] %vm171_vm12, %v170_v27   ;;  %vm267_vm12 = vcmask 343360  }
  0xac   :  { %v176_v28 = vpop.permute.xlu0 %175   ;;  %v182_v29 = vpop.permute.xlu1 %181  }
  0xad   :  { %178 = vst.msk [vmem:[#allocation0] sm:$0x1] %vm177_vm13, %v176_v28   ;;  %vm273_vm13 = vcmask 326960  }
  0xae   :  { %184 = vst.msk [vmem:[#allocation0] sm:$0x1] %vm183_vm14, %v182_v29   ;;  %vm279_vm14 = vcmask 310560  }
  0xb0   :  { %v188_v30 = vpop.permute.xlu0 %187   ;;  %v194_v31 = vpop.permute.xlu1 %193  }
  0xb1   :  { %190 = vst.msk [vmem:[#allocation0] sm:$0x1] %vm189_vm15, %v188_v30   ;;  %vm285_vm15 = vcmask 294160  }
  0xb2   :  { %196 = vst.msk [vmem:[#allocation0] sm:$0x1] %vm195_vm0, %v194_v31   ;;  %vm291_vm0 = vcmask 277760  }
  0xb4   :  { %v200_v32 = vpop.permute.xlu0 %199   ;;  %v206_v33 = vpop.permute.xlu1 %205  }
  0xb5   :  { %202 = vst.msk [vmem:[#allocation0] sm:$0x1] %vm201_vm1, %v200_v32   ;;  %vm297_vm1 = vcmask 261360  }
  0xb6   :  { %208 = vst.msk [vmem:[#allocation0] sm:$0x1] %vm207_vm2, %v206_v33   ;;  %vm303_vm2 = vcmask 244960  }
  0xb8   :  { %v212_v34 = vpop.permute.xlu0 %211   ;;  %v218_v35 = vpop.permute.xlu1 %217  }
  0xb9   :  { %214 = vst.msk [vmem:[#allocation0] sm:$0x1] %vm213_vm3, %v212_v34   ;;  %vm309_vm3 = vcmask 228560  }
  0xba   :  { %220 = vst.msk [vmem:[#allocation0] sm:$0x1] %vm219_vm4, %v218_v35   ;;  %vm315_vm4 = vcmask 212160  }
  0xbc   :  { %v224_v36 = vpop.permute.xlu0 %223   ;;  %v230_v37 = vpop.permute.xlu1 %229  }
  0xbd   :  { %226 = vst.msk [vmem:[#allocation0] sm:$0x1] %vm225_vm5, %v224_v36   ;;  %vm321_vm5 = vcmask 195760  }
  0xbe   :  { %232 = vst.msk [vmem:[#allocation0] sm:$0x1] %vm231_vm6, %v230_v37   ;;  %vm327_vm6 = vcmask 179360  }
  0xc0   :  { %v236_v38 = vpop.permute.xlu0 %235   ;;  %v242_v39 = vpop.permute.xlu1 %241  }
  0xc1   :  { %238 = vst.msk [vmem:[#allocation0] sm:$0x1] %vm237_vm7, %v236_v38   ;;  %vm333_vm7 = vcmask 162960  }
  0xc2   :  { %244 = vst.msk [vmem:[#allocation0] sm:$0x1] %vm243_vm8, %v242_v39   ;;  %vm339_vm8 = vcmask 146560  }
  0xc4   :  { %v248_v40 = vpop.permute.xlu0 %247   ;;  %v254_v41 = vpop.permute.xlu1 %253  }
  0xc5   :  { %250 = vst.msk [vmem:[#allocation0] sm:$0x1] %vm249_vm9, %v248_v40   ;;  %vm345_vm9 = vcmask 130160  }
  0xc6   :  { %256 = vst.msk [vmem:[#allocation0] sm:$0x1] %vm255_vm10, %v254_v41   ;;  %vm351_vm10 = vcmask 113760  }
  0xc8   :  { %v260_v42 = vpop.permute.xlu0 %259   ;;  %v266_v43 = vpop.permute.xlu1 %265  }
  0xc9   :  { %262 = vst.msk [vmem:[#allocation0] sm:$0x1] %vm261_vm11, %v260_v42   ;;  %vm357_vm11 = vcmask 97360  }
  0xca   :  { %268 = vst.msk [vmem:[#allocation0] sm:$0x1] %vm267_vm12, %v266_v43   ;;  %vm363_vm12 = vcmask 80960  }
  0xcc   :  { %v272_v44 = vpop.permute.xlu0 %271   ;;  %v278_v45 = vpop.permute.xlu1 %277  }
  0xcd   :  { %274 = vst.msk [vmem:[#allocation0] sm:$0x1] %vm273_vm13, %v272_v44   ;;  %vm369_vm13 = vcmask 64560  }
  0xce   :  { %280 = vst.msk [vmem:[#allocation0] sm:$0x1] %vm279_vm14, %v278_v45   ;;  %vm375_vm14 = vcmask 48160  }
  0xd0   :  { %v284_v46 = vpop.permute.xlu0 %283   ;;  %v290_v47 = vpop.permute.xlu1 %289  }
  0xd1   :  { %286 = vst.msk [vmem:[#allocation0] sm:$0x1] %vm285_vm15, %v284_v46   ;;  %vm381_vm15 = vcmask 31760  }
  0xd2   :  { %292 = vst.msk [vmem:[#allocation0] sm:$0x1] %vm291_vm0, %v290_v47  }
  0xd4   :  { %v296_v48 = vpop.permute.xlu0 %295   ;;  %v302_v49 = vpop.permute.xlu1 %301  }
  0xd5   :  { %298 = vst.msk [vmem:[#allocation0] sm:$0x1] %vm297_vm1, %v296_v48  }
  0xd6   :  { %304 = vst.msk [vmem:[#allocation0] sm:$0x1] %vm303_vm2, %v302_v49  }
  0xd8   :  { %v308_v50 = vpop.permute.xlu0 %307   ;;  %v314_v51 = vpop.permute.xlu1 %313  }
  0xd9   :  { %310 = vst.msk [vmem:[#allocation0] sm:$0x1] %vm309_vm3, %v308_v50  }
  0xda   :  { %316 = vst.msk [vmem:[#allocation0] sm:$0x1] %vm315_vm4, %v314_v51  }
  0xdc   :  { %v320_v52 = vpop.permute.xlu0 %319   ;;  %v326_v53 = vpop.permute.xlu1 %325  }
  0xdd   :  { %322 = vst.msk [vmem:[#allocation0] sm:$0x1] %vm321_vm5, %v320_v52  }
  0xde   :  { %328 = vst.msk [vmem:[#allocation0] sm:$0x1] %vm327_vm6, %v326_v53  }
  0xe0   :  { %v332_v54 = vpop.permute.xlu0 %331   ;;  %v338_v55 = vpop.permute.xlu1 %337  }
  0xe1   :  { %334 = vst.msk [vmem:[#allocation0] sm:$0x1] %vm333_vm7, %v332_v54  }
  0xe2   :  { %340 = vst.msk [vmem:[#allocation0] sm:$0x1] %vm339_vm8, %v338_v55  }
  0xe4   :  { %v344_v56 = vpop.permute.xlu0 %343   ;;  %v350_v57 = vpop.permute.xlu1 %349  }
  0xe5   :  { %346 = vst.msk [vmem:[#allocation0] sm:$0x1] %vm345_vm9, %v344_v56  }
  0xe6   :  { %352 = vst.msk [vmem:[#allocation0] sm:$0x1] %vm351_vm10, %v350_v57  }
  0xe8   :  { %v356_v58 = vpop.permute.xlu0 %355   ;;  %v362_v59 = vpop.permute.xlu1 %361  }
  0xe9   :  { %358 = vst.msk [vmem:[#allocation0] sm:$0x1] %vm357_vm11, %v356_v58  }
  0xea   :  { %364 = vst.msk [vmem:[#allocation0] sm:$0x1] %vm363_vm12, %v362_v59  }
  0xec   :  { %v368_v60 = vpop.permute.xlu0 %367   ;;  %v374_v61 = vpop.permute.xlu1 %373  }
  0xed   :  { %370 = vst.msk [vmem:[#allocation0] sm:$0x1] %vm369_vm13, %v368_v60  }
  0xee   :  { %376 = vst.msk [vmem:[#allocation0] sm:$0x1] %vm375_vm14, %v374_v61  }
  0xf0   :  { %v380_v62 = vpop.permute.xlu0 %379  }
  0xf1   :  { %382 = vst.msk [vmem:[#allocation0] sm:$0x1] %vm381_vm15, %v380_v62  }
  0xf8   :  { %v386_v63 = vld [vmem:[#allocation0] sm:$0x1] }
  0xf9   :  { %388 = vst [vmem:[%s784_s1] sm:$0x1] %v386_v63 }

// kernel: squeeze.9
= control target key start
LH: loop header
LB: loop body
LE: loop exit
PB: predicated region body
PF: predicated region fallthrough
CT: control target
= control target key end

     0   :  { %s34_s8 = smov 122   ;;  %vm7_vm0 = vcmask 15360   ;;  %s35_s11 = smov 124   ;;  %s61_s0 = inlined_call_operand.vmem [shape: f32[2,8], index: 0, kind: input, shape index: {}]   ;;  %s62_s1 = inlined_call_operand.vmem [shape: f32[8,2], index: 1, kind: output, shape index: {}]  }
   0x1   :  { %v4_v0 = vld [vmem:[%s61_s0] sm:$0x3]  ;;  %s33_s0 = smov 126  }
   0x2   :  { %5 = vst [vmem:[#allocation0] sm:$0x3] %v4_v0 }
   0x9   :  { %v9_v1 = vld [vmem:[#allocation0] sm:$0x3]  }
   0xa   :  { %v21_v2 = vld [vmem:[#allocation0] sm:$0x3]   ;;  %10 = vrot.lane.b32.xlu0 %v9_v1, %s33_s0 }
   0xb   :  { %22 = vrot.lane.b32.xlu1 %v21_v2, %s34_s8  ;;  %v6_v3 = vld [vmem:[#allocation0] sm:$0x3]  }
   0xc   :  { %v15_v4 = vld [vmem:[#allocation0] sm:$0x3]   ;;  %8 = vst.msk [vmem:[%s62_s1] ss:$4 sm:$0x3] %vm7_vm0, %v6_v3  }
   0xe   :  { %16 = vrot.lane.b32.xlu0 %v15_v4, %s35_s11 }
  0x7c   :  { %v11_v5 = vpop.permute.xlu0 %10  }
  0x7d   :  { %v23_v6 = vpop.permute.xlu1 %22   ;;  %27 = vst.msk [vmem:[%s62_s1 + $0x1] ss:$4 sm:$0x3] %vm7_vm0, %v11_v5  }
  0x7e   :  { %29 = vst.msk [vmem:[%s62_s1 + $0x3] ss:$4 sm:$0x3] %vm7_vm0, %v23_v6  }
  0x80   :  { %v17_v7 = vpop.permute.xlu0 %16  }
  0x81   :  { %28 = vst.msk [vmem:[%s62_s1 + $0x2] ss:$4 sm:$0x3] %vm7_vm0, %v17_v7  }

// kernel: cnn0_forward.1
= control target key start
LH: loop header
LB: loop body
LE: loop exit
PB: predicated region body
PF: predicated region fallthrough
CT: control target
= control target key end

     0   :  { %s9497_s24 = smov 0   ;;  %s14128_s0 = inlined_call_operand.vmem [shape: bf16[8,4,517], index: 0, kind: input, shape index: {}]   ;;  %s14129_s1 = inlined_call_operand.vmem [shape: bf16[8,4,3,172], index: 1, kind: input, shape index: {}]   ;;  %s14130_s2 = inlined_call_operand.vmem [shape: bf16[32,8], index: 2, kind: input, shape index: {}]   ;;  %s14131_s3 = inlined_call_operand.vmem [shape: bf16[64,49], index: 3, kind: input, shape index: {}]   ;;  %s14132_s4 = inlined_call_operand.vmem [shape: f32[4,32,512], index: 4, kind: input, shape index: {}]   ;;  %s14133_s5 = inlined_call_operand.vmem [shape: f32[2,32,169], index: 5, kind: input, shape index: {}]   ;;  %s14134_s6 = inlined_call_operand.vmem [shape: f32[8,128], index: 6, kind: input, shape index: {}]   ;;  %s14135_s7 = inlined_call_operand.vmem [shape: f32[2,8,128], index: 7, kind: output, shape index: {}]  }
   0x1   :  { %14201 = sst [smem:[#allocation26_spill]] %s14128_s0 }
   0x2   :  { %14202 = sst [smem:[#allocation27_spill]] %s14129_s1 }
   0x3   :  { %14203 = sst [smem:[#allocation28_spill]] %s14130_s2 }
   0x4   :  { %14204 = sst [smem:[#allocation29_spill]] %s14131_s3 }
   0x5   :  { %14205 = sst [smem:[#allocation30_spill]] %s14132_s4 }
   0x6 LB: > { %s9503_s25 = sadd.s32 4294967295, %s9449_s24   ;;  %p8696_p0 = scmp.ge.s32.totalorder %s9449_s24, 1  ;;  %s9449_s24 = sphi %s9497_s24, %s17_s24  }
   0x7   : > { %p251_p1 = scmp.lt.s32.totalorder %s9449_s24, 3 }
   0x9   : > { %p252_p2 = pnand %p8696_p0, %p251_p1 }
   0xb   : > { %255 = sbr.rel (%p252_p2) target bundleno = 6638 (0x19ee), region = 48 }
  0x12   : > { %s8697_s26 = sshll.u32 %s9503_s25, 2  ;;  %v14136_v0 = vlaneseq  ;;  %v9451_v1 = vmov 1983009808   ;;  %s14207_s0 = sld [smem:[#allocation26_spill]]  ;;  %v14139_v28 = vmov 0   ;;  %vm382_vm0 = vcmask 1039360  }
  0x13   : > { %p290_p3 = scmp.lt.s32.totalorder %s8697_s26, 7  ;;  %v330_v2 = vunpack.c.l.s4 %v9451_v1  ;;  %s9452_s8 = smov 127   ;;  %631 = vmatprep.mubr.bf16.mxu0 %v14139_v28  ;;  %906 = vmatprep.mubr.bf16.mxu1 %v14139_v28  ;;  %vm412_vm1 = vcmask 1040384   ;;  %vm413_vm2 = vsmask.f32 256  ;;  %vm407_vm4 = vcmask 1031168  }
  0x14   : > { %v333_v3 = vshrl.u32 %v14136_v0, 7  ;;  %s9453_s9 = smov 126   ;;  %vm9605_vm3 = vmand %vm412_vm1, %vm413_vm2  ;;  %vm559_vm5 = vcmask 1041408   ;;  %vm560_vm6 = vsmask.f32 1280  ;;  %vm567_vm8 = vcmask 1042432  }
  0x15   : > { %s14330_s26 = smov (!%p290_p3, %s8697_s26), 7  ;;  %v331_v4 = vunpack.c.0.s8 %v330_v2  ;;  %vm9641_vm7 = vmand %vm559_vm5, %vm560_vm6  ;;  %vm588_vm9 = vcmask 1043456   ;;  %vm584_vm10 = vcmask 64512   ;;  %s14212_s2 = sld [smem:[#allocation28_spill]]  ;;  %vm9456_vm11 = vmmov 0  }
  0x16   : > { %s9011_s27 = smul.u32 10, %s14330_s26  ;;  %s14215_s3 = sld [smem:[#allocation29_spill]]  ;;  %vm1204_vm12 = vcmask 400384   ;;  %vm2444_vm13 = vcmask 334848  }
  0x17   : > { %v9512_v5 = vsub.s32 %v331_v4, %v333_v3  ;;  %s14217_s4 = sld [smem:[#allocation30_spill]]  ;;  %s8914_s12 = sshll.u32 %s14330_s26, 4 }
  0x18   : > { %s9517_s30 = scalar_lea.vmem %s14207_s0, %s9011_s27  ;;  %s14220_s1 = sld [smem:[#allocation27_spill]] }
  0x19   : > { %14206 = vst [vmem:[#allocation2_spill] sm:$0xff] %v9512_v5  ;;  %v324_v6 = vld [vmem:[%s9517_s30] sm:$0xff]  ;;  %v9566_v27 = vld.sshfl [vmem:[%s9517_s30 + $0x8] sm:$0x3 pattern:$0x76325410] }
  0x1a   : > { %v9521_v7 = vrot.slane %v324_v6, %v9512_v5  ;;  %v328_v8 = vcombine.high %v324_v6, %v324_v6  ;;  %v9576_v30 = vshrl.u32 %v9566_v27, 16  ;;  %v370_v32 = vshll.u32 %v9566_v27, 16  ;;  %p303_p4 = scmp.lt.s32.totalorder %s9503_s25, 1 }
  0x1b   : > { %v396_v39 = vrot.slane %v9566_v27, 7 }
  0x1c   : > { %456 = vrot.lane.b32.xlu0 %v9521_v7, %s9452_s8  ;;  %v9526_v9 = vrot.slane %v328_v8, %v9512_v5  ;;  %v9530_v10 = vcombine.high %v9521_v7, %v9521_v7  ;;  %v9533_v11 = vshrl.u32 %v9521_v7, 16  ;;  %v392_v13 = vrot.slane %v9521_v7, 7  ;;  %s14332_s25 = smov (!%p303_p4, %s9503_s25), 1 }
  0x1d   : > { %v358_v14 = vshll.u32 %v9521_v7, 16  ;;  %v479_v34 = vrot.slane %v9576_v30, 7  ;;  %v750_v42 = vrot.slane %v370_v32, 1 }
  0x1e   : > { %460 = vrot.lane.b32.xlu1 %v9526_v9, %s9452_s8  ;;  %v475_v12 = vrot.slane %v9533_v11, 7  ;;  %v361_v15 = vshll.u32 %v9530_v10, 16  ;;  %v393_v16 = vrot.slane %v9530_v10, 7  ;;  %v9546_v17 = vshrl.u32 %v9526_v9, 16  ;;  %s10342_s15 = scalar_lea.vmem %s14220_s1, %s8914_s12 }
  0x1f   : > { %v9550_v18 = vcombine.high %v9526_v9, %v9526_v9  ;;  %v9554_v20 = vshrl.u32 %v9530_v10, 16  ;;  %v364_v22 = vshll.u32 %v9526_v9, 16  ;;  %v394_v26 = vrot.slane %v9526_v9, 7 }
  0x20   : > { %458 = vrot.lane.b32.xlu0 %v9530_v10, %s9452_s8  ;;  %v9074_v19 = vpack.i.bf16 %v361_v15, %v358_v14  ;;  %v477_v21 = vrot.slane %v9546_v17, 7  ;;  %v746_v33 = vrot.slane %v358_v14, 1  ;;  %v747_v37 = vrot.slane %v361_v15, 1 }
  0x21   : > { %v367_v23 = vshll.u32 %v9550_v18, 16  ;;  %v476_v24 = vrot.slane %v9554_v20, 7  ;;  %v9572_v29 = vshrl.u32 %v9550_v18, 16  ;;  %v395_v36 = vrot.slane %v9550_v18, 7 }
  0x22   : > { %480 = vrot.lane.b32.xlu1 %v475_v12, %s9453_s9  ;;  %v9084_v35 = vpack.i.bf16 %v746_v33, %v370_v32  ;;  %v748_v38 = vrot.slane %v364_v22, 1 }
  0x23   : > { %v9079_v25 = vpack.i.bf16 %v367_v23, %v364_v22  ;;  %v478_v31 = vrot.slane %v9572_v29, 7  ;;  %v749_v41 = vrot.slane %v367_v23, 1 }
  0x24   : > { %397 = vrot.lane.b32.xlu0 %v392_v13, %s9453_s9  ;;  %v9089_v40 = vpack.i.bf16 %v748_v38, %v747_v37 }
  0x25   : > { %v9094_v43 = vpack.i.bf16 %v750_v42, %v749_v41 }
  0x26   : > { %399 = vrot.lane.b32.xlu1 %v393_v16, %s9453_s9 }
  0x28   : > { %9075 = vrot.lane.b32.xlu0 %v9074_v19, %s9452_s8 }
  0x2a   : > { %484 = vrot.lane.b32.xlu1 %v477_v21, %s9453_s9 }
  0x2c   : > { %482 = vrot.lane.b32.xlu0 %v476_v24, %s9453_s9 }
  0x2e   : > { %9080 = vrot.lane.b32.xlu1 %v9079_v25, %s9452_s8 }
  0x30   : > { %401 = vrot.lane.b32.xlu0 %v394_v26, %s9453_s9 }
  0x32   : > { %462 = vrot.lane.b32.xlu1 %v9550_v18, %s9452_s8 }
  0x34   : > { %464 = vrot.lane.b32.xlu0 %v9566_v27, %s9452_s8 }
  0x36   : > { %486 = vrot.lane.b32.xlu1 %v478_v31, %s9453_s9 }
  0x38   : > { %488 = vrot.lane.b32.xlu0 %v479_v34, %s9453_s9 }
  0x3a   : > { %9085 = vrot.lane.b32.xlu1 %v9084_v35, %s9452_s8 }
  0x3c   : > { %403 = vrot.lane.b32.xlu0 %v395_v36, %s9453_s9 }
  0x3e   : > { %405 = vrot.lane.b32.xlu1 %v396_v39, %s9453_s9 }
  0x40   : > { %9090 = vrot.lane.b32.xlu0 %v9089_v40, %s9452_s8 }
  0x42   : > { %770 = vrot.lane.b32.xlu1 %v9521_v7, %s9453_s9 }
  0x44   : > { %772 = vrot.lane.b32.xlu0 %v9530_v10, %s9453_s9 }
  0x46   : > { %774 = vrot.lane.b32.xlu1 %v9526_v9, %s9453_s9 }
  0x48   : > { %9095 = vrot.lane.b32.xlu0 %v9094_v43, %s9452_s8 }
  0x4a   : > { %776 = vrot.lane.b32.xlu1 %v9550_v18, %s9453_s9 }
  0x4c   : > { %778 = vrot.lane.b32.xlu0 %v9566_v27, %s9453_s9 }
  0x8e   : > { %v457_v44 = vpop.permute.xlu0 %456 }
  0x90   : > { %v461_v45 = vpop.permute.xlu1 %460 }
  0x92   : > { %v459_v46 = vpop.permute.xlu0 %458 }
  0x93   : > { %v466_v52 = vsel %vm382_vm0, %v457_v44, %v459_v46  ;;  %v467_v55 = vsel %vm382_vm0, %v459_v46, %v461_v45 }
  0x94   : > { %v481_v47 = vpop.permute.xlu1 %480  ;;  %v494_v57 = vsel %vm9605_vm3, %v9533_v11, %v466_v52  ;;  %v495_v59 = vsel %vm9605_vm3, %v9554_v20, %v467_v55  ;;  %v736_v55 = vrot.slane %v9521_v7, 1 }
  0x96   : > { %v398_v48 = vpop.permute.xlu0 %397 }
  0x98   : > { %v400_v49 = vpop.permute.xlu1 %399 }
  0x99   : > { %v408_v22 = vsel %vm407_vm4, %v398_v48, %v400_v49 }
  0x9a   : > { %v9076_v50 = vpop.permute.xlu0 %9075 }
  0x9b   : > { %v9078_v53 = vunpack.i.h.bf16 %v9076_v50  ;;  %v9077_v54 = vunpack.i.l.bf16 %v9076_v50 }
  0x9c   : > { %v485_v56 = vpop.permute.xlu1 %484 }
  0x9d   : > { %v383_v60 = vsel %vm382_vm0, %v9077_v54, %v9078_v53  ;;  %v9678_v54 = vld [vmem:[%s14212_s2] sm:$0xff]  }
  0x9e   : > { %v483_v58 = vpop.permute.xlu0 %482  ;;  %v415_v14 = vsel %vm9605_vm3, %v9521_v7, %v383_v60 }
  0x9f   : > { %v490_v61 = vsel %vm407_vm4, %v481_v47, %v483_v58  ;;  %v491_v62 = vsel %vm407_vm4, %v483_v58, %v485_v56  ;;  %v423_v32 = vsel %vm412_vm1, %v415_v14, %v408_v22 }
  0xa0   : > { %v9621_v63 = vsel %vm412_vm1, %v494_v57, %v490_v61  ;;  %v9624_v1 = vsel %vm412_vm1, %v495_v59, %v491_v62  ;;  %v9626_v2 = vpop.permute.xlu1 %9080 }
  0xa1   : > { %v519_v3 = vshrl.u32 %v9621_v63, 16  ;;  %v522_v4 = vshll.u32 %v9621_v63, 16  ;;  %v526_v6 = vshrl.u32 %v9624_v1, 16  ;;  %v529_v8 = vshll.u32 %v9624_v1, 16 }
  0xa2   : > { %v9082_v12 = vunpack.i.l.bf16 %v9626_v2  ;;  %v402_v13 = vpop.permute.xlu0 %401  ;;  %v9083_v34 = vunpack.i.h.bf16 %v9626_v2 }
  0xa3   : > { %v521_v15 = vrot.slane %v519_v3, 6  ;;  %v524_v16 = vrot.slane %v522_v4, 7  ;;  %v409_v19 = vsel %vm407_vm4, %v400_v49, %v402_v13  ;;  %v528_v21 = vrot.slane %v526_v6, 6 }
  0xa4   : > { %v384_v23 = vsel %vm382_vm0, %v9078_v53, %v9082_v12  ;;  %v463_v24 = vpop.permute.xlu1 %462  ;;  %v531_v25 = vrot.slane %v529_v8, 7  ;;  %v385_v49 = vsel %vm382_vm0, %v9082_v12, %v9083_v34  ;;  %v737_v3 = vrot.slane %v9530_v10, 1 }
  0xa5   : > { %v416_v31 = vsel %vm9605_vm3, %v9530_v10, %v384_v23  ;;  %v525_v33 = vor.u32 %v524_v16, %v521_v15  ;;  %v468_v35 = vsel %vm382_vm0, %v461_v45, %v463_v24 }
  0xa6   : > { %v465_v36 = vpop.permute.xlu0 %464  ;;  %v427_v37 = vsel %vm412_vm1, %v416_v31, %v409_v19  ;;  %v532_v38 = vor.u32 %v531_v25, %v528_v21  ;;  %v496_v45 = vsel %vm9605_vm3, %v9546_v17, %v468_v35  ;;  %v417_v21 = vsel %vm9605_vm3, %v9526_v9, %v385_v49 }
  0xa7   : > { %v469_v39 = vsel %vm382_vm0, %v463_v24, %v465_v36  ;;  %v562_v40 = vsel %vm9641_vm7, %v423_v32, %v525_v33  ;;  %v498_v41 = vsel %vm9605_vm3, %v9576_v30, %v465_v36 }
  0xa8   : > { %v487_v42 = vpop.permute.xlu1 %486  ;;  %v563_v43 = vsel %vm9641_vm7, %v427_v37, %v532_v38  ;;  %v570_v44 = vsel %vm567_vm8, %v562_v40, 1065369472  ;;  %v497_v50 = vsel %vm9605_vm3, %v9572_v29, %v469_v39 }
  0xa9   : > { %v492_v46 = vsel %vm407_vm4, %v485_v56, %v487_v42  ;;  %v572_v47 = vsel %vm567_vm8, %v563_v43, 1065369472  ;;  %v589_v48 = vsel %vm588_vm9, %v570_v44, 0 }
  0xaa   : > { %v9672_v52 = vsel %vm412_vm1, %v496_v45, %v492_v46  ;;  %8705 = vmatprep.subr.msk.bf16.mxu0 %vm588_vm9, %v572_v47  ;;  %v489_v53 = vpop.permute.xlu0 %488 }
  0xab   : > { %v533_v56 = vshrl.u32 %v9672_v52, 16  ;;  %v536_v57 = vshll.u32 %v9672_v52, 16  ;;  %v493_v58 = vsel %vm407_vm4, %v487_v42, %v489_v53  ;;  %v9685_v59 = vsel %vm412_vm1, %v498_v41, %v489_v53  ;;  %600 = vmatpush1.bf16.msra.mxu0 %v589_v48 }
  0xac   : > { %v9688_v60 = vsel %vm412_vm1, %v497_v50, %v493_v58  ;;  %v547_v61 = vshrl.u32 %v9685_v59, 16  ;;  %v550_v62 = vshll.u32 %v9685_v59, 16  ;;  %v9086_v2 = vpop.permute.xlu1 %9085 }
  0xad   : > { %v535_v4 = vrot.slane %v533_v56, 6  ;;  %v538_v6 = vrot.slane %v536_v57, 7  ;;  %v540_v8 = vshrl.u32 %v9688_v60, 16  ;;  %v543_v12 = vshll.u32 %v9688_v60, 16 }
  0xae   : > { %v549_v14 = vrot.slane %v547_v61, 6  ;;  %v552_v15 = vrot.slane %v550_v62, 7  ;;  %v9087_v16 = vunpack.i.l.bf16 %v9086_v2  ;;  %8706 = vmatmul.mubr.msk.bf16.vlgmr.msra.gmra.mrb[0].mxu0 %vm584_vm10, %v9678_v54  ;;  %v404_v19 = vpop.permute.xlu0 %403  ;;  %v9088_v40 = vunpack.i.h.bf16 %v9086_v2 }
  0xaf   : > { %v542_v22 = vrot.slane %v540_v8, 6  ;;  %v545_v23 = vrot.slane %v543_v12, 7  ;;  %v410_v24 = vsel %vm407_vm4, %v402_v13, %v404_v19  ;;  %v539_v25 = vor.u32 %v538_v6, %v535_v4  ;;  %674 = vmatprep.mubr.bf16.mxu0 %v14139_v28 }
  0xb0   : > { %v553_v31 = vor.u32 %v552_v15, %v549_v14  ;;  %v386_v32 = vsel %vm382_vm0, %v9083_v34, %v9087_v16  ;;  %v431_v33 = vsel %vm412_vm1, %v417_v21, %v410_v24  ;;  %v406_v35 = vpop.permute.xlu1 %405  ;;  %v419_v36 = vsel %vm9605_vm3, %v9566_v27, %v9087_v16 }
  0xb1   : > { %v411_v37 = vsel %vm407_vm4, %v404_v19, %v406_v35  ;;  %v418_v38 = vsel %vm9605_vm3, %v9550_v18, %v386_v32  ;;  %v439_v13 = vsel %vm412_vm1, %v419_v36, %v406_v35  ;;  %v546_v39 = vor.u32 %v545_v23, %v542_v22 }
  0xb2   : > { %v435_v41 = vsel %vm412_vm1, %v418_v38, %v411_v37  ;;  %v9091_v34 = vpop.permute.xlu0 %9090  ;;  %v564_v42 = vsel %vm9641_vm7, %v431_v33, %v539_v25  ;;  %v566_v43 = vsel %vm9641_vm7, %v439_v13, %v553_v31  ;;  %v14137_v4 = vmov 0.0  }
  0xb3   : > { %v9093_v44 = vunpack.i.h.bf16 %v9091_v34  ;;  %v9092_v45 = vunpack.i.l.bf16 %v9091_v34  ;;  %v565_v46 = vsel %vm9641_vm7, %v435_v41, %v546_v39  ;;  %v574_v47 = vsel %vm567_vm8, %v564_v42, 1065369472 }
  0xb4   : > { %v771_v48 = vpop.permute.xlu1 %770  ;;  %v576_v49 = vsel %vm567_vm8, %v565_v46, 1065369472  ;;  %v593_v56 = vsel %vm588_vm9, %v574_v47, 0  ;;  %v578_v61 = vsel %vm567_vm8, %v566_v43, 1065369472  ;;  %v738_v22 = vrot.slane %v9526_v9, 1 }
  0xb5   : > { %v761_v50 = vsel %vm382_vm0, %v9088_v40, %v9092_v45  ;;  %v762_v53 = vsel %vm382_vm0, %v9092_v45, %v9093_v44  ;;  %8707 = vmatprep.subr.msk.bf16.mxu0 %vm588_vm9, %v576_v49  ;;  %v597_v16 = vsel %vm588_vm9, %v578_v61, 0  ;;  %v739_v23 = vrot.slane %v9550_v18, 1 }
  0xb6   : > { %v773_v57 = vpop.permute.xlu0 %772  ;;  %v784_v58 = vsel %vm9605_vm3, %v736_v55, %v761_v50  ;;  %643 = vmatpush1.bf16.msra.mxu0 %v593_v56  ;;  %v785_v2 = vsel %vm9605_vm3, %v737_v3, %v762_v53  ;;  %v14141_v24 = vrot.slane %v9566_v27, 1 }
  0xb7   : > { %v780_v62 = vsel %vm407_vm4, %v771_v48, %v773_v57  ;;  %8939 = vmatprep.subr.bf16.mxu0 %v14137_v4 }
  0xb8   : > { %v9737_v6 = vsel %vm412_vm1, %v784_v58, %v780_v62  ;;  %v775_v8 = vpop.permute.xlu1 %774 }
  0xb9   : > { %v809_v12 = vshrl.u32 %v9737_v6, 16  ;;  %v812_v14 = vshll.u32 %v9737_v6, 16  ;;  %v781_v15 = vsel %vm407_vm4, %v773_v57, %v775_v8  ;;  %8708 = vmatmul.mubr.msk.bf16.vlgmr.msra.gmra.mrb[4].mxu0 %vm584_vm10, %v9678_v54 }
  0xba   : > { %v9746_v19 = vsel %vm412_vm1, %v785_v2, %v781_v15  ;;  %8940 = vmatpush3.bf16.msra.mxu0 %v597_v16  ;;  %v9096_v21 = vpop.permute.xlu0 %9095  ;;  %8941 = vmatprep.mubr.msk.bf16.mxu0 %vm9456_vm11, %v14137_v4 }
  0xbb   : > { %v811_v25 = vrot.slane %v809_v12, 6  ;;  %v814_v31 = vrot.slane %v812_v14, 7  ;;  %v816_v32 = vshrl.u32 %v9746_v19, 16  ;;  %v819_v33 = vshll.u32 %v9746_v19, 16 }
  0xbc   : > { %v9098_v35 = vunpack.i.h.bf16 %v9096_v21  ;;  %v9097_v36 = vunpack.i.l.bf16 %v9096_v21  ;;  %v777_v37 = vpop.permute.xlu1 %776 }
  0xbd   : > { %v782_v38 = vsel %vm407_vm4, %v775_v8, %v777_v37  ;;  %v818_v13 = vrot.slane %v816_v32, 6  ;;  %v821_v39 = vrot.slane %v819_v33, 7  ;;  %v815_v43 = vor.u32 %v814_v31, %v811_v25 }
  0xbe   : > { %v763_v40 = vsel %vm382_vm0, %v9093_v44, %v9097_v36  ;;  %v764_v41 = vsel %vm382_vm0, %v9097_v36, %v9098_v35  ;;  %v779_v34 = vpop.permute.xlu0 %778  ;;  %v788_v42 = vsel %vm9605_vm3, %v14141_v24, %v9098_v35 }
  0xbf   : > { %v786_v45 = vsel %vm9605_vm3, %v738_v22, %v763_v40  ;;  %v783_v46 = vsel %vm407_vm4, %v777_v37, %v779_v34  ;;  %v787_v44 = vsel %vm9605_vm3, %v739_v23, %v764_v41  ;;  %v9772_v47 = vsel %vm412_vm1, %v788_v42, %v779_v34 }
  0xc0   : > { %v9775_v48 = vsel %vm412_vm1, %v786_v45, %v782_v38  ;;  %v9778_v49 = vsel %vm412_vm1, %v787_v44, %v783_v46  ;;  %v837_v50 = vshrl.u32 %v9772_v47, 16  ;;  %v840_v53 = vshll.u32 %v9772_v47, 16 }
  0xc1   : > { %v823_v56 = vshrl.u32 %v9775_v48, 16  ;;  %v826_v57 = vshll.u32 %v9775_v48, 16  ;;  %v830_v58 = vshrl.u32 %v9778_v49, 16  ;;  %v833_v61 = vshll.u32 %v9778_v49, 16  ;;  %8942 = vmatmul.mubr.msk.bf16.vlgmr.msra.gmra.mrb[8].mxu0 %vm584_vm10, %v9678_v54 }
  0xc2   : > { %v839_v62 = vrot.slane %v837_v50, 6  ;;  %v842_v2 = vrot.slane %v840_v53, 7  ;;  %v822_v8 = vor.u32 %v821_v39, %v818_v13  ;;  %v849_v12 = vsel %vm9641_vm7, %v9621_v63, %v815_v43  ;;  %949 = vmatprep.mubr.bf16.mxu0 %v14139_v28 }
  0xc3   : > { %v825_v14 = vrot.slane %v823_v56, 6  ;;  %v828_v15 = vrot.slane %v826_v57, 7  ;;  %v832_v16 = vrot.slane %v830_v58, 6  ;;  %v835_v21 = vrot.slane %v833_v61, 7 }
  0xc4   : > { %v843_v25 = vor.u32 %v842_v2, %v839_v62  ;;  %v850_v31 = vsel %vm9641_vm7, %v9624_v1, %v822_v8  ;;  %v855_v32 = vsel %vm567_vm8, %v849_v12, 1065369472 }
  0xc5   : > { %v857_v33 = vsel %vm567_vm8, %v850_v31, 1065369472  ;;  %v836_v35 = vor.u32 %v835_v21, %v832_v16  ;;  %v829_v36 = vor.u32 %v828_v15, %v825_v14  ;;  %v864_v63 = vsel %vm588_vm9, %v855_v32, 0 }
  0xc6   : > { %8710 = vmatprep.subr.msk.bf16.mxu1 %vm588_vm9, %v857_v33  ;;  %v853_v37 = vsel %vm9641_vm7, %v9685_v59, %v843_v25 }
  0xc7   : > { %875 = vmatpush1.bf16.msra.mxu1 %v864_v63  ;;  %v852_v38 = vsel %vm9641_vm7, %v9688_v60, %v836_v35  ;;  %v863_v1 = vsel %vm567_vm8, %v853_v37, 1065369472  ;;  %v851_v13 = vsel %vm9641_vm7, %v9672_v52, %v829_v36 }
  0xc8   : > { %8945 = vmatprep.subr.bf16.mxu1 %v14137_v4  ;;  %v861_v39 = vsel %vm567_vm8, %v852_v38, 1065369472  ;;  %v872_v40 = vsel %vm588_vm9, %v863_v1, 0  ;;  %v859_v41 = vsel %vm567_vm8, %v851_v13, 1065369472 }
  0xc9   : > { %8712 = vmatprep.subr.msk.bf16.mxu0 %vm588_vm9, %v861_v39  ;;  %v868_v59 = vsel %vm588_vm9, %v859_v41, 0 }
  0xca   : > { %8711 = vmatmul.mubr.msk.bf16.vlgmr.msra.gmra.mrb[0].mxu1 %vm584_vm10, %v9678_v54  ;;  %918 = vmatpush1.bf16.msra.mxu0 %v868_v59 }
  0xcb   : > { %8946 = vmatpush3.bf16.msra.mxu1 %v872_v40  ;;  %8947 = vmatprep.mubr.msk.bf16.mxu1 %vm9456_vm11, %v14137_v4 }
  0xcd   : > { %8713 = vmatmul.mubr.msk.bf16.vlgmr.msra.gmra.mrb[12].mxu0 %vm584_vm10, %v9678_v54 }
  0xce   : > { %1247 = vmatprep.mubr.bf16.mxu0 %v14139_v28 }
  0xd2   : > { %8948 = vmatmul.mubr.msk.bf16.vlgmr.msra.gmra.mrb[4].mxu1 %vm584_vm10, %v9678_v54 }
  0xd3   : > { %1300 = vmatprep.mubr.bf16.mxu1 %v14139_v28 }
 0x181   : > { %v9825_v52 = vpop.f32.mrb[0].mxu0 }
 0x182   : > { %v726_v60 = vmax.f32 %v9825_v52, 0.0  ;;  %v9828_v34 = vpop.f32.mrb[1].mxu0 }
 0x183   : > { %v9830_v42 = vpop.f32.mrb[2].mxu0  ;;  %v727_v43 = vmax.f32 %v9828_v34, 0.0 }
 0x184   : > { %v731_v45 = vmax.f32 %v9830_v42, 0.0  ;;  %1021 = vrot.lane.b32.xlu1 %v726_v60, %s9452_s8  ;;  %v9837_v46 = vpop.f32.mrb[3].mxu0 }
 0x185   : > { %v732_v44 = vmax.f32 %v9837_v46, 0.0 }
 0x186   : > { %1031 = vrot.lane.b32.xlu0 %v731_v45, %s9452_s8 }
 0x188   : > { %1023 = vrot.lane.b32.xlu1 %v727_v43, %s9452_s8 }
 0x18a   : > { %1033 = vrot.lane.b32.xlu0 %v732_v44, %s9452_s8 }
 0x18c   : > { %v9849_v50 = vpop.f32.mrb[4].mxu0 }
 0x18d   : > { %v9851_v53 = vpop.f32.mrb[5].mxu0  ;;  %v728_v13 = vmax.f32 %v9849_v50, 0.0 }
 0x18e   : > { %v9853_v56 = vpop.f32.mrb[6].mxu0  ;;  %v729_v37 = vmax.f32 %v9851_v53, 0.0 }
 0x18f   : > { %v9855_v57 = vpop.f32.mrb[7].mxu0  ;;  %v733_v40 = vmax.f32 %v9853_v56, 0.0 }
 0x190   : > { %v734_v41 = vmax.f32 %v9855_v57, 0.0 }
 0x194   : > { %v9857_v58 = vpop.f32.mrb[8].mxu0 }
 0x195   : > { %v8943_v61 = vpop.f32.mrb[9].mxu0  ;;  %v730_v59 = vmax.f32 %v9857_v58, 0.0 }
 0x196   : > { %v9859_v62 = vpop.f32.mrb[10].mxu0 }
 0x197   : > { %v8944_v2 = vpop.f32.mrb[11].mxu0  ;;  %v735_v61 = vmax.f32 %v9859_v62, 0.0 }
 0x19d   : > { %v908_v8 = vpop.f32.mrb[0].mxu1 }
 0x19e   : > { %v9861_v12 = vmax.f32 %v908_v8, 0.0  ;;  %v910_v14 = vpop.f32.mrb[1].mxu1 }
 0x19f   : > { %v912_v15 = vpop.f32.mrb[2].mxu1  ;;  %v9867_v32 = vmax.f32 %v910_v14, 0.0 }
 0x1a0   : > { %v9863_v16 = vmax.f32 %v912_v15, 0.0  ;;  %v914_v21 = vpop.f32.mrb[3].mxu1  ;;  %1090 = vrot.lane.b32.xlu1 %v9861_v12, %s9452_s8  ;;  %v951_v25 = vpop.f32.mrb[12].mxu0 }
 0x1a1   : > { %v953_v31 = vpop.f32.mrb[13].mxu0  ;;  %v9871_v36 = vmax.f32 %v914_v21, 0.0  ;;  %v9898_v8 = vmax.f32 %v951_v25, 0.0 }
 0x1a2   : > { %1100 = vrot.lane.b32.xlu0 %v9863_v16, %s9452_s8  ;;  %v955_v33 = vpop.f32.mrb[14].mxu0  ;;  %v9896_v2 = vmax.f32 %v953_v31, 0.0 }
 0x1a3   : > { %v957_v35 = vpop.f32.mrb[15].mxu0  ;;  %v9905_v58 = vmax.f32 %v955_v33, 0.0 }
 0x1a4   : > { %1092 = vrot.lane.b32.xlu1 %v9867_v32, %s9452_s8  ;;  %v9909_v14 = vmax.f32 %v957_v35, 0.0 }
 0x1a5   : > { %v994_v63 = vpop.f32.mrb[4].mxu1 }
 0x1a6   : > { %1102 = vrot.lane.b32.xlu0 %v9871_v36, %s9452_s8  ;;  %v8949_v38 = vpop.f32.mrb[5].mxu1  ;;  %v9911_v15 = vmax.f32 %v994_v63, 0.0 }
 0x1a7   : > { %v997_v1 = vpop.f32.mrb[6].mxu1 }
 0x1a8   : > { %1027 = vrot.lane.b32.xlu1 %v729_v37, %s9452_s8  ;;  %v8950_v39 = vpop.f32.mrb[7].mxu1  ;;  %v9917_v21 = vmax.f32 %v997_v1, 0.0 }
 0x1aa   : > { %1025 = vrot.lane.b32.xlu0 %v728_v13, %s9452_s8 }
 0x1ac   : > { %1035 = vrot.lane.b32.xlu1 %v733_v40, %s9452_s8 }
 0x1ae   : > { %1037 = vrot.lane.b32.xlu0 %v734_v41, %s9452_s8 }
 0x1b0   : > { %1029 = vrot.lane.b32.xlu1 %v730_v59, %s9452_s8 }
 0x1b2   : > { %1039 = vrot.lane.b32.xlu0 %v735_v61, %s9452_s8 }
 0x1b4   : > { %1096 = vrot.lane.b32.xlu1 %v9896_v2, %s9452_s8 }
 0x1b6   : > { %1094 = vrot.lane.b32.xlu0 %v9898_v8, %s9452_s8 }
 0x1b8   : > { %1104 = vrot.lane.b32.xlu1 %v9905_v58, %s9452_s8 }
 0x1ba   : > { %1106 = vrot.lane.b32.xlu0 %v9909_v14, %s9452_s8 }
 0x1bc   : > { %1098 = vrot.lane.b32.xlu1 %v9911_v15, %s9452_s8 }
 0x1be   : > { %1108 = vrot.lane.b32.xlu0 %v9917_v21, %s9452_s8 }
 0x1c0   : > { %1462 = vrot.lane.b32.xlu1 %v736_v55, %s9452_s8 }
 0x1c2   : > { %1464 = vrot.lane.b32.xlu0 %v737_v3, %s9452_s8 }
 0x1c4   : > { %1466 = vrot.lane.b32.xlu1 %v738_v22, %s9452_s8 }
 0x1f6   : > { %v1022_v25 = vpop.permute.xlu1 %1021 }
 0x1f8   : > { %v1032_v31 = vpop.permute.xlu0 %1031 }
 0x1fa   : > { %v1024_v33 = vpop.permute.xlu1 %1023 }
 0x1fb   : > { %v1042_v63 = vsel %vm382_vm0, %v1022_v25, %v1024_v33 }
 0x1fc   : > { %v1034_v35 = vpop.permute.xlu0 %1033  ;;  %v1060_v7 = vadd.f32 %v1042_v63, %v726_v60 }
 0x1fd   : > { %v1046_v38 = vsel %vm382_vm0, %v1032_v31, %v1034_v35 }
 0x1fe   : > { %v1065_v10 = vadd.f32 %v1046_v38, %v731_v45  ;;  %v1070_v1 = vadd.f32 %v1060_v7, %v9861_v12 }
 0x200   : > { %v1075_v25 = vadd.f32 %v1065_v10, %v9863_v16 }
 0x212   : > { %v1091_v55 = vpop.permute.xlu1 %1090 }
 0x214   : > { %v1101_v3 = vpop.permute.xlu0 %1100 }
 0x216   : > { %v1093_v9 = vpop.permute.xlu1 %1092 }
 0x217   : > { %v9940_v22 = vsel %vm382_vm0, %v1091_v55, %v1093_v9 }
 0x218   : > { %v1128_v39 = vadd.f32 %v9940_v22, %v1070_v1  ;;  %v1103_v0 = vpop.permute.xlu0 %1102 }
 0x219   : > { %v9945_v31 = vsel %vm382_vm0, %v1101_v3, %v1103_v0 }
 0x21a   : > { %v1133_v52 = vadd.f32 %v9945_v31, %v1075_v25  ;;  %v1028_v60 = vpop.permute.xlu1 %1027  ;;  %v1138_v42 = vmul.f32 0.25, %v1128_v39 }
 0x21c   : > { %v1143_v45 = vmul.f32 0.25, %v1133_v52  ;;  %v1026_v63 = vpop.permute.xlu0 %1025 }
 0x21d   : > { %v1043_v55 = vsel %vm382_vm0, %v1024_v33, %v1026_v63  ;;  %v1044_v39 = vsel %vm382_vm0, %v1026_v63, %v1028_v60 }
 0x21e   : > { %v1036_v38 = vpop.permute.xlu1 %1035  ;;  %v1148_v7 = vpack.c.bf16 %v1143_v45, %v1138_v42  ;;  %v1061_v3 = vadd.f32 %v1043_v55, %v727_v43  ;;  %v1062_v33 = vadd.f32 %v1044_v39, %v728_v13 }
 0x21f   : > { %v1047_v1 = vsel %vm382_vm0, %v1034_v35, %v1036_v38 }
 0x220   : > { %v1038_v4 = vpop.permute.xlu0 %1037  ;;  %1158 = vrot.lane.b32.xlu1 %v1148_v7, %s9452_s8  ;;  %1176 = vrot.lane.b32.xlu0 %v1148_v7, %s9453_s9  ;;  %v1066_v52 = vadd.f32 %v1047_v1, %v732_v44  ;;  %v1071_v24 = vadd.f32 %v1061_v3, %v9867_v32 }
 0x221   : > { %v1048_v42 = vsel %vm382_vm0, %v1036_v38, %v1038_v4 }
 0x222   : > { %v1030_v10 = vpop.permute.xlu1 %1029  ;;  %v1067_v34 = vadd.f32 %v1048_v42, %v733_v40  ;;  %v1076_v50 = vadd.f32 %v1066_v52, %v9871_v36 }
 0x223   : > { %v1045_v28 = vsel %vm382_vm0, %v1028_v60, %v1030_v10  ;;  %v1064_v43 = vadd.f32 %v1030_v10, %v730_v59 }
 0x224   : > { %v1040_v25 = vpop.permute.xlu0 %1039  ;;  %v1063_v44 = vadd.f32 %v1045_v28, %v729_v37  ;;  %v1072_v28 = vadd.f32 %v1062_v33, %v9898_v8 }
 0x225   : > { %v1049_v63 = vsel %vm382_vm0, %v1038_v4, %v1040_v25  ;;  %v1069_v38 = vadd.f32 %v1040_v25, %v735_v61  ;;  %v1074_v53 = vadd.f32 %v1064_v43, %v9911_v15 }
 0x226   : > { %v1097_v45 = vpop.permute.xlu1 %1096  ;;  %v1068_v4 = vadd.f32 %v1049_v63, %v734_v41  ;;  %v1073_v62 = vadd.f32 %v1063_v44, %v9896_v2 }
 0x228   : > { %v1095_v35 = vpop.permute.xlu0 %1094  ;;  %v1078_v3 = vadd.f32 %v1068_v4, %v9909_v14 }
 0x229   : > { %v9966_v46 = vsel %vm382_vm0, %v1093_v9, %v1095_v35  ;;  %v1079_v9 = vadd.f32 %v1069_v38, %v9917_v21 }
 0x22a   : > { %v1129_v60 = vadd.f32 %v9966_v46, %v1071_v24  ;;  %v1105_v13 = vpop.permute.xlu1 %1104  ;;  %v1077_v24 = vadd.f32 %v1067_v34, %v9905_v58 }
 0x22b   : > { %v9975_v56 = vsel %vm382_vm0, %v1103_v0, %v1105_v13  ;;  %v9988_v0 = vsel %vm382_vm0, %v1095_v35, %v1097_v45 }
 0x22c   : > { %v1134_v40 = vadd.f32 %v9975_v56, %v1076_v50  ;;  %v1107_v59 = vpop.permute.xlu0 %1106  ;;  %v1139_v61 = vmul.f32 0.25, %v1129_v60  ;;  %v1130_v42 = vadd.f32 %v9988_v0, %v1072_v28 }
 0x22d   : > { %v9984_v37 = vsel %vm382_vm0, %v1105_v13, %v1107_v59 }
 0x22e   : > { %v1144_v57 = vmul.f32 0.25, %v1134_v40  ;;  %v9990_v41 = vpop.permute.xlu1 %1098  ;;  %v1135_v55 = vadd.f32 %v9984_v37, %v1077_v24  ;;  %v1140_v50 = vmul.f32 0.25, %v1130_v42 }
 0x22f   : > { %v9996_v10 = vsel %vm382_vm0, %v1097_v45, %v9990_v41  ;;  %v1132_v1 = vadd.f32 %v9990_v41, %v1074_v53 }
 0x230   : > { %v10000_v25 = vpop.permute.xlu0 %1108  ;;  %v1149_v39 = vpack.c.bf16 %v1144_v57, %v1139_v61  ;;  %v1131_v52 = vadd.f32 %v9996_v10, %v1073_v62  ;;  %v1145_v34 = vmul.f32 0.25, %v1135_v55 }
 0x231   : > { %v10006_v33 = vsel %vm382_vm0, %v1107_v59, %v10000_v25  ;;  %v1137_v35 = vadd.f32 %v10000_v25, %v1079_v9  ;;  %v1142_v43 = vmul.f32 0.25, %v1132_v1  ;;  %v14214_v1 = vmov 0  }
 0x232   : > { %1215 = vmatprep.subr.bf16.mxu0 %v1149_v39  ;;  %v1136_v45 = vadd.f32 %v10006_v33, %v1078_v3  ;;  %v1141_v44 = vmul.f32 0.25, %v1131_v52  ;;  %v1150_v4 = vpack.c.bf16 %v1145_v34, %v1140_v50  ;;  %v1463_v40 = vpop.permute.xlu1 %1462  ;;  %v1453_v50 = vrot.slane %v9554_v20, 1 }
 0x233   : > { %1216 = vmatpush1.bf16.msra.mxu0 %v1148_v7  ;;  %v1147_v63 = vmul.f32 0.25, %v1137_v35  ;;  %v14213_v7 = vrot.slane %v9566_v27, 1  ;;  %v1212_v27 = vsel %vm412_vm1, 65535, %v14214_v1 }
 0x234   : > { %v1146_v60 = vmul.f32 0.25, %v1136_v45  ;;  %v1465_v53 = vpop.permute.xlu0 %1464  ;;  %v10039_v35 = vand.u32 1065369472, %v1212_v27  ;;  %v1452_v45 = vrot.slane %v9533_v11, 1 }
 0x235   : > { %v1152_v13 = vpack.c.bf16 %v1147_v63, %v1142_v43  ;;  %v1472_v63 = vsel %vm382_vm0, %v1463_v40, %v1465_v53 }
 0x236   : > { %v1151_v38 = vpack.c.bf16 %v1146_v60, %v1141_v44  ;;  %v1467_v59 = vpop.permute.xlu1 %1466 }
 0x237   : > { %1184 = vrot.lane.b32.xlu0 %v1152_v13, %s9453_s9  ;;  %1166 = vrot.lane.b32.xlu1 %v1152_v13, %s9452_s8 }
 0x238   : > { %1268 = vmatprep.subr.bf16.mxu1 %v1151_v38 }
 0x239   : > { %1269 = vmatpush1.bf16.msra.mxu1 %v1150_v4 }
 0x23b   : > { %1178 = vrot.lane.b32.xlu0 %v1149_v39, %s9453_s9  ;;  %1160 = vrot.lane.b32.xlu1 %v1149_v39, %s9452_s8 }
 0x23f   : > { %1162 = vrot.lane.b32.xlu0 %v1150_v4, %s9452_s8  ;;  %1180 = vrot.lane.b32.xlu1 %v1150_v4, %s9453_s9  ;;  %v1495_v4 = vsel %vm9605_vm3, %v1452_v45, %v1472_v63 }
 0x243   : > { %1182 = vrot.lane.b32.xlu1 %v1151_v38, %s9453_s9  ;;  %1164 = vrot.lane.b32.xlu0 %v1151_v38, %s9452_s8 }
 0x247   : > { %1483 = vrot.lane.b32.xlu1 %v9554_v20, %s9453_s9  ;;  %1481 = vrot.lane.b32.xlu0 %v9533_v11, %s9453_s9  ;;  %v1473_v11 = vsel %vm382_vm0, %v1465_v53, %v1467_v59  ;;  %v10058_v20 = vld [vmem:[%s14215_s3] sm:$0xff]  }
 0x248   : > { %v1496_v53 = vsel %vm9605_vm3, %v1453_v50, %v1473_v11 }
 0x24b   : > { %1468 = vrot.lane.b32.xlu1 %v739_v23, %s9452_s8  ;;  %1485 = vrot.lane.b32.xlu0 %v9546_v17, %s9453_s9 }
 0x24f   : > { %1487 = vrot.lane.b32.xlu1 %v9572_v29, %s9453_s9  ;;  %1470 = vrot.lane.b32.xlu0 %v14213_v7, %s9452_s8 }
 0x253   : > { %1489 = vrot.lane.b32.xlu0 %v9576_v30, %s9453_s9 }
 0x292   : > { %v1159_v28 = vpop.permute.xlu1 %1158  ;;  %v1177_v24 = vpop.permute.xlu0 %1176 }
 0x2a9   : > { %v1167_v18 = vpop.permute.xlu1 %1166  ;;  %v1185_v23 = vpop.permute.xlu0 %1184 }
 0x2ad   : > { %v1161_v62 = vpop.permute.xlu1 %1160  ;;  %v1179_v61 = vpop.permute.xlu0 %1178 }
 0x2ae   : > { %v1168_v3 = vsel %vm382_vm0, %v1159_v28, %v1161_v62  ;;  %v1186_v44 = vsel %vm407_vm4, %v1177_v24, %v1179_v61 }
 0x2b1   : > { %v1181_v57 = vpop.permute.xlu1 %1180  ;;  %v1163_v9 = vpop.permute.xlu0 %1162 }
 0x2b2   : > { %v1169_v55 = vsel %vm382_vm0, %v1161_v62, %v1163_v9  ;;  %v1187_v39 = vsel %vm407_vm4, %v1179_v61, %v1181_v57 }
 0x2b3   : > { %1217 = vmatprep.subr.bf16.mxu0 %v1169_v55 }
 0x2b4   : > { %1218 = vmatpush1.bf16.msra.mxu0 %v1168_v3 }
 0x2b5   : > { %1219 = vmatprep.subr.bf16.mxu0 %v1187_v39  ;;  %v1183_v52 = vpop.permute.xlu1 %1182  ;;  %v1165_v42 = vpop.permute.xlu0 %1164 }
 0x2b6   : > { %v1171_v34 = vsel %vm382_vm0, %v1165_v42, %v1167_v18  ;;  %v1170_v43 = vsel %vm382_vm0, %v1163_v9, %v1165_v42  ;;  %v1189_v60 = vsel %vm407_vm4, %v1183_v52, %v1185_v23  ;;  %v1188_v28 = vsel %vm407_vm4, %v1181_v57, %v1183_v52 }
 0x2b7   : > { %1270 = vmatprep.subr.bf16.mxu1 %v1171_v34  ;;  %v1454_v23 = vrot.slane %v9546_v17, 1  ;;  %v1456_v34 = vrot.slane %v9576_v30, 1 }
 0x2b8   : > { %1220 = vmatpush1.bf16.msra.mxu0 %v1186_v44  ;;  %1271 = vmatpush1.bf16.msra.mxu1 %v1170_v43 }
 0x2b9   : > { %v1484_v13 = vpop.permute.xlu1 %1483  ;;  %v1482_v38 = vpop.permute.xlu0 %1481  ;;  %1272 = vmatprep.subr.bf16.mxu1 %v1189_v60  ;;  %1221 = vmatprep.subr.bf16.mxu0 %v10039_v35 }
 0x2ba   : > { %v1491_v7 = vsel %vm407_vm4, %v1482_v38, %v1484_v13  ;;  %v10084_v38 = vld [vmem:[%s14215_s3 + $0x8] sm:$0xff]  }
 0x2bb   : > { %v1502_v40 = vsel %vm412_vm1, %v1495_v4, %v1491_v7 }
 0x2bc   : > { %v1515_v24 = vshrl.u32 %v1502_v40, 16  ;;  %v1518_v18 = vshll.u32 %v1502_v40, 16  ;;  %1222 = vmatpush1.bf16.msra.mxu0 %v10039_v35  ;;  %1273 = vmatpush1.bf16.msra.mxu1 %v1188_v28 }
 0x2bd   : > { %v1469_v62 = vpop.permute.xlu1 %1468  ;;  %v1486_v61 = vpop.permute.xlu0 %1485  ;;  %1274 = vmatprep.subr.bf16.mxu1 %v10039_v35 }
 0x2be   : > { %v1517_v57 = vrot.slane %v1515_v24, 6  ;;  %v1520_v9 = vrot.slane %v1518_v18, 7  ;;  %v1474_v55 = vsel %vm382_vm0, %v1467_v59, %v1469_v62  ;;  %v1492_v27 = vsel %vm407_vm4, %v1484_v13, %v1486_v61 }
 0x2bf   : > { %v1505_v3 = vsel %vm412_vm1, %v1496_v53, %v1492_v27  ;;  %8717 = vmatmul.mubr.msk.bf16.vlgmr.msra.gmra.mrb[16].mxu0 %vm1204_vm12, %v10058_v20  ;;  %v1497_v17 = vsel %vm9605_vm3, %v1454_v23, %v1474_v55  ;;  %v1455_v59 = vrot.slane %v9572_v29, 1 }
 0x2c0   : > { %v1521_v39 = vor.u32 %v1520_v9, %v1517_v57  ;;  %v1522_v52 = vshrl.u32 %v1505_v3, 16  ;;  %v1525_v42 = vshll.u32 %v1505_v3, 16  ;;  %1275 = vmatpush1.bf16.msra.mxu1 %v10039_v35  ;;  %1257 = vmatprep.mubr.bf16.mxu0 %v14214_v1 }
 0x2c1   : > { %v1488_v45 = vpop.permute.xlu1 %1487  ;;  %v1471_v43 = vpop.permute.xlu0 %1470 }
 0x2c2   : > { %v1524_v63 = vrot.slane %v1522_v52, 6  ;;  %v1527_v44 = vrot.slane %v1525_v42, 7  ;;  %v1493_v60 = vsel %vm407_vm4, %v1486_v61, %v1488_v45  ;;  %v1475_v50 = vsel %vm382_vm0, %v1469_v62, %v1471_v43 }
 0x2c3   : > { %v1508_v13 = vsel %vm412_vm1, %v1497_v17, %v1493_v60  ;;  %8719 = vmatmul.mubr.msk.bf16.vlgmr.msra.gmra.mrb[8].mxu1 %vm1204_vm12, %v10058_v20  ;;  %v1555_v29 = vsel %vm9641_vm7, %v9737_v6, %v1521_v39  ;;  %v1498_v7 = vsel %vm9605_vm3, %v1455_v59, %v1475_v50  ;;  %v1499_v40 = vsel %vm9605_vm3, %v1456_v34, %v1471_v43 }
 0x2c4   : > { %v1529_v30 = vshrl.u32 %v1508_v13, 16  ;;  %v1532_v11 = vshll.u32 %v1508_v13, 16  ;;  %v1528_v4 = vor.u32 %v1527_v44, %v1524_v63  ;;  %1310 = vmatprep.mubr.bf16.mxu1 %v14214_v1  ;;  %v1561_v24 = vsel %vm567_vm8, %v1555_v29, 1065369472 }
 0x2c5   : > { %v1490_v28 = vpop.permute.xlu0 %1489  ;;  %v1570_v17 = vsel %vm588_vm9, %v1561_v24, 0  ;;  %v14216_v43 = vmov 0.0  }
 0x2c6   : > { %v1531_v18 = vrot.slane %v1529_v30, 6  ;;  %v1534_v53 = vrot.slane %v1532_v11, 7  ;;  %v1494_v23 = vsel %vm407_vm4, %v1488_v45, %v1490_v28  ;;  %v1514_v6 = vsel %vm412_vm1, %v1499_v40, %v1490_v28  ;;  %v1337_v30 = vld [vmem:[%s14217_s4] sm:$0xff]  ;;  %v1338_v40 = vld [vmem:[%s14217_s4 + $0x8] sm:$0xff] }
 0x2c7   : > { %v1511_v62 = vsel %vm412_vm1, %v1498_v7, %v1494_v23  ;;  %v1543_v61 = vshrl.u32 %v1514_v6, 16  ;;  %v1546_v57 = vshll.u32 %v1514_v6, 16  ;;  %8718 = vmatmul.mubr.msk.bf16.gmra.mrb[20].mxu0 %vm1204_vm12, %v10084_v38  ;;  %v1556_v9 = vsel %vm9641_vm7, %v9746_v19, %v1528_v4  ;;  %v8721_v11 = vld [vmem:[%s14217_s4 + $0x100] sm:$0xff] }
 0x2c8   : > { %v1535_v55 = vor.u32 %v1534_v53, %v1531_v18  ;;  %v1536_v27 = vshrl.u32 %v1511_v62, 16  ;;  %v1539_v3 = vshll.u32 %v1511_v62, 16  ;;  %v1563_v39 = vsel %vm567_vm8, %v1556_v9, 1065369472  ;;  %1612 = vmatprep.mubr.bf16.mxu0 %v14214_v1  ;;  %v8723_v9 = vld [vmem:[%s14217_s4 + $0x110] sm:$0xff] }
 0x2c9   : > { %v1545_v52 = vrot.slane %v1543_v61, 6  ;;  %v1548_v42 = vrot.slane %v1546_v57, 7  ;;  %8737 = vmatprep.subr.msk.bf16.mxu0 %vm588_vm9, %v1563_v39  ;;  %v1339_v57 = vld [vmem:[%s14217_s4 + $0x10] sm:$0xff]  ;;  %v8724_v39 = vld [vmem:[%s14217_s4 + $0x118] sm:$0xff] }
 0x2ca   : > { %v1538_v45 = vrot.slane %v1536_v27, 6  ;;  %v1541_v59 = vrot.slane %v1539_v3, 7  ;;  %1581 = vmatpush1.bf16.msra.mxu0 %v1570_v17  ;;  %v1557_v19 = vsel %vm9641_vm7, %v9775_v48, %v1535_v55  ;;  %v1340_v3 = vld [vmem:[%s14217_s4 + $0x18] sm:$0xff] }
 0x2cb   : > { %v1549_v34 = vor.u32 %v1548_v42, %v1545_v52  ;;  %8720 = vmatmul.mubr.msk.bf16.gmra.mrb[12].mxu1 %vm1204_vm12, %v10084_v38  ;;  %8951 = vmatprep.subr.bf16.mxu0 %v14216_v43  ;;  %v1565_v60 = vsel %vm567_vm8, %v1557_v19, 1065369472 }
 0x2cc   : > { %v1542_v63 = vor.u32 %v1541_v59, %v1538_v45  ;;  %1655 = vmatprep.mubr.bf16.mxu1 %v14214_v1 }
 0x2cd   : > { %v1559_v44 = vsel %vm9641_vm7, %v9772_v47, %v1549_v34  ;;  %v1574_v47 = vsel %vm588_vm9, %v1565_v60, 0 }
 0x2ce   : > { %v1558_v50 = vsel %vm9641_vm7, %v9778_v49, %v1542_v63  ;;  %v1569_v48 = vsel %vm567_vm8, %v1559_v44, 1065369472  ;;  %v1341_v63 = vld [vmem:[%s14217_s4 + $0x20] sm:$0xff] }
 0x2cf   : > { %8738 = vmatmul.mubr.msk.bf16.vlgmr.msra.gmra.mrb[24].mxu0 %vm584_vm10, %v9678_v54  ;;  %v1567_v13 = vsel %vm567_vm8, %v1558_v50, 1065369472  ;;  %v1578_v29 = vsel %vm588_vm9, %v1569_v48, 0  ;;  %v8725_v48 = vld [vmem:[%s14217_s4 + $0x120] sm:$0xff] }
 0x2d0   : > { %8739 = vmatprep.subr.msk.bf16.mxu1 %vm588_vm9, %v1567_v13  ;;  %8952 = vmatpush3.bf16.msra.mxu0 %v1578_v29 }
 0x2d1   : > { %1624 = vmatpush1.bf16.msra.mxu1 %v1574_v47  ;;  %8953 = vmatprep.mubr.msk.bf16.mxu0 %vm9456_vm11, %v14216_v43 }
 0x2d4   : > { %8740 = vmatmul.mubr.msk.bf16.vlgmr.msra.gmra.mrb[16].mxu1 %vm584_vm10, %v9678_v54 }
 0x2d5   : > { %1883 = vmatprep.mubr.bf16.mxu1 %v14214_v1 }
 0x2d7   : > { %8954 = vmatmul.mubr.msk.bf16.vlgmr.msra.gmra.mrb[28].mxu0 %vm584_vm10, %v9678_v54  ;;  %v8722_v54 = vld [vmem:[%s14217_s4 + $0x108] sm:$0xff] }
 0x2d8   : > { %1936 = vmatprep.mubr.bf16.mxu0 %v14214_v1 }
 0x392   : > { %v1249_v49 = vpop.f32.mrb[16].mxu0 }
 0x393   : > { %v1321_v4 = vmax.f32 %v1249_v49, 0.0  ;;  %v1251_v7 = vpop.f32.mrb[17].mxu0 }
 0x394   : > { %v1322_v28 = vmax.f32 %v1251_v7, 0.0  ;;  %v1253_v24 = vpop.f32.mrb[18].mxu0  ;;  %v8726_v7 = vld [vmem:[%s14217_s4 + $0x128] sm:$0xff] }
 0x395   : > { %v1353_v18 = vmul.f32 %v1337_v30, %v1321_v4  ;;  %v1411_v53 = vmul.f32 %v8721_v11, %v1321_v4  ;;  %v1255_v23 = vpop.f32.mrb[19].mxu0  ;;  %v1325_v45 = vmax.f32 %v1253_v24, 0.0  ;;  %v1342_v4 = vld [vmem:[%s14217_s4 + $0x28] sm:$0xff] }
 0x396   : > { %v1354_v6 = vmul.f32 %v1338_v40, %v1322_v28  ;;  %v1412_v62 = vmul.f32 %v8722_v54, %v1322_v28  ;;  %v1302_v61 = vpop.f32.mrb[8].mxu1  ;;  %v1326_v49 = vmax.f32 %v1255_v23, 0.0  ;;  %v1343_v23 = vld [vmem:[%s14217_s4 + $0x30] sm:$0xff] }
 0x397   : > { %v1323_v55 = vmax.f32 %v1302_v61, 0.0  ;;  %v1304_v27 = vpop.f32.mrb[9].mxu1  ;;  %v1357_v11 = vmul.f32 %v1341_v63, %v1325_v45  ;;  %v1415_v24 = vmul.f32 %v8725_v48, %v1325_v45 }
 0x398   : > { %v1369_v52 = vadd.f32 %v1354_v6, %v1353_v18  ;;  %v1427_v42 = vadd.f32 %v1412_v62, %v1411_v53  ;;  %v1324_v17 = vmax.f32 %v1304_v27, 0.0  ;;  %v1306_v59 = vpop.f32.mrb[10].mxu1  ;;  %v8727_v6 = vld [vmem:[%s14217_s4 + $0x130] sm:$0xff] }
 0x399   : > { %v1355_v19 = vmul.f32 %v1339_v57, %v1323_v55  ;;  %v1413_v34 = vmul.f32 %v8723_v9, %v1323_v55  ;;  %v1308_v44 = vpop.f32.mrb[11].mxu1  ;;  %v1327_v18 = vmax.f32 %v1306_v59, 0.0  ;;  %v1717_v57 = vadd.f32 %v9940_v22, %v9861_v12 }
 0x39a   : > { %v1356_v60 = vmul.f32 %v1340_v3, %v1324_v17  ;;  %v1414_v50 = vmul.f32 %v8724_v39, %v1324_v17  ;;  %v1259_v13 = vpop.f32.mrb[20].mxu0  ;;  %v1328_v62 = vmax.f32 %v1308_v44, 0.0  ;;  %v1722_v9 = vadd.f32 %v9945_v31, %v9863_v16  ;;  %v1345_v44 = vld [vmem:[%s14217_s4 + $0x40] sm:$0xff] }
 0x39b   : > { %v1370_v29 = vadd.f32 %v1369_v52, %v1355_v19  ;;  %v1428_v47 = vadd.f32 %v1427_v42, %v1413_v34  ;;  %v10166_v30 = vpop.f32.mrb[21].mxu0  ;;  %v1358_v3 = vmul.f32 %v1342_v4, %v1326_v49  ;;  %v1416_v39 = vmul.f32 %v8726_v7, %v1326_v49  ;;  %v1344_v52 = vld [vmem:[%s14217_s4 + $0x38] sm:$0xff]  ;;  %v1346_v4 = vld [vmem:[%s14217_s4 + $0x48] sm:$0xff] }
 0x39c   : > { %v10174_v40 = vpop.f32.mrb[22].mxu0  ;;  %v8728_v42 = vld [vmem:[%s14217_s4 + $0x138] sm:$0xff]  ;;  %v1329_v45 = vmax.f32 %v1259_v13, 0.0  ;;  %v1718_v12 = vadd.f32 %v9966_v46, %v9867_v32  ;;  %v1723_v16 = vadd.f32 %v9975_v56, %v9871_v36  ;;  %v1719_v22 = vadd.f32 %v9988_v0, %v9898_v8  ;;  %v8729_v32 = vld [vmem:[%s14217_s4 + $0x140] sm:$0xff] }
 0x39d   : > { %v1371_v54 = vadd.f32 %v1370_v29, %v1356_v60  ;;  %v1429_v28 = vadd.f32 %v1428_v47, %v1414_v50  ;;  %v10176_v53 = vpop.f32.mrb[23].mxu0  ;;  %v1359_v31 = vmul.f32 %v1343_v23, %v1327_v18  ;;  %v1417_v19 = vmul.f32 %v8727_v6, %v1327_v18  ;;  %v8731_v18 = vld [vmem:[%s14217_s4 + $0x150] sm:$0xff] }
 0x39e   : > { %v10184_v61 = vpop.f32.mrb[12].mxu1  ;;  %v1360_v50 = vmul.f32 %v1344_v52, %v1328_v62  ;;  %v1418_v48 = vmul.f32 %v8728_v42, %v1328_v62  ;;  %v1720_v8 = vadd.f32 %v9996_v10, %v9896_v2  ;;  %v1724_v46 = vadd.f32 %v9984_v37, %v9905_v58  ;;  %v8730_v2 = vld [vmem:[%s14217_s4 + $0x148] sm:$0xff]  ;;  %v1348_v52 = vld [vmem:[%s14217_s4 + $0x58] sm:$0xff] }
 0x39f   : > { %v1372_v55 = vadd.f32 %v1371_v54, %v1357_v11  ;;  %v1430_v27 = vadd.f32 %v1429_v28, %v1415_v24  ;;  %v10196_v17 = vpop.f32.mrb[13].mxu1  ;;  %v1330_v13 = vmax.f32 %v10166_v30, 0.0  ;;  %v1333_v29 = vmax.f32 %v10174_v40, 0.0  ;;  %v1347_v40 = vld [vmem:[%s14217_s4 + $0x50] sm:$0xff] }
 0x3a0   : > { %v10198_v59 = vpop.f32.mrb[14].mxu1  ;;  %v1361_v49 = vmul.f32 %v1345_v44, %v1329_v45  ;;  %v1331_v11 = vmax.f32 %v10184_v61, 0.0  ;;  %v1419_v30 = vmul.f32 %v8729_v32, %v1329_v45  ;;  %v1332_v28 = vmax.f32 %v10196_v17, 0.0 }
 0x3a1   : > { %v1373_v34 = vadd.f32 %v1372_v55, %v1358_v3  ;;  %v1431_v63 = vadd.f32 %v1430_v27, %v1416_v39  ;;  %v10209_v60 = vpop.f32.mrb[15].mxu1  ;;  %v1362_v3 = vmul.f32 %v1346_v4, %v1330_v13  ;;  %v1420_v39 = vmul.f32 %v8730_v2, %v1330_v13  ;;  %v1350_v2 = vld [vmem:[%s14217_s4 + $0x68] sm:$0xff] }
 0x3a2   : > { %v1614_v36 = vpop.f32.mrb[24].mxu0  ;;  %v1363_v17 = vmul.f32 %v1347_v40, %v1331_v11 }
 0x3a3   : > { %v1374_v56 = vadd.f32 %v1373_v34, %v1359_v31  ;;  %v1432_v0 = vadd.f32 %v1431_v63, %v1417_v19  ;;  %v1616_v47 = vpop.f32.mrb[25].mxu0  ;;  %v1707_v10 = vmax.f32 %v1614_v36, 0.0  ;;  %v1421_v34 = vmul.f32 %v8731_v18, %v1331_v11 }
 0x3a4   : > { %v1708_v58 = vmax.f32 %v1616_v47, 0.0  ;;  %v1618_v37 = vpop.f32.mrb[26].mxu0  ;;  %v1364_v36 = vmul.f32 %v1348_v52, %v1332_v28  ;;  %v8736_v52 = vld [vmem:[%s14217_s4 + $0x178] sm:$0xff] }
 0x3a5   : > { %v1375_v7 = vadd.f32 %v1374_v56, %v1360_v50  ;;  %v1433_v54 = vadd.f32 %v1432_v0, %v1418_v48  ;;  %v10231_v24 = vpop.f32.mrb[27].mxu0  ;;  %v10236_v23 = vadd.f32 %v1717_v57, %v1707_v10  ;;  %v1712_v62 = vmax.f32 %v1618_v37, 0.0  ;;  %1747 = vrot.lane.b32.xlu1 %v1707_v10, %s9452_s8  ;;  %v8732_v57 = vld [vmem:[%s14217_s4 + $0x158] sm:$0xff]  ;;  %v1349_v50 = vld [vmem:[%s14217_s4 + $0x60] sm:$0xff] }
 0x3a6   : > { %v10238_v6 = vadd.f32 %v1718_v12, %v1708_v58  ;;  %v1713_v61 = vmax.f32 %v10231_v24, 0.0  ;;  %v8733_v56 = vld [vmem:[%s14217_s4 + $0x160] sm:$0xff]  ;;  %v1422_v11 = vmul.f32 %v8732_v57, %v1332_v28 }
 0x3a7   : > { %v1376_v55 = vadd.f32 %v1375_v7, %v1361_v49  ;;  %v1434_v27 = vadd.f32 %v1433_v54, %v1419_v30  ;;  %v1657_v42 = vpop.f32.mrb[16].mxu1  ;;  %v10248_v45 = vadd.f32 %v1722_v9, %v1712_v62  ;;  %v1334_v9 = vmax.f32 %v10176_v53, 0.0 }
 0x3a8   : > { %v10250_v12 = vadd.f32 %v1723_v16, %v1713_v61  ;;  %v1709_v31 = vmax.f32 %v1657_v42, 0.0  ;;  %v1659_v19 = vpop.f32.mrb[17].mxu1  ;;  %v1725_v54 = vadd.f32 %v10006_v33, %v9909_v14  ;;  %v1423_v24 = vmul.f32 %v8733_v56, %v1333_v29 }
 0x3a9   : > { %v1377_v63 = vadd.f32 %v1376_v55, %v1362_v3  ;;  %v1435_v44 = vadd.f32 %v1434_v27, %v1420_v39  ;;  %v1710_v48 = vmax.f32 %v1659_v19, 0.0  ;;  %v1661_v32 = vpop.f32.mrb[18].mxu1  ;;  %1749 = vrot.lane.b32.xlu1 %v1708_v58, %s9452_s8  ;;  %v8734_v58 = vld [vmem:[%s14217_s4 + $0x168] sm:$0xff]  ;;  %v1351_v55 = vld [vmem:[%s14217_s4 + $0x70] sm:$0xff]  ;;  %v1366_v27 = vmul.f32 %v1350_v2, %v1334_v9  ;;  %v1352_v39 = vld [vmem:[%s14217_s4 + $0x78] sm:$0xff] }
 0x3aa   : > { %v10259_v16 = vadd.f32 %v1719_v22, %v1709_v31  ;;  %v1714_v0 = vmax.f32 %v1661_v32, 0.0  ;;  %v10262_v13 = vpop.f32.mrb[28].mxu0  ;;  %1751 = vrot.lane.b32.xlu0 %v1709_v31, %s9452_s8  ;;  %v1663_v47 = vpop.f32.mrb[19].mxu1  ;;  %v1365_v22 = vmul.f32 %v1349_v50, %v1333_v29  ;;  %v1424_v29 = vmul.f32 %v8734_v58, %v1334_v9 }
 0x3ab   : > { %v1378_v49 = vadd.f32 %v1377_v63, %v1363_v17  ;;  %v1436_v4 = vadd.f32 %v1435_v44, %v1421_v34  ;;  %v10268_v10 = vadd.f32 %v1720_v8, %v1710_v48  ;;  %v8955_v53 = vpop.f32.mrb[29].mxu0  ;;  %v1715_v7 = vmax.f32 %v1663_v47, 0.0 }
 0x3ac   : > { %v10273_v37 = vadd.f32 %v1724_v46, %v1714_v0  ;;  %v10277_v30 = vpop.f32.mrb[30].mxu0  ;;  %v1335_v8 = vmax.f32 %v10198_v59, 0.0  ;;  %v8735_v46 = vld [vmem:[%s14217_s4 + $0x170] sm:$0xff]  ;;  %v1336_v59 = vmax.f32 %v10209_v60, 0.0  ;;  %v1711_v63 = vmax.f32 %v10262_v13, 0.0 }
 0x3ad   : > { %v1379_v40 = vadd.f32 %v1378_v49, %v1364_v36  ;;  %v1437_v28 = vadd.f32 %v1436_v4, %v1422_v11  ;;  %v8956_v18 = vpop.f32.mrb[31].mxu0  ;;  %v10286_v3 = vadd.f32 %v1725_v54, %v1715_v7  ;;  %1753 = vrot.lane.b32.xlu1 %v1710_v48, %s9452_s8  ;;  %v1716_v48 = vmax.f32 %v10277_v30, 0.0 }
 0x3ae   : > { %1757 = vrot.lane.b32.xlu0 %v1712_v62, %s9452_s8  ;;  %v1367_v42 = vmul.f32 %v1351_v55, %v1335_v8  ;;  %v1425_v17 = vmul.f32 %v8735_v46, %v1335_v8  ;;  %v1368_v62 = vmul.f32 %v1352_v39, %v1336_v59  ;;  %v1426_v19 = vmul.f32 %v8736_v52, %v1336_v59 }
 0x3af   : > { %v1380_v14 = vadd.f32 %v1379_v40, %v1365_v22  ;;  %v1438_v33 = vadd.f32 %v1437_v28, %v1423_v24  ;;  %v1721_v54 = vadd.f32 %v9990_v41, %v9911_v15  ;;  %v1726_v55 = vadd.f32 %v10000_v25, %v9917_v21 }
 0x3b1   : > { %v1381_v57 = vadd.f32 %v1380_v14, %v1366_v27  ;;  %v1439_v31 = vadd.f32 %v1438_v33, %v1424_v29  ;;  %1761 = vrot.lane.b32.xlu1 %v1714_v0, %s9452_s8  ;;  %v1731_v18 = vadd.f32 %v1721_v54, %v1711_v63  ;;  %v1736_v41 = vadd.f32 %v1726_v55, %v1716_v48 }
 0x3b2   : > { %1759 = vrot.lane.b32.xlu0 %v1713_v61, %s9452_s8 }
 0x3b3   : > { %v1382_v34 = vadd.f32 %v1381_v57, %v1367_v42  ;;  %v1440_v60 = vadd.f32 %v1439_v31, %v1425_v17 }
 0x3b5   : > { %v10300_v44 = vadd.f32 %v1382_v34, %v1368_v62  ;;  %v10302_v50 = vadd.f32 %v1440_v60, %v1426_v19  ;;  %1755 = vrot.lane.b32.xlu1 %v1711_v63, %s9452_s8 }
 0x3b6   : > { %1763 = vrot.lane.b32.xlu0 %v1715_v7, %s9452_s8 }
 0x3b7   : > { %14218 = vst [vmem:[#allocation3_spill] sm:$0xff] %v10300_v44  ;;  %14219 = vst [vmem:[#allocation4_spill] sm:$0xff] %v10302_v50 }
 0x3ba   : > { %1765 = vrot.lane.b32.xlu0 %v1716_v48, %s9452_s8 }
 0x417   : > { %v1748_v32 = vpop.permute.xlu1 %1747 }
 0x41b   : > { %v1750_v61 = vpop.permute.xlu1 %1749 }
 0x41c   : > { %v1752_v36 = vpop.permute.xlu0 %1751  ;;  %v1767_v56 = vsel %vm382_vm0, %v1748_v32, %v1750_v61  ;;  %v8783_v32 = vld.sshfl [vmem:[%s10342_s15 + $0x8] sm:$0x33 pattern:$0x76325410] }
 0x41d   : > { %v1768_v13 = vsel %vm382_vm0, %v1750_v61, %v1752_v36  ;;  %v1785_v47 = vadd.f32 %v1767_v56, %v10236_v23 }
 0x41e   : > { %v1786_v49 = vadd.f32 %v1768_v13, %v10238_v6 }
 0x41f   : > { %v1754_v9 = vpop.permute.xlu1 %1753  ;;  %v1795_v30 = vmul.f32 0.25, %v1785_v47 }
 0x420   : > { %v1758_v0 = vpop.permute.xlu0 %1757  ;;  %v1769_v2 = vsel %vm382_vm0, %v1752_v36, %v1754_v9  ;;  %v1796_v40 = vmul.f32 0.25, %v1786_v49 }
 0x421   : > { %v1787_v23 = vadd.f32 %v1769_v2, %v10259_v16 }
 0x423   : > { %v1762_v11 = vpop.permute.xlu1 %1761  ;;  %v1797_v33 = vmul.f32 0.25, %v1787_v23  ;;  %v2207_v23 = vshrl.u32 %v8783_v32, 16 }
 0x424   : > { %v1760_v4 = vpop.permute.xlu0 %1759 }
 0x425   : > { %v1771_v53 = vsel %vm382_vm0, %v1758_v0, %v1760_v4  ;;  %v1772_v22 = vsel %vm382_vm0, %v1760_v4, %v1762_v11  ;;  %v2205_v4 = vcombine.high %v8783_v32, %v8783_v32 }
 0x426   : > { %v1790_v58 = vadd.f32 %v1771_v53, %v10248_v45  ;;  %v1791_v7 = vadd.f32 %v1772_v22, %v10250_v12 }
 0x427   : > { %v1756_v24 = vpop.permute.xlu1 %1755 }
 0x428   : > { %v1800_v6 = vmul.f32 0.25, %v1790_v58  ;;  %v1801_v28 = vmul.f32 0.25, %v1791_v7  ;;  %v1764_v8 = vpop.permute.xlu0 %1763  ;;  %v1770_v46 = vsel %vm382_vm0, %v1754_v9, %v1756_v24  ;;  %v1789_v14 = vadd.f32 %v1756_v24, %v1731_v18 }
 0x429   : > { %v1773_v45 = vsel %vm382_vm0, %v1762_v11, %v1764_v8  ;;  %v1788_v16 = vadd.f32 %v1770_v46, %v10268_v10  ;;  %v8778_v11 = vld.sshfl [vmem:[%s10342_s15] sm:$0x33 pattern:$0x76325410] }
 0x42a   : > { %v1805_v12 = vpack.c.bf16 %v1800_v6, %v1795_v30  ;;  %v1792_v27 = vadd.f32 %v1773_v45, %v10273_v37  ;;  %v1806_v15 = vpack.c.bf16 %v1801_v28, %v1796_v40  ;;  %v1799_v42 = vmul.f32 0.25, %v1789_v14 }
 0x42b   : > { %v1798_v17 = vmul.f32 0.25, %v1788_v16  ;;  %v2100_v58 = vcombine.high %v8778_v11, %v8778_v11  ;;  %v2215_v30 = vshrl.u32 %v2205_v4, 16  ;;  %v2218_v40 = vshll.u32 %v2205_v4, 16 }
 0x42c   : > { %v1802_v29 = vmul.f32 0.25, %v1792_v27  ;;  %1817 = vrot.lane.b32.xlu1 %v1806_v15, %s9452_s8  ;;  %1851 = vmatprep.subr.bf16.mxu1 %v1806_v15  ;;  %v1766_v59 = vpop.permute.xlu0 %1765  ;;  %v2210_v6 = vshll.u32 %v8783_v32, 16 }
 0x42d   : > { %v1774_v21 = vsel %vm382_vm0, %v1764_v8, %v1766_v59  ;;  %v1794_v25 = vadd.f32 %v1766_v59, %v1736_v41  ;;  %1852 = vmatpush1.bf16.msra.mxu1 %v1805_v12  ;;  %v2217_v46 = vrot.slane %v2215_v30, 6  ;;  %v2220_v45 = vrot.slane %v2218_v40, 7  ;;  %v8765_v30 = vld [vmem:[%s14217_s4 + $0x198] sm:$0xff] }
 0x42e   : > { %v1793_v39 = vadd.f32 %v1774_v21, %v10286_v3  ;;  %v1807_v52 = vpack.c.bf16 %v1802_v29, %v1797_v33  ;;  %v10345_v3 = vld.sshfl [vmem:[%s10342_s15 + $0x4] sm:$0x33 pattern:$0x76325410]  ;;  %v2212_v27 = vrot.slane %v2210_v6, 7 }
 0x42f   : > { %v1804_v37 = vmul.f32 0.25, %v1794_v25  ;;  %v2111_v62 = vcombine.high %v10345_v3, %v10345_v3  ;;  %v2113_v63 = vshrl.u32 %v10345_v3, 16  ;;  %v2116_v48 = vshll.u32 %v10345_v3, 16 }
 0x430   : > { %v1803_v57 = vmul.f32 0.25, %v1793_v39  ;;  %1815 = vrot.lane.b32.xlu1 %v1805_v12, %s9452_s8  ;;  %1819 = vrot.lane.b32.xlu0 %v1807_v52, %s9452_s8  ;;  %v2221_v29 = vor.u32 %v2220_v45, %v2217_v46  ;;  %v8766_v46 = vld [vmem:[%s14217_s4 + $0x1a0] sm:$0xff] }
 0x431   : > { %v1809_v10 = vpack.c.bf16 %v1804_v37, %v1799_v42  ;;  %v2121_v34 = vshrl.u32 %v2111_v62, 16  ;;  %v2124_v60 = vshll.u32 %v2111_v62, 16  ;;  %v2115_v47 = vrot.slane %v2113_v63, 6  ;;  %v8763_v63 = vld [vmem:[%s14217_s4 + $0x188] sm:$0xff] }
 0x432   : > { %v1808_v31 = vpack.c.bf16 %v1803_v57, %v1798_v17  ;;  %v2118_v49 = vrot.slane %v2116_v48, 7  ;;  %v2225_v37 = vsel %vm9641_vm7, %v2111_v62, %v2221_v29  ;;  %v8746_v62 = vld [vmem:[%s14217_s4 + $0x80] sm:$0xff] }
 0x433   : > { %v2123_v56 = vrot.slane %v2121_v34, 6  ;;  %v2126_v9 = vrot.slane %v2124_v60, 7  ;;  %v2229_v57 = vsel %vm567_vm8, %v2225_v37, 1065369472  ;;  %v8768_v37 = vld [vmem:[%s14217_s4 + $0x1b0] sm:$0xff] }
 0x434   : > { %1837 = vrot.lane.b32.xlu1 %v1807_v52, %s9453_s9  ;;  %1835 = vrot.lane.b32.xlu0 %v1806_v15, %s9453_s9  ;;  %v2119_v54 = vor.u32 %v2118_v49, %v2115_v47 }
 0x435   : > { %1904 = vmatprep.subr.bf16.mxu0 %v1808_v31  ;;  %v2127_v7 = vor.u32 %v2126_v9, %v2123_v56 }
 0x436   : > { %1905 = vmatpush1.bf16.msra.mxu0 %v1807_v52  ;;  %v2130_v55 = vsel %vm9641_vm7, %v8778_v11, %v2119_v54  ;;  %v8749_v54 = vld [vmem:[%s14217_s4 + $0x98] sm:$0xff] }
 0x437   : > { %v2131_v18 = vsel %vm9641_vm7, %v2100_v58, %v2127_v7  ;;  %v2133_v16 = vsel %vm567_vm8, %v2130_v55, 1065369472 }
 0x438   : > { %1833 = vrot.lane.b32.xlu0 %v1805_v12, %s9453_s9  ;;  %1823 = vrot.lane.b32.xlu1 %v1809_v10, %s9452_s8  ;;  %v2209_v12 = vrot.slane %v2207_v23, 6  ;;  %v2135_v41 = vsel %vm567_vm8, %v2131_v18, 1065369472  ;;  %v2144_v39 = vsel %vm588_vm9, %v2133_v16, 0  ;;  %v8767_v16 = vld [vmem:[%s14217_s4 + $0x1a8] sm:$0xff] }
 0x43a   : > { %v2213_v59 = vor.u32 %v2212_v27, %v2209_v12 }
 0x43c   : > { %1839 = vrot.lane.b32.xlu1 %v1808_v31, %s9453_s9  ;;  %1821 = vrot.lane.b32.xlu0 %v1808_v31, %s9452_s8  ;;  %v2224_v17 = vsel %vm9641_vm7, %v10345_v3, %v2213_v59  ;;  %v9178_v3 = vld [vmem:[%s14212_s2 + $0x8] sm:$0xff]  }
 0x440   : > { %1841 = vrot.lane.b32.xlu0 %v1809_v10, %s9453_s9  ;;  %v2227_v10 = vsel %vm567_vm8, %v2224_v17, 1065369472 }
 0x441   : > { %v2230_v31 = vsel %vm588_vm9, %v2227_v10, 0 }
 0x49e   : > { %v1818_v19 = vpop.permute.xlu1 %1817 }
 0x4a2   : > { %v1816_v61 = vpop.permute.xlu1 %1815  ;;  %v1820_v36 = vpop.permute.xlu0 %1819 }
 0x4a3   : > { %v1825_v0 = vsel %vm382_vm0, %v1816_v61, %v1818_v19  ;;  %v1826_v13 = vsel %vm382_vm0, %v1818_v19, %v1820_v36  ;;  %v8762_v19 = vld [vmem:[%s14217_s4 + $0x180] sm:$0xff] }
 0x4a4   : > { %1853 = vmatprep.subr.bf16.mxu1 %v1826_v13 }
 0x4a5   : > { %1854 = vmatpush1.bf16.msra.mxu1 %v1825_v0 }
 0x4a6   : > { %v1838_v2 = vpop.permute.xlu1 %1837  ;;  %v1836_v53 = vpop.permute.xlu0 %1835 }
 0x4a7   : > { %v1844_v22 = vsel %vm407_vm4, %v1836_v53, %v1838_v2 }
 0x4a8   : > { %1855 = vmatprep.subr.bf16.mxu1 %v1844_v22 }
 0x4aa   : > { %v1834_v28 = vpop.permute.xlu0 %1833  ;;  %v1824_v24 = vpop.permute.xlu1 %1823 }
 0x4ab   : > { %v1843_v8 = vsel %vm407_vm4, %v1834_v28, %v1836_v53  ;;  %v8764_v53 = vld [vmem:[%s14217_s4 + $0x190] sm:$0xff] }
 0x4ac   : > { %1856 = vmatpush1.bf16.msra.mxu1 %v1843_v8 }
 0x4ad   : > { %1857 = vmatprep.subr.bf16.mxu1 %v10039_v35 }
 0x4ae   : > { %v1822_v15 = vpop.permute.xlu0 %1821  ;;  %v1840_v21 = vpop.permute.xlu1 %1839 }
 0x4af   : > { %v1828_v14 = vsel %vm382_vm0, %v1822_v15, %v1824_v24  ;;  %v1827_v33 = vsel %vm382_vm0, %v1820_v36, %v1822_v15  ;;  %v1845_v42 = vsel %vm407_vm4, %v1838_v2, %v1840_v21  ;;  %v8748_v2 = vld [vmem:[%s14217_s4 + $0x90] sm:$0xff]  ;;  %v8750_v24 = vld [vmem:[%s14217_s4 + $0xa0] sm:$0xff]  ;;  %v8751_v15 = vld [vmem:[%s14217_s4 + $0xa8] sm:$0xff] }
 0x4b0   : > { %1858 = vmatpush1.bf16.msra.mxu1 %v10039_v35  ;;  %1906 = vmatprep.subr.bf16.mxu0 %v1828_v14 }
 0x4b1   : > { %1907 = vmatpush1.bf16.msra.mxu0 %v1827_v33  ;;  %8781 = vmatprep.subr.msk.bf16.mxu1 %vm588_vm9, %v2135_v41 }
 0x4b2   : > { %v1842_v25 = vpop.permute.xlu0 %1841 }
 0x4b3   : > { %8742 = vmatmul.mubr.msk.bf16.vlgmr.msra.gmra.mrb[20].mxu1 %vm1204_vm12, %v10058_v20  ;;  %v1846_v52 = vsel %vm407_vm4, %v1840_v21, %v1842_v25 }
 0x4b4   : > { %1908 = vmatprep.subr.bf16.mxu0 %v1846_v52  ;;  %1893 = vmatprep.mubr.bf16.mxu1 %v14214_v1 }
 0x4b5   : > { %1909 = vmatpush1.bf16.msra.mxu0 %v1845_v42  ;;  %2149 = vmatpush1.bf16.msra.mxu1 %v2144_v39  ;;  %v8752_v42 = vld [vmem:[%s14217_s4 + $0xb0] sm:$0xff] }
 0x4b6   : > { %1910 = vmatprep.subr.bf16.mxu0 %v10039_v35 }
 0x4b9   : > { %1911 = vmatpush1.bf16.msra.mxu0 %v10039_v35 }
 0x4ba   : > { %8784 = vmatprep.subr.msk.bf16.mxu0 %vm588_vm9, %v2229_v57 }
 0x4bb   : > { %8743 = vmatmul.mubr.msk.bf16.gmra.mrb[24].mxu1 %vm1204_vm12, %v10084_v38 }
 0x4bc   : > { %8744 = vmatmul.mubr.msk.bf16.vlgmr.msra.gmra.mrb[32].mxu0 %vm1204_vm12, %v10058_v20  ;;  %2180 = vmatprep.mubr.bf16.mxu1 %v14214_v1 }
 0x4bd   : > { %1946 = vmatprep.mubr.bf16.mxu0 %v14214_v1  ;;  %2235 = vmatpush1.bf16.msra.mxu0 %v2230_v31 }
 0x4c3   : > { %8782 = vmatmul.mubr.msk.bf16.vlgmr.msra.gmra.mrb[28].mxu1 %vm584_vm10, %v9178_v3 }
 0x4c4   : > { %8745 = vmatmul.mubr.msk.bf16.gmra.mrb[36].mxu0 %vm1204_vm12, %v10084_v38  ;;  %2399 = vmatprep.mubr.bf16.mxu1 %v14214_v1  ;;  %v8747_v38 = vld [vmem:[%s14217_s4 + $0x88] sm:$0xff] }
 0x4c5   : > { %2266 = vmatprep.mubr.bf16.mxu0 %v14214_v1 }
 0x4cc   : > { %8785 = vmatmul.mubr.msk.bf16.vlgmr.msra.gmra.mrb[40].mxu0 %vm584_vm10, %v9178_v3 }
 0x4cd   : > { %2799 = vmatprep.mubr.bf16.mxu0 %v14214_v1 }
 0x586   : > { %v1885_v20 = vpop.f32.mrb[20].mxu1 }
 0x587   : > { %v1957_v34 = vmax.f32 %v1885_v20, 0.0  ;;  %v1887_v60 = vpop.f32.mrb[21].mxu1 }
 0x588   : > { %v1958_v48 = vmax.f32 %v1887_v60, 0.0  ;;  %v1889_v32 = vpop.f32.mrb[22].mxu1 }
 0x589   : > { %v1990_v61 = vmul.f32 %v8746_v62, %v1957_v34  ;;  %v2048_v36 = vmul.f32 %v8762_v19, %v1957_v34  ;;  %v1891_v56 = vpop.f32.mrb[23].mxu1  ;;  %v1961_v40 = vmax.f32 %v1889_v32, 0.0  ;;  %v8753_v62 = vld [vmem:[%s14217_s4 + $0xb8] sm:$0xff] }
 0x58a   : > { %v1991_v9 = vmul.f32 %v8747_v38, %v1958_v48  ;;  %v2049_v0 = vmul.f32 %v8763_v63, %v1958_v48  ;;  %v1962_v45 = vmax.f32 %v1891_v56, 0.0  ;;  %v8769_v63 = vld [vmem:[%s14217_s4 + $0x1b8] sm:$0xff] }
 0x58b   : > { %v1994_v33 = vmul.f32 %v8750_v24, %v1961_v40  ;;  %v2052_v29 = vmul.f32 %v8766_v46, %v1961_v40  ;;  %v8756_v46 = vld [vmem:[%s14217_s4 + $0xd0] sm:$0xff] }
 0x58c   : > { %v2006_v13 = vadd.f32 %v1991_v9, %v1990_v61  ;;  %v2064_v47 = vadd.f32 %v2049_v0, %v2048_v36  ;;  %v1995_v52 = vmul.f32 %v8751_v15, %v1962_v45  ;;  %v2053_v31 = vmul.f32 %v8767_v16, %v1962_v45  ;;  %v8754_v36 = vld [vmem:[%s14217_s4 + $0xc0] sm:$0xff]  ;;  %v8772_v45 = vld [vmem:[%s14217_s4 + $0x1d0] sm:$0xff] }
 0x58e   : > { %v10413_v49 = vpop.f32.mrb[24].mxu1 }
 0x58f   : > { %v10415_v11 = vpop.f32.mrb[25].mxu1  ;;  %v1938_v4 = vpop.f32.mrb[32].mxu0  ;;  %v1965_v38 = vmax.f32 %v10413_v49, 0.0  ;;  %v8770_v49 = vld [vmem:[%s14217_s4 + $0x1c0] sm:$0xff] }
 0x590   : > { %v1959_v22 = vmax.f32 %v1938_v4, 0.0  ;;  %v10423_v58 = vpop.f32.mrb[26].mxu1  ;;  %v1940_v7 = vpop.f32.mrb[33].mxu0  ;;  %v1966_v4 = vmax.f32 %v10415_v11, 0.0 }
 0x591   : > { %v1960_v23 = vmax.f32 %v1940_v7, 0.0  ;;  %v10431_v6 = vpop.f32.mrb[27].mxu1  ;;  %v1942_v28 = vpop.f32.mrb[34].mxu0  ;;  %v1998_v40 = vmul.f32 %v8754_v36, %v1965_v38  ;;  %v8759_v36 = vld [vmem:[%s14217_s4 + $0xe8] sm:$0xff] }
 0x592   : > { %v1992_v8 = vmul.f32 %v8748_v2, %v1959_v22  ;;  %v2050_v18 = vmul.f32 %v8764_v53, %v1959_v22  ;;  %v1944_v55 = vpop.f32.mrb[35].mxu0  ;;  %v1963_v25 = vmax.f32 %v1942_v28, 0.0  ;;  %v8755_v53 = vld [vmem:[%s14217_s4 + $0xc8] sm:$0xff]  ;;  %v2056_v28 = vmul.f32 %v8770_v49, %v1965_v38 }
 0x593   : > { %v1993_v12 = vmul.f32 %v8749_v54, %v1960_v23  ;;  %v2051_v27 = vmul.f32 %v8765_v30, %v1960_v23  ;;  %v1964_v17 = vmax.f32 %v1944_v55, 0.0  ;;  %v8771_v23 = vld [vmem:[%s14217_s4 + $0x1c8] sm:$0xff]  ;;  %v1999_v55 = vmul.f32 %v8755_v53, %v1966_v4 }
 0x594   : > { %v2007_v41 = vadd.f32 %v2006_v13, %v1992_v8  ;;  %v2065_v14 = vadd.f32 %v2064_v47, %v2050_v18  ;;  %v1996_v56 = vmul.f32 %v8752_v42, %v1963_v25  ;;  %v2054_v0 = vmul.f32 %v8768_v37, %v1963_v25  ;;  %v8773_v25 = vld [vmem:[%s14217_s4 + $0x1d8] sm:$0xff]  ;;  %v8758_v37 = vld [vmem:[%s14217_s4 + $0xe0] sm:$0xff] }
 0x595   : > { %v1997_v2 = vmul.f32 %v8753_v62, %v1964_v17  ;;  %v2055_v54 = vmul.f32 %v8769_v63, %v1964_v17  ;;  %v2057_v15 = vmul.f32 %v8771_v23, %v1966_v4  ;;  %v1970_v62 = vmax.f32 %v10431_v6, 0.0  ;;  %v8775_v6 = vld [vmem:[%s14217_s4 + $0x1e8] sm:$0xff]  ;;  %v8776_v23 = vld [vmem:[%s14217_s4 + $0x1f0] sm:$0xff] }
 0x596   : > { %v2008_v59 = vadd.f32 %v2007_v41, %v1993_v12  ;;  %v2066_v21 = vadd.f32 %v2065_v14, %v2051_v27  ;;  %v10445_v39 = vpop.f32.mrb[28].mxu1 }
 0x597   : > { %v1948_v57 = vpop.f32.mrb[36].mxu0  ;;  %v10453_v10 = vpop.f32.mrb[29].mxu1  ;;  %v2191_v19 = vmax.f32 %v10445_v39, 0.0 }
 0x598   : > { %v2009_v3 = vadd.f32 %v2008_v59, %v1994_v33  ;;  %v2067_v20 = vadd.f32 %v2066_v21, %v2052_v29  ;;  %v10459_v34 = vpop.f32.mrb[37].mxu0  ;;  %v10461_v60 = vpop.f32.mrb[30].mxu1  ;;  %v2192_v48 = vmax.f32 %v10453_v10, 0.0  ;;  %v1967_v18 = vmax.f32 %v1948_v57, 0.0  ;;  %v8757_v33 = vld [vmem:[%s14217_s4 + $0xd8] sm:$0xff]  ;;  %v8798_v59 = vld [vmem:[%s9517_s30 + $0xa] sm:$0xff] }
 0x599   : > { %v10468_v32 = vpop.f32.mrb[31].mxu1  ;;  %v10470_v61 = vpop.f32.mrb[38].mxu0  ;;  %2285 = vrot.lane.b32.xlu1 %v2191_v19, %s9452_s8  ;;  %v2193_v30 = vmax.f32 %v10461_v60, 0.0  ;;  %v1968_v12 = vmax.f32 %v10459_v34, 0.0  ;;  %v1969_v21 = vmax.f32 %v10423_v58, 0.0  ;;  %v10540_v38 = vrot.slane %v8798_v59, %v9512_v5 }
 0x59a   : > { %v2010_v9 = vadd.f32 %v2009_v3, %v1995_v52  ;;  %v2068_v13 = vadd.f32 %v2067_v20, %v2053_v31  ;;  %v10478_v47 = vpop.f32.mrb[39].mxu0  ;;  %2287 = vrot.lane.b32.xlu0 %v2192_v48, %s9452_s8  ;;  %v2194_v11 = vmax.f32 %v10468_v32, 0.0  ;;  %v2000_v17 = vmul.f32 %v8756_v46, %v1967_v18  ;;  %v8774_v20 = vld [vmem:[%s14217_s4 + $0x1e0] sm:$0xff] }
 0x59b   : > { %v2058_v31 = vmul.f32 %v8772_v45, %v1967_v18  ;;  %v2001_v34 = vmul.f32 %v8757_v33, %v1968_v12  ;;  %v2517_v63 = vcombine.high %v8798_v59, %v8798_v59  ;;  %v2002_v49 = vmul.f32 %v8758_v37, %v1969_v21  ;;  %v8761_v45 = vld [vmem:[%s14217_s4 + $0xf8] sm:$0xff] }
 0x59c   : > { %v2011_v22 = vadd.f32 %v2010_v9, %v1996_v56  ;;  %v2069_v7 = vadd.f32 %v2068_v13, %v2054_v0  ;;  %v2059_v0 = vmul.f32 %v8773_v25, %v1968_v12  ;;  %v1972_v46 = vmax.f32 %v10478_v47, 0.0  ;;  %v8777_v12 = vld [vmem:[%s14217_s4 + $0x1f8] sm:$0xff] }
 0x59d   : > { %2289 = vrot.lane.b32.xlu1 %v2193_v30, %s9452_s8 }
 0x59e   : > { %v2012_v24 = vadd.f32 %v2011_v22, %v1997_v2  ;;  %v2070_v8 = vadd.f32 %v2069_v7, %v2055_v54  ;;  %2291 = vrot.lane.b32.xlu0 %v2194_v11, %s9452_s8  ;;  %v2060_v2 = vmul.f32 %v8774_v20, %v1969_v21  ;;  %v1971_v7 = vmax.f32 %v10470_v61, 0.0 }
 0x59f   : > { %v10508_v27 = vpop.f32.mrb[40].mxu0  ;;  %v2003_v54 = vmul.f32 %v8759_v36, %v1970_v62  ;;  %v10565_v61 = vcombine.high %v10540_v38, %v10540_v38  ;;  %v2547_v20 = vshll.u32 %v10540_v38, 16 }
 0x5a0   : > { %v2013_v41 = vadd.f32 %v2012_v24, %v1998_v40  ;;  %v2071_v14 = vadd.f32 %v2070_v8, %v2056_v28  ;;  %v2277_v16 = vmax.f32 %v10508_v27, 0.0  ;;  %v10514_v29 = vpop.f32.mrb[41].mxu0  ;;  %v8760_v40 = vld [vmem:[%s14217_s4 + $0xf0] sm:$0xff]  ;;  %v10568_v28 = vshrl.u32 %v10540_v38, 16 }
 0x5a1   : > { %v2278_v52 = vmax.f32 %v10514_v29, 0.0  ;;  %v10522_v42 = vpop.f32.mrb[42].mxu0  ;;  %v10571_v24 = vrot.slane %v2517_v63, %v9512_v5  ;;  %v2061_v8 = vmul.f32 %v8775_v6, %v1970_v62  ;;  %v2062_v33 = vmul.f32 %v8776_v23, %v1971_v7 }
 0x5a2   : > { %v2014_v57 = vadd.f32 %v2013_v41, %v1999_v55  ;;  %v2072_v3 = vadd.f32 %v2071_v14, %v2057_v15  ;;  %2311 = vrot.lane.b32.xlu1 %v2277_v16, %s9452_s8  ;;  %v10530_v58 = vpop.f32.mrb[43].mxu0  ;;  %v2279_v13 = vmax.f32 %v10522_v42, 0.0  ;;  %v10581_v15 = vshrl.u32 %v10565_v61, 16 }
 0x5a3   : > { %2313 = vrot.lane.b32.xlu0 %v2278_v52, %s9452_s8  ;;  %v2280_v4 = vmax.f32 %v10530_v58, 0.0  ;;  %v2004_v41 = vmul.f32 %v8760_v40, %v1971_v7  ;;  %v2658_v47 = vrot.slane %v10568_v28, 7  ;;  %v10589_v21 = vshrl.u32 %v10571_v24, 16 }
 0x5a4   : > { %v2015_v56 = vadd.f32 %v2014_v57, %v2000_v17  ;;  %v2073_v9 = vadd.f32 %v2072_v3, %v2058_v31  ;;  %v10593_v25 = vcombine.high %v10571_v24, %v10571_v24  ;;  %v2005_v57 = vmul.f32 %v8761_v45, %v1972_v46  ;;  %v10627_v7 = vld.sshfl [vmem:[%s9517_s30 + $0x12] sm:$0x3 pattern:$0x76325410] }
 0x5a5   : > { %v2063_v31 = vmul.f32 %v8777_v12, %v1972_v46  ;;  %v2659_v3 = vrot.slane %v10581_v15, 7  ;;  %v2550_v62 = vshll.u32 %v10565_v61, 16  ;;  %v2660_v36 = vrot.slane %v10589_v21, 7 }
 0x5a6   : > { %v2016_v53 = vadd.f32 %v2015_v56, %v2001_v34  ;;  %v2074_v22 = vadd.f32 %v2073_v9, %v2059_v0  ;;  %2315 = vrot.lane.b32.xlu1 %v2279_v13, %s9452_s8  ;;  %v2553_v56 = vshll.u32 %v10571_v24, 16  ;;  %v2556_v9 = vshll.u32 %v10593_v25, 16 }
 0x5a7   : > { %2317 = vrot.lane.b32.xlu0 %v2280_v4, %s9452_s8  ;;  %v9099_v0 = vpack.i.bf16 %v2550_v62, %v2547_v20  ;;  %v2580_v6 = vrot.slane %v10540_v38, 7  ;;  %v2559_v23 = vshll.u32 %v10627_v7, 16 }
 0x5a8   : > { %v2017_v18 = vadd.f32 %v2016_v53, %v2002_v49  ;;  %v2075_v55 = vadd.f32 %v2074_v22, %v2060_v2  ;;  %v9104_v49 = vpack.i.bf16 %v2556_v9, %v2553_v56  ;;  %v2581_v2 = vrot.slane %v10565_v61, 7 }
 0x5a9   : > { %v2582_v53 = vrot.slane %v10571_v24, 7  ;;  %v10624_v22 = vshrl.u32 %v10593_v25, 16 }
 0x5aa   : > { %v2018_v14 = vadd.f32 %v2017_v18, %v2003_v54  ;;  %v2076_v59 = vadd.f32 %v2075_v55, %v2061_v8  ;;  %2639 = vrot.lane.b32.xlu1 %v10540_v38, %s9452_s8  ;;  %v10631_v54 = vshrl.u32 %v10627_v7, 16  ;;  %v2914_v8 = vrot.slane %v2547_v20, 1 }
 0x5ab   : > { %2641 = vrot.lane.b32.xlu0 %v10565_v61, %s9452_s8  ;;  %v2661_v40 = vrot.slane %v10624_v22, 7 }
 0x5ac   : > { %v2019_v37 = vadd.f32 %v2018_v14, %v2004_v41  ;;  %v2077_v17 = vadd.f32 %v2076_v59, %v2062_v33  ;;  %v2662_v18 = vrot.slane %v10631_v54, 7  ;;  %v9109_v55 = vpack.i.bf16 %v2914_v8, %v2559_v23 }
 0x5ae   : > { %2643 = vrot.lane.b32.xlu1 %v10571_v24, %s9452_s8  ;;  %v10600_v34 = vadd.f32 %v2019_v37, %v2005_v57  ;;  %v10602_v63 = vadd.f32 %v2077_v17, %v2063_v31 }
 0x5af   : > { %2663 = vrot.lane.b32.xlu0 %v2658_v47, %s9453_s9 }
 0x5b0   : > { %14221 = vst [vmem:[#allocation5_spill] sm:$0xff] %v10600_v34  ;;  %14222 = vst [vmem:[#allocation6_spill] sm:$0xff] %v10602_v63 }
 0x5b2   : > { %2665 = vrot.lane.b32.xlu1 %v2659_v3, %s9453_s9 }
 0x5b3   : > { %2667 = vrot.lane.b32.xlu0 %v2660_v36, %s9453_s9 }
 0x5b6   : > { %9100 = vrot.lane.b32.xlu1 %v9099_v0, %s9452_s8 }
 0x5b7   : > { %9105 = vrot.lane.b32.xlu0 %v9104_v49, %s9452_s8 }
 0x5ba   : > { %2585 = vrot.lane.b32.xlu1 %v2580_v6, %s9453_s9 }
 0x5bb   : > { %2587 = vrot.lane.b32.xlu0 %v2581_v2, %s9453_s9 }
 0x5be   : > { %2589 = vrot.lane.b32.xlu1 %v2582_v53, %s9453_s9 }
 0x5bf   : > { %2645 = vrot.lane.b32.xlu0 %v10593_v25, %s9452_s8 }
 0x5c2   : > { %2647 = vrot.lane.b32.xlu1 %v10627_v7, %s9452_s8 }
 0x5c3   : > { %2669 = vrot.lane.b32.xlu0 %v2661_v40, %s9453_s9  ;;  %v2583_v40 = vrot.slane %v10593_v25, 7 }
 0x5c6   : > { %2671 = vrot.lane.b32.xlu1 %v2662_v18, %s9453_s9  ;;  %v2584_v18 = vrot.slane %v10627_v7, 7 }
 0x5c7   : > { %9110 = vrot.lane.b32.xlu0 %v9109_v55, %s9452_s8  ;;  %v2915_v55 = vrot.slane %v2550_v62, 1 }
 0x60b   : > { %v2286_v46 = vpop.permute.xlu1 %2285 }
 0x60c   : > { %v2288_v45 = vpop.permute.xlu0 %2287 }
 0x60d   : > { %v2293_v12 = vsel %vm382_vm0, %v2286_v46, %v2288_v45  ;;  %v2300_v33 = vadd.f32 %v2288_v45, %v2192_v48  ;;  %v2916_v46 = vrot.slane %v2553_v56, 1 }
 0x60e   : > { %v2299_v47 = vadd.f32 %v2293_v12, %v2191_v19 }
 0x60f   : > { %v2290_v41 = vpop.permute.xlu1 %2289  ;;  %v2304_v3 = vadd.f32 %v2300_v33, %v2278_v52 }
 0x610   : > { %v2292_v14 = vpop.permute.xlu0 %2291  ;;  %v2303_v10 = vadd.f32 %v2299_v47, %v2277_v16 }
 0x611   : > { %v2294_v59 = vsel %vm382_vm0, %v2290_v41, %v2292_v14  ;;  %v2302_v37 = vadd.f32 %v2292_v14, %v2194_v11 }
 0x612   : > { %v2301_v57 = vadd.f32 %v2294_v59, %v2193_v30 }
 0x613   : > { %v2306_v39 = vadd.f32 %v2302_v37, %v2280_v4  ;;  %v9114_v37 = vpack.i.bf16 %v2916_v46, %v2915_v55  ;;  %v10747_v46 = vld [vmem:[%s14212_s2] sm:$0xff]  }
 0x614   : > { %v2312_v17 = vpop.permute.xlu1 %2311  ;;  %v2305_v32 = vadd.f32 %v2301_v57, %v2279_v13 }
 0x615   : > { %v2314_v31 = vpop.permute.xlu0 %2313 }
 0x616   : > { %v2319_v20 = vsel %vm382_vm0, %v2312_v17, %v2314_v31  ;;  %v2326_v48 = vadd.f32 %v2314_v31, %v2304_v3 }
 0x617   : > { %v2325_v19 = vadd.f32 %v2319_v20, %v2303_v10 }
 0x618   : > { %v2316_v36 = vpop.permute.xlu1 %2315  ;;  %v2330_v52 = vmul.f32 0.25, %v2326_v48 }
 0x619   : > { %v2318_v60 = vpop.permute.xlu0 %2317  ;;  %v2329_v6 = vmul.f32 0.25, %v2325_v19  ;;  %v2917_v19 = vrot.slane %v2556_v9, 1 }
 0x61a   : > { %v2320_v30 = vsel %vm382_vm0, %v2316_v36, %v2318_v60  ;;  %v2328_v11 = vadd.f32 %v2318_v60, %v2306_v39 }
 0x61b   : > { %v2327_v29 = vadd.f32 %v2320_v30, %v2305_v32 }
 0x61c   : > { %v2332_v0 = vmul.f32 0.25, %v2328_v11  ;;  %v2640_v49 = vpop.permute.xlu1 %2639  ;;  %v2918_v11 = vrot.slane %v2559_v23, 1 }
 0x61d   : > { %v2331_v27 = vmul.f32 0.25, %v2327_v29  ;;  %v2642_v16 = vpop.permute.xlu0 %2641 }
 0x61e   : > { %v2334_v2 = vpack.c.bf16 %v2332_v0, %v2330_v52  ;;  %v2649_v42 = vsel %vm382_vm0, %v2640_v49, %v2642_v16 }
 0x61f   : > { %v2333_v53 = vpack.c.bf16 %v2331_v27, %v2329_v6  ;;  %v2677_v8 = vsel %vm9605_vm3, %v10568_v28, %v2649_v42 }
 0x620   : > { %2346 = vrot.lane.b32.xlu1 %v2334_v2, %s9453_s9  ;;  %2339 = vrot.lane.b32.xlu0 %v2334_v2, %s9452_s8  ;;  %v10668_v58 = vpop.permute.xlu1 %2643 }
 0x621   : > { %2367 = vmatprep.subr.bf16.mxu1 %v2334_v2  ;;  %v2664_v13 = vpop.permute.xlu0 %2663  ;;  %v2650_v4 = vsel %vm382_vm0, %v2642_v16, %v10668_v58  ;;  %v9119_v2 = vpack.i.bf16 %v2918_v11, %v2917_v19 }
 0x622   : > { %2368 = vmatpush1.bf16.msra.mxu1 %v2333_v53  ;;  %v2678_v45 = vsel %vm9605_vm3, %v10581_v15, %v2650_v4 }
 0x624   : > { %2337 = vrot.lane.b32.xlu1 %v2333_v53, %s9452_s8  ;;  %2344 = vrot.lane.b32.xlu0 %v2333_v53, %s9453_s9  ;;  %v2666_v12 = vpop.permute.xlu1 %2665 }
 0x625   : > { %v2668_v41 = vpop.permute.xlu0 %2667  ;;  %v2673_v14 = vsel %vm407_vm4, %v2664_v13, %v2666_v12 }
 0x626   : > { %v2674_v33 = vsel %vm407_vm4, %v2666_v12, %v2668_v41  ;;  %v10689_v59 = vsel %vm412_vm1, %v2677_v8, %v2673_v14 }
 0x627   : > { %v10692_v47 = vsel %vm412_vm1, %v2678_v45, %v2674_v33  ;;  %v2702_v62 = vshrl.u32 %v10689_v59, 16  ;;  %v2705_v56 = vshll.u32 %v10689_v59, 16 }
 0x628   : > { %2591 = vrot.lane.b32.xlu1 %v2583_v40, %s9453_s9  ;;  %2593 = vrot.lane.b32.xlu0 %v2584_v18, %s9453_s9  ;;  %v2709_v17 = vshrl.u32 %v10692_v47, 16  ;;  %v2712_v57 = vshll.u32 %v10692_v47, 16  ;;  %v9101_v31 = vpop.permute.xlu1 %9100 }
 0x629   : > { %v10700_v3 = vpop.permute.xlu0 %9105  ;;  %v2704_v20 = vrot.slane %v2702_v62, 6  ;;  %v2707_v10 = vrot.slane %v2705_v56, 7  ;;  %v9103_v48 = vunpack.i.h.bf16 %v9101_v31  ;;  %v9102_v36 = vunpack.i.l.bf16 %v9101_v31 }
 0x62a   : > { %v9107_v39 = vunpack.i.l.bf16 %v10700_v3  ;;  %v2711_v32 = vrot.slane %v2709_v17, 6  ;;  %v2714_v60 = vrot.slane %v2712_v57, 7 }
 0x62b   : > { %v2571_v30 = vsel %vm382_vm0, %v9102_v36, %v9103_v48  ;;  %v2708_v0 = vor.u32 %v2707_v10, %v2704_v20  ;;  %v9108_v36 = vunpack.i.h.bf16 %v10700_v3 }
 0x62c   : > { %9115 = vrot.lane.b32.xlu1 %v9114_v37, %s9452_s8  ;;  %2938 = vrot.lane.b32.xlu0 %v10540_v38, %s9453_s9  ;;  %v2572_v29 = vsel %vm382_vm0, %v9103_v48, %v9107_v39  ;;  %v2586_v52 = vpop.permute.xlu1 %2585  ;;  %v2599_v9 = vsel %vm9605_vm3, %v10540_v38, %v2571_v30  ;;  %v2715_v23 = vor.u32 %v2714_v60, %v2711_v32 }
 0x62d   : > { %v2588_v49 = vpop.permute.xlu0 %2587  ;;  %v2600_v16 = vsel %vm9605_vm3, %v10565_v61, %v2572_v29 }
 0x62e   : > { %v2595_v6 = vsel %vm407_vm4, %v2586_v52, %v2588_v49 }
 0x62f   : > { %v2606_v27 = vsel %vm412_vm1, %v2599_v9, %v2595_v6 }
 0x630   : > { %2940 = vrot.lane.b32.xlu1 %v10565_v61, %s9453_s9  ;;  %2942 = vrot.lane.b32.xlu0 %v10571_v24, %s9453_s9  ;;  %v10726_v53 = vpop.permute.xlu1 %2589  ;;  %v2742_v42 = vsel %vm9641_vm7, %v2606_v27, %v2708_v0 }
 0x631   : > { %v2596_v13 = vsel %vm407_vm4, %v2588_v49, %v10726_v53  ;;  %v2748_v4 = vsel %vm567_vm8, %v2742_v42, 1065369472  ;;  %v2646_v45 = vpop.permute.xlu0 %2645  ;;  %v2573_v49 = vsel %vm382_vm0, %v9107_v39, %v9108_v36 }
 0x632   : > { %v2610_v40 = vsel %vm412_vm1, %v2600_v16, %v2596_v13  ;;  %v2757_v18 = vsel %vm588_vm9, %v2748_v4, 0  ;;  %v2651_v14 = vsel %vm382_vm0, %v10668_v58, %v2646_v45  ;;  %v2601_v3 = vsel %vm9605_vm3, %v10571_v24, %v2573_v49 }
 0x633   : > { %v2743_v8 = vsel %vm9641_vm7, %v2610_v40, %v2715_v23  ;;  %v2679_v37 = vsel %vm9605_vm3, %v10589_v21, %v2651_v14 }
 0x634   : > { %9120 = vrot.lane.b32.xlu1 %v9119_v2, %s9452_s8  ;;  %2944 = vrot.lane.b32.xlu0 %v10593_v25, %s9453_s9  ;;  %v2750_v55 = vsel %vm567_vm8, %v2743_v8, 1065369472  ;;  %v2648_v12 = vpop.permute.xlu1 %2647 }
 0x635   : > { %8801 = vmatprep.subr.msk.bf16.mxu0 %vm588_vm9, %v2750_v55  ;;  %v2670_v33 = vpop.permute.xlu0 %2669  ;;  %v2652_v62 = vsel %vm382_vm0, %v2646_v45, %v2648_v12  ;;  %v2681_v31 = vsel %vm9605_vm3, %v10631_v54, %v2648_v12 }
 0x636   : > { %2768 = vmatpush1.bf16.msra.mxu0 %v2757_v18  ;;  %v2675_v17 = vsel %vm407_vm4, %v2668_v41, %v2670_v33  ;;  %v2680_v57 = vsel %vm9605_vm3, %v10624_v22, %v2652_v62 }
 0x637   : > { %v10767_v20 = vsel %vm412_vm1, %v2679_v37, %v2675_v17 }
 0x638   : > { %2946 = vrot.lane.b32.xlu1 %v10627_v7, %s9453_s9  ;;  %v2672_v56 = vpop.permute.xlu1 %2671  ;;  %v2716_v19 = vshrl.u32 %v10767_v20, 16  ;;  %v2719_v32 = vshll.u32 %v10767_v20, 16 }
 0x639   : > { %8802 = vmatmul.mubr.msk.bf16.vlgmr.msra.gmra.mrb[44].mxu0 %vm584_vm10, %v10747_v46  ;;  %v2676_v58 = vsel %vm407_vm4, %v2670_v33, %v2672_v56  ;;  %v10769_v10 = vpop.permute.xlu0 %9110  ;;  %v10775_v41 = vsel %vm412_vm1, %v2681_v31, %v2672_v56 }
 0x63a   : > { %2842 = vmatprep.mubr.bf16.mxu0 %v14214_v1  ;;  %v10772_v48 = vsel %vm412_vm1, %v2680_v57, %v2676_v58  ;;  %v2730_v11 = vshrl.u32 %v10775_v41, 16  ;;  %v2733_v29 = vshll.u32 %v10775_v41, 16  ;;  %v9112_v0 = vunpack.i.l.bf16 %v10769_v10 }
 0x63b   : > { %v2723_v60 = vshrl.u32 %v10772_v48, 16  ;;  %v2726_v30 = vshll.u32 %v10772_v48, 16  ;;  %v2718_v6 = vrot.slane %v2716_v19, 6  ;;  %v2721_v27 = vrot.slane %v2719_v32, 7 }
 0x63c   : > { %v2732_v2 = vrot.slane %v2730_v11, 6  ;;  %v2735_v42 = vrot.slane %v2733_v29, 7  ;;  %v2574_v40 = vsel %vm382_vm0, %v9108_v36, %v9112_v0  ;;  %v2603_v39 = vsel %vm9605_vm3, %v10627_v7, %v9112_v0 }
 0x63d   : > { %v2725_v16 = vrot.slane %v2723_v60, 6  ;;  %v2728_v23 = vrot.slane %v2726_v30, 7  ;;  %v2602_v45 = vsel %vm9605_vm3, %v10593_v25, %v2574_v40  ;;  %v2722_v33 = vor.u32 %v2721_v27, %v2718_v6  ;;  %v9180_v6 = vld [vmem:[%s14215_s3 + $0x10] sm:$0xff]  }
 0x63e   : > { %v2736_v18 = vor.u32 %v2735_v42, %v2732_v2  ;;  %v14146_v11 = vrot.slane %v10540_v38, 1  ;;  %v14145_v29 = vrot.slane %v10565_v61, 1 }
 0x63f   : > { %v2729_v14 = vor.u32 %v2728_v23, %v2725_v16 }
 0x692   : > { %v2347_v52 = vpop.permute.xlu1 %2346  ;;  %v2340_v9 = vpop.permute.xlu0 %2339 }
 0x693   : > { %2369 = vmatprep.subr.bf16.mxu1 %v2340_v9 }
 0x696   : > { %v2338_v13 = vpop.permute.xlu1 %2337  ;;  %v2345_v4 = vpop.permute.xlu0 %2344 }
 0x697   : > { %v2341_v8 = vsel %vm382_vm0, %v2338_v13, %v2340_v9  ;;  %v2348_v62 = vsel %vm407_vm4, %v2345_v4, %v2347_v52 }
 0x698   : > { %2370 = vmatpush1.bf16.msra.mxu1 %v2341_v8 }
 0x699   : > { %2371 = vmatprep.subr.bf16.mxu1 %v2347_v52  ;;  %v9113_v52 = vunpack.i.h.bf16 %v10769_v10 }
 0x69a   : > { %v2592_v55 = vpop.permute.xlu1 %2591  ;;  %v2594_v12 = vpop.permute.xlu0 %2593 }
 0x69b   : > { %v2597_v56 = vsel %vm407_vm4, %v10726_v53, %v2592_v55  ;;  %v2598_v37 = vsel %vm407_vm4, %v2592_v55, %v2594_v12  ;;  %v2622_v17 = vsel %vm412_vm1, %v2603_v39, %v2594_v12 }
 0x69c   : > { %v2614_v57 = vsel %vm412_vm1, %v2601_v3, %v2597_v56  ;;  %v2618_v31 = vsel %vm412_vm1, %v2602_v45, %v2598_v37  ;;  %2372 = vmatpush1.bf16.msra.mxu1 %v2348_v62  ;;  %v2746_v53 = vsel %vm9641_vm7, %v2622_v17, %v2736_v18  ;;  %v14143_v56 = vrot.slane %v10593_v25, 1 }
 0x69d   : > { %v2745_v58 = vsel %vm9641_vm7, %v2618_v31, %v2729_v14  ;;  %v2744_v36 = vsel %vm9641_vm7, %v2614_v57, %v2722_v33  ;;  %2373 = vmatprep.subr.bf16.mxu1 %v10039_v35  ;;  %v2756_v27 = vsel %vm567_vm8, %v2746_v53, 1065369472  ;;  %v14144_v33 = vrot.slane %v10571_v24, 1 }
 0x69e   : > { %v9116_v19 = vpop.permute.xlu1 %9115  ;;  %v2939_v32 = vpop.permute.xlu0 %2938  ;;  %v2754_v60 = vsel %vm567_vm8, %v2745_v58, 1065369472  ;;  %v2752_v30 = vsel %vm567_vm8, %v2744_v36, 1065369472  ;;  %v2765_v8 = vsel %vm588_vm9, %v2756_v27, 0  ;;  %v14142_v37 = vrot.slane %v10627_v7, 1 }
 0x69f   : > { %v9118_v9 = vunpack.i.h.bf16 %v9116_v19  ;;  %v9117_v0 = vunpack.i.l.bf16 %v9116_v19  ;;  %8803 = vmatprep.subr.msk.bf16.mxu0 %vm588_vm9, %v2754_v60  ;;  %v2761_v49 = vsel %vm588_vm9, %v2752_v30, 0  ;;  %v9181_v36 = vld [vmem:[%s14215_s3 + $0x18] sm:$0xff]  }
 0x6a0   : > { %2811 = vmatpush1.bf16.msra.mxu0 %v2761_v49  ;;  %2374 = vmatpush1.bf16.msra.mxu1 %v10039_v35 }
 0x6a1   : > { %v2929_v16 = vsel %vm382_vm0, %v9113_v52, %v9117_v0  ;;  %v2930_v23 = vsel %vm382_vm0, %v9117_v0, %v9118_v9  ;;  %8957 = vmatprep.subr.bf16.mxu0 %v14216_v43 }
 0x6a2   : > { %v2941_v10 = vpop.permute.xlu1 %2940  ;;  %v2952_v2 = vsel %vm9605_vm3, %v14146_v11, %v2929_v16  ;;  %v2953_v42 = vsel %vm9605_vm3, %v14145_v29, %v2930_v23  ;;  %v2943_v13 = vpop.permute.xlu0 %2942 }
 0x6a3   : > { %v2948_v4 = vsel %vm407_vm4, %v2939_v32, %v2941_v10  ;;  %v2949_v40 = vsel %vm407_vm4, %v2941_v10, %v2943_v13  ;;  %8804 = vmatmul.mubr.msk.bf16.vlgmr.msra.gmra.mrb[48].mxu0 %vm584_vm10, %v10747_v46  ;;  %8788 = vmatmul.mubr.msk.bf16.vlgmr.msra.gmra.mrb[32].mxu1 %vm1204_vm12, %v9180_v6 }
 0x6a4   : > { %v10843_v3 = vsel %vm412_vm1, %v2952_v2, %v2948_v4  ;;  %v10846_v39 = vsel %vm412_vm1, %v2953_v42, %v2949_v40  ;;  %8958 = vmatpush3.bf16.msra.mxu0 %v2765_v8  ;;  %2409 = vmatprep.mubr.bf16.mxu1 %v14214_v1 }
 0x6a5   : > { %v2977_v18 = vshrl.u32 %v10843_v3, 16  ;;  %v2980_v55 = vshll.u32 %v10843_v3, 16  ;;  %v2984_v45 = vshrl.u32 %v10846_v39, 16  ;;  %v2987_v12 = vshll.u32 %v10846_v39, 16  ;;  %8959 = vmatprep.mubr.msk.bf16.mxu0 %vm9456_vm11, %v14216_v43 }
 0x6a6   : > { %v9121_v14 = vpop.permute.xlu1 %9120  ;;  %v2945_v62 = vpop.permute.xlu0 %2944 }
 0x6a7   : > { %v2979_v17 = vrot.slane %v2977_v18, 6  ;;  %v2982_v57 = vrot.slane %v2980_v55, 7  ;;  %v2986_v31 = vrot.slane %v2984_v45, 6  ;;  %v2989_v58 = vrot.slane %v2987_v12, 7 }
 0x6a8   : > { %v9123_v53 = vunpack.i.h.bf16 %v9121_v14  ;;  %v9122_v19 = vunpack.i.l.bf16 %v9121_v14  ;;  %v2950_v32 = vsel %vm407_vm4, %v2943_v13, %v2945_v62 }
 0x6a9   : > { %v2990_v60 = vor.u32 %v2989_v58, %v2986_v31  ;;  %v2983_v6 = vor.u32 %v2982_v57, %v2979_v17 }
 0x6aa   : > { %v2931_v30 = vsel %vm382_vm0, %v9118_v9, %v9122_v19  ;;  %v2932_v52 = vsel %vm382_vm0, %v9122_v19, %v9123_v53  ;;  %v2947_v0 = vpop.permute.xlu1 %2946  ;;  %v2956_v49 = vsel %vm9605_vm3, %v14142_v37, %v9123_v53 }
 0x6ab   : > { %v2954_v27 = vsel %vm9605_vm3, %v14144_v33, %v2931_v30  ;;  %v2951_v16 = vsel %vm407_vm4, %v2945_v62, %v2947_v0  ;;  %v2955_v9 = vsel %vm9605_vm3, %v14143_v56, %v2932_v52  ;;  %v10878_v23 = vsel %vm412_vm1, %v2956_v49, %v2947_v0  ;;  %8789 = vmatmul.mubr.msk.bf16.gmra.mrb[36].mxu1 %vm1204_vm12, %v9181_v36  ;;  %v2434_v56 = vld [vmem:[%s14133_s5 + $0x30] sm:$0xff] }
 0x6ac   : > { %v10882_v10 = vsel %vm412_vm1, %v2954_v27, %v2950_v32  ;;  %v10885_v2 = vsel %vm412_vm1, %v2955_v9, %v2951_v16  ;;  %v3005_v42 = vshrl.u32 %v10878_v23, 16  ;;  %v3008_v13 = vshll.u32 %v10878_v23, 16  ;;  %8960 = vmatmul.mubr.msk.bf16.vlgmr.msra.gmra.mrb[52].mxu0 %vm584_vm10, %v10747_v46  ;;  %3074 = vmatprep.mubr.bf16.mxu1 %v14214_v1 }
 0x6ad   : > { %14223 = vst [vmem:[#allocation7_spill] sm:$0xff] %v10882_v10  ;;  %14224 = vst [vmem:[#allocation8_spill] sm:$0xff] %v10885_v2  ;;  %v2991_v4 = vshrl.u32 %v10882_v10, 16  ;;  %v2994_v40 = vshll.u32 %v10882_v10, 16  ;;  %v2998_v8 = vshrl.u32 %v10885_v2, 16  ;;  %v3001_v18 = vshll.u32 %v10885_v2, 16  ;;  %3117 = vmatprep.mubr.bf16.mxu0 %v14214_v1 }
 0x6ae   : > { %v3007_v55 = vrot.slane %v3005_v42, 6  ;;  %v3010_v45 = vrot.slane %v3008_v13, 7  ;;  %v3018_v12 = vsel %vm9641_vm7, %v10692_v47, %v2990_v60  ;;  %v3017_v14 = vsel %vm9641_vm7, %v10689_v59, %v2983_v6 }
 0x6af   : > { %v2993_v62 = vrot.slane %v2991_v4, 6  ;;  %v2996_v17 = vrot.slane %v2994_v40, 7  ;;  %v3000_v57 = vrot.slane %v2998_v8, 6  ;;  %v3003_v31 = vrot.slane %v3001_v18, 7  ;;  %v2428_v4 = vld [vmem:[%s14133_s5] sm:$0xff] }
 0x6b0   : > { %v3011_v58 = vor.u32 %v3010_v45, %v3007_v55  ;;  %v3025_v36 = vsel %vm567_vm8, %v3018_v12, 1065369472  ;;  %v3023_v53 = vsel %vm567_vm8, %v3017_v14, 1065369472  ;;  %v8790_v40 = vld [vmem:[%s14133_s5 + $0x40] sm:$0xff]  ;;  %v2429_v12 = vld [vmem:[%s14133_s5 + $0x8] sm:$0xff] }
 0x6b1   : > { %8806 = vmatprep.subr.msk.bf16.mxu1 %vm588_vm9, %v3025_v36  ;;  %v3032_v19 = vsel %vm588_vm9, %v3023_v53, 0  ;;  %v3004_v32 = vor.u32 %v3003_v31, %v3000_v57  ;;  %v2997_v30 = vor.u32 %v2996_v17, %v2993_v62  ;;  %v8791_v14 = vld [vmem:[%s14133_s5 + $0x48] sm:$0xff]  ;;  %v8792_v36 = vld [vmem:[%s14133_s5 + $0x50] sm:$0xff] }
 0x6b2   : > { %3043 = vmatpush1.bf16.msra.mxu1 %v3032_v19  ;;  %v3021_v59 = vsel %vm9641_vm7, %v10775_v41, %v3011_v58  ;;  %v2430_v58 = vld [vmem:[%s14133_s5 + $0x10] sm:$0xff] }
 0x6b3   : > { %8963 = vmatprep.subr.bf16.mxu1 %v14216_v43  ;;  %v3020_v47 = vsel %vm9641_vm7, %v10772_v48, %v3004_v32  ;;  %v3031_v60 = vsel %vm567_vm8, %v3021_v59, 1065369472  ;;  %v3019_v52 = vsel %vm9641_vm7, %v10767_v20, %v2997_v30 }
 0x6b4   : > { %v3029_v0 = vsel %vm567_vm8, %v3020_v47, 1065369472  ;;  %v3040_v49 = vsel %vm588_vm9, %v3031_v60, 0  ;;  %v3027_v6 = vsel %vm567_vm8, %v3019_v52, 1065369472  ;;  %v2431_v47 = vld [vmem:[%s14133_s5 + $0x18] sm:$0xff] }
 0x6b5   : > { %8807 = vmatmul.mubr.msk.bf16.vlgmr.msra.gmra.mrb[40].mxu1 %vm584_vm10, %v10747_v46  ;;  %8808 = vmatprep.subr.msk.bf16.mxu0 %vm588_vm9, %v3029_v0  ;;  %v3036_v41 = vsel %vm588_vm9, %v3027_v6, 0  ;;  %v8793_v60 = vld [vmem:[%s14133_s5 + $0x58] sm:$0xff] }
 0x6b6   : > { %8964 = vmatpush3.bf16.msra.mxu1 %v3040_v49  ;;  %3086 = vmatpush1.bf16.msra.mxu0 %v3036_v41 }
 0x6b7   : > { %8965 = vmatprep.mubr.msk.bf16.mxu1 %vm9456_vm11, %v14216_v43 }
 0x6b9   : > { %8809 = vmatmul.mubr.msk.bf16.vlgmr.msra.gmra.mrb[56].mxu0 %vm584_vm10, %v10747_v46 }
 0x6ba   : > { %3393 = vmatprep.mubr.bf16.mxu0 %v14214_v1 }
 0x6bd   : > { %8966 = vmatmul.mubr.msk.bf16.vlgmr.msra.gmra.mrb[44].mxu1 %vm584_vm10, %v10747_v46 }
 0x6be   : > { %3446 = vmatprep.mubr.bf16.mxu1 %v14214_v1 }
 0x70c   : > { %v10933_v20 = vpop.f32.mrb[44].mxu0 }
 0x70d   : > { %v10935_v48 = vpop.f32.mrb[45].mxu0 }
 0x70e   : > { %v14151_v27 = vmax.f32 %v10935_v48, 0.0  ;;  %v10938_v16 = vpop.f32.mrb[46].mxu0 }
 0x70f   : > { %v10940_v9 = vpop.f32.mrb[47].mxu0  ;;  %v14154_v33 = vmax.f32 %v10938_v16, 0.0 }
 0x710   : > { %3191 = vrot.lane.b32.xlu0 %v14151_v27, %s9452_s8  ;;  %v14150_v6 = vmax.f32 %v10940_v9, 0.0 }
 0x776   : > { %v10945_v42 = vpop.f32.mrb[48].mxu0  ;;  %v2401_v13 = vpop.f32.mrb[32].mxu1 }
 0x777   : > { %v2896_v8 = vmax.f32 %v10945_v42, 0.0  ;;  %v10954_v18 = vpop.f32.mrb[49].mxu0  ;;  %v2420_v55 = vmax.f32 %v2401_v13, 0.0  ;;  %v2403_v45 = vpop.f32.mrb[33].mxu1 }
 0x778   : > { %v14148_v62 = vmax.f32 %v10954_v18, 0.0  ;;  %v10963_v17 = vpop.f32.mrb[50].mxu0  ;;  %v2421_v57 = vmax.f32 %v2403_v45, 0.0  ;;  %v2405_v31 = vpop.f32.mrb[34].mxu1 }
 0x779   : > { %3193 = vrot.lane.b32.xlu1 %v2896_v8, %s9452_s8  ;;  %v10974_v53 = vpop.f32.mrb[51].mxu0  ;;  %v2436_v19 = vmul.f32 %v2428_v4, %v2420_v55  ;;  %v2475_v32 = vmul.f32 %v8790_v40, %v2420_v55  ;;  %v2422_v30 = vmax.f32 %v2405_v31, 0.0  ;;  %v2407_v59 = vpop.f32.mrb[35].mxu1  ;;  %v2901_v41 = vmax.f32 %v10963_v17, 0.0 }
 0x77a   : > { %3195 = vrot.lane.b32.xlu0 %v14148_v62, %s9452_s8  ;;  %v2437_v52 = vmul.f32 %v2429_v12, %v2421_v57  ;;  %v2476_v0 = vmul.f32 %v8791_v14, %v2421_v57  ;;  %v2423_v49 = vmax.f32 %v2407_v59, 0.0 }
 0x77b   : > { %v2438_v13 = vmul.f32 %v2430_v58, %v2422_v30  ;;  %v2477_v4 = vmul.f32 %v8792_v36, %v2422_v30  ;;  %v2432_v36 = vld [vmem:[%s14133_s5 + $0x20] sm:$0xff] }
 0x77c   : > { %v2445_v40 = vsel %vm2444_vm13, %v2437_v52, 0.0  ;;  %v2483_v55 = vsel %vm2444_vm13, %v2476_v0, 0.0  ;;  %v2439_v45 = vmul.f32 %v2431_v47, %v2423_v49  ;;  %v2478_v31 = vmul.f32 %v8793_v60, %v2423_v49  ;;  %v8794_v30 = vld [vmem:[%s14133_s5 + $0x60] sm:$0xff]  ;;  %v2433_v0 = vld [vmem:[%s14133_s5 + $0x28] sm:$0xff] }
 0x77d   : > { %3201 = vrot.lane.b32.xlu1 %v14150_v6, %s9452_s8  ;;  %v2446_v37 = vadd.f32 %v2445_v40, %v2436_v19  ;;  %v2484_v12 = vadd.f32 %v2483_v55, %v2475_v32  ;;  %v14147_v19 = vmax.f32 %v10974_v53, 0.0  ;;  %v8795_v49 = vld [vmem:[%s14133_s5 + $0x68] sm:$0xff]  ;;  %v14149_v40 = vmax.f32 %v10933_v20, 0.0 }
 0x77e   : > { %3203 = vrot.lane.b32.xlu0 %v2901_v41, %s9452_s8  ;;  %v2448_v14 = vsel %vm2444_vm13, %v2439_v45, 0.0  ;;  %v2486_v57 = vsel %vm2444_vm13, %v2478_v31, 0.0  ;;  %v2411_v58 = vpop.f32.mrb[36].mxu1 }
 0x77f   : > { %v11004_v32 = vpop.f32.mrb[52].mxu0  ;;  %v2447_v59 = vadd.f32 %v2446_v37, %v2438_v13  ;;  %v2485_v47 = vadd.f32 %v2484_v12, %v2477_v4  ;;  %v2424_v60 = vmax.f32 %v2411_v58, 0.0  ;;  %v2413_v52 = vpop.f32.mrb[37].mxu1 }
 0x780   : > { %v8961_v55 = vpop.f32.mrb[53].mxu0  ;;  %v2425_v45 = vmax.f32 %v2413_v52, 0.0  ;;  %v2415_v31 = vpop.f32.mrb[38].mxu1 }
 0x781   : > { %3205 = vrot.lane.b32.xlu1 %v14147_v19, %s9452_s8  ;;  %v2449_v37 = vadd.f32 %v2448_v14, %v2447_v59  ;;  %v2487_v13 = vadd.f32 %v2486_v57, %v2485_v47  ;;  %v11016_v4 = vpop.f32.mrb[54].mxu0  ;;  %v2440_v12 = vmul.f32 %v2432_v36, %v2424_v60  ;;  %v2479_v58 = vmul.f32 %v8794_v30, %v2424_v60  ;;  %v8796_v55 = vld [vmem:[%s14133_s5 + $0x70] sm:$0xff]  ;;  %v2417_v52 = vpop.f32.mrb[39].mxu1  ;;  %v2435_v30 = vld [vmem:[%s14133_s5 + $0x38] sm:$0xff] }
 0x782   : > { %3189 = vrot.lane.b32.xlu0 %v14149_v40, %s9452_s8  ;;  %v14153_v14 = vmax.f32 %v11004_v32, 0.0  ;;  %v8962_v57 = vpop.f32.mrb[55].mxu0  ;;  %v2441_v59 = vmul.f32 %v2433_v0, %v2425_v45  ;;  %v2480_v47 = vmul.f32 %v8795_v49, %v2425_v45  ;;  %v2426_v36 = vmax.f32 %v2415_v31, 0.0  ;;  %v8797_v60 = vld [vmem:[%s14133_s5 + $0x78] sm:$0xff] }
 0x783   : > { %v2450_v29 = vadd.f32 %v2449_v37, %v2440_v12  ;;  %v2488_v11 = vadd.f32 %v2487_v13, %v2479_v58  ;;  %v2427_v19 = vmax.f32 %v2417_v52, 0.0  ;;  %v14152_v27 = vmax.f32 %v11016_v4, 0.0 }
 0x784   : > { %v2451_v62 = vsel %vm2444_vm13, %v2441_v59, 0.0  ;;  %v2489_v57 = vsel %vm2444_vm13, %v2480_v47, 0.0  ;;  %v2442_v0 = vmul.f32 %v2434_v56, %v2426_v36  ;;  %v2481_v49 = vmul.f32 %v8796_v55, %v2426_v36 }
 0x785   : > { %3199 = vrot.lane.b32.xlu1 %v14154_v33, %s9452_s8  ;;  %v2452_v45 = vadd.f32 %v2451_v62, %v2450_v29  ;;  %v2490_v31 = vadd.f32 %v2489_v57, %v2488_v11  ;;  %v2443_v40 = vmul.f32 %v2435_v30, %v2427_v19  ;;  %v2482_v6 = vmul.f32 %v8797_v60, %v2427_v19 }
 0x786   : > { %3197 = vrot.lane.b32.xlu0 %v14153_v14, %s9452_s8 }
 0x787   : > { %v2453_v37 = vadd.f32 %v2452_v45, %v2442_v0  ;;  %v2491_v13 = vadd.f32 %v2490_v31, %v2481_v49  ;;  %v2454_v12 = vsel %vm2444_vm13, %v2443_v40, 0.0  ;;  %v2492_v56 = vsel %vm2444_vm13, %v2482_v6, 0.0 }
 0x788   : > { %v3076_v58 = vpop.f32.mrb[40].mxu1 }
 0x789   : > { %3207 = vrot.lane.b32.xlu1 %v14152_v27, %s9452_s8  ;;  %v3078_v11 = vpop.f32.mrb[41].mxu1  ;;  %v11049_v29 = vadd.f32 %v2454_v12, %v2453_v37  ;;  %v11051_v62 = vadd.f32 %v2492_v56, %v2491_v13  ;;  %v11069_v37 = vmax.f32 %v3076_v58, 0.0 }
 0x78a   : > { %v3080_v19 = vpop.f32.mrb[42].mxu1  ;;  %v11079_v12 = vmax.f32 %v3078_v11, 0.0 }
 0x78b   : > { %14225 = vst [vmem:[#allocation9_spill] sm:$0xff] %v11049_v29  ;;  %14226 = vst [vmem:[#allocation10_spill] sm:$0xff] %v11051_v62  ;;  %v3082_v55 = vpop.f32.mrb[43].mxu1  ;;  %v11067_v45 = vmax.f32 %v3080_v19, 0.0  ;;  %v3192_v19 = vpop.permute.xlu0 %3191 }
 0x78c   : > { %v3119_v52 = vpop.f32.mrb[56].mxu0  ;;  %v11077_v13 = vmax.f32 %v3082_v55, 0.0 }
 0x78d   : > { %v11053_v59 = vmax.f32 %v3119_v52, 0.0  ;;  %v3121_v47 = vpop.f32.mrb[57].mxu0 }
 0x78e   : > { %v11055_v36 = vmax.f32 %v3121_v47, 0.0  ;;  %v3123_v40 = vpop.f32.mrb[58].mxu0 }
 0x78f   : > { %14227 = vst [vmem:[#allocation11_spill] sm:$0xff] %v11053_v59  ;;  %3261 = vrot.lane.b32.xlu1 %v11053_v59, %s9452_s8  ;;  %v3125_v6 = vpop.f32.mrb[59].mxu0  ;;  %v11063_v0 = vmax.f32 %v3123_v40, 0.0 }
 0x790   : > { %v11059_v30 = vmax.f32 %v3125_v6, 0.0  ;;  %3263 = vrot.lane.b32.xlu0 %v11055_v36, %s9452_s8  ;;  %v3162_v60 = vpop.f32.mrb[44].mxu1 }
 0x791   : > { %v8967_v57 = vpop.f32.mrb[45].mxu1  ;;  %14228 = vst [vmem:[#allocation12_spill] sm:$0xff] %v11063_v0  ;;  %v11085_v58 = vmax.f32 %v3162_v60, 0.0 }
 0x792   : > { %v3165_v49 = vpop.f32.mrb[46].mxu1 }
 0x793   : > { %3273 = vrot.lane.b32.xlu1 %v11059_v30, %s9452_s8  ;;  %v8968_v31 = vpop.f32.mrb[47].mxu1  ;;  %v11083_v56 = vmax.f32 %v3165_v49, 0.0 }
 0x794   : > { %3271 = vrot.lane.b32.xlu0 %v11063_v0, %s9452_s8 }
 0x797   : > { %3267 = vrot.lane.b32.xlu1 %v11067_v45, %s9452_s8 }
 0x798   : > { %3257 = vrot.lane.b32.xlu0 %v11069_v37, %s9452_s8 }
 0x79b   : > { %3269 = vrot.lane.b32.xlu1 %v11077_v13, %s9452_s8 }
 0x79c   : > { %3259 = vrot.lane.b32.xlu0 %v11079_v12, %s9452_s8 }
 0x79f   : > { %3275 = vrot.lane.b32.xlu1 %v11083_v56, %s9452_s8 }
 0x7a0   : > { %3265 = vrot.lane.b32.xlu0 %v11085_v58, %s9452_s8 }
 0x7eb   : > { %v3194_v55 = vpop.permute.xlu1 %3193 }
 0x7ec   : > { %v3196_v11 = vpop.permute.xlu0 %3195  ;;  %v3210_v50 = vsel %vm382_vm0, %v3192_v19, %v3194_v55 }
 0x7ed   : > { %v3211_v60 = vsel %vm382_vm0, %v3194_v55, %v3196_v11  ;;  %v14231_v55 = vmax.f32 %v10940_v9, 0.0 }
 0x7ee   : > { %v3229_v14 = vadd.f32 %v3211_v60, %v2896_v8  ;;  %v14230_v60 = vmax.f32 %v10935_v48, 0.0 }
 0x7ef   : > { %v3202_v52 = vpop.permute.xlu1 %3201 }
 0x7f0   : > { %v3204_v47 = vpop.permute.xlu0 %3203  ;;  %v3239_v34 = vadd.f32 %v3229_v14, %v11053_v59  ;;  %v3228_v14 = vadd.f32 %v3210_v50, %v14230_v60 }
 0x7f1   : > { %v3214_v44 = vsel %vm382_vm0, %v3202_v52, %v3204_v47 }
 0x7f2   : > { %v3233_v59 = vadd.f32 %v3214_v44, %v14231_v55  ;;  %v14237_v55 = vmax.f32 %v11016_v4, 0.0 }
 0x7f3   : > { %v3206_v40 = vpop.permute.xlu1 %3205 }
 0x7f4   : > { %v3190_v57 = vpop.permute.xlu0 %3189  ;;  %v3215_v27 = vsel %vm382_vm0, %v3204_v47, %v3206_v40  ;;  %v14232_v47 = vmax.f32 %v10933_v20, 0.0  ;;  %v3243_v44 = vadd.f32 %v3233_v59, %v11077_v13 }
 0x7f5   : > { %v3234_v62 = vadd.f32 %v3215_v27, %v2901_v41  ;;  %v3209_v5 = vsel %vm382_vm0, %v3190_v57, %v3192_v19 }
 0x7f6   : > { %v3227_v19 = vadd.f32 %v3209_v5, %v14232_v47  ;;  %v3238_v5 = vadd.f32 %v3228_v14, %v11079_v12 }
 0x7f7   : > { %v3200_v6 = vpop.permute.xlu1 %3199  ;;  %v3244_v17 = vadd.f32 %v3234_v62, %v11063_v0 }
 0x7f8   : > { %v3198_v31 = vpop.permute.xlu0 %3197  ;;  %v3213_v42 = vsel %vm382_vm0, %v3200_v6, %v3202_v52  ;;  %v14233_v52 = vmax.f32 %v10938_v16, 0.0  ;;  %v3237_v50 = vadd.f32 %v3227_v19, %v11069_v37  ;;  %v14234_v16 = vmax.f32 %v10954_v18, 0.0 }
 0x7f9   : > { %v3212_v62 = vsel %vm382_vm0, %v3196_v11, %v3198_v31 }
 0x7fb   : > { %v3208_v49 = vpop.permute.xlu1 %3207 }
 0x7fc   : > { %v3216_v0 = vsel %vm382_vm0, %v3206_v40, %v3208_v49  ;;  %v14236_v40 = vmax.f32 %v10974_v53, 0.0  ;;  %v3236_v47 = vadd.f32 %v3208_v49, %v14237_v55 }
 0x801   : > { %v3262_v33 = vpop.permute.xlu1 %3261 }
 0x802   : > { %v3264_v63 = vpop.permute.xlu0 %3263 }
 0x803   : > { %v11100_v29 = vsel %vm382_vm0, %v3262_v33, %v3264_v63 }
 0x804   : > { %14229 = vst [vmem:[#allocation13_spill] sm:$0xff] %v11100_v29  ;;  %v3297_v8 = vadd.f32 %v11100_v29, %v3239_v34  ;;  %v3232_v34 = vadd.f32 %v3213_v42, %v14233_v52  ;;  %v3230_v42 = vadd.f32 %v3212_v62, %v14234_v16 }
 0x805   : > { %v3274_v10 = vpop.permute.xlu1 %3273 }
 0x806   : > { %v3272_v27 = vpop.permute.xlu0 %3271  ;;  %v3307_v29 = vmul.f32 0.25, %v3297_v8  ;;  %v3242_v20 = vadd.f32 %v3232_v34, %v11067_v45  ;;  %v3235_v8 = vadd.f32 %v3216_v0, %v14236_v40 }
 0x807   : > { %v11110_v41 = vsel %vm382_vm0, %v3272_v27, %v3274_v10 }
 0x808   : > { %v3302_v57 = vadd.f32 %v11110_v41, %v3244_v17  ;;  %v14235_v17 = vmax.f32 %v11004_v32, 0.0 }
 0x809   : > { %v3268_v6 = vpop.permute.xlu1 %3267 }
 0x80a   : > { %v3312_v2 = vmul.f32 0.25, %v3302_v57  ;;  %v3258_v48 = vpop.permute.xlu0 %3257  ;;  %v3231_v11 = vadd.f32 %v3198_v31, %v14235_v17  ;;  %v3245_v31 = vadd.f32 %v3235_v8, %v11059_v30  ;;  %v3240_v57 = vadd.f32 %v3230_v42, %v11055_v36 }
 0x80c   : > { %v3317_v9 = vpack.c.bf16 %v3312_v2, %v3307_v29 }
 0x80d   : > { %v3270_v60 = vpop.permute.xlu1 %3269 }
 0x80e   : > { %v11136_v2 = vsel %vm382_vm0, %v3268_v6, %v3270_v60  ;;  %v11139_v29 = vsel %vm382_vm0, %v3270_v60, %v3272_v27  ;;  %v3260_v59 = vpop.permute.xlu0 %3259  ;;  %3347 = vrot.lane.b32.xlu0 %v3317_v9, %s9453_s9  ;;  %3329 = vrot.lane.b32.xlu1 %v3317_v9, %s9452_s8 }
 0x80f   : > { %v3300_v18 = vadd.f32 %v11136_v2, %v3242_v20  ;;  %v3301_v53 = vadd.f32 %v11139_v29, %v3243_v44  ;;  %v11146_v32 = vsel %vm382_vm0, %v3258_v48, %v3260_v59  ;;  %v11149_v4 = vsel %vm382_vm0, %v3260_v59, %v3262_v33 }
 0x810   : > { %v3295_v0 = vadd.f32 %v11146_v32, %v3237_v50  ;;  %v3296_v49 = vadd.f32 %v11149_v4, %v3238_v5  ;;  %v14238_v33 = vrot.slane %v10540_v38, 1  ;;  %v14239_v48 = vrot.slane %v10565_v61, 1 }
 0x811   : > { %v3310_v27 = vmul.f32 0.25, %v3300_v18  ;;  %v3311_v14 = vmul.f32 0.25, %v3301_v53  ;;  %v11154_v19 = vpop.permute.xlu1 %3275  ;;  %v3241_v50 = vadd.f32 %v3231_v11, %v11085_v58  ;;  %v3246_v44 = vadd.f32 %v3236_v47, %v11083_v56 }
 0x812   : > { %v3305_v52 = vmul.f32 0.25, %v3295_v0  ;;  %v3306_v34 = vmul.f32 0.25, %v3296_v49  ;;  %v11159_v6 = vsel %vm382_vm0, %v3274_v10, %v11154_v19  ;;  %3575 = vrot.lane.b32.xlu0 %v14238_v33, %s9452_s8  ;;  %v11164_v62 = vpop.permute.xlu0 %3265  ;;  %3577 = vrot.lane.b32.xlu1 %v14239_v48, %s9452_s8  ;;  %v14240_v11 = vrot.slane %v10571_v24, 1 }
 0x813   : > { %v11173_v5 = vsel %vm382_vm0, %v3264_v63, %v11164_v62  ;;  %v3303_v10 = vadd.f32 %v11159_v6, %v3245_v31  ;;  %v3304_v42 = vadd.f32 %v11154_v19, %v3246_v44  ;;  %v3299_v17 = vadd.f32 %v11164_v62, %v3241_v50 }
 0x814   : > { %v3315_v20 = vpack.c.bf16 %v3310_v27, %v3305_v52  ;;  %v3316_v16 = vpack.c.bf16 %v3311_v14, %v3306_v34  ;;  %v3298_v38 = vadd.f32 %v11173_v5, %v3240_v57  ;;  %v14241_v24 = vrot.slane %v10593_v25, 1 }
 0x815   : > { %v3313_v61 = vmul.f32 0.25, %v3303_v10  ;;  %v3314_v8 = vmul.f32 0.25, %v3304_v42  ;;  %v3309_v60 = vmul.f32 0.25, %v3299_v17 }
 0x816   : > { %3361 = vmatprep.subr.bf16.mxu0 %v3316_v16  ;;  %3579 = vrot.lane.b32.xlu0 %v14240_v11, %s9452_s8  ;;  %v3308_v40 = vmul.f32 0.25, %v3298_v38 }
 0x817   : > { %3345 = vrot.lane.b32.xlu1 %v3316_v16, %s9453_s9  ;;  %3362 = vmatpush1.bf16.msra.mxu0 %v3315_v20  ;;  %v3319_v55 = vpack.c.bf16 %v3314_v8, %v3309_v60  ;;  %v11226_v60 = vld [vmem:[%s14215_s3] sm:$0xff]  }
 0x818   : > { %v3318_v63 = vpack.c.bf16 %v3313_v61, %v3308_v40  ;;  %v3566_v61 = vrot.slane %v10581_v15, 1 }
 0x81a   : > { %3327 = vrot.lane.b32.xlu0 %v3316_v16, %s9452_s8  ;;  %3414 = vmatprep.subr.bf16.mxu1 %v3318_v63 }
 0x81b   : > { %3343 = vrot.lane.b32.xlu1 %v3315_v20, %s9453_s9  ;;  %3415 = vmatpush1.bf16.msra.mxu1 %v3317_v9  ;;  %v14242_v9 = vrot.slane %v10627_v7, 1 }
 0x81e   : > { %3325 = vrot.lane.b32.xlu0 %v3315_v20, %s9452_s8  ;;  %v3565_v20 = vrot.slane %v10568_v28, 1 }
 0x81f   : > { %3351 = vrot.lane.b32.xlu1 %v3319_v55, %s9453_s9 }
 0x822   : > { %3333 = vrot.lane.b32.xlu0 %v3319_v55, %s9452_s8 }
 0x823   : > { %3331 = vrot.lane.b32.xlu1 %v3318_v63, %s9452_s8 }
 0x826   : > { %3349 = vrot.lane.b32.xlu0 %v3318_v63, %s9453_s9 }
 0x827   : > { %3594 = vrot.lane.b32.xlu1 %v10568_v28, %s9453_s9 }
 0x82a   : > { %3596 = vrot.lane.b32.xlu0 %v10581_v15, %s9453_s9 }
 0x82b   : > { %3598 = vrot.lane.b32.xlu1 %v10589_v21, %s9453_s9 }
 0x82e   : > { %3581 = vrot.lane.b32.xlu0 %v14241_v24, %s9452_s8 }
 0x82f   : > { %3583 = vrot.lane.b32.xlu1 %v14242_v9, %s9452_s8 }
 0x832   : > { %3600 = vrot.lane.b32.xlu0 %v10624_v22, %s9453_s9 }
 0x833   : > { %3602 = vrot.lane.b32.xlu1 %v10631_v54, %s9453_s9 }
 0x880   : > { %v3348_v47 = vpop.permute.xlu0 %3347  ;;  %v3330_v59 = vpop.permute.xlu1 %3329 }
 0x884   : > { %v3576_v18 = vpop.permute.xlu0 %3575  ;;  %v3578_v53 = vpop.permute.xlu1 %3577 }
 0x885   : > { %v3585_v17 = vsel %vm382_vm0, %v3576_v18, %v3578_v53  ;;  %v3569_v18 = vrot.slane %v10631_v54, 1 }
 0x886   : > { %v3608_v63 = vsel %vm9605_vm3, %v3565_v20, %v3585_v17 }
 0x888   : > { %v3580_v0 = vpop.permute.xlu0 %3579 }
 0x889   : > { %v3346_v49 = vpop.permute.xlu1 %3345  ;;  %v3586_v11 = vsel %vm382_vm0, %v3578_v53, %v3580_v0 }
 0x88a   : > { %v3354_v52 = vsel %vm407_vm4, %v3346_v49, %v3348_v47  ;;  %v3609_v15 = vsel %vm9605_vm3, %v3566_v61, %v3586_v11 }
 0x88c   : > { %v3328_v31 = vpop.permute.xlu0 %3327 }
 0x88d   : > { %v3344_v27 = vpop.permute.xlu1 %3343  ;;  %v3336_v25 = vsel %vm382_vm0, %v3328_v31, %v3330_v59 }
 0x88e   : > { %3363 = vmatprep.subr.bf16.mxu0 %v3336_v25  ;;  %v3353_v33 = vsel %vm407_vm4, %v3344_v27, %v3346_v49 }
 0x890   : > { %v3326_v14 = vpop.permute.xlu0 %3325 }
 0x891   : > { %v3335_v7 = vsel %vm382_vm0, %v3326_v14, %v3328_v31  ;;  %v3352_v57 = vpop.permute.xlu1 %3351  ;;  %v3568_v31 = vrot.slane %v10624_v22, 1 }
 0x892   : > { %3364 = vmatpush1.bf16.msra.mxu0 %v3335_v7 }
 0x893   : > { %3365 = vmatprep.subr.bf16.mxu0 %v3354_v52 }
 0x894   : > { %v3334_v34 = vpop.permute.xlu0 %3333 }
 0x895   : > { %v3332_v48 = vpop.permute.xlu1 %3331 }
 0x896   : > { %3366 = vmatpush1.bf16.msra.mxu0 %v3353_v33  ;;  %v3338_v50 = vsel %vm382_vm0, %v3332_v48, %v3334_v34  ;;  %v3337_v44 = vsel %vm382_vm0, %v3330_v59, %v3332_v48 }
 0x897   : > { %3416 = vmatprep.subr.bf16.mxu1 %v3338_v50  ;;  %3367 = vmatprep.subr.bf16.mxu0 %v10039_v35 }
 0x898   : > { %3417 = vmatpush1.bf16.msra.mxu1 %v3337_v44  ;;  %v3350_v10 = vpop.permute.xlu0 %3349 }
 0x899   : > { %v3595_v16 = vpop.permute.xlu1 %3594  ;;  %v3356_v38 = vsel %vm407_vm4, %v3350_v10, %v3352_v57  ;;  %v3355_v42 = vsel %vm407_vm4, %v3348_v47, %v3350_v10  ;;  %v3567_v57 = vrot.slane %v10589_v21, 1 }
 0x89a   : > { %3368 = vmatpush1.bf16.msra.mxu0 %v10039_v35  ;;  %3418 = vmatprep.subr.bf16.mxu1 %v3356_v38 }
 0x89c   : > { %3419 = vmatpush1.bf16.msra.mxu1 %v3355_v42  ;;  %v3597_v40 = vpop.permute.xlu0 %3596 }
 0x89d   : > { %v3599_v28 = vpop.permute.xlu1 %3598  ;;  %v3604_v8 = vsel %vm407_vm4, %v3595_v16, %v3597_v40  ;;  %8811 = vmatmul.mubr.msk.bf16.vlgmr.msra.gmra.mrb[60].mxu0 %vm1204_vm12, %v11226_v60  ;;  %3420 = vmatprep.subr.bf16.mxu1 %v10039_v35  ;;  %v11256_v16 = vld [vmem:[%s14215_s3 + $0x8] sm:$0xff]  }
 0x89e   : > { %v3605_v55 = vsel %vm407_vm4, %v3597_v40, %v3599_v28  ;;  %v3615_v24 = vsel %vm412_vm1, %v3608_v63, %v3604_v8  ;;  %3403 = vmatprep.mubr.bf16.mxu0 %v14214_v1 }
 0x89f   : > { %v3618_v9 = vsel %vm412_vm1, %v3609_v15, %v3605_v55  ;;  %v3628_v47 = vshrl.u32 %v3615_v24, 16  ;;  %v3631_v59 = vshll.u32 %v3615_v24, 16 }
 0x8a0   : > { %v3635_v53 = vshrl.u32 %v3618_v9, 16  ;;  %v3638_v49 = vshll.u32 %v3618_v9, 16  ;;  %3421 = vmatpush1.bf16.msra.mxu1 %v10039_v35  ;;  %v3582_v27 = vpop.permute.xlu0 %3581 }
 0x8a1   : > { %v3630_v25 = vrot.slane %v3628_v47, 6  ;;  %v3633_v14 = vrot.slane %v3631_v59, 7  ;;  %v3584_v7 = vpop.permute.xlu1 %3583  ;;  %v3587_v33 = vsel %vm382_vm0, %v3580_v0, %v3582_v27 }
 0x8a2   : > { %v3637_v52 = vrot.slane %v3635_v53, 6  ;;  %v3640_v34 = vrot.slane %v3638_v49, 7  ;;  %v3588_v48 = vsel %vm382_vm0, %v3582_v27, %v3584_v7  ;;  %v3612_v54 = vsel %vm9605_vm3, %v3569_v18, %v3584_v7 }
 0x8a3   : > { %v3634_v50 = vor.u32 %v3633_v14, %v3630_v25  ;;  %8813 = vmatmul.mubr.msk.bf16.vlgmr.msra.gmra.mrb[48].mxu1 %vm1204_vm12, %v11226_v60  ;;  %v3611_v22 = vsel %vm9605_vm3, %v3568_v31, %v3588_v48  ;;  %v3610_v21 = vsel %vm9605_vm3, %v3567_v57, %v3587_v33  ;;  %v14243_v57 = vld [vmem:[#allocation8_spill] sm:$0xff]  ;;  %v14244_v33 = vld [vmem:[#allocation7_spill] sm:$0xff] }
 0x8a4   : > { %v3601_v44 = vpop.permute.xlu0 %3600  ;;  %v3641_v10 = vor.u32 %v3640_v34, %v3637_v52  ;;  %3456 = vmatprep.mubr.bf16.mxu1 %v14214_v1 }
 0x8a5   : > { %v3603_v0 = vpop.permute.xlu1 %3602  ;;  %v3606_v20 = vsel %vm407_vm4, %v3599_v28, %v3601_v44  ;;  %8812 = vmatmul.mubr.msk.bf16.gmra.mrb[64].mxu0 %vm1204_vm12, %v11256_v16  ;;  %v3668_v38 = vsel %vm9641_vm7, %v10843_v3, %v3634_v50 }
 0x8a6   : > { %v3627_v42 = vsel %vm412_vm1, %v3612_v54, %v3603_v0  ;;  %v3607_v17 = vsel %vm407_vm4, %v3601_v44, %v3603_v0  ;;  %v3621_v61 = vsel %vm412_vm1, %v3610_v21, %v3606_v20  ;;  %v3669_v11 = vsel %vm9641_vm7, %v10846_v39, %v3641_v10  ;;  %3725 = vmatprep.mubr.bf16.mxu0 %v14214_v1 }
 0x8a7   : > { %v3656_v40 = vshrl.u32 %v3627_v42, 16  ;;  %v3659_v63 = vshll.u32 %v3627_v42, 16  ;;  %v3624_v28 = vsel %vm412_vm1, %v3611_v22, %v3607_v17  ;;  %v3642_v8 = vshrl.u32 %v3621_v61, 16  ;;  %v9189_v17 = vld [vmem:[%s14217_s4 + $0x100] sm:$0xff] }
 0x8a8   : > { %v3645_v15 = vshll.u32 %v3621_v61, 16  ;;  %v3649_v55 = vshrl.u32 %v3624_v28, 16  ;;  %v3652_v3 = vshll.u32 %v3624_v28, 16  ;;  %v3676_v24 = vsel %vm567_vm8, %v3669_v11, 1065369472  ;;  %v9191_v28 = vld [vmem:[%s14217_s4 + $0x108] sm:$0xff] }
 0x8a9   : > { %v3658_v9 = vrot.slane %v3656_v40, 6  ;;  %v3661_v47 = vrot.slane %v3659_v63, 7  ;;  %v3644_v59 = vrot.slane %v3642_v8, 6  ;;  %8815 = vmatprep.subr.msk.bf16.mxu0 %vm588_vm9, %v3676_v24  ;;  %v3674_v18 = vsel %vm567_vm8, %v3668_v38, 1065369472  ;;  %v9188_v38 = vld [vmem:[%s14217_s4] sm:$0xff] }
 0x8aa   : > { %v3647_v39 = vrot.slane %v3645_v15, 7  ;;  %v3651_v53 = vrot.slane %v3649_v55, 6  ;;  %v3654_v49 = vrot.slane %v3652_v3, 7  ;;  %v3683_v31 = vsel %vm588_vm9, %v3674_v18, 0  ;;  %v9190_v40 = vld [vmem:[%s14217_s4 + $0x8] sm:$0xff] }
 0x8ab   : > { %v3662_v27 = vor.u32 %v3661_v47, %v3658_v9  ;;  %3694 = vmatpush1.bf16.msra.mxu0 %v3683_v31  ;;  %8814 = vmatmul.mubr.msk.bf16.gmra.mrb[52].mxu1 %vm1204_vm12, %v11256_v16  ;;  %v9193_v31 = vld [vmem:[%s14217_s4 + $0x110] sm:$0xff] }
 0x8ac   : > { %v3648_v25 = vor.u32 %v3647_v39, %v3644_v59  ;;  %8969 = vmatprep.subr.bf16.mxu0 %v14216_v43  ;;  %v3655_v14 = vor.u32 %v3654_v49, %v3651_v53  ;;  %3768 = vmatprep.mubr.bf16.mxu1 %v14214_v1  ;;  %v9192_v53 = vld [vmem:[%s14217_s4 + $0x10] sm:$0xff] }
 0x8ad   : > { %v3672_v7 = vsel %vm9641_vm7, %v10878_v23, %v3662_v27  ;;  %v9187_v23 = vld [vmem:[%s14212_s2] sm:$0xff]  }
 0x8ae   : > { %8816 = vmatmul.mubr.msk.bf16.vlgmr.msra.gmra.mrb[68].mxu0 %vm584_vm10, %v10747_v46  ;;  %v3671_v52 = vsel %vm9641_vm7, %v14243_v57, %v3655_v14  ;;  %v3682_v34 = vsel %vm567_vm8, %v3672_v7, 1065369472  ;;  %v3670_v48 = vsel %vm9641_vm7, %v14244_v33, %v3648_v25  ;;  %v9194_v7 = vld [vmem:[%s14217_s4 + $0x18] sm:$0xff] }
 0x8af   : > { %v3680_v50 = vsel %vm567_vm8, %v3671_v52, 1065369472  ;;  %v3691_v54 = vsel %vm588_vm9, %v3682_v34, 0  ;;  %v3678_v22 = vsel %vm567_vm8, %v3670_v48, 1065369472  ;;  %8971 = vmatprep.mubr.msk.bf16.mxu0 %vm9456_vm11, %v14216_v43  ;;  %v9195_v52 = vld [vmem:[%s14217_s4 + $0x118] sm:$0xff] }
 0x8b0   : > { %8817 = vmatprep.subr.msk.bf16.mxu1 %vm588_vm9, %v3680_v50  ;;  %8970 = vmatpush3.bf16.msra.mxu0 %v3691_v54  ;;  %v3687_v46 = vsel %vm588_vm9, %v3678_v22, 0 }
 0x8b1   : > { %3737 = vmatpush1.bf16.msra.mxu1 %v3687_v46  ;;  %v9196_v46 = vld [vmem:[%s14217_s4 + $0x20] sm:$0xff] }
 0x8b4   : > { %8818 = vmatmul.mubr.msk.bf16.vlgmr.msra.gmra.mrb[56].mxu1 %vm584_vm10, %v9187_v23 }
 0x8b5   : > { %3996 = vmatprep.mubr.bf16.mxu1 %v14214_v1 }
 0x8b6   : > { %8972 = vmatmul.mubr.msk.bf16.vlgmr.msra.gmra.mrb[72].mxu0 %vm584_vm10, %v9187_v23 }
 0x8b7   : > { %4049 = vmatprep.mubr.bf16.mxu0 %v14214_v1 }
 0x970   : > { %v3395_v44 = vpop.f32.mrb[60].mxu0 }
 0x971   : > { %v3467_v10 = vmax.f32 %v3395_v44, 0.0  ;;  %v3397_v21 = vpop.f32.mrb[61].mxu0  ;;  %v14245_v44 = vld [vmem:[#allocation11_spill] sm:$0xff] }
 0x972   : > { %v3468_v0 = vmax.f32 %v3397_v21, 0.0  ;;  %v3399_v20 = vpop.f32.mrb[62].mxu0 }
 0x973   : > { %v3483_v42 = vmul.f32 %v9188_v38, %v3467_v10  ;;  %v3524_v61 = vmul.f32 %v9189_v17, %v3467_v10  ;;  %v3401_v11 = vpop.f32.mrb[63].mxu0  ;;  %v3471_v47 = vmax.f32 %v3399_v20, 0.0  ;;  %v14246_v10 = vld [vmem:[#allocation13_spill] sm:$0xff] }
 0x974   : > { %v3484_v63 = vmul.f32 %v9190_v40, %v3468_v0  ;;  %v3525_v8 = vmul.f32 %v9191_v28, %v3468_v0  ;;  %v3472_v48 = vmax.f32 %v3401_v11, 0.0  ;;  %v11342_v21 = vadd.f32 %v14246_v10, %v14245_v44  ;;  %v9197_v0 = vld [vmem:[%s14217_s4 + $0x120] sm:$0xff]  ;;  %v14247_v28 = vld [vmem:[#allocation12_spill] sm:$0xff] }
 0x975   : > { %v3487_v23 = vmul.f32 %v9196_v46, %v3471_v47  ;;  %v3528_v20 = vmul.f32 %v9197_v0, %v3471_v47 }
 0x976   : > { %v3499_v15 = vadd.f32 %v3484_v63, %v3483_v42  ;;  %v3540_v55 = vadd.f32 %v3525_v8, %v3524_v61  ;;  %v3448_v3 = vpop.f32.mrb[48].mxu1  ;;  %v3830_v63 = vadd.f32 %v11146_v32, %v11069_v37  ;;  %v11354_v8 = vadd.f32 %v11110_v41, %v14247_v28 }
 0x977   : > { %v3469_v24 = vmax.f32 %v3448_v3, 0.0  ;;  %v3450_v9 = vpop.f32.mrb[49].mxu1  ;;  %v9199_v3 = vld [vmem:[%s14217_s4 + $0x128] sm:$0xff]  ;;  %v3831_v37 = vadd.f32 %v11149_v4, %v11079_v12  ;;  %v3835_v41 = vadd.f32 %v11136_v2, %v11067_v45  ;;  %v3836_v32 = vadd.f32 %v11139_v29, %v11077_v13  ;;  %v9201_v12 = vld [vmem:[%s14217_s4 + $0x130] sm:$0xff] }
 0x978   : > { %v3470_v59 = vmax.f32 %v3450_v9, 0.0  ;;  %v11317_v18 = vpop.f32.mrb[64].mxu0  ;;  %v3452_v39 = vpop.f32.mrb[50].mxu1 }
 0x979   : > { %v3485_v49 = vmul.f32 %v9192_v53, %v3469_v24  ;;  %v3526_v27 = vmul.f32 %v9193_v31, %v3469_v24  ;;  %v11325_v25 = vpop.f32.mrb[65].mxu0  ;;  %v3454_v14 = vpop.f32.mrb[51].mxu1  ;;  %v3473_v17 = vmax.f32 %v3452_v39, 0.0  ;;  %v3475_v61 = vmax.f32 %v11317_v18, 0.0  ;;  %v9200_v53 = vld [vmem:[%s14217_s4 + $0x30] sm:$0xff] }
 0x97a   : > { %v3486_v57 = vmul.f32 %v9194_v7, %v3470_v59  ;;  %v3527_v34 = vmul.f32 %v9195_v52, %v3470_v59  ;;  %v11333_v33 = vpop.f32.mrb[66].mxu0  ;;  %v3474_v11 = vmax.f32 %v3454_v14, 0.0  ;;  %v3529_v24 = vmul.f32 %v9199_v3, %v3472_v48 }
 0x97b   : > { %v3500_v50 = vadd.f32 %v3499_v15, %v3485_v49  ;;  %v3541_v54 = vadd.f32 %v3540_v55, %v3526_v27  ;;  %v11335_v22 = vpop.f32.mrb[67].mxu0  ;;  %v9198_v15 = vld [vmem:[%s14217_s4 + $0x28] sm:$0xff]  ;;  %v11374_v39 = vadd.f32 %v11173_v5, %v11055_v36  ;;  %v3489_v49 = vmul.f32 %v9200_v53, %v3473_v17  ;;  %v9202_v36 = vld [vmem:[%s14217_s4 + $0x40] sm:$0xff]  ;;  %v9203_v5 = vld [vmem:[%s14217_s4 + $0x38] sm:$0xff] }
 0x97c   : > { %v3488_v55 = vmul.f32 %v9198_v15, %v3472_v48  ;;  %v3530_v4 = vmul.f32 %v9201_v12, %v3473_v17  ;;  %v3491_v13 = vmul.f32 %v9202_v36, %v3475_v61  ;;  %v3476_v29 = vmax.f32 %v11325_v25, 0.0  ;;  %v9204_v48 = vld [vmem:[%s14217_s4 + $0x138] sm:$0xff]  ;;  %v9205_v25 = vld [vmem:[%s14217_s4 + $0x140] sm:$0xff]  ;;  %v9206_v17 = vld [vmem:[%s14217_s4 + $0x48] sm:$0xff] }
 0x97d   : > { %v3501_v38 = vadd.f32 %v3500_v50, %v3486_v57  ;;  %v3542_v42 = vadd.f32 %v3541_v54, %v3527_v34  ;;  %v3490_v14 = vmul.f32 %v9203_v5, %v3474_v11  ;;  %v11393_v57 = vadd.f32 %v11159_v6, %v11059_v30  ;;  %v9209_v12 = vld [vmem:[%s14217_s4 + $0x150] sm:$0xff] }
 0x97e   : > { %v11348_v40 = vpop.f32.mrb[52].mxu1  ;;  %v3531_v50 = vmul.f32 %v9204_v48, %v3474_v11  ;;  %v3492_v11 = vmul.f32 %v9206_v17, %v3476_v29  ;;  %v9214_v17 = vld [vmem:[%s14217_s4 + $0x68] sm:$0xff] }
 0x97f   : > { %v3502_v9 = vadd.f32 %v3501_v38, %v3487_v23  ;;  %v3543_v47 = vadd.f32 %v3542_v42, %v3528_v20  ;;  %v11362_v59 = vpop.f32.mrb[53].mxu1  ;;  %v3532_v23 = vmul.f32 %v9205_v25, %v3475_v61  ;;  %v3477_v44 = vmax.f32 %v11348_v40, 0.0  ;;  %v9212_v25 = vld [vmem:[%s14217_s4 + $0x60] sm:$0xff] }
 0x980   : > { %v11364_v18 = vpop.f32.mrb[54].mxu1  ;;  %v3478_v28 = vmax.f32 %v11362_v59, 0.0  ;;  %v3480_v59 = vmax.f32 %v11335_v22, 0.0  ;;  %v9210_v22 = vld [vmem:[%s14217_s4 + $0x58] sm:$0xff] }
 0x981   : > { %v3503_v31 = vadd.f32 %v3502_v9, %v3488_v55  ;;  %v3544_v27 = vadd.f32 %v3543_v47, %v3529_v24  ;;  %v3727_v45 = vpop.f32.mrb[68].mxu0  ;;  %v11382_v2 = vpop.f32.mrb[55].mxu1  ;;  %v3479_v47 = vmax.f32 %v11333_v33, 0.0 }
 0x982   : > { %v3729_v7 = vpop.f32.mrb[69].mxu0  ;;  %v3820_v54 = vmax.f32 %v3727_v45, 0.0  ;;  %v3494_v36 = vmul.f32 %v9210_v22, %v3478_v28 }
 0x983   : > { %v3504_v52 = vadd.f32 %v3503_v31, %v3489_v49  ;;  %v3545_v34 = vadd.f32 %v3544_v27, %v3530_v4  ;;  %v3731_v46 = vpop.f32.mrb[70].mxu0  ;;  %v3821_v10 = vmax.f32 %v3729_v7, 0.0  ;;  %v3534_v4 = vmul.f32 %v9209_v12, %v3477_v44 }
 0x984   : > { %v3825_v0 = vmax.f32 %v3731_v46, 0.0  ;;  %v3733_v30 = vpop.f32.mrb[71].mxu0  ;;  %v11402_v38 = vadd.f32 %v3830_v63, %v3820_v54  ;;  %3860 = vrot.lane.b32.xlu0 %v3820_v54, %s9452_s8  ;;  %v9207_v63 = vld [vmem:[%s14217_s4 + $0x148] sm:$0xff] }
 0x985   : > { %v3505_v6 = vadd.f32 %v3504_v52, %v3490_v14  ;;  %v3546_v20 = vadd.f32 %v3545_v34, %v3531_v50  ;;  %v3826_v42 = vmax.f32 %v3733_v30, 0.0  ;;  %v11409_v61 = vadd.f32 %v3831_v37, %v3821_v10  ;;  %v9208_v37 = vld [vmem:[%s14217_s4 + $0x50] sm:$0xff] }
 0x986   : > { %v11411_v40 = vadd.f32 %v3835_v41, %v3825_v0  ;;  %3870 = vrot.lane.b32.xlu1 %v3825_v0, %s9452_s8  ;;  %v3533_v15 = vmul.f32 %v9207_v63, %v3476_v29  ;;  %v3493_v41 = vmul.f32 %v9208_v37, %v3477_v44 }
 0x987   : > { %v3506_v55 = vadd.f32 %v3505_v6, %v3491_v13  ;;  %v3547_v3 = vadd.f32 %v3546_v20, %v3532_v23  ;;  %v11417_v24 = vadd.f32 %v3836_v32, %v3826_v42  ;;  %v3770_v9 = vpop.f32.mrb[56].mxu1  ;;  %v9211_v13 = vld [vmem:[%s14217_s4 + $0x158] sm:$0xff]  ;;  %v3495_v23 = vmul.f32 %v9212_v25, %v3479_v47 }
 0x988   : > { %v3822_v53 = vmax.f32 %v3770_v9, 0.0  ;;  %v3772_v49 = vpop.f32.mrb[57].mxu1  ;;  %3862 = vrot.lane.b32.xlu0 %v3821_v10, %s9452_s8  ;;  %v3535_v29 = vmul.f32 %v9211_v13, %v3478_v28 }
 0x989   : > { %v3507_v31 = vadd.f32 %v3506_v55, %v3492_v11  ;;  %v3548_v32 = vadd.f32 %v3547_v3, %v3533_v15  ;;  %v3823_v27 = vmax.f32 %v3772_v49, 0.0  ;;  %v3774_v33 = vpop.f32.mrb[58].mxu1  ;;  %v11428_v45 = vpop.f32.mrb[72].mxu0  ;;  %v3496_v11 = vmul.f32 %v9214_v17, %v3480_v59  ;;  %v9217_v55 = vld [vmem:[%s14217_s4 + $0x170] sm:$0xff] }
 0x98a   : > { %v11437_v5 = vadd.f32 %v11342_v21, %v3822_v53  ;;  %v3827_v14 = vmax.f32 %v3774_v33, 0.0  ;;  %3872 = vrot.lane.b32.xlu1 %v3826_v42, %s9452_s8  ;;  %v3776_v7 = vpop.f32.mrb[59].mxu1  ;;  %v8973_v52 = vpop.f32.mrb[73].mxu0  ;;  %v9213_v21 = vld [vmem:[%s14217_s4 + $0x160] sm:$0xff]  ;;  %v3482_v42 = vmax.f32 %v11382_v2, 0.0 }
 0x98b   : > { %v3508_v34 = vadd.f32 %v3507_v31, %v3493_v41  ;;  %v3549_v48 = vadd.f32 %v3548_v32, %v3534_v4  ;;  %v11441_v50 = vadd.f32 %v11374_v39, %v3823_v27  ;;  %v3828_v54 = vmax.f32 %v3776_v7, 0.0  ;;  %v11443_v46 = vpop.f32.mrb[74].mxu0 }
 0x98c   : > { %v3536_v44 = vmul.f32 %v9213_v21, %v3479_v47  ;;  %v3847_v10 = vadd.f32 %v11354_v8, %v3827_v14  ;;  %v8974_v0 = vpop.f32.mrb[75].mxu0  ;;  %v3481_v39 = vmax.f32 %v11364_v18, 0.0  ;;  %3866 = vrot.lane.b32.xlu0 %v3823_v27, %s9452_s8  ;;  %v9215_v8 = vld [vmem:[%s14217_s4 + $0x168] sm:$0xff]  ;;  %v9218_v47 = vld [vmem:[%s14217_s4 + $0x78] sm:$0xff]  ;;  %v3824_v31 = vmax.f32 %v11428_v45, 0.0 }
 0x98d   : > { %v3509_v30 = vadd.f32 %v3508_v34, %v3494_v36  ;;  %v3550_v6 = vadd.f32 %v3549_v48, %v3535_v29  ;;  %v11454_v20 = vadd.f32 %v11393_v57, %v3828_v54  ;;  %v3537_v28 = vmul.f32 %v9215_v8, %v3480_v59  ;;  %v9216_v57 = vld [vmem:[%s14217_s4 + $0x70] sm:$0xff] }
 0x98e   : > { %3864 = vrot.lane.b32.xlu1 %v3822_v53, %s9452_s8  ;;  %v3497_v15 = vmul.f32 %v9216_v57, %v3481_v39  ;;  %v3538_v3 = vmul.f32 %v9217_v55, %v3481_v39  ;;  %v3498_v59 = vmul.f32 %v9218_v47, %v3482_v42  ;;  %v9219_v53 = vld [vmem:[%s14217_s4 + $0x178] sm:$0xff]  ;;  %v3829_v12 = vmax.f32 %v11443_v46, 0.0 }
 0x98f   : > { %v3510_v18 = vadd.f32 %v3509_v30, %v3495_v23  ;;  %v3551_v63 = vadd.f32 %v3550_v6, %v3536_v44  ;;  %v3539_v49 = vmul.f32 %v9219_v53, %v3482_v42  ;;  %v3834_v44 = vadd.f32 %v11164_v62, %v11085_v58 }
 0x990   : > { %3874 = vrot.lane.b32.xlu0 %v3827_v14, %s9452_s8  ;;  %v3839_v30 = vadd.f32 %v11154_v19, %v11083_v56 }
 0x991   : > { %v3511_v2 = vadd.f32 %v3510_v18, %v3496_v11  ;;  %v3552_v9 = vadd.f32 %v3551_v63, %v3537_v28  ;;  %v3844_v39 = vadd.f32 %v3834_v44, %v3824_v31 }
 0x992   : > { %3876 = vrot.lane.b32.xlu1 %v3828_v54, %s9452_s8  ;;  %v3849_v17 = vadd.f32 %v3839_v30, %v3829_v12 }
 0x993   : > { %v3512_v37 = vadd.f32 %v3511_v2, %v3497_v15  ;;  %v3553_v41 = vadd.f32 %v3552_v9, %v3538_v3 }
 0x994   : > { %3868 = vrot.lane.b32.xlu0 %v3824_v31, %s9452_s8 }
 0x995   : > { %v11482_v4 = vadd.f32 %v3512_v37, %v3498_v59  ;;  %v11484_v32 = vadd.f32 %v3553_v41, %v3539_v49  ;;  %v8831_v41 = vld.sshfl [vmem:[%s10342_s15 + $0x18] sm:$0x33 pattern:$0x76325410] }
 0x996   : > { %3878 = vrot.lane.b32.xlu1 %v3829_v12, %s9452_s8  ;;  %v4277_v12 = vcombine.high %v8831_v41, %v8831_v41 }
 0x997   : > { %14248 = vst [vmem:[#allocation8_spill] sm:$0xff] %v11482_v4  ;;  %14249 = vst [vmem:[#allocation7_spill] sm:$0xff] %v11484_v32 }
 0x9f6   : > { %v3861_v27 = vpop.permute.xlu0 %3860 }
 0x9f8   : > { %v3871_v33 = vpop.permute.xlu1 %3870 }
 0x9fa   : > { %v3863_v22 = vpop.permute.xlu0 %3862 }
 0x9fb   : > { %v3880_v36 = vsel %vm382_vm0, %v3861_v27, %v3863_v22 }
 0x9fc   : > { %v3873_v13 = vpop.permute.xlu1 %3872  ;;  %v3898_v29 = vadd.f32 %v3880_v36, %v11402_v38 }
 0x9fd   : > { %v3884_v45 = vsel %vm382_vm0, %v3871_v33, %v3873_v13 }
 0x9fe   : > { %v3903_v14 = vadd.f32 %v3884_v45, %v11411_v40  ;;  %v3867_v7 = vpop.permute.xlu0 %3866  ;;  %v3908_v52 = vmul.f32 0.25, %v3898_v29  ;;  %v8827_v29 = vld.sshfl [vmem:[%s10342_s15 + $0x10] sm:$0x33 pattern:$0x76325410] }
 0xa00   : > { %v3913_v34 = vmul.f32 0.25, %v3903_v14  ;;  %v3865_v48 = vpop.permute.xlu1 %3864  ;;  %v4279_v14 = vshrl.u32 %v8831_v41, 16 }
 0xa01   : > { %v3881_v54 = vsel %vm382_vm0, %v3863_v22, %v3865_v48  ;;  %v3882_v46 = vsel %vm382_vm0, %v3865_v48, %v3867_v7 }
 0xa02   : > { %v3918_v25 = vpack.c.bf16 %v3913_v34, %v3908_v52  ;;  %v3899_v23 = vadd.f32 %v3881_v54, %v11409_v61  ;;  %v3875_v21 = vpop.permute.xlu0 %3874  ;;  %v3900_v38 = vadd.f32 %v3882_v46, %v11437_v5  ;;  %v4290_v52 = vshll.u32 %v4277_v12, 16 }
 0xa03   : > { %v3885_v0 = vsel %vm382_vm0, %v3873_v13, %v3875_v21  ;;  %v4282_v34 = vshll.u32 %v8831_v41, 16 }
 0xa04   : > { %3928 = vrot.lane.b32.xlu0 %v3918_v25, %s9452_s8  ;;  %3946 = vrot.lane.b32.xlu1 %v3918_v25, %s9453_s9  ;;  %v3877_v40 = vpop.permute.xlu1 %3876  ;;  %v3904_v6 = vadd.f32 %v3885_v0, %v11417_v24  ;;  %v3909_v58 = vmul.f32 0.25, %v3899_v23  ;;  %v3910_v11 = vmul.f32 0.25, %v3900_v38  ;;  %v4281_v38 = vrot.slane %v4279_v14, 6 }
 0xa05   : > { %v3886_v61 = vsel %vm382_vm0, %v3875_v21, %v3877_v40  ;;  %v4180_v21 = vcombine.high %v8827_v29, %v8827_v29  ;;  %v4292_v30 = vrot.slane %v4290_v52, 7 }
 0xa06   : > { %v3905_v42 = vadd.f32 %v3886_v61, %v3847_v10  ;;  %v3914_v62 = vmul.f32 0.25, %v3904_v6  ;;  %v3869_v5 = vpop.permute.xlu0 %3868  ;;  %v4284_v6 = vrot.slane %v4282_v34, 7 }
 0xa07   : > { %v3883_v28 = vsel %vm382_vm0, %v3867_v7, %v3869_v5  ;;  %v3902_v18 = vadd.f32 %v3869_v5, %v3844_v39  ;;  %v4287_v7 = vshrl.u32 %v4277_v12, 16 }
 0xa08   : > { %v3915_v8 = vmul.f32 0.25, %v3905_v42  ;;  %v3879_v63 = vpop.permute.xlu1 %3878  ;;  %v3919_v57 = vpack.c.bf16 %v3914_v62, %v3909_v58  ;;  %v3901_v15 = vadd.f32 %v3883_v28, %v11441_v50  ;;  %v4285_v28 = vor.u32 %v4284_v6, %v4281_v38 }
 0xa09   : > { %v3887_v56 = vsel %vm382_vm0, %v3877_v40, %v3879_v63  ;;  %v3907_v19 = vadd.f32 %v3879_v63, %v3849_v17  ;;  %v3912_v10 = vmul.f32 0.25, %v3902_v18  ;;  %v4289_v40 = vrot.slane %v4287_v7, 6 }
 0xa0a   : > { %v3920_v24 = vpack.c.bf16 %v3915_v8, %v3910_v11  ;;  %v3906_v2 = vadd.f32 %v3887_v56, %v11454_v20  ;;  %3930 = vrot.lane.b32.xlu0 %v3919_v57, %s9452_s8  ;;  %3964 = vmatprep.subr.bf16.mxu1 %v3919_v57  ;;  %v3911_v3 = vmul.f32 0.25, %v3901_v15  ;;  %v8828_v20 = vld.sshfl [vmem:[%s10342_s15 + $0x14] sm:$0x33 pattern:$0x76325410] }
 0xa0b   : > { %v3917_v55 = vmul.f32 0.25, %v3907_v19  ;;  %3948 = vrot.lane.b32.xlu1 %v3919_v57, %s9453_s9  ;;  %3965 = vmatpush1.bf16.msra.mxu1 %v3918_v25  ;;  %v4191_v59 = vcombine.high %v8828_v20, %v8828_v20  ;;  %v4193_v33 = vshrl.u32 %v8828_v20, 16  ;;  %v4196_v22 = vshll.u32 %v8828_v20, 16 }
 0xa0c   : > { %v3916_v9 = vmul.f32 0.25, %v3906_v2  ;;  %v4293_v8 = vor.u32 %v4292_v30, %v4289_v40  ;;  %v9227_v30 = vld [vmem:[%s14217_s4 + $0x98] sm:$0xff] }
 0xa0d   : > { %v3922_v47 = vpack.c.bf16 %v3917_v55, %v3912_v10  ;;  %v4201_v49 = vshrl.u32 %v4191_v59, 16  ;;  %v4204_v31 = vshll.u32 %v4191_v59, 16  ;;  %v4195_v54 = vrot.slane %v4193_v33, 6 }
 0xa0e   : > { %v3921_v50 = vpack.c.bf16 %v3916_v9, %v3911_v3  ;;  %v4198_v46 = vrot.slane %v4196_v22, 7  ;;  %v4297_v2 = vsel %vm9641_vm7, %v4191_v59, %v4293_v8  ;;  %v4296_v10 = vsel %vm9641_vm7, %v8828_v20, %v4285_v28  ;;  %v9224_v22 = vld [vmem:[%s14217_s4 + $0x188] sm:$0xff] }
 0xa0f   : > { %3936 = vrot.lane.b32.xlu0 %v3922_v47, %s9452_s8  ;;  %3932 = vrot.lane.b32.xlu1 %v3920_v24, %s9452_s8  ;;  %v4203_v13 = vrot.slane %v4201_v49, 6  ;;  %v4206_v45 = vrot.slane %v4204_v31, 7  ;;  %v4301_v3 = vsel %vm567_vm8, %v4297_v2, 1065369472  ;;  %v4299_v9 = vsel %vm567_vm8, %v4296_v10, 1065369472 }
 0xa10   : > { %4017 = vmatprep.subr.bf16.mxu0 %v3921_v50  ;;  %v4199_v39 = vor.u32 %v4198_v46, %v4195_v54  ;;  %v9222_v49 = vld [vmem:[%s14217_s4 + $0x180] sm:$0xff]  ;;  %v9226_v46 = vld [vmem:[%s14217_s4 + $0x190] sm:$0xff] }
 0xa11   : > { %4018 = vmatpush1.bf16.msra.mxu0 %v3920_v24  ;;  %v4207_v44 = vor.u32 %v4206_v45, %v4203_v13 }
 0xa12   : > { %v4210_v63 = vsel %vm9641_vm7, %v8827_v29, %v4199_v39 }
 0xa13   : > { %3950 = vrot.lane.b32.xlu0 %v3920_v24, %s9453_s9  ;;  %3934 = vrot.lane.b32.xlu1 %v3921_v50, %s9452_s8  ;;  %v4211_v11 = vsel %vm9641_vm7, %v4180_v21, %v4207_v44  ;;  %v4213_v24 = vsel %vm567_vm8, %v4210_v63, 1065369472 }
 0xa14   : > { %v4215_v19 = vsel %vm567_vm8, %v4211_v11, 1065369472  ;;  %v4216_v55 = vsel %vm588_vm9, %v4213_v24, 0  ;;  %v9232_v24 = vld [vmem:[%s14217_s4 + $0x1a8] sm:$0xff] }
 0xa17   : > { %3952 = vrot.lane.b32.xlu0 %v3921_v50, %s9453_s9  ;;  %3954 = vrot.lane.b32.xlu1 %v3922_v47, %s9453_s9  ;;  %v4302_v47 = vsel %vm588_vm9, %v4299_v9, 0  ;;  %v9220_v50 = vld [vmem:[%s14212_s2 + $0x8] sm:$0xff]  }
 0xa76   : > { %v3929_v37 = vpop.permute.xlu0 %3928  ;;  %v3947_v53 = vpop.permute.xlu1 %3946 }
 0xa7c   : > { %v3931_v27 = vpop.permute.xlu0 %3930 }
 0xa7d   : > { %v3949_v36 = vpop.permute.xlu1 %3948  ;;  %v3938_v0 = vsel %vm382_vm0, %v3929_v37, %v3931_v27 }
 0xa7e   : > { %v3956_v5 = vsel %vm407_vm4, %v3947_v53, %v3949_v36 }
 0xa81   : > { %v3937_v48 = vpop.permute.xlu0 %3936  ;;  %v3933_v25 = vpop.permute.xlu1 %3932 }
 0xa82   : > { %v3939_v23 = vsel %vm382_vm0, %v3931_v27, %v3933_v25  ;;  %v9223_v27 = vld [vmem:[%s14217_s4 + $0x88] sm:$0xff] }
 0xa83   : > { %3966 = vmatprep.subr.bf16.mxu1 %v3939_v23 }
 0xa84   : > { %3967 = vmatpush1.bf16.msra.mxu1 %v3938_v0 }
 0xa85   : > { %v3951_v61 = vpop.permute.xlu0 %3950  ;;  %v3935_v42 = vpop.permute.xlu1 %3934 }
 0xa86   : > { %v3957_v17 = vsel %vm407_vm4, %v3949_v36, %v3951_v61  ;;  %v3941_v58 = vsel %vm382_vm0, %v3935_v42, %v3937_v48  ;;  %v3940_v62 = vsel %vm382_vm0, %v3933_v25, %v3935_v42  ;;  %v9225_v48 = vld [vmem:[%s14217_s4 + $0x90] sm:$0xff] }
 0xa87   : > { %3968 = vmatprep.subr.bf16.mxu1 %v3957_v17  ;;  %4019 = vmatprep.subr.bf16.mxu0 %v3941_v58  ;;  %v9229_v17 = vld [vmem:[%s14217_s4 + $0xa0] sm:$0xff] }
 0xa88   : > { %4020 = vmatpush1.bf16.msra.mxu0 %v3940_v62  ;;  %3969 = vmatpush1.bf16.msra.mxu1 %v3956_v5  ;;  %v9230_v5 = vld [vmem:[%s14217_s4 + $0x1a0] sm:$0xff] }
 0xa89   : > { %v3953_v18 = vpop.permute.xlu0 %3952  ;;  %v3955_v57 = vpop.permute.xlu1 %3954  ;;  %3970 = vmatprep.subr.bf16.mxu1 %v10039_v35 }
 0xa8a   : > { %v3958_v15 = vsel %vm407_vm4, %v3951_v61, %v3953_v18  ;;  %v3959_v56 = vsel %vm407_vm4, %v3953_v18, %v3955_v57  ;;  %v9228_v61 = vld [vmem:[%s14217_s4 + $0x198] sm:$0xff] }
 0xa8b   : > { %4021 = vmatprep.subr.bf16.mxu0 %v3959_v56  ;;  %v9231_v56 = vld [vmem:[%s14217_s4 + $0xa8] sm:$0xff] }
 0xa8c   : > { %3971 = vmatpush1.bf16.msra.mxu1 %v10039_v35  ;;  %4022 = vmatpush1.bf16.msra.mxu0 %v3958_v15 }
 0xa8d   : > { %4023 = vmatprep.subr.bf16.mxu0 %v10039_v35  ;;  %8829 = vmatprep.subr.msk.bf16.mxu1 %vm588_vm9, %v4215_v19 }
 0xa8f   : > { %8820 = vmatmul.mubr.msk.bf16.vlgmr.msra.gmra.mrb[60].mxu1 %vm1204_vm12, %v11226_v60 }
 0xa90   : > { %4024 = vmatpush1.bf16.msra.mxu0 %v10039_v35  ;;  %4006 = vmatprep.mubr.bf16.mxu1 %v14214_v1 }
 0xa91   : > { %4221 = vmatpush1.bf16.msra.mxu1 %v4216_v55  ;;  %8832 = vmatprep.subr.msk.bf16.mxu0 %vm588_vm9, %v4301_v3 }
 0xa93   : > { %8822 = vmatmul.mubr.msk.bf16.vlgmr.msra.gmra.mrb[76].mxu0 %vm1204_vm12, %v11226_v60 }
 0xa94   : > { %4059 = vmatprep.mubr.bf16.mxu0 %v14214_v1  ;;  %4307 = vmatpush1.bf16.msra.mxu0 %v4302_v47 }
 0xa97   : > { %8821 = vmatmul.mubr.msk.bf16.gmra.mrb[64].mxu1 %vm1204_vm12, %v11256_v16 }
 0xa98   : > { %4252 = vmatprep.mubr.bf16.mxu1 %v14214_v1 }
 0xa9b   : > { %8823 = vmatmul.mubr.msk.bf16.gmra.mrb[80].mxu0 %vm1204_vm12, %v11256_v16  ;;  %v9221_v16 = vld [vmem:[%s14217_s4 + $0x80] sm:$0xff] }
 0xa9c   : > { %4338 = vmatprep.mubr.bf16.mxu0 %v14214_v1 }
 0xa9f   : > { %8830 = vmatmul.mubr.msk.bf16.vlgmr.msra.gmra.mrb[68].mxu1 %vm584_vm10, %v9220_v50 }
 0xaa0   : > { %4455 = vmatprep.mubr.bf16.mxu1 %v14214_v1 }
 0xaa3   : > { %8833 = vmatmul.mubr.msk.bf16.vlgmr.msra.gmra.mrb[84].mxu0 %vm584_vm10, %v9220_v50  ;;  %v9233_v50 = vld [vmem:[%s14217_s4 + $0xb0] sm:$0xff] }
 0xaa4   : > { %4837 = vmatprep.mubr.bf16.mxu0 %v14214_v1 }
 0xb62   : > { %v3998_v60 = vpop.f32.mrb[60].mxu1 }
 0xb63   : > { %v4070_v20 = vmax.f32 %v3998_v60, 0.0  ;;  %v4000_v59 = vpop.f32.mrb[61].mxu1 }
 0xb64   : > { %v4071_v37 = vmax.f32 %v4000_v59, 0.0  ;;  %v4002_v41 = vpop.f32.mrb[62].mxu1  ;;  %v9234_v59 = vld [vmem:[%s14217_s4 + $0x1b0] sm:$0xff] }
 0xb65   : > { %v4086_v53 = vmul.f32 %v9221_v16, %v4070_v20  ;;  %v4127_v31 = vmul.f32 %v9222_v49, %v4070_v20  ;;  %v4004_v12 = vpop.f32.mrb[63].mxu1  ;;  %v4074_v52 = vmax.f32 %v4002_v41, 0.0 }
 0xb66   : > { %v4087_v33 = vmul.f32 %v9223_v27, %v4071_v37  ;;  %v4128_v36 = vmul.f32 %v9224_v22, %v4071_v37  ;;  %v4051_v13 = vpop.f32.mrb[76].mxu0  ;;  %v4075_v44 = vmax.f32 %v4004_v12, 0.0  ;;  %v9236_v22 = vld [vmem:[%s14217_s4 + $0x1b8] sm:$0xff] }
 0xb67   : > { %v4072_v29 = vmax.f32 %v4051_v13, 0.0  ;;  %v4053_v45 = vpop.f32.mrb[77].mxu0  ;;  %v4090_v58 = vmul.f32 %v9229_v17, %v4074_v52  ;;  %v4131_v11 = vmul.f32 %v9230_v5, %v4074_v52 }
 0xb68   : > { %v4102_v14 = vadd.f32 %v4087_v33, %v4086_v53  ;;  %v4143_v7 = vadd.f32 %v4128_v36, %v4127_v31  ;;  %v4055_v34 = vpop.f32.mrb[78].mxu0  ;;  %v4073_v23 = vmax.f32 %v4053_v45, 0.0  ;;  %v4091_v19 = vmul.f32 %v9231_v56, %v4075_v44  ;;  %v9235_v53 = vld [vmem:[%s14217_s4 + $0xb8] sm:$0xff]  ;;  %v9237_v45 = vld [vmem:[%s14217_s4 + $0xc0] sm:$0xff] }
 0xb69   : > { %v4088_v54 = vmul.f32 %v9225_v48, %v4072_v29  ;;  %v4129_v25 = vmul.f32 %v9226_v46, %v4072_v29  ;;  %v4057_v21 = vpop.f32.mrb[79].mxu0  ;;  %v4076_v18 = vmax.f32 %v4055_v34, 0.0  ;;  %v4132_v2 = vmul.f32 %v9232_v24, %v4075_v44  ;;  %v9238_v48 = vld [vmem:[%s14217_s4 + $0x1c0] sm:$0xff] }
 0xb6a   : > { %v4008_v38 = vpop.f32.mrb[64].mxu1  ;;  %v4089_v6 = vmul.f32 %v9227_v30, %v4073_v23  ;;  %v4130_v39 = vmul.f32 %v9228_v61, %v4073_v23  ;;  %v4077_v57 = vmax.f32 %v4057_v21, 0.0  ;;  %v9239_v23 = vld [vmem:[%s14217_s4 + $0xc8] sm:$0xff] }
 0xb6b   : > { %v4103_v0 = vadd.f32 %v4102_v14, %v4088_v54  ;;  %v4144_v40 = vadd.f32 %v4143_v7, %v4129_v25  ;;  %v4010_v42 = vpop.f32.mrb[65].mxu1  ;;  %v4078_v9 = vmax.f32 %v4008_v38, 0.0  ;;  %v4092_v60 = vmul.f32 %v9233_v50, %v4076_v18  ;;  %v8836_v50 = vld [vmem:[%s9517_s30 + $0x14] sm:$0xff] }
 0xb6c   : > { %v11593_v62 = vpop.f32.mrb[66].mxu1  ;;  %v4133_v37 = vmul.f32 %v9234_v59, %v4076_v18  ;;  %v4093_v49 = vmul.f32 %v9235_v53, %v4077_v57  ;;  %v4079_v31 = vmax.f32 %v4010_v42, 0.0  ;;  %v4134_v36 = vmul.f32 %v9236_v22, %v4077_v57 }
 0xb6d   : > { %v4104_v8 = vadd.f32 %v4103_v0, %v4089_v6  ;;  %v4145_v28 = vadd.f32 %v4144_v40, %v4130_v39  ;;  %v11598_v63 = vpop.f32.mrb[67].mxu1  ;;  %v4094_v14 = vmul.f32 %v9237_v45, %v4078_v9  ;;  %v4135_v54 = vmul.f32 %v9238_v48, %v4078_v9  ;;  %v9240_v6 = vld [vmem:[%s14217_s4 + $0x1c8] sm:$0xff] }
 0xb6e   : > { %v4061_v15 = vpop.f32.mrb[80].mxu0  ;;  %v4095_v21 = vmul.f32 %v9239_v23, %v4079_v31  ;;  %v4136_v61 = vmul.f32 %v9240_v6, %v4079_v31  ;;  %v4082_v17 = vmax.f32 %v11593_v62, 0.0  ;;  %v9242_v62 = vld [vmem:[%s14217_s4 + $0x1d0] sm:$0xff]  ;;  %v4083_v56 = vmax.f32 %v11598_v63, 0.0 }
 0xb6f   : > { %v4105_v10 = vadd.f32 %v4104_v8, %v4090_v58  ;;  %v4146_v55 = vadd.f32 %v4145_v28, %v4131_v11  ;;  %v4063_v3 = vpop.f32.mrb[81].mxu0  ;;  %v4080_v46 = vmax.f32 %v4061_v15, 0.0  ;;  %v9241_v28 = vld [vmem:[%s14217_s4 + $0xd0] sm:$0xff]  ;;  %v4555_v48 = vcombine.high %v8836_v50, %v8836_v50 }
 0xb70   : > { %v11606_v47 = vpop.f32.mrb[82].mxu0  ;;  %v4081_v44 = vmax.f32 %v4063_v3, 0.0 }
 0xb71   : > { %v4106_v20 = vadd.f32 %v4105_v10, %v4091_v19  ;;  %v4147_v41 = vadd.f32 %v4146_v55, %v4132_v2  ;;  %v11614_v16 = vpop.f32.mrb[83].mxu0  ;;  %v4096_v18 = vmul.f32 %v9241_v28, %v4080_v46  ;;  %v4137_v57 = vmul.f32 %v9242_v62, %v4080_v46  ;;  %v9243_v19 = vld [vmem:[%s14217_s4 + $0xd8] sm:$0xff] }
 0xb72   : > { %v11619_v12 = vpop.f32.mrb[68].mxu1  ;;  %v4097_v24 = vmul.f32 %v9243_v19, %v4081_v44  ;;  %v9244_v55 = vld [vmem:[%s14217_s4 + $0x1d8] sm:$0xff]  ;;  %v4084_v53 = vmax.f32 %v11606_v47, 0.0 }
 0xb73   : > { %v4107_v27 = vadd.f32 %v4106_v20, %v4092_v60  ;;  %v4148_v33 = vadd.f32 %v4147_v41, %v4133_v37  ;;  %v4263_v13 = vmax.f32 %v11619_v12, 0.0  ;;  %v11625_v29 = vpop.f32.mrb[69].mxu1  ;;  %v4138_v3 = vmul.f32 %v9244_v55, %v4081_v44  ;;  %v9245_v60 = vld [vmem:[%s14217_s4 + $0xe0] sm:$0xff] }
 0xb74   : > { %v11630_v7 = vpop.f32.mrb[70].mxu1  ;;  %v4264_v38 = vmax.f32 %v11625_v29, 0.0  ;;  %v4098_v63 = vmul.f32 %v9245_v60, %v4082_v17  ;;  %v9246_v20 = vld [vmem:[%s14217_s4 + $0x1e0] sm:$0xff] }
 0xb75   : > { %v4108_v52 = vadd.f32 %v4107_v27, %v4093_v49  ;;  %v4149_v34 = vadd.f32 %v4148_v33, %v4134_v36  ;;  %v11635_v25 = vpop.f32.mrb[71].mxu1  ;;  %4357 = vrot.lane.b32.xlu0 %v4263_v13, %s9452_s8  ;;  %v4265_v9 = vmax.f32 %v11630_v7, 0.0  ;;  %v4139_v59 = vmul.f32 %v9246_v20, %v4082_v17  ;;  %v9247_v49 = vld [vmem:[%s14217_s4 + $0xe8] sm:$0xff]  ;;  %v14250_v36 = vld [vmem:[#allocation2_spill] sm:$0xff]  ;;  %v9251_v17 = vld [vmem:[%s14217_s4 + $0xf8] sm:$0xff] }
 0xb76   : > { %v11644_v0 = vpop.f32.mrb[84].mxu0  ;;  %4359 = vrot.lane.b32.xlu1 %v4264_v38, %s9452_s8  ;;  %v4099_v31 = vmul.f32 %v9247_v49, %v4083_v56  ;;  %v9248_v27 = vld [vmem:[%s14217_s4 + $0x1e8] sm:$0xff]  ;;  %v4266_v22 = vmax.f32 %v11635_v25, 0.0  ;;  %v11700_v45 = vrot.slane %v8836_v50, %v14250_v36  ;;  %v11734_v62 = vrot.slane %v4555_v48, %v14250_v36 }
 0xb77   : > { %v4109_v40 = vadd.f32 %v4108_v52, %v4094_v14  ;;  %v4150_v30 = vadd.f32 %v4149_v34, %v4135_v54  ;;  %v4349_v39 = vmax.f32 %v11644_v0, 0.0  ;;  %v11650_v42 = vpop.f32.mrb[85].mxu0  ;;  %v4140_v33 = vmul.f32 %v9248_v27, %v4083_v56  ;;  %v9249_v54 = vld [vmem:[%s14217_s4 + $0xf0] sm:$0xff] }
 0xb78   : > { %v4350_v58 = vmax.f32 %v11650_v42, 0.0  ;;  %v11657_v5 = vpop.f32.mrb[86].mxu0  ;;  %v4085_v52 = vmax.f32 %v11614_v16, 0.0  ;;  %v4100_v46 = vmul.f32 %v9249_v54, %v4084_v53  ;;  %v4620_v49 = vrot.slane %v11734_v62, 7 }
 0xb79   : > { %v4110_v11 = vadd.f32 %v4109_v40, %v4095_v21  ;;  %v4151_v8 = vadd.f32 %v4150_v30, %v4136_v61  ;;  %4383 = vrot.lane.b32.xlu0 %v4349_v39, %s9452_s8  ;;  %v11668_v15 = vpop.f32.mrb[87].mxu0  ;;  %v4351_v34 = vmax.f32 %v11657_v5, 0.0  ;;  %v9250_v21 = vld [vmem:[%s14217_s4 + $0x1f0] sm:$0xff]  ;;  %v11719_v30 = vcombine.high %v11700_v45, %v11700_v45 }
 0xb7a   : > { %4385 = vrot.lane.b32.xlu1 %v4350_v58, %s9452_s8  ;;  %v4141_v44 = vmul.f32 %v9250_v21, %v4084_v53  ;;  %v4352_v16 = vmax.f32 %v11668_v15, 0.0  ;;  %v11783_v27 = vld.sshfl [vmem:[%s9517_s30 + $0x1c] sm:$0x3 pattern:$0x76325410] }
 0xb7b   : > { %v4111_v2 = vadd.f32 %v4110_v11, %v4096_v18  ;;  %v4152_v10 = vadd.f32 %v4151_v8, %v4137_v57  ;;  %v4101_v11 = vmul.f32 %v9251_v17, %v4085_v52  ;;  %v9252_v8 = vld [vmem:[%s14217_s4 + $0x1f8] sm:$0xff]  ;;  %v11731_v18 = vshrl.u32 %v11700_v45, 16 }
 0xb7c   : > { %v4142_v28 = vmul.f32 %v9252_v8, %v4085_v52  ;;  %v11739_v57 = vshrl.u32 %v11719_v30, 16  ;;  %v4588_v50 = vshll.u32 %v11719_v30, 16  ;;  %v4619_v53 = vrot.slane %v11719_v30, 7 }
 0xb7d   : > { %v4112_v37 = vadd.f32 %v4111_v2, %v4097_v24  ;;  %v4153_v41 = vadd.f32 %v4152_v10, %v4138_v3  ;;  %4361 = vrot.lane.b32.xlu0 %v4265_v9, %s9452_s8  ;;  %v4696_v24 = vrot.slane %v11731_v18, 7  ;;  %v11749_v2 = vshrl.u32 %v11734_v62, 16 }
 0xb7e   : > { %4363 = vrot.lane.b32.xlu1 %v4266_v22, %s9452_s8  ;;  %v11753_v10 = vcombine.high %v11734_v62, %v11734_v62  ;;  %v4697_v55 = vrot.slane %v11739_v57, 7  ;;  %v4585_v3 = vshll.u32 %v11700_v45, 16 }
 0xb7f   : > { %v4113_v47 = vadd.f32 %v4112_v37, %v4098_v63  ;;  %v4154_v14 = vadd.f32 %v4153_v41, %v4139_v59  ;;  %v4698_v60 = vrot.slane %v11749_v2, 7  ;;  %v4591_v63 = vshll.u32 %v11734_v62, 16 }
 0xb80   : > { %v4594_v20 = vshll.u32 %v11753_v10, 16  ;;  %v9124_v59 = vpack.i.bf16 %v4588_v50, %v4585_v3  ;;  %v4618_v41 = vrot.slane %v11700_v45, 7  ;;  %v4952_v52 = vrot.slane %v4585_v3, 1 }
 0xb81   : > { %v4114_v23 = vadd.f32 %v4113_v47, %v4099_v31  ;;  %v4155_v40 = vadd.f32 %v4154_v14, %v4140_v33  ;;  %4387 = vrot.lane.b32.xlu0 %v4351_v34, %s9452_s8  ;;  %v11780_v31 = vshrl.u32 %v11753_v10, 16  ;;  %v11787_v33 = vshrl.u32 %v11783_v27, 16 }
 0xb82   : > { %4389 = vrot.lane.b32.xlu1 %v4352_v16, %s9452_s8  ;;  %v9129_v37 = vpack.i.bf16 %v4594_v20, %v4591_v63  ;;  %v4597_v14 = vshll.u32 %v11783_v27, 16 }
 0xb83   : > { %v4115_v6 = vadd.f32 %v4114_v23, %v4100_v46  ;;  %v4156_v61 = vadd.f32 %v4155_v40, %v4141_v44  ;;  %v4699_v47 = vrot.slane %v11780_v31, 7  ;;  %v4700_v48 = vrot.slane %v11787_v33, 7 }
 0xb84   : > { %v9134_v54 = vpack.i.bf16 %v4952_v52, %v4597_v14 }
 0xb85   : > { %4677 = vrot.lane.b32.xlu0 %v11700_v45, %s9452_s8  ;;  %v11741_v56 = vadd.f32 %v4115_v6, %v4101_v11  ;;  %v11743_v19 = vadd.f32 %v4156_v61, %v4142_v28 }
 0xb86   : > { %4679 = vrot.lane.b32.xlu1 %v11719_v30, %s9452_s8 }
 0xb87   : > { %14251 = vst [vmem:[#allocation11_spill] sm:$0xff] %v11741_v56  ;;  %14252 = vst [vmem:[#allocation13_spill] sm:$0xff] %v11743_v19 }
 0xb89   : > { %4681 = vrot.lane.b32.xlu0 %v11734_v62, %s9452_s8 }
 0xb8a   : > { %4701 = vrot.lane.b32.xlu1 %v4696_v24, %s9453_s9 }
 0xb8d   : > { %4703 = vrot.lane.b32.xlu0 %v4697_v55, %s9453_s9 }
 0xb8e   : > { %4705 = vrot.lane.b32.xlu1 %v4698_v60, %s9453_s9 }
 0xb91   : > { %9125 = vrot.lane.b32.xlu0 %v9124_v59, %s9452_s8 }
 0xb92   : > { %9130 = vrot.lane.b32.xlu1 %v9129_v37, %s9452_s8 }
 0xb95   : > { %4623 = vrot.lane.b32.xlu0 %v4618_v41, %s9453_s9 }
 0xb96   : > { %4625 = vrot.lane.b32.xlu1 %v4619_v53, %s9453_s9 }
 0xb99   : > { %4627 = vrot.lane.b32.xlu0 %v4620_v49, %s9453_s9 }
 0xb9a   : > { %4683 = vrot.lane.b32.xlu1 %v11753_v10, %s9452_s8 }
 0xb9d   : > { %4685 = vrot.lane.b32.xlu0 %v11783_v27, %s9452_s8 }
 0xb9e   : > { %4707 = vrot.lane.b32.xlu1 %v4699_v47, %s9453_s9 }
 0xba1   : > { %4709 = vrot.lane.b32.xlu0 %v4700_v48, %s9453_s9  ;;  %v4953_v48 = vrot.slane %v4588_v50, 1 }
 0xba2   : > { %9135 = vrot.lane.b32.xlu1 %v9134_v54, %s9452_s8  ;;  %v4954_v54 = vrot.slane %v4591_v63, 1 }
 0xbe7   : > { %v4358_v46 = vpop.permute.xlu0 %4357 }
 0xbe8   : > { %v4360_v23 = vpop.permute.xlu1 %4359 }
 0xbe9   : > { %v4365_v21 = vsel %vm382_vm0, %v4358_v46, %v4360_v23  ;;  %v4372_v40 = vadd.f32 %v4360_v23, %v4264_v38  ;;  %v4621_v23 = vrot.slane %v11753_v10, 7 }
 0xbea   : > { %v4371_v6 = vadd.f32 %v4365_v21, %v4263_v13  ;;  %v4622_v21 = vrot.slane %v11783_v27, 7 }
 0xbeb   : > { %v4384_v44 = vpop.permute.xlu0 %4383  ;;  %v4376_v11 = vadd.f32 %v4372_v40, %v4350_v58 }
 0xbec   : > { %v4386_v61 = vpop.permute.xlu1 %4385  ;;  %v4375_v8 = vadd.f32 %v4371_v6, %v4349_v39 }
 0xbed   : > { %v4391_v24 = vsel %vm382_vm0, %v4384_v44, %v4386_v61  ;;  %v4398_v13 = vadd.f32 %v4386_v61, %v4376_v11  ;;  %v9139_v11 = vpack.i.bf16 %v4954_v54, %v4953_v48 }
 0xbee   : > { %v4397_v58 = vadd.f32 %v4391_v24, %v4375_v8 }
 0xbef   : > { %v4362_v17 = vpop.permute.xlu0 %4361  ;;  %v4402_v25 = vmul.f32 0.25, %v4398_v13 }
 0xbf0   : > { %v4364_v28 = vpop.permute.xlu1 %4363  ;;  %v4401_v41 = vmul.f32 0.25, %v4397_v58 }
 0xbf1   : > { %v4366_v55 = vsel %vm382_vm0, %v4362_v17, %v4364_v28  ;;  %v4374_v29 = vadd.f32 %v4364_v28, %v4266_v22 }
 0xbf2   : > { %v4373_v12 = vadd.f32 %v4366_v55, %v4265_v9 }
 0xbf3   : > { %v4388_v38 = vpop.permute.xlu0 %4387  ;;  %v4378_v42 = vadd.f32 %v4374_v29, %v4352_v16 }
 0xbf4   : > { %v4377_v0 = vadd.f32 %v4373_v12, %v4351_v34  ;;  %v4390_v39 = vpop.permute.xlu1 %4389 }
 0xbf5   : > { %v4392_v3 = vsel %vm382_vm0, %v4388_v38, %v4390_v39  ;;  %v4400_v60 = vadd.f32 %v4390_v39, %v4378_v42 }
 0xbf6   : > { %v4399_v37 = vadd.f32 %v4392_v3, %v4377_v0  ;;  %v4955_v3 = vrot.slane %v4594_v20, 1 }
 0xbf7   : > { %v4678_v59 = vpop.permute.xlu0 %4677  ;;  %v4404_v22 = vmul.f32 0.25, %v4400_v60 }
 0xbf8   : > { %v4403_v53 = vmul.f32 0.25, %v4399_v37  ;;  %v4680_v7 = vpop.permute.xlu1 %4679 }
 0xbf9   : > { %v4406_v9 = vpack.c.bf16 %v4404_v22, %v4402_v25  ;;  %v4687_v49 = vsel %vm382_vm0, %v4678_v59, %v4680_v7  ;;  %v4956_v59 = vrot.slane %v4597_v14, 1 }
 0xbfa   : > { %v4405_v16 = vpack.c.bf16 %v4403_v53, %v4401_v41  ;;  %v4715_v34 = vsel %vm9605_vm3, %v11731_v18, %v4687_v49 }
 0xbfb   : > { %v11822_v15 = vpop.permute.xlu0 %4681  ;;  %4418 = vrot.lane.b32.xlu0 %v4406_v9, %s9453_s9  ;;  %4411 = vrot.lane.b32.xlu1 %v4406_v9, %s9452_s8 }
 0xbfc   : > { %4423 = vmatprep.subr.bf16.mxu1 %v4406_v9  ;;  %v4702_v5 = vpop.permute.xlu1 %4701  ;;  %v4688_v47 = vsel %vm382_vm0, %v4680_v7, %v11822_v15 }
 0xbfd   : > { %4424 = vmatpush1.bf16.msra.mxu1 %v4405_v16  ;;  %v4716_v44 = vsel %vm9605_vm3, %v11739_v57, %v4688_v47 }
 0xbff   : > { %v4704_v52 = vpop.permute.xlu0 %4703  ;;  %4409 = vrot.lane.b32.xlu0 %v4405_v16, %s9452_s8  ;;  %4416 = vrot.lane.b32.xlu1 %v4405_v16, %s9453_s9  ;;  %v9144_v16 = vpack.i.bf16 %v4956_v59, %v4955_v3 }
 0xc00   : > { %v4711_v46 = vsel %vm407_vm4, %v4702_v5, %v4704_v52  ;;  %v4706_v50 = vpop.permute.xlu1 %4705 }
 0xc01   : > { %v11844_v40 = vsel %vm412_vm1, %v4715_v34, %v4711_v46  ;;  %v4712_v61 = vsel %vm407_vm4, %v4704_v52, %v4706_v50  ;;  %v11903_v46 = vld [vmem:[%s14212_s2] sm:$0xff]  }
 0xc02   : > { %v4740_v63 = vshrl.u32 %v11844_v40, 16  ;;  %v4743_v6 = vshll.u32 %v11844_v40, 16  ;;  %v11850_v8 = vsel %vm412_vm1, %v4716_v44, %v4712_v61 }
 0xc03   : > { %v9126_v17 = vpop.permute.xlu0 %9125  ;;  %4629 = vrot.lane.b32.xlu0 %v4621_v23, %s9453_s9  ;;  %4631 = vrot.lane.b32.xlu1 %v4622_v21, %s9453_s9  ;;  %v4747_v29 = vshrl.u32 %v11850_v8, 16  ;;  %v4750_v38 = vshll.u32 %v11850_v8, 16 }
 0xc04   : > { %v4742_v28 = vrot.slane %v4740_v63, 6  ;;  %v9128_v24 = vunpack.i.h.bf16 %v9126_v17  ;;  %v4745_v55 = vrot.slane %v4743_v6, 7  ;;  %v9127_v12 = vunpack.i.l.bf16 %v9126_v17  ;;  %v11856_v13 = vpop.permute.xlu1 %9130 }
 0xc05   : > { %v9132_v42 = vunpack.i.l.bf16 %v11856_v13  ;;  %v4749_v58 = vrot.slane %v4747_v29, 6  ;;  %v4752_v0 = vrot.slane %v4750_v38, 7 }
 0xc06   : > { %v4609_v60 = vsel %vm382_vm0, %v9127_v12, %v9128_v24  ;;  %v4746_v22 = vor.u32 %v4745_v55, %v4742_v28 }
 0xc07   : > { %v4624_v39 = vpop.permute.xlu0 %4623  ;;  %9140 = vrot.lane.b32.xlu0 %v9139_v11, %s9452_s8  ;;  %4976 = vrot.lane.b32.xlu1 %v11700_v45, %s9453_s9  ;;  %v4610_v37 = vsel %vm382_vm0, %v9128_v24, %v9132_v42  ;;  %v4637_v25 = vsel %vm9605_vm3, %v11700_v45, %v4609_v60  ;;  %v4753_v53 = vor.u32 %v4752_v0, %v4749_v58 }
 0xc08   : > { %v4626_v20 = vpop.permute.xlu1 %4625  ;;  %v4638_v41 = vsel %vm9605_vm3, %v11719_v30, %v4610_v37 }
 0xc09   : > { %v4633_v7 = vsel %vm407_vm4, %v4624_v39, %v4626_v20 }
 0xc0a   : > { %v4644_v14 = vsel %vm412_vm1, %v4637_v25, %v4633_v7 }
 0xc0b   : > { %v11877_v9 = vpop.permute.xlu0 %4627  ;;  %4978 = vrot.lane.b32.xlu0 %v11719_v30, %s9453_s9  ;;  %4980 = vrot.lane.b32.xlu1 %v11734_v62, %s9453_s9  ;;  %v4780_v34 = vsel %vm9641_vm7, %v4644_v14, %v4746_v22 }
 0xc0c   : > { %v4634_v49 = vsel %vm407_vm4, %v4626_v20, %v11877_v9  ;;  %v4786_v52 = vsel %vm567_vm8, %v4780_v34, 1065369472  ;;  %v4684_v23 = vpop.permute.xlu1 %4683 }
 0xc0d   : > { %v4648_v5 = vsel %vm412_vm1, %v4638_v41, %v4634_v49  ;;  %v4795_v54 = vsel %vm588_vm9, %v4786_v52, 0  ;;  %v4689_v44 = vsel %vm382_vm0, %v11822_v15, %v4684_v23 }
 0xc0e   : > { %v4781_v47 = vsel %vm9641_vm7, %v4648_v5, %v4753_v53  ;;  %v4717_v17 = vsel %vm9605_vm3, %v11749_v2, %v4689_v44 }
 0xc0f   : > { %v4788_v48 = vsel %vm567_vm8, %v4781_v47, 1065369472  ;;  %9145 = vrot.lane.b32.xlu0 %v9144_v16, %s9452_s8  ;;  %4982 = vrot.lane.b32.xlu1 %v11753_v10, %s9453_s9  ;;  %v4686_v21 = vpop.permute.xlu0 %4685 }
 0xc10   : > { %8839 = vmatprep.subr.msk.bf16.mxu0 %vm588_vm9, %v4788_v48  ;;  %v4708_v63 = vpop.permute.xlu1 %4707  ;;  %v4690_v6 = vsel %vm382_vm0, %v4684_v23, %v4686_v21  ;;  %v4719_v24 = vsel %vm9605_vm3, %v11787_v33, %v4686_v21 }
 0xc11   : > { %4806 = vmatpush1.bf16.msra.mxu0 %v4795_v54  ;;  %v4713_v11 = vsel %vm407_vm4, %v4706_v50, %v4708_v63  ;;  %v4718_v28 = vsel %vm9605_vm3, %v11780_v31, %v4690_v6  ;;  %v9133_v50 = vunpack.i.h.bf16 %v11856_v13 }
 0xc12   : > { %v11923_v55 = vsel %vm412_vm1, %v4717_v17, %v4713_v11 }
 0xc13   : > { %4984 = vrot.lane.b32.xlu0 %v11783_v27, %s9453_s9  ;;  %v4710_v61 = vpop.permute.xlu0 %4709  ;;  %v4754_v58 = vshrl.u32 %v11923_v55, 16  ;;  %v4757_v0 = vshll.u32 %v11923_v55, 16  ;;  %v4611_v20 = vsel %vm382_vm0, %v9132_v42, %v9133_v50 }
 0xc14   : > { %8840 = vmatmul.mubr.msk.bf16.vlgmr.msra.gmra.mrb[88].mxu0 %vm584_vm10, %v11903_v46  ;;  %v4714_v15 = vsel %vm407_vm4, %v4708_v63, %v4710_v61  ;;  %v9136_v29 = vpop.permute.xlu1 %9135  ;;  %v11929_v12 = vsel %vm412_vm1, %v4719_v24, %v4710_v61  ;;  %v4639_v13 = vsel %vm9605_vm3, %v11734_v62, %v4611_v20 }
 0xc15   : > { %4880 = vmatprep.mubr.bf16.mxu0 %v14214_v1  ;;  %v11926_v38 = vsel %vm412_vm1, %v4718_v28, %v4714_v15  ;;  %v4768_v60 = vshrl.u32 %v11929_v12, 16  ;;  %v4771_v59 = vshll.u32 %v11929_v12, 16  ;;  %v9137_v22 = vunpack.i.l.bf16 %v9136_v29 }
 0xc16   : > { %v4761_v39 = vshrl.u32 %v11926_v38, 16  ;;  %v4764_v3 = vshll.u32 %v11926_v38, 16  ;;  %v4756_v41 = vrot.slane %v4754_v58, 6  ;;  %v4759_v53 = vrot.slane %v4757_v0, 7 }
 0xc17   : > { %v4770_v49 = vrot.slane %v4768_v60, 6  ;;  %v4773_v16 = vrot.slane %v4771_v59, 7  ;;  %v4612_v47 = vsel %vm382_vm0, %v9133_v50, %v9137_v22  ;;  %v4641_v42 = vsel %vm9605_vm3, %v11783_v27, %v9137_v22 }
 0xc18   : > { %v4763_v7 = vrot.slane %v4761_v39, 6  ;;  %v4766_v14 = vrot.slane %v4764_v3, 7  ;;  %v4640_v23 = vsel %vm9605_vm3, %v11753_v10, %v4612_v47  ;;  %v4760_v63 = vor.u32 %v4759_v53, %v4756_v41 }
 0xc19   : > { %v4774_v48 = vor.u32 %v4773_v16, %v4770_v49  ;;  %v14166_v60 = vrot.slane %v11700_v45, 1  ;;  %v14165_v59 = vrot.slane %v11719_v30, 1 }
 0xc1a   : > { %v4767_v44 = vor.u32 %v4766_v14, %v4763_v7 }
 0xc6d   : > { %v4419_v37 = vpop.permute.xlu0 %4418  ;;  %v4412_v25 = vpop.permute.xlu1 %4411 }
 0xc6e   : > { %4425 = vmatprep.subr.bf16.mxu1 %v4412_v25 }
 0xc71   : > { %v4410_v5 = vpop.permute.xlu0 %4409  ;;  %v4417_v34 = vpop.permute.xlu1 %4416 }
 0xc72   : > { %v4413_v52 = vsel %vm382_vm0, %v4410_v5, %v4412_v25  ;;  %v4420_v6 = vsel %vm407_vm4, %v4417_v34, %v4419_v37 }
 0xc73   : > { %4426 = vmatpush1.bf16.msra.mxu1 %v4413_v52  ;;  %v9254_v52 = vld [vmem:[%s14215_s3 + $0x10] sm:$0xff]  }
 0xc74   : > { %4427 = vmatprep.subr.bf16.mxu1 %v4419_v37  ;;  %v9138_v37 = vunpack.i.h.bf16 %v9136_v29 }
 0xc75   : > { %v4630_v54 = vpop.permute.xlu0 %4629  ;;  %v4632_v21 = vpop.permute.xlu1 %4631 }
 0xc76   : > { %v4635_v61 = vsel %vm407_vm4, %v11877_v9, %v4630_v54  ;;  %v4636_v17 = vsel %vm407_vm4, %v4630_v54, %v4632_v21  ;;  %v4660_v11 = vsel %vm412_vm1, %v4641_v42, %v4632_v21 }
 0xc77   : > { %v4652_v28 = vsel %vm412_vm1, %v4639_v13, %v4635_v61  ;;  %v4656_v24 = vsel %vm412_vm1, %v4640_v23, %v4636_v17  ;;  %4428 = vmatpush1.bf16.msra.mxu1 %v4420_v6  ;;  %v4784_v9 = vsel %vm9641_vm7, %v4660_v11, %v4774_v48  ;;  %v14163_v61 = vrot.slane %v11753_v10, 1 }
 0xc78   : > { %v4783_v15 = vsel %vm9641_vm7, %v4656_v24, %v4767_v44  ;;  %v4782_v50 = vsel %vm9641_vm7, %v4652_v28, %v4760_v63  ;;  %4429 = vmatprep.subr.bf16.mxu1 %v10039_v35  ;;  %v4794_v41 = vsel %vm567_vm8, %v4784_v9, 1065369472  ;;  %v14164_v63 = vrot.slane %v11734_v62, 1 }
 0xc79   : > { %v9141_v58 = vpop.permute.xlu0 %9140  ;;  %v4977_v0 = vpop.permute.xlu1 %4976  ;;  %v4792_v39 = vsel %vm567_vm8, %v4783_v15, 1065369472  ;;  %v4790_v3 = vsel %vm567_vm8, %v4782_v50, 1065369472  ;;  %v4803_v47 = vsel %vm588_vm9, %v4794_v41, 0  ;;  %v14162_v17 = vrot.slane %v11783_v27, 1 }
 0xc7a   : > { %v9143_v25 = vunpack.i.h.bf16 %v9141_v58  ;;  %v9142_v22 = vunpack.i.l.bf16 %v9141_v58  ;;  %8841 = vmatprep.subr.msk.bf16.mxu0 %vm588_vm9, %v4792_v39  ;;  %v4799_v20 = vsel %vm588_vm9, %v4790_v3, 0 }
 0xc7b   : > { %4849 = vmatpush1.bf16.msra.mxu0 %v4799_v20  ;;  %4430 = vmatpush1.bf16.msra.mxu1 %v10039_v35 }
 0xc7c   : > { %v4967_v53 = vsel %vm382_vm0, %v9138_v37, %v9142_v22  ;;  %v4968_v7 = vsel %vm382_vm0, %v9142_v22, %v9143_v25  ;;  %8975 = vmatprep.subr.bf16.mxu0 %v14216_v43 }
 0xc7d   : > { %v4979_v14 = vpop.permute.xlu0 %4978  ;;  %v4990_v29 = vsel %vm9605_vm3, %v14166_v60, %v4967_v53  ;;  %v4991_v49 = vsel %vm9605_vm3, %v14165_v59, %v4968_v7  ;;  %v4981_v16 = vpop.permute.xlu1 %4980  ;;  %v9268_v59 = vld [vmem:[%s14133_s5 + $0x30] sm:$0xff] }
 0xc7e   : > { %v4986_v5 = vsel %vm407_vm4, %v4977_v0, %v4979_v14  ;;  %v4987_v34 = vsel %vm407_vm4, %v4979_v14, %v4981_v16  ;;  %8842 = vmatmul.mubr.msk.bf16.vlgmr.msra.gmra.mrb[92].mxu0 %vm584_vm10, %v11903_v46  ;;  %8834 = vmatmul.mubr.msk.bf16.vlgmr.msra.gmra.mrb[72].mxu1 %vm1204_vm12, %v9254_v52  ;;  %v9255_v14 = vld [vmem:[%s14215_s3 + $0x18] sm:$0xff]   ;;  %v9269_v60 = vld [vmem:[%s14133_s5 + $0x70] sm:$0xff] }
 0xc7f   : > { %v11995_v13 = vsel %vm412_vm1, %v4990_v29, %v4986_v5  ;;  %v11998_v42 = vsel %vm412_vm1, %v4991_v49, %v4987_v34  ;;  %8976 = vmatpush3.bf16.msra.mxu0 %v4803_v47  ;;  %4465 = vmatprep.mubr.bf16.mxu1 %v14214_v1 }
 0xc80   : > { %v5015_v48 = vshrl.u32 %v11995_v13, 16  ;;  %v5018_v54 = vshll.u32 %v11995_v13, 16  ;;  %v5022_v23 = vshrl.u32 %v11998_v42, 16  ;;  %v5025_v21 = vshll.u32 %v11998_v42, 16  ;;  %8977 = vmatprep.mubr.msk.bf16.mxu0 %vm9456_vm11, %v14216_v43 }
 0xc81   : > { %v9146_v44 = vpop.permute.xlu0 %9145  ;;  %v4983_v6 = vpop.permute.xlu1 %4982 }
 0xc82   : > { %v5017_v11 = vrot.slane %v5015_v48, 6  ;;  %v5020_v28 = vrot.slane %v5018_v54, 7  ;;  %v5024_v24 = vrot.slane %v5022_v23, 6  ;;  %v5027_v15 = vrot.slane %v5025_v21, 7 }
 0xc83   : > { %v9148_v50 = vunpack.i.h.bf16 %v9146_v44  ;;  %v9147_v9 = vunpack.i.l.bf16 %v9146_v44  ;;  %v4988_v58 = vsel %vm407_vm4, %v4981_v16, %v4983_v6 }
 0xc84   : > { %v5028_v0 = vor.u32 %v5027_v15, %v5024_v24  ;;  %v5021_v20 = vor.u32 %v5020_v28, %v5017_v11 }
 0xc85   : > { %v4969_v39 = vsel %vm382_vm0, %v9143_v25, %v9147_v9  ;;  %v4970_v3 = vsel %vm382_vm0, %v9147_v9, %v9148_v50  ;;  %v4985_v37 = vpop.permute.xlu0 %4984  ;;  %v4994_v22 = vsel %vm9605_vm3, %v14162_v17, %v9148_v50 }
 0xc86   : > { %v4992_v41 = vsel %vm9605_vm3, %v14164_v63, %v4969_v39  ;;  %v4989_v53 = vsel %vm407_vm4, %v4983_v6, %v4985_v37  ;;  %v4993_v25 = vsel %vm9605_vm3, %v14163_v61, %v4970_v3  ;;  %v12027_v7 = vsel %vm412_vm1, %v4994_v22, %v4985_v37  ;;  %8835 = vmatmul.mubr.msk.bf16.gmra.mrb[76].mxu1 %vm1204_vm12, %v9255_v14 }
 0xc87   : > { %v12034_v29 = vsel %vm412_vm1, %v4992_v41, %v4988_v58  ;;  %v12037_v49 = vsel %vm412_vm1, %v4993_v25, %v4989_v53  ;;  %v5043_v16 = vshrl.u32 %v12027_v7, 16  ;;  %v5046_v5 = vshll.u32 %v12027_v7, 16  ;;  %8978 = vmatmul.mubr.msk.bf16.vlgmr.msra.gmra.mrb[96].mxu0 %vm584_vm10, %v11903_v46  ;;  %5112 = vmatprep.mubr.bf16.mxu1 %v14214_v1 }
 0xc88   : > { %14253 = vst [vmem:[#allocation12_spill] sm:$0xff] %v12034_v29  ;;  %14254 = vst [vmem:[#allocation14_spill] sm:$0xff] %v12037_v49  ;;  %v5029_v34 = vshrl.u32 %v12034_v29, 16  ;;  %v5032_v47 = vshll.u32 %v12034_v29, 16  ;;  %v5036_v52 = vshrl.u32 %v12037_v49, 16  ;;  %v5039_v48 = vshll.u32 %v12037_v49, 16  ;;  %5155 = vmatprep.mubr.bf16.mxu0 %v14214_v1 }
 0xc89   : > { %v5045_v54 = vrot.slane %v5043_v16, 6  ;;  %v5048_v23 = vrot.slane %v5046_v5, 7  ;;  %v5056_v21 = vsel %vm9641_vm7, %v11850_v8, %v5028_v0  ;;  %v5055_v44 = vsel %vm9641_vm7, %v11844_v40, %v5021_v20 }
 0xc8a   : > { %v5031_v6 = vrot.slane %v5029_v34, 6  ;;  %v5034_v11 = vrot.slane %v5032_v47, 7  ;;  %v5038_v28 = vrot.slane %v5036_v52, 6  ;;  %v5041_v24 = vrot.slane %v5039_v48, 7 }
 0xc8b   : > { %v5049_v15 = vor.u32 %v5048_v23, %v5045_v54  ;;  %v5063_v50 = vsel %vm567_vm8, %v5056_v21, 1065369472  ;;  %v5061_v9 = vsel %vm567_vm8, %v5055_v44, 1065369472 }
 0xc8c   : > { %8844 = vmatprep.subr.msk.bf16.mxu1 %vm588_vm9, %v5063_v50  ;;  %v5070_v58 = vsel %vm588_vm9, %v5061_v9, 0  ;;  %v5042_v39 = vor.u32 %v5041_v24, %v5038_v28  ;;  %v5035_v3 = vor.u32 %v5034_v11, %v5031_v6  ;;  %v9256_v11 = vld [vmem:[%s14133_s5] sm:$0xff] }
 0xc8d   : > { %5081 = vmatpush1.bf16.msra.mxu1 %v5070_v58  ;;  %v5059_v40 = vsel %vm9641_vm7, %v11929_v12, %v5049_v15  ;;  %v9257_v24 = vld [vmem:[%s14133_s5 + $0x40] sm:$0xff]  ;;  %v9258_v58 = vld [vmem:[%s14133_s5 + $0x8] sm:$0xff] }
 0xc8e   : > { %8981 = vmatprep.subr.bf16.mxu1 %v14216_v43  ;;  %v5058_v8 = vsel %vm9641_vm7, %v11926_v38, %v5042_v39  ;;  %v5069_v0 = vsel %vm567_vm8, %v5059_v40, 1065369472  ;;  %v5057_v37 = vsel %vm9641_vm7, %v11923_v55, %v5035_v3  ;;  %v9259_v3 = vld [vmem:[%s14133_s5 + $0x48] sm:$0xff] }
 0xc8f   : > { %v5067_v22 = vsel %vm567_vm8, %v5058_v8, 1065369472  ;;  %v5078_v20 = vsel %vm588_vm9, %v5069_v0, 0  ;;  %v5065_v41 = vsel %vm567_vm8, %v5057_v37, 1065369472 }
 0xc90   : > { %8845 = vmatmul.mubr.msk.bf16.vlgmr.msra.gmra.mrb[80].mxu1 %vm584_vm10, %v11903_v46  ;;  %8846 = vmatprep.subr.msk.bf16.mxu0 %vm588_vm9, %v5067_v22  ;;  %v5074_v12 = vsel %vm588_vm9, %v5065_v41, 0  ;;  %v9260_v22 = vld [vmem:[%s14133_s5 + $0x10] sm:$0xff] }
 0xc91   : > { %8982 = vmatpush3.bf16.msra.mxu1 %v5078_v20  ;;  %5124 = vmatpush1.bf16.msra.mxu0 %v5074_v12  ;;  %v9261_v41 = vld [vmem:[%s14133_s5 + $0x50] sm:$0xff] }
 0xc92   : > { %8983 = vmatprep.mubr.msk.bf16.mxu1 %vm9456_vm11, %v14216_v43 }
 0xc94   : > { %8847 = vmatmul.mubr.msk.bf16.vlgmr.msra.gmra.mrb[100].mxu0 %vm584_vm10, %v11903_v46 }
 0xc95   : > { %5431 = vmatprep.mubr.bf16.mxu0 %v14214_v1 }
 0xc98   : > { %8984 = vmatmul.mubr.msk.bf16.vlgmr.msra.gmra.mrb[84].mxu1 %vm584_vm10, %v11903_v46 }
 0xc99   : > { %5484 = vmatprep.mubr.bf16.mxu1 %v14214_v1 }
 0xce7   : > { %v12085_v55 = vpop.f32.mrb[88].mxu0 }
 0xce8   : > { %v12087_v38 = vpop.f32.mrb[89].mxu0 }
 0xce9   : > { %v14174_v53 = vmax.f32 %v12087_v38, 0.0  ;;  %v12090_v25 = vpop.f32.mrb[90].mxu0 }
 0xcea   : > { %v12092_v14 = vpop.f32.mrb[91].mxu0 }
 0xceb   : > { %5229 = vrot.lane.b32.xlu1 %v14174_v53, %s9452_s8  ;;  %v14173_v0 = vmax.f32 %v12092_v14, 0.0 }
 0xd51   : > { %v12097_v16 = vpop.f32.mrb[92].mxu0  ;;  %v4457_v5 = vpop.f32.mrb[72].mxu1 }
 0xd52   : > { %v4934_v34 = vmax.f32 %v12097_v16, 0.0  ;;  %v12100_v47 = vpop.f32.mrb[93].mxu0  ;;  %v4476_v52 = vmax.f32 %v4457_v5, 0.0  ;;  %v4459_v48 = vpop.f32.mrb[73].mxu1 }
 0xd53   : > { %v14170_v54 = vmax.f32 %v12100_v47, 0.0  ;;  %v12103_v23 = vpop.f32.mrb[94].mxu0  ;;  %v4477_v21 = vmax.f32 %v4459_v48, 0.0  ;;  %v4461_v44 = vpop.f32.mrb[74].mxu1  ;;  %v9262_v48 = vld [vmem:[%s14133_s5 + $0x18] sm:$0xff] }
 0xd54   : > { %5231 = vrot.lane.b32.xlu0 %v4934_v34, %s9452_s8  ;;  %v12108_v6 = vpop.f32.mrb[95].mxu0  ;;  %v4484_v28 = vmul.f32 %v9256_v11, %v4476_v52  ;;  %v4513_v15 = vmul.f32 %v9257_v24, %v4476_v52  ;;  %v4478_v50 = vmax.f32 %v4461_v44, 0.0  ;;  %v4463_v9 = vpop.f32.mrb[75].mxu1  ;;  %v4939_v37 = vmax.f32 %v12103_v23, 0.0  ;;  %v9263_v44 = vld [vmem:[%s14133_s5 + $0x58] sm:$0xff] }
 0xd55   : > { %5233 = vrot.lane.b32.xlu1 %v14170_v54, %s9452_s8  ;;  %v4485_v39 = vmul.f32 %v9258_v58, %v4477_v21  ;;  %v4514_v40 = vmul.f32 %v9259_v3, %v4477_v21  ;;  %v4479_v8 = vmax.f32 %v4463_v9, 0.0  ;;  %v14168_v3 = vmax.f32 %v12108_v6, 0.0 }
 0xd56   : > { %v4486_v20 = vmul.f32 %v9260_v22, %v4478_v50  ;;  %v4515_v12 = vmul.f32 %v9261_v41, %v4478_v50 }
 0xd57   : > { %v4492_v5 = vsel %vm2444_vm13, %v4485_v39, 0.0  ;;  %v4521_v52 = vsel %vm2444_vm13, %v4514_v40, 0.0  ;;  %v4487_v21 = vmul.f32 %v9262_v48, %v4479_v8  ;;  %v4516_v11 = vmul.f32 %v9263_v44, %v4479_v8 }
 0xd58   : > { %5239 = vrot.lane.b32.xlu0 %v14173_v0, %s9452_s8  ;;  %v4493_v24 = vadd.f32 %v4492_v5, %v4484_v28  ;;  %v4522_v50 = vadd.f32 %v4521_v52, %v4513_v15  ;;  %v14172_v28 = vmax.f32 %v12085_v55, 0.0 }
 0xd59   : > { %5241 = vrot.lane.b32.xlu1 %v4939_v37, %s9452_s8  ;;  %v4495_v9 = vsel %vm2444_vm13, %v4487_v21, 0.0  ;;  %v4524_v58 = vsel %vm2444_vm13, %v4516_v11, 0.0  ;;  %v4467_v39 = vpop.f32.mrb[76].mxu1 }
 0xd5a   : > { %v12150_v40 = vpop.f32.mrb[96].mxu0  ;;  %v4494_v8 = vadd.f32 %v4493_v24, %v4486_v20  ;;  %v4523_v22 = vadd.f32 %v4522_v50, %v4515_v12  ;;  %v4480_v41 = vmax.f32 %v4467_v39, 0.0  ;;  %v4469_v48 = vpop.f32.mrb[77].mxu1  ;;  %v9264_v20 = vld [vmem:[%s14133_s5 + $0x20] sm:$0xff] }
 0xd5b   : > { %v8979_v15 = vpop.f32.mrb[97].mxu0  ;;  %v4481_v5 = vmax.f32 %v4469_v48, 0.0  ;;  %v4471_v52 = vpop.f32.mrb[78].mxu1  ;;  %v9265_v24 = vld [vmem:[%s14133_s5 + $0x60] sm:$0xff]  ;;  %v9267_v48 = vld [vmem:[%s14133_s5 + $0x68] sm:$0xff] }
 0xd5c   : > { %5243 = vrot.lane.b32.xlu0 %v14168_v3, %s9452_s8  ;;  %v4496_v21 = vadd.f32 %v4495_v9, %v4494_v8  ;;  %v4525_v44 = vadd.f32 %v4524_v58, %v4523_v22  ;;  %v12156_v11 = vpop.f32.mrb[98].mxu0  ;;  %v4488_v12 = vmul.f32 %v9264_v20, %v4480_v41  ;;  %v4517_v50 = vmul.f32 %v9265_v24, %v4480_v41  ;;  %v4473_v39 = vpop.f32.mrb[79].mxu1  ;;  %v9266_v8 = vld [vmem:[%s14133_s5 + $0x28] sm:$0xff] }
 0xd5d   : > { %5227 = vrot.lane.b32.xlu1 %v14172_v28, %s9452_s8  ;;  %v14169_v9 = vmax.f32 %v12150_v40, 0.0  ;;  %v8980_v58 = vpop.f32.mrb[99].mxu0  ;;  %v4489_v22 = vmul.f32 %v9266_v8, %v4481_v5  ;;  %v4518_v15 = vmul.f32 %v9267_v48, %v4481_v5  ;;  %v4482_v20 = vmax.f32 %v4471_v52, 0.0 }
 0xd5e   : > { %v14171_v41 = vmax.f32 %v12090_v25, 0.0  ;;  %v4497_v24 = vadd.f32 %v4496_v21, %v4488_v12  ;;  %v4526_v17 = vadd.f32 %v4525_v44, %v4517_v50  ;;  %v4483_v61 = vmax.f32 %v4473_v39, 0.0  ;;  %v9270_v44 = vld [vmem:[%s14133_s5 + $0x38] sm:$0xff] }
 0xd5f   : > { %v4498_v63 = vsel %vm2444_vm13, %v4489_v22, 0.0  ;;  %v4527_v58 = vsel %vm2444_vm13, %v4518_v15, 0.0  ;;  %v4490_v8 = vmul.f32 %v9268_v59, %v4482_v20  ;;  %v4519_v5 = vmul.f32 %v9269_v60, %v4482_v20  ;;  %v9271_v59 = vld [vmem:[%s14133_s5 + $0x78] sm:$0xff] }
 0xd60   : > { %5237 = vrot.lane.b32.xlu0 %v14171_v41, %s9452_s8  ;;  %v4499_v52 = vadd.f32 %v4498_v63, %v4497_v24  ;;  %v4528_v21 = vadd.f32 %v4527_v58, %v4526_v17  ;;  %v4491_v12 = vmul.f32 %v9270_v44, %v4483_v61  ;;  %v4520_v50 = vmul.f32 %v9271_v59, %v4483_v61 }
 0xd61   : > { %v14167_v39 = vmax.f32 %v12156_v11, 0.0  ;;  %5235 = vrot.lane.b32.xlu1 %v14169_v9, %s9452_s8 }
 0xd62   : > { %v4500_v60 = vadd.f32 %v4499_v52, %v4490_v8  ;;  %v4529_v22 = vadd.f32 %v4528_v21, %v4519_v5  ;;  %v4501_v63 = vsel %vm2444_vm13, %v4491_v12, 0.0  ;;  %v4530_v17 = vsel %vm2444_vm13, %v4520_v50, 0.0 }
 0xd63   : > { %v5114_v48 = vpop.f32.mrb[80].mxu1 }
 0xd64   : > { %5245 = vrot.lane.b32.xlu0 %v14167_v39, %s9452_s8  ;;  %v5116_v15 = vpop.f32.mrb[81].mxu1  ;;  %v12201_v20 = vadd.f32 %v4501_v63, %v4500_v60  ;;  %v12203_v61 = vadd.f32 %v4530_v17, %v4529_v22 }
 0xd65   : > { %v5118_v24 = vpop.f32.mrb[82].mxu1 }
 0xd66   : > { %14255 = vst [vmem:[#allocation15_spill] sm:$0xff] %v12201_v20  ;;  %14256 = vst [vmem:[#allocation16_spill] sm:$0xff] %v12203_v61  ;;  %v5120_v58 = vpop.f32.mrb[83].mxu1  ;;  %v12219_v17 = vmax.f32 %v5118_v24, 0.0 }
 0xd67   : > { %v5157_v44 = vpop.f32.mrb[100].mxu0 }
 0xd68   : > { %v12205_v59 = vmax.f32 %v5157_v44, 0.0  ;;  %v5159_v8 = vpop.f32.mrb[101].mxu0 }
 0xd69   : > { %v12207_v5 = vmax.f32 %v5159_v8, 0.0  ;;  %v5161_v52 = vpop.f32.mrb[102].mxu0  ;;  %v12221_v8 = vmax.f32 %v5114_v48, 0.0 }
 0xd6a   : > { %14257 = vst [vmem:[#allocation17_spill] sm:$0xff] %v12205_v59  ;;  %5299 = vrot.lane.b32.xlu0 %v12205_v59, %s9452_s8  ;;  %v5163_v21 = vpop.f32.mrb[103].mxu0  ;;  %v12215_v22 = vmax.f32 %v5161_v52, 0.0  ;;  %v12229_v52 = vmax.f32 %v5120_v58, 0.0  ;;  %v5230_v58 = vpop.permute.xlu1 %5229 }
 0xd6b   : > { %v12211_v12 = vmax.f32 %v5163_v21, 0.0  ;;  %5301 = vrot.lane.b32.xlu1 %v12207_v5, %s9452_s8  ;;  %v5200_v50 = vpop.f32.mrb[84].mxu1  ;;  %v12231_v21 = vmax.f32 %v5116_v15, 0.0 }
 0xd6c   : > { %v8985_v60 = vpop.f32.mrb[85].mxu1  ;;  %14258 = vst [vmem:[#allocation18_spill] sm:$0xff] %v12215_v22  ;;  %v12237_v48 = vmax.f32 %v5200_v50, 0.0 }
 0xd6d   : > { %v5203_v63 = vpop.f32.mrb[86].mxu1 }
 0xd6e   : > { %5311 = vrot.lane.b32.xlu0 %v12211_v12, %s9452_s8  ;;  %v8986_v44 = vpop.f32.mrb[87].mxu1  ;;  %v12235_v24 = vmax.f32 %v5203_v63, 0.0 }
 0xd6f   : > { %5309 = vrot.lane.b32.xlu1 %v12215_v22, %s9452_s8 }
 0xd72   : > { %5305 = vrot.lane.b32.xlu0 %v12219_v17, %s9452_s8 }
 0xd73   : > { %5295 = vrot.lane.b32.xlu1 %v12221_v8, %s9452_s8 }
 0xd76   : > { %5307 = vrot.lane.b32.xlu0 %v12229_v52, %s9452_s8 }
 0xd77   : > { %5297 = vrot.lane.b32.xlu1 %v12231_v21, %s9452_s8 }
 0xd7a   : > { %5313 = vrot.lane.b32.xlu0 %v12235_v24, %s9452_s8 }
 0xd7b   : > { %5303 = vrot.lane.b32.xlu1 %v12237_v48, %s9452_s8 }
 0xdc6   : > { %v5232_v60 = vpop.permute.xlu0 %5231 }
 0xdc7   : > { %v5234_v15 = vpop.permute.xlu1 %5233  ;;  %v5248_v56 = vsel %vm382_vm0, %v5230_v58, %v5232_v60 }
 0xdc8   : > { %v5249_v50 = vsel %vm382_vm0, %v5232_v60, %v5234_v15  ;;  %v14261_v60 = vmax.f32 %v12092_v14, 0.0 }
 0xdc9   : > { %v5267_v0 = vadd.f32 %v5249_v50, %v4934_v34  ;;  %v14260_v50 = vmax.f32 %v12087_v38, 0.0 }
 0xdca   : > { %v5240_v44 = vpop.permute.xlu0 %5239 }
 0xdcb   : > { %v5242_v39 = vpop.permute.xlu1 %5241  ;;  %v5277_v32 = vadd.f32 %v5267_v0, %v12205_v59  ;;  %v5266_v0 = vadd.f32 %v5248_v56, %v14260_v50 }
 0xdcc   : > { %v5252_v4 = vsel %vm382_vm0, %v5240_v44, %v5242_v39 }
 0xdcd   : > { %v5271_v59 = vadd.f32 %v5252_v4, %v14261_v60  ;;  %v14267_v60 = vmax.f32 %v12156_v11, 0.0 }
 0xdce   : > { %v5244_v3 = vpop.permute.xlu0 %5243 }
 0xdcf   : > { %v5228_v63 = vpop.permute.xlu1 %5227  ;;  %v5253_v28 = vsel %vm382_vm0, %v5242_v39, %v5244_v3  ;;  %v14262_v39 = vmax.f32 %v12085_v55, 0.0  ;;  %v5281_v4 = vadd.f32 %v5271_v59, %v12229_v52 }
 0xdd0   : > { %v5272_v61 = vadd.f32 %v5253_v28, %v4939_v37  ;;  %v5247_v36 = vsel %vm382_vm0, %v5228_v63, %v5230_v58 }
 0xdd1   : > { %v5265_v58 = vadd.f32 %v5247_v36, %v14262_v39  ;;  %v5276_v36 = vadd.f32 %v5266_v0, %v12231_v21 }
 0xdd2   : > { %v5238_v9 = vpop.permute.xlu0 %5237  ;;  %v5282_v23 = vadd.f32 %v5272_v61, %v12215_v22 }
 0xdd3   : > { %v5236_v41 = vpop.permute.xlu1 %5235  ;;  %v5251_v16 = vsel %vm382_vm0, %v5238_v9, %v5240_v44  ;;  %v14263_v9 = vmax.f32 %v12090_v25, 0.0  ;;  %v5275_v56 = vadd.f32 %v5265_v58, %v12221_v8  ;;  %v14264_v25 = vmax.f32 %v12100_v47, 0.0 }
 0xdd4   : > { %v5250_v61 = vsel %vm382_vm0, %v5234_v15, %v5236_v41 }
 0xdd6   : > { %v5246_v54 = vpop.permute.xlu0 %5245 }
 0xdd7   : > { %v5254_v22 = vsel %vm382_vm0, %v5244_v3, %v5246_v54  ;;  %v14266_v3 = vmax.f32 %v12108_v6, 0.0  ;;  %v5274_v39 = vadd.f32 %v5246_v54, %v14267_v60 }
 0xddc   : > { %v5300_v53 = vpop.permute.xlu0 %5299 }
 0xddd   : > { %v5302_v19 = vpop.permute.xlu1 %5301 }
 0xdde   : > { %v12252_v20 = vsel %vm382_vm0, %v5300_v53, %v5302_v19 }
 0xddf   : > { %14259 = vst [vmem:[#allocation19_spill] sm:$0xff] %v12252_v20  ;;  %v5335_v34 = vadd.f32 %v12252_v20, %v5277_v32  ;;  %v5270_v32 = vadd.f32 %v5251_v16, %v14263_v9  ;;  %v5268_v16 = vadd.f32 %v5250_v61, %v14264_v25 }
 0xde0   : > { %v5312_v29 = vpop.permute.xlu0 %5311 }
 0xde1   : > { %v5310_v37 = vpop.permute.xlu1 %5309  ;;  %v5345_v20 = vmul.f32 0.25, %v5335_v34  ;;  %v5280_v55 = vadd.f32 %v5270_v32, %v12219_v17  ;;  %v5273_v34 = vadd.f32 %v5254_v22, %v14266_v3 }
 0xde2   : > { %v12262_v28 = vsel %vm382_vm0, %v5310_v37, %v5312_v29 }
 0xde3   : > { %v5340_v63 = vadd.f32 %v12262_v28, %v5282_v23  ;;  %v14265_v23 = vmax.f32 %v12150_v40, 0.0  ;;  %v5283_v22 = vadd.f32 %v5273_v34, %v12211_v12 }
 0xde4   : > { %v5306_v44 = vpop.permute.xlu0 %5305 }
 0xde5   : > { %v5350_v49 = vmul.f32 0.25, %v5340_v63  ;;  %v5296_v38 = vpop.permute.xlu1 %5295  ;;  %v5269_v15 = vadd.f32 %v5236_v41, %v14265_v23  ;;  %v5278_v63 = vadd.f32 %v5268_v16, %v12207_v5 }
 0xde7   : > { %v5355_v14 = vpack.c.bf16 %v5350_v49, %v5345_v20 }
 0xde8   : > { %v5308_v50 = vpop.permute.xlu0 %5307 }
 0xde9   : > { %v12288_v49 = vsel %vm382_vm0, %v5306_v44, %v5308_v50  ;;  %v12291_v20 = vsel %vm382_vm0, %v5308_v50, %v5310_v37  ;;  %v5298_v59 = vpop.permute.xlu1 %5297  ;;  %5385 = vrot.lane.b32.xlu1 %v5355_v14, %s9453_s9  ;;  %5367 = vrot.lane.b32.xlu0 %v5355_v14, %s9452_s8 }
 0xdea   : > { %v5338_v47 = vadd.f32 %v12288_v49, %v5280_v55  ;;  %v5339_v6 = vadd.f32 %v12291_v20, %v5281_v4  ;;  %v12298_v40 = vsel %vm382_vm0, %v5296_v38, %v5298_v59  ;;  %v12301_v54 = vsel %vm382_vm0, %v5298_v59, %v5300_v53 }
 0xdeb   : > { %v5333_v11 = vadd.f32 %v12298_v40, %v5275_v56  ;;  %v5334_v41 = vadd.f32 %v12301_v54, %v5276_v36  ;;  %v14268_v53 = vrot.slane %v11700_v45, 1  ;;  %v14269_v38 = vrot.slane %v11719_v30, 1 }
 0xdec   : > { %v5348_v37 = vmul.f32 0.25, %v5338_v47  ;;  %v5349_v0 = vmul.f32 0.25, %v5339_v6  ;;  %v12306_v58 = vpop.permute.xlu0 %5313  ;;  %v5279_v56 = vadd.f32 %v5269_v15, %v12237_v48  ;;  %v5284_v4 = vadd.f32 %v5274_v39, %v12235_v24 }
 0xded   : > { %v5343_v9 = vmul.f32 0.25, %v5333_v11  ;;  %v5344_v32 = vmul.f32 0.25, %v5334_v41  ;;  %v12311_v44 = vsel %vm382_vm0, %v5312_v29, %v12306_v58  ;;  %5613 = vrot.lane.b32.xlu1 %v14268_v53, %s9452_s8  ;;  %v12316_v61 = vpop.permute.xlu1 %5303  ;;  %5615 = vrot.lane.b32.xlu0 %v14269_v38, %s9452_s8  ;;  %v14270_v15 = vrot.slane %v11734_v62, 1 }
 0xdee   : > { %v12325_v36 = vsel %vm382_vm0, %v5302_v19, %v12316_v61  ;;  %v5341_v29 = vadd.f32 %v12311_v44, %v5283_v22  ;;  %v5342_v16 = vadd.f32 %v12306_v58, %v5284_v4  ;;  %v5337_v23 = vadd.f32 %v12316_v61, %v5279_v56 }
 0xdef   : > { %v5353_v55 = vpack.c.bf16 %v5348_v37, %v5343_v9  ;;  %v5354_v25 = vpack.c.bf16 %v5349_v0, %v5344_v32  ;;  %v5336_v45 = vadd.f32 %v12325_v36, %v5278_v63  ;;  %v14271_v62 = vrot.slane %v11753_v10, 1 }
 0xdf0   : > { %v5351_v30 = vmul.f32 0.25, %v5341_v29  ;;  %v5352_v34 = vmul.f32 0.25, %v5342_v16  ;;  %v5347_v50 = vmul.f32 0.25, %v5337_v23 }
 0xdf1   : > { %5399 = vmatprep.subr.bf16.mxu0 %v5354_v25  ;;  %5617 = vrot.lane.b32.xlu1 %v14270_v15, %s9452_s8  ;;  %v5346_v3 = vmul.f32 0.25, %v5336_v45 }
 0xdf2   : > { %5383 = vrot.lane.b32.xlu0 %v5354_v25, %s9453_s9  ;;  %5400 = vmatpush1.bf16.msra.mxu0 %v5353_v55  ;;  %v5357_v60 = vpack.c.bf16 %v5352_v34, %v5347_v50  ;;  %v12378_v50 = vld [vmem:[%s14215_s3] sm:$0xff]  }
 0xdf3   : > { %v5356_v19 = vpack.c.bf16 %v5351_v30, %v5346_v3  ;;  %v5604_v30 = vrot.slane %v11739_v57, 1 }
 0xdf5   : > { %5365 = vrot.lane.b32.xlu1 %v5354_v25, %s9452_s8  ;;  %5452 = vmatprep.subr.bf16.mxu1 %v5356_v19 }
 0xdf6   : > { %5381 = vrot.lane.b32.xlu0 %v5353_v55, %s9453_s9  ;;  %5453 = vmatpush1.bf16.msra.mxu1 %v5355_v14  ;;  %v14272_v14 = vrot.slane %v11783_v27, 1 }
 0xdf9   : > { %5363 = vrot.lane.b32.xlu1 %v5353_v55, %s9452_s8  ;;  %v5603_v55 = vrot.slane %v11731_v18, 1 }
 0xdfa   : > { %5389 = vrot.lane.b32.xlu0 %v5357_v60, %s9453_s9 }
 0xdfd   : > { %5371 = vrot.lane.b32.xlu1 %v5357_v60, %s9452_s8 }
 0xdfe   : > { %5369 = vrot.lane.b32.xlu0 %v5356_v19, %s9452_s8 }
 0xe01   : > { %5387 = vrot.lane.b32.xlu1 %v5356_v19, %s9453_s9 }
 0xe02   : > { %5632 = vrot.lane.b32.xlu0 %v11731_v18, %s9453_s9 }
 0xe05   : > { %5634 = vrot.lane.b32.xlu1 %v11739_v57, %s9453_s9 }
 0xe06   : > { %5636 = vrot.lane.b32.xlu0 %v11749_v2, %s9453_s9 }
 0xe09   : > { %5619 = vrot.lane.b32.xlu1 %v14271_v62, %s9452_s8 }
 0xe0a   : > { %5621 = vrot.lane.b32.xlu0 %v14272_v14, %s9452_s8 }
 0xe0d   : > { %5638 = vrot.lane.b32.xlu1 %v11780_v31, %s9453_s9 }
 0xe0e   : > { %5640 = vrot.lane.b32.xlu0 %v11787_v33, %s9453_s9 }
 0xe5b   : > { %v5386_v39 = vpop.permute.xlu1 %5385  ;;  %v5368_v59 = vpop.permute.xlu0 %5367 }
 0xe5f   : > { %v5614_v47 = vpop.permute.xlu1 %5613  ;;  %v5616_v6 = vpop.permute.xlu0 %5615 }
 0xe60   : > { %v5623_v23 = vsel %vm382_vm0, %v5614_v47, %v5616_v6  ;;  %v5607_v47 = vrot.slane %v11787_v33, 1 }
 0xe61   : > { %v5646_v19 = vsel %vm9605_vm3, %v5603_v55, %v5623_v23 }
 0xe63   : > { %v5618_v11 = vpop.permute.xlu1 %5617 }
 0xe64   : > { %v5384_v41 = vpop.permute.xlu0 %5383  ;;  %v5624_v15 = vsel %vm382_vm0, %v5616_v6, %v5618_v11 }
 0xe65   : > { %v5392_v9 = vsel %vm407_vm4, %v5384_v41, %v5386_v39  ;;  %v5647_v57 = vsel %vm9605_vm3, %v5604_v30, %v5624_v15 }
 0xe67   : > { %v5366_v22 = vpop.permute.xlu1 %5365 }
 0xe68   : > { %v5382_v37 = vpop.permute.xlu0 %5381  ;;  %v5374_v10 = vsel %vm382_vm0, %v5366_v22, %v5368_v59 }
 0xe69   : > { %5401 = vmatprep.subr.bf16.mxu0 %v5374_v10  ;;  %v5391_v53 = vsel %vm407_vm4, %v5382_v37, %v5384_v41 }
 0xe6b   : > { %v5364_v0 = vpop.permute.xlu1 %5363 }
 0xe6c   : > { %v5373_v27 = vsel %vm382_vm0, %v5364_v0, %v5366_v22  ;;  %v5390_v63 = vpop.permute.xlu0 %5389  ;;  %v5606_v22 = vrot.slane %v11780_v31, 1 }
 0xe6d   : > { %5402 = vmatpush1.bf16.msra.mxu0 %v5373_v27 }
 0xe6e   : > { %5403 = vmatprep.subr.bf16.mxu0 %v5392_v9 }
 0xe6f   : > { %v5372_v32 = vpop.permute.xlu1 %5371 }
 0xe70   : > { %v5370_v38 = vpop.permute.xlu0 %5369 }
 0xe71   : > { %5404 = vmatpush1.bf16.msra.mxu0 %v5391_v53  ;;  %v5376_v56 = vsel %vm382_vm0, %v5370_v38, %v5372_v32  ;;  %v5375_v4 = vsel %vm382_vm0, %v5368_v59, %v5370_v38 }
 0xe72   : > { %5454 = vmatprep.subr.bf16.mxu1 %v5376_v56  ;;  %5405 = vmatprep.subr.bf16.mxu0 %v10039_v35 }
 0xe73   : > { %5455 = vmatpush1.bf16.msra.mxu1 %v5375_v4  ;;  %v5388_v29 = vpop.permute.xlu1 %5387 }
 0xe74   : > { %v5633_v25 = vpop.permute.xlu0 %5632  ;;  %v5394_v45 = vsel %vm407_vm4, %v5388_v29, %v5390_v63  ;;  %v5393_v16 = vsel %vm407_vm4, %v5386_v39, %v5388_v29  ;;  %v5605_v63 = vrot.slane %v11749_v2, 1 }
 0xe75   : > { %5406 = vmatpush1.bf16.msra.mxu0 %v10039_v35  ;;  %5456 = vmatprep.subr.bf16.mxu1 %v5394_v45 }
 0xe77   : > { %5457 = vmatpush1.bf16.msra.mxu1 %v5393_v16  ;;  %v5635_v3 = vpop.permute.xlu1 %5634 }
 0xe78   : > { %v5637_v18 = vpop.permute.xlu0 %5636  ;;  %v5642_v34 = vsel %vm407_vm4, %v5633_v25, %v5635_v3  ;;  %8849 = vmatmul.mubr.msk.bf16.vlgmr.msra.gmra.mrb[104].mxu0 %vm1204_vm12, %v12378_v50  ;;  %5458 = vmatprep.subr.bf16.mxu1 %v10039_v35  ;;  %v12408_v25 = vld [vmem:[%s14215_s3 + $0x8] sm:$0xff]  }
 0xe79   : > { %v5643_v60 = vsel %vm407_vm4, %v5635_v3, %v5637_v18  ;;  %v5653_v62 = vsel %vm412_vm1, %v5646_v19, %v5642_v34  ;;  %5441 = vmatprep.mubr.bf16.mxu0 %v14214_v1 }
 0xe7a   : > { %v5656_v14 = vsel %vm412_vm1, %v5647_v57, %v5643_v60  ;;  %v5666_v39 = vshrl.u32 %v5653_v62, 16  ;;  %v5669_v59 = vshll.u32 %v5653_v62, 16 }
 0xe7b   : > { %v5673_v6 = vshrl.u32 %v5656_v14, 16  ;;  %v5676_v41 = vshll.u32 %v5656_v14, 16  ;;  %5459 = vmatpush1.bf16.msra.mxu1 %v10039_v35  ;;  %v5620_v37 = vpop.permute.xlu1 %5619 }
 0xe7c   : > { %v5668_v10 = vrot.slane %v5666_v39, 6  ;;  %v5671_v0 = vrot.slane %v5669_v59, 7  ;;  %v5622_v27 = vpop.permute.xlu0 %5621  ;;  %v5625_v53 = vsel %vm382_vm0, %v5618_v11, %v5620_v37 }
 0xe7d   : > { %v5675_v9 = vrot.slane %v5673_v6, 6  ;;  %v5678_v32 = vrot.slane %v5676_v41, 7  ;;  %v5626_v38 = vsel %vm382_vm0, %v5620_v37, %v5622_v27  ;;  %v5650_v33 = vsel %vm9605_vm3, %v5607_v47, %v5622_v27 }
 0xe7e   : > { %v5672_v56 = vor.u32 %v5671_v0, %v5668_v10  ;;  %8851 = vmatmul.mubr.msk.bf16.vlgmr.msra.gmra.mrb[88].mxu1 %vm1204_vm12, %v12378_v50  ;;  %v5649_v31 = vsel %vm9605_vm3, %v5606_v22, %v5626_v38  ;;  %v5648_v2 = vsel %vm9605_vm3, %v5605_v63, %v5625_v53  ;;  %v14273_v63 = vld [vmem:[#allocation14_spill] sm:$0xff]  ;;  %v14274_v53 = vld [vmem:[#allocation12_spill] sm:$0xff] }
 0xe7f   : > { %v5639_v4 = vpop.permute.xlu1 %5638  ;;  %v5679_v29 = vor.u32 %v5678_v32, %v5675_v9  ;;  %5494 = vmatprep.mubr.bf16.mxu1 %v14214_v1 }
 0xe80   : > { %v5641_v11 = vpop.permute.xlu0 %5640  ;;  %v5644_v55 = vsel %vm407_vm4, %v5637_v18, %v5639_v4  ;;  %8850 = vmatmul.mubr.msk.bf16.gmra.mrb[108].mxu0 %vm1204_vm12, %v12408_v25  ;;  %v5706_v45 = vsel %vm9641_vm7, %v11995_v13, %v5672_v56 }
 0xe81   : > { %v5665_v16 = vsel %vm412_vm1, %v5650_v33, %v5641_v11  ;;  %v5645_v23 = vsel %vm407_vm4, %v5639_v4, %v5641_v11  ;;  %v5659_v30 = vsel %vm412_vm1, %v5648_v2, %v5644_v55  ;;  %v5707_v15 = vsel %vm9641_vm7, %v11998_v42, %v5679_v29  ;;  %5763 = vmatprep.mubr.bf16.mxu0 %v14214_v1 }
 0xe82   : > { %v5694_v3 = vshrl.u32 %v5665_v16, 16  ;;  %v5697_v19 = vshll.u32 %v5665_v16, 16  ;;  %v5662_v18 = vsel %vm412_vm1, %v5649_v31, %v5645_v23  ;;  %v5680_v34 = vshrl.u32 %v5659_v30, 16  ;;  %v9275_v23 = vld [vmem:[%s14217_s4 + $0x100] sm:$0xff] }
 0xe83   : > { %v5683_v57 = vshll.u32 %v5659_v30, 16  ;;  %v5687_v60 = vshrl.u32 %v5662_v18, 16  ;;  %v5690_v13 = vshll.u32 %v5662_v18, 16  ;;  %v5714_v62 = vsel %vm567_vm8, %v5707_v15, 1065369472 }
 0xe84   : > { %v5696_v14 = vrot.slane %v5694_v3, 6  ;;  %v5699_v39 = vrot.slane %v5697_v19, 7  ;;  %v5682_v59 = vrot.slane %v5680_v34, 6  ;;  %8853 = vmatprep.subr.msk.bf16.mxu0 %vm588_vm9, %v5714_v62  ;;  %v5712_v47 = vsel %vm567_vm8, %v5706_v45, 1065369472  ;;  %v9274_v45 = vld [vmem:[%s14217_s4] sm:$0xff] }
 0xe85   : > { %v5685_v42 = vrot.slane %v5683_v57, 7  ;;  %v5689_v6 = vrot.slane %v5687_v60, 6  ;;  %v5692_v41 = vrot.slane %v5690_v13, 7  ;;  %v5721_v22 = vsel %vm588_vm9, %v5712_v47, 0  ;;  %v9277_v19 = vld [vmem:[%s14217_s4 + $0x108] sm:$0xff] }
 0xe86   : > { %v5700_v37 = vor.u32 %v5699_v39, %v5696_v14  ;;  %5732 = vmatpush1.bf16.msra.mxu0 %v5721_v22  ;;  %8852 = vmatmul.mubr.msk.bf16.gmra.mrb[92].mxu1 %vm1204_vm12, %v12408_v25 }
 0xe87   : > { %v5686_v10 = vor.u32 %v5685_v42, %v5682_v59  ;;  %8987 = vmatprep.subr.bf16.mxu0 %v14216_v43  ;;  %v5693_v0 = vor.u32 %v5692_v41, %v5689_v6  ;;  %5806 = vmatprep.mubr.bf16.mxu1 %v14214_v1  ;;  %v9278_v42 = vld [vmem:[%s14217_s4 + $0x10] sm:$0xff] }
 0xe88   : > { %v5710_v27 = vsel %vm9641_vm7, %v12027_v7, %v5700_v37  ;;  %v9279_v41 = vld [vmem:[%s14217_s4 + $0x110] sm:$0xff] }
 0xe89   : > { %8854 = vmatmul.mubr.msk.bf16.vlgmr.msra.gmra.mrb[112].mxu0 %vm584_vm10, %v11903_v46  ;;  %v5709_v9 = vsel %vm9641_vm7, %v14273_v63, %v5693_v0  ;;  %v5720_v32 = vsel %vm567_vm8, %v5710_v27, 1065369472  ;;  %v5708_v38 = vsel %vm9641_vm7, %v14274_v53, %v5686_v10  ;;  %v9280_v0 = vld [vmem:[%s14217_s4 + $0x18] sm:$0xff] }
 0xe8a   : > { %v5718_v56 = vsel %vm567_vm8, %v5709_v9, 1065369472  ;;  %v5729_v33 = vsel %vm588_vm9, %v5720_v32, 0  ;;  %v5716_v31 = vsel %vm567_vm8, %v5708_v38, 1065369472  ;;  %8989 = vmatprep.mubr.msk.bf16.mxu0 %vm9456_vm11, %v14216_v43  ;;  %v9281_v63 = vld [vmem:[%s14217_s4 + $0x118] sm:$0xff] }
 0xe8b   : > { %8855 = vmatprep.subr.msk.bf16.mxu1 %vm588_vm9, %v5718_v56  ;;  %8988 = vmatpush3.bf16.msra.mxu0 %v5729_v33  ;;  %v5725_v7 = vsel %vm588_vm9, %v5716_v31, 0  ;;  %v9282_v31 = vld [vmem:[%s14217_s4 + $0x20] sm:$0xff] }
 0xe8c   : > { %5775 = vmatpush1.bf16.msra.mxu1 %v5725_v7 }
 0xe8f   : > { %8856 = vmatmul.mubr.msk.bf16.vlgmr.msra.gmra.mrb[96].mxu1 %vm584_vm10, %v11903_v46 }
 0xe90   : > { %6034 = vmatprep.mubr.bf16.mxu1 %v14214_v1 }
 0xe91   : > { %8990 = vmatmul.mubr.msk.bf16.vlgmr.msra.gmra.mrb[116].mxu0 %vm584_vm10, %v11903_v46  ;;  %v9276_v46 = vld [vmem:[%s14217_s4 + $0x8] sm:$0xff] }
 0xe92   : > { %6087 = vmatprep.mubr.bf16.mxu0 %v14214_v1 }
 0xf4b   : > { %v5433_v4 = vpop.f32.mrb[104].mxu0 }
 0xf4c   : > { %v5505_v29 = vmax.f32 %v5433_v4, 0.0  ;;  %v5435_v2 = vpop.f32.mrb[105].mxu0  ;;  %v14275_v4 = vld [vmem:[#allocation17_spill] sm:$0xff] }
 0xf4d   : > { %v5506_v11 = vmax.f32 %v5435_v2, 0.0  ;;  %v5437_v55 = vpop.f32.mrb[106].mxu0 }
 0xf4e   : > { %v5521_v16 = vmul.f32 %v9274_v45, %v5505_v29  ;;  %v5562_v30 = vmul.f32 %v9275_v23, %v5505_v29  ;;  %v5439_v15 = vpop.f32.mrb[107].mxu0  ;;  %v5509_v14 = vmax.f32 %v5437_v55, 0.0  ;;  %v14276_v29 = vld [vmem:[#allocation19_spill] sm:$0xff] }
 0xf4f   : > { %v5522_v3 = vmul.f32 %v9276_v46, %v5506_v11  ;;  %v5563_v18 = vmul.f32 %v9277_v19, %v5506_v11  ;;  %v5510_v53 = vmax.f32 %v5439_v15, 0.0  ;;  %v12493_v2 = vadd.f32 %v14276_v29, %v14275_v4  ;;  %v9283_v11 = vld [vmem:[%s14217_s4 + $0x120] sm:$0xff] }
 0xf50   : > { %v5525_v7 = vmul.f32 %v9282_v31, %v5509_v14  ;;  %v5566_v55 = vmul.f32 %v9283_v11, %v5509_v14  ;;  %v14277_v19 = vld [vmem:[#allocation18_spill] sm:$0xff] }
 0xf51   : > { %v5537_v34 = vadd.f32 %v5522_v3, %v5521_v16  ;;  %v5578_v57 = vadd.f32 %v5563_v18, %v5562_v30  ;;  %v5486_v60 = vpop.f32.mrb[88].mxu1  ;;  %v5868_v3 = vadd.f32 %v12298_v40, %v12221_v8  ;;  %v12505_v18 = vadd.f32 %v12262_v28, %v14277_v19 }
 0xf52   : > { %v5507_v13 = vmax.f32 %v5486_v60, 0.0  ;;  %v5488_v62 = vpop.f32.mrb[89].mxu1  ;;  %v9285_v60 = vld [vmem:[%s14217_s4 + $0x128] sm:$0xff]  ;;  %v5869_v8 = vadd.f32 %v12301_v54, %v12231_v21  ;;  %v5873_v28 = vadd.f32 %v12288_v49, %v12219_v17  ;;  %v5874_v40 = vadd.f32 %v12291_v20, %v12229_v52  ;;  %v9287_v21 = vld [vmem:[%s14217_s4 + $0x130] sm:$0xff] }
 0xf53   : > { %v5508_v39 = vmax.f32 %v5488_v62, 0.0  ;;  %v12468_v59 = vpop.f32.mrb[108].mxu0  ;;  %v5490_v47 = vpop.f32.mrb[90].mxu1 }
 0xf54   : > { %v5523_v6 = vmul.f32 %v9278_v42, %v5507_v13  ;;  %v5564_v22 = vmul.f32 %v9279_v41, %v5507_v13  ;;  %v12476_v37 = vpop.f32.mrb[109].mxu0  ;;  %v5492_v10 = vpop.f32.mrb[91].mxu1  ;;  %v5511_v23 = vmax.f32 %v5490_v47, 0.0  ;;  %v5513_v30 = vmax.f32 %v12468_v59, 0.0  ;;  %v9286_v42 = vld [vmem:[%s14217_s4 + $0x30] sm:$0xff] }
 0xf55   : > { %v5524_v27 = vmul.f32 %v9280_v0, %v5508_v39  ;;  %v5565_v9 = vmul.f32 %v9281_v63, %v5508_v39  ;;  %v12484_v32 = vpop.f32.mrb[110].mxu0  ;;  %v5512_v15 = vmax.f32 %v5492_v10, 0.0  ;;  %v5567_v13 = vmul.f32 %v9285_v60, %v5510_v53 }
 0xf56   : > { %v5538_v38 = vadd.f32 %v5537_v34, %v5523_v6  ;;  %v5579_v56 = vadd.f32 %v5578_v57, %v5564_v22  ;;  %v12486_v33 = vpop.f32.mrb[111].mxu0  ;;  %v9284_v34 = vld [vmem:[%s14217_s4 + $0x28] sm:$0xff]  ;;  %v12525_v47 = vadd.f32 %v12325_v36, %v12207_v5  ;;  %v5527_v6 = vmul.f32 %v9286_v42, %v5511_v23  ;;  %v9288_v5 = vld [vmem:[%s14217_s4 + $0x40] sm:$0xff]  ;;  %v9289_v36 = vld [vmem:[%s14217_s4 + $0x38] sm:$0xff] }
 0xf57   : > { %v5526_v57 = vmul.f32 %v9284_v34, %v5510_v53  ;;  %v5568_v54 = vmul.f32 %v9287_v21, %v5511_v23  ;;  %v5529_v52 = vmul.f32 %v9288_v5, %v5513_v30  ;;  %v5514_v20 = vmax.f32 %v12476_v37, 0.0  ;;  %v9290_v53 = vld [vmem:[%s14217_s4 + $0x138] sm:$0xff]  ;;  %v9291_v37 = vld [vmem:[%s14217_s4 + $0x140] sm:$0xff]  ;;  %v9292_v23 = vld [vmem:[%s14217_s4 + $0x48] sm:$0xff] }
 0xf58   : > { %v5539_v45 = vadd.f32 %v5538_v38, %v5524_v27  ;;  %v5580_v16 = vadd.f32 %v5579_v56, %v5565_v9  ;;  %v5528_v10 = vmul.f32 %v9289_v36, %v5512_v15  ;;  %v12544_v27 = vadd.f32 %v12311_v44, %v12211_v12  ;;  %v9295_v21 = vld [vmem:[%s14217_s4 + $0x150] sm:$0xff] }
 0xf59   : > { %v12499_v46 = vpop.f32.mrb[92].mxu1  ;;  %v5569_v38 = vmul.f32 %v9290_v53, %v5512_v15  ;;  %v5530_v15 = vmul.f32 %v9292_v23, %v5514_v20  ;;  %v9300_v23 = vld [vmem:[%s14217_s4 + $0x68] sm:$0xff] }
 0xf5a   : > { %v5540_v62 = vadd.f32 %v5539_v45, %v5525_v7  ;;  %v5581_v14 = vadd.f32 %v5580_v16, %v5566_v55  ;;  %v12513_v39 = vpop.f32.mrb[93].mxu1  ;;  %v5570_v7 = vmul.f32 %v9291_v37, %v5513_v30  ;;  %v5515_v4 = vmax.f32 %v12499_v46, 0.0  ;;  %v9298_v37 = vld [vmem:[%s14217_s4 + $0x60] sm:$0xff] }
 0xf5b   : > { %v12515_v59 = vpop.f32.mrb[94].mxu1  ;;  %v5516_v19 = vmax.f32 %v12513_v39, 0.0  ;;  %v5518_v39 = vmax.f32 %v12486_v33, 0.0  ;;  %v9296_v33 = vld [vmem:[%s14217_s4 + $0x58] sm:$0xff] }
 0xf5c   : > { %v5541_v41 = vadd.f32 %v5540_v62, %v5526_v57  ;;  %v5582_v22 = vadd.f32 %v5581_v14, %v5567_v13  ;;  %v5765_v17 = vpop.f32.mrb[112].mxu0  ;;  %v12533_v49 = vpop.f32.mrb[95].mxu1  ;;  %v5517_v14 = vmax.f32 %v12484_v32, 0.0 }
 0xf5d   : > { %v5767_v0 = vpop.f32.mrb[113].mxu0  ;;  %v5858_v56 = vmax.f32 %v5765_v17, 0.0  ;;  %v5532_v5 = vmul.f32 %v9296_v33, %v5516_v19 }
 0xf5e   : > { %v5542_v63 = vadd.f32 %v5541_v41, %v5527_v6  ;;  %v5583_v9 = vadd.f32 %v5582_v22, %v5568_v54  ;;  %v5769_v31 = vpop.f32.mrb[114].mxu0  ;;  %v5859_v29 = vmax.f32 %v5767_v0, 0.0  ;;  %v5572_v54 = vmul.f32 %v9295_v21, %v5515_v4 }
 0xf5f   : > { %v5863_v11 = vmax.f32 %v5769_v31, 0.0  ;;  %v5771_v12 = vpop.f32.mrb[115].mxu0  ;;  %v12553_v45 = vadd.f32 %v5868_v3, %v5858_v56  ;;  %5898 = vrot.lane.b32.xlu1 %v5858_v56, %s9452_s8  ;;  %v9293_v3 = vld [vmem:[%s14217_s4 + $0x148] sm:$0xff] }
 0xf60   : > { %v5543_v44 = vadd.f32 %v5542_v63, %v5528_v10  ;;  %v5584_v55 = vadd.f32 %v5583_v9, %v5569_v38  ;;  %v5864_v16 = vmax.f32 %v5771_v12, 0.0  ;;  %v12560_v30 = vadd.f32 %v5869_v8, %v5859_v29  ;;  %v9294_v8 = vld [vmem:[%s14217_s4 + $0x50] sm:$0xff] }
 0xf61   : > { %v12562_v46 = vadd.f32 %v5873_v28, %v5863_v11  ;;  %5908 = vrot.lane.b32.xlu0 %v5863_v11, %s9452_s8  ;;  %v5571_v34 = vmul.f32 %v9293_v3, %v5514_v20  ;;  %v5531_v28 = vmul.f32 %v9294_v8, %v5515_v4 }
 0xf62   : > { %v5544_v57 = vadd.f32 %v5543_v44, %v5529_v52  ;;  %v5585_v60 = vadd.f32 %v5584_v55, %v5570_v7  ;;  %v12568_v13 = vadd.f32 %v5874_v40, %v5864_v16  ;;  %v5808_v62 = vpop.f32.mrb[96].mxu1  ;;  %v9297_v52 = vld [vmem:[%s14217_s4 + $0x158] sm:$0xff]  ;;  %v5533_v7 = vmul.f32 %v9298_v37, %v5517_v14 }
 0xf63   : > { %v5860_v42 = vmax.f32 %v5808_v62, 0.0  ;;  %v5810_v6 = vpop.f32.mrb[97].mxu1  ;;  %5900 = vrot.lane.b32.xlu1 %v5859_v29, %s9452_s8  ;;  %v5573_v20 = vmul.f32 %v9297_v52, %v5516_v19 }
 0xf64   : > { %v5545_v41 = vadd.f32 %v5544_v57, %v5530_v15  ;;  %v5586_v40 = vadd.f32 %v5585_v60, %v5571_v34  ;;  %v5861_v22 = vmax.f32 %v5810_v6, 0.0  ;;  %v5812_v32 = vpop.f32.mrb[98].mxu1  ;;  %v12579_v17 = vpop.f32.mrb[116].mxu0  ;;  %v5534_v15 = vmul.f32 %v9300_v23, %v5518_v39  ;;  %v9303_v57 = vld [vmem:[%s14217_s4 + $0x170] sm:$0xff] }
 0xf65   : > { %v12588_v36 = vadd.f32 %v12493_v2, %v5860_v42  ;;  %v5865_v10 = vmax.f32 %v5812_v32, 0.0  ;;  %5910 = vrot.lane.b32.xlu0 %v5864_v16, %s9452_s8  ;;  %v5814_v0 = vpop.f32.mrb[99].mxu1  ;;  %v8991_v63 = vpop.f32.mrb[117].mxu0  ;;  %v9299_v2 = vld [vmem:[%s14217_s4 + $0x160] sm:$0xff]  ;;  %v5520_v16 = vmax.f32 %v12533_v49, 0.0 }
 0xf66   : > { %v5546_v9 = vadd.f32 %v5545_v41, %v5531_v28  ;;  %v5587_v53 = vadd.f32 %v5586_v40, %v5572_v54  ;;  %v12592_v38 = vadd.f32 %v12525_v47, %v5861_v22  ;;  %v5866_v56 = vmax.f32 %v5814_v0, 0.0  ;;  %v12594_v31 = vpop.f32.mrb[118].mxu0 }
 0xf67   : > { %v5574_v4 = vmul.f32 %v9299_v2, %v5517_v14  ;;  %v5885_v29 = vadd.f32 %v12505_v18, %v5865_v10  ;;  %v8992_v11 = vpop.f32.mrb[119].mxu0  ;;  %v5519_v47 = vmax.f32 %v12515_v59, 0.0  ;;  %5904 = vrot.lane.b32.xlu1 %v5861_v22, %s9452_s8  ;;  %v9301_v18 = vld [vmem:[%s14217_s4 + $0x168] sm:$0xff]  ;;  %v9304_v14 = vld [vmem:[%s14217_s4 + $0x78] sm:$0xff]  ;;  %v5862_v41 = vmax.f32 %v12579_v17, 0.0 }
 0xf68   : > { %v5547_v12 = vadd.f32 %v5546_v9, %v5532_v5  ;;  %v5588_v44 = vadd.f32 %v5587_v53, %v5573_v20  ;;  %v12605_v55 = vadd.f32 %v12544_v27, %v5866_v56  ;;  %v5575_v19 = vmul.f32 %v9301_v18, %v5518_v39  ;;  %v9302_v27 = vld [vmem:[%s14217_s4 + $0x70] sm:$0xff] }
 0xf69   : > { %5902 = vrot.lane.b32.xlu0 %v5860_v42, %s9452_s8  ;;  %v5535_v34 = vmul.f32 %v9302_v27, %v5519_v47  ;;  %v5576_v60 = vmul.f32 %v9303_v57, %v5519_v47  ;;  %v5536_v39 = vmul.f32 %v9304_v14, %v5520_v16  ;;  %v9305_v42 = vld [vmem:[%s14217_s4 + $0x178] sm:$0xff]  ;;  %v5867_v21 = vmax.f32 %v12594_v31, 0.0 }
 0xf6a   : > { %v5548_v59 = vadd.f32 %v5547_v12, %v5533_v7  ;;  %v5589_v3 = vadd.f32 %v5588_v44, %v5574_v4  ;;  %v5577_v6 = vmul.f32 %v9305_v42, %v5520_v16  ;;  %v5872_v4 = vadd.f32 %v12316_v61, %v12237_v48 }
 0xf6b   : > { %5912 = vrot.lane.b32.xlu1 %v5865_v10, %s9452_s8  ;;  %v5877_v12 = vadd.f32 %v12306_v58, %v12235_v24 }
 0xf6c   : > { %v5549_v49 = vadd.f32 %v5548_v59, %v5534_v15  ;;  %v5590_v62 = vadd.f32 %v5589_v3, %v5575_v19  ;;  %v5882_v47 = vadd.f32 %v5872_v4, %v5862_v41 }
 0xf6d   : > { %5914 = vrot.lane.b32.xlu0 %v5866_v56, %s9452_s8  ;;  %v5887_v23 = vadd.f32 %v5877_v12, %v5867_v21 }
 0xf6e   : > { %v5550_v8 = vadd.f32 %v5549_v49, %v5535_v34  ;;  %v5591_v28 = vadd.f32 %v5590_v62, %v5576_v60 }
 0xf6f   : > { %5906 = vrot.lane.b32.xlu1 %v5862_v41, %s9452_s8 }
 0xf70   : > { %v12633_v54 = vadd.f32 %v5550_v8, %v5536_v39  ;;  %v12635_v40 = vadd.f32 %v5591_v28, %v5577_v6  ;;  %v8869_v28 = vld.sshfl [vmem:[%s10342_s15 + $0x28] sm:$0x33 pattern:$0x76325410] }
 0xf71   : > { %5916 = vrot.lane.b32.xlu0 %v5867_v21, %s9452_s8  ;;  %v6315_v21 = vcombine.high %v8869_v28, %v8869_v28 }
 0xf72   : > { %14278 = vst [vmem:[#allocation14_spill] sm:$0xff] %v12633_v54  ;;  %14279 = vst [vmem:[#allocation12_spill] sm:$0xff] %v12635_v40 }
 0xfd1   : > { %v5899_v22 = vpop.permute.xlu1 %5898 }
 0xfd3   : > { %v5909_v32 = vpop.permute.xlu0 %5908 }
 0xfd5   : > { %v5901_v33 = vpop.permute.xlu1 %5900 }
 0xfd6   : > { %v5918_v5 = vsel %vm382_vm0, %v5899_v22, %v5901_v33 }
 0xfd7   : > { %v5911_v52 = vpop.permute.xlu0 %5910  ;;  %v5936_v20 = vadd.f32 %v5918_v5, %v12553_v45 }
 0xfd8   : > { %v5922_v17 = vsel %vm382_vm0, %v5909_v32, %v5911_v52 }
 0xfd9   : > { %v5941_v10 = vadd.f32 %v5922_v17, %v12562_v46  ;;  %v5905_v0 = vpop.permute.xlu1 %5904  ;;  %v5946_v63 = vmul.f32 0.25, %v5936_v20  ;;  %v8865_v20 = vld.sshfl [vmem:[%s10342_s15 + $0x20] sm:$0x33 pattern:$0x76325410] }
 0xfdb   : > { %v5951_v9 = vmul.f32 0.25, %v5941_v10  ;;  %v5903_v53 = vpop.permute.xlu0 %5902  ;;  %v6317_v10 = vshrl.u32 %v8869_v28, 16 }
 0xfdc   : > { %v5919_v56 = vsel %vm382_vm0, %v5901_v33, %v5903_v53  ;;  %v5920_v31 = vsel %vm382_vm0, %v5903_v53, %v5905_v0 }
 0xfdd   : > { %v5956_v37 = vpack.c.bf16 %v5951_v9, %v5946_v63  ;;  %v5937_v7 = vadd.f32 %v5919_v56, %v12560_v30  ;;  %v5913_v2 = vpop.permute.xlu1 %5912  ;;  %v5938_v45 = vadd.f32 %v5920_v31, %v12588_v36  ;;  %v6328_v63 = vshll.u32 %v6315_v21, 16 }
 0xfde   : > { %v5923_v11 = vsel %vm382_vm0, %v5911_v52, %v5913_v2  ;;  %v6320_v9 = vshll.u32 %v8869_v28, 16 }
 0xfdf   : > { %5966 = vrot.lane.b32.xlu1 %v5956_v37, %s9452_s8  ;;  %5984 = vrot.lane.b32.xlu0 %v5956_v37, %s9453_s9  ;;  %v5915_v46 = vpop.permute.xlu0 %5914  ;;  %v5942_v44 = vadd.f32 %v5923_v11, %v12568_v13  ;;  %v5947_v48 = vmul.f32 0.25, %v5937_v7  ;;  %v5948_v15 = vmul.f32 0.25, %v5938_v45  ;;  %v6319_v45 = vrot.slane %v6317_v10, 6 }
 0xfe0   : > { %v5924_v30 = vsel %vm382_vm0, %v5913_v2, %v5915_v46  ;;  %v6218_v2 = vcombine.high %v8865_v20, %v8865_v20  ;;  %v6330_v12 = vrot.slane %v6328_v63, 7 }
 0xfe1   : > { %v5943_v16 = vadd.f32 %v5924_v30, %v5885_v29  ;;  %v5952_v61 = vmul.f32 0.25, %v5942_v44  ;;  %v5907_v36 = vpop.permute.xlu1 %5906  ;;  %v6322_v44 = vrot.slane %v6320_v9, 7 }
 0xfe2   : > { %v5921_v19 = vsel %vm382_vm0, %v5905_v0, %v5907_v36  ;;  %v5940_v59 = vadd.f32 %v5907_v36, %v5882_v47  ;;  %v6325_v0 = vshrl.u32 %v6315_v21, 16 }
 0xfe3   : > { %v5953_v18 = vmul.f32 0.25, %v5943_v16  ;;  %v5917_v3 = vpop.permute.xlu0 %5916  ;;  %v5957_v27 = vpack.c.bf16 %v5952_v61, %v5947_v48  ;;  %v5939_v34 = vadd.f32 %v5921_v19, %v12592_v38  ;;  %v6323_v19 = vor.u32 %v6322_v44, %v6319_v45 }
 0xfe4   : > { %v5925_v24 = vsel %vm382_vm0, %v5915_v46, %v5917_v3  ;;  %v5945_v58 = vadd.f32 %v5917_v3, %v5887_v23  ;;  %v5950_v29 = vmul.f32 0.25, %v5940_v59  ;;  %v6327_v46 = vrot.slane %v6325_v0, 6 }
 0xfe5   : > { %v5958_v13 = vpack.c.bf16 %v5953_v18, %v5948_v15  ;;  %v5944_v49 = vadd.f32 %v5925_v24, %v12605_v55  ;;  %5968 = vrot.lane.b32.xlu1 %v5957_v27, %s9452_s8  ;;  %6002 = vmatprep.subr.bf16.mxu1 %v5957_v27  ;;  %v5949_v60 = vmul.f32 0.25, %v5939_v34  ;;  %v8866_v55 = vld.sshfl [vmem:[%s10342_s15 + $0x24] sm:$0x33 pattern:$0x76325410] }
 0xfe6   : > { %v5955_v57 = vmul.f32 0.25, %v5945_v58  ;;  %5986 = vrot.lane.b32.xlu0 %v5957_v27, %s9453_s9  ;;  %6003 = vmatpush1.bf16.msra.mxu1 %v5956_v37  ;;  %v6229_v39 = vcombine.high %v8866_v55, %v8866_v55  ;;  %v6231_v32 = vshrl.u32 %v8866_v55, 16  ;;  %v6234_v33 = vshll.u32 %v8866_v55, 16 }
 0xfe7   : > { %v5954_v62 = vmul.f32 0.25, %v5944_v49  ;;  %v6331_v18 = vor.u32 %v6330_v12, %v6327_v46  ;;  %v9313_v12 = vld [vmem:[%s14217_s4 + $0x98] sm:$0xff] }
 0xfe8   : > { %v5960_v14 = vpack.c.bf16 %v5955_v57, %v5950_v29  ;;  %v6239_v6 = vshrl.u32 %v6229_v39, 16  ;;  %v6242_v41 = vshll.u32 %v6229_v39, 16  ;;  %v6233_v56 = vrot.slane %v6231_v32, 6 }
 0xfe9   : > { %v5959_v38 = vpack.c.bf16 %v5954_v62, %v5949_v60  ;;  %v6236_v31 = vrot.slane %v6234_v33, 7  ;;  %v6335_v49 = vsel %vm9641_vm7, %v6229_v39, %v6331_v18  ;;  %v6334_v29 = vsel %vm9641_vm7, %v8866_v55, %v6323_v19  ;;  %v9310_v33 = vld [vmem:[%s14217_s4 + $0x188] sm:$0xff] }
 0xfea   : > { %5974 = vrot.lane.b32.xlu1 %v5960_v14, %s9452_s8  ;;  %5970 = vrot.lane.b32.xlu0 %v5958_v13, %s9452_s8  ;;  %v6241_v52 = vrot.slane %v6239_v6, 6  ;;  %v6244_v17 = vrot.slane %v6242_v41, 7  ;;  %v6339_v60 = vsel %vm567_vm8, %v6335_v49, 1065369472  ;;  %v6337_v62 = vsel %vm567_vm8, %v6334_v29, 1065369472 }
 0xfeb   : > { %6055 = vmatprep.subr.bf16.mxu0 %v5959_v38  ;;  %v6237_v47 = vor.u32 %v6236_v31, %v6233_v56  ;;  %v9308_v6 = vld [vmem:[%s14217_s4 + $0x180] sm:$0xff]  ;;  %v9312_v31 = vld [vmem:[%s14217_s4 + $0x190] sm:$0xff] }
 0xfec   : > { %6056 = vmatpush1.bf16.msra.mxu0 %v5958_v13  ;;  %v6245_v4 = vor.u32 %v6244_v17, %v6241_v52 }
 0xfed   : > { %v6248_v3 = vsel %vm9641_vm7, %v8865_v20, %v6237_v47 }
 0xfee   : > { %5988 = vrot.lane.b32.xlu1 %v5958_v13, %s9453_s9  ;;  %5972 = vrot.lane.b32.xlu0 %v5959_v38, %s9452_s8  ;;  %v6249_v15 = vsel %vm9641_vm7, %v6218_v2, %v6245_v4  ;;  %v6251_v13 = vsel %vm567_vm8, %v6248_v3, 1065369472 }
 0xfef   : > { %v6253_v58 = vsel %vm567_vm8, %v6249_v15, 1065369472  ;;  %v6254_v57 = vsel %vm588_vm9, %v6251_v13, 0  ;;  %v9318_v13 = vld [vmem:[%s14217_s4 + $0x1a8] sm:$0xff] }
 0xff2   : > { %5990 = vrot.lane.b32.xlu1 %v5959_v38, %s9453_s9  ;;  %5992 = vrot.lane.b32.xlu0 %v5960_v14, %s9453_s9  ;;  %v6340_v14 = vsel %vm588_vm9, %v6337_v62, 0  ;;  %v9306_v38 = vld [vmem:[%s14212_s2 + $0x8] sm:$0xff]  }
0x1051   : > { %v5967_v8 = vpop.permute.xlu1 %5966  ;;  %v5985_v42 = vpop.permute.xlu0 %5984 }
0x1057   : > { %v5969_v22 = vpop.permute.xlu1 %5968 }
0x1058   : > { %v5987_v5 = vpop.permute.xlu0 %5986  ;;  %v5976_v11 = vsel %vm382_vm0, %v5967_v8, %v5969_v22 }
0x1059   : > { %v5994_v36 = vsel %vm407_vm4, %v5985_v42, %v5987_v5 }
0x105c   : > { %v5975_v53 = vpop.permute.xlu1 %5974  ;;  %v5971_v37 = vpop.permute.xlu0 %5970 }
0x105d   : > { %v5977_v7 = vsel %vm382_vm0, %v5969_v22, %v5971_v37  ;;  %v9309_v22 = vld [vmem:[%s14217_s4 + $0x88] sm:$0xff] }
0x105e   : > { %6004 = vmatprep.subr.bf16.mxu1 %v5977_v7 }
0x105f   : > { %6005 = vmatpush1.bf16.msra.mxu1 %v5976_v11 }
0x1060   : > { %v5989_v30 = vpop.permute.xlu1 %5988  ;;  %v5973_v16 = vpop.permute.xlu0 %5972 }
0x1061   : > { %v5995_v23 = vsel %vm407_vm4, %v5987_v5, %v5989_v30  ;;  %v5979_v48 = vsel %vm382_vm0, %v5973_v16, %v5975_v53  ;;  %v5978_v61 = vsel %vm382_vm0, %v5971_v37, %v5973_v16  ;;  %v9311_v53 = vld [vmem:[%s14217_s4 + $0x90] sm:$0xff] }
0x1062   : > { %6006 = vmatprep.subr.bf16.mxu1 %v5995_v23  ;;  %6057 = vmatprep.subr.bf16.mxu0 %v5979_v48  ;;  %v9315_v23 = vld [vmem:[%s14217_s4 + $0xa0] sm:$0xff] }
0x1063   : > { %6058 = vmatpush1.bf16.msra.mxu0 %v5978_v61  ;;  %6007 = vmatpush1.bf16.msra.mxu1 %v5994_v36  ;;  %v9316_v36 = vld [vmem:[%s14217_s4 + $0x1a0] sm:$0xff] }
0x1064   : > { %v5991_v59 = vpop.permute.xlu1 %5990  ;;  %v5993_v27 = vpop.permute.xlu0 %5992  ;;  %6008 = vmatprep.subr.bf16.mxu1 %v10039_v35 }
0x1065   : > { %v5996_v34 = vsel %vm407_vm4, %v5989_v30, %v5991_v59  ;;  %v5997_v24 = vsel %vm407_vm4, %v5991_v59, %v5993_v27  ;;  %v9314_v30 = vld [vmem:[%s14217_s4 + $0x198] sm:$0xff] }
0x1066   : > { %6059 = vmatprep.subr.bf16.mxu0 %v5997_v24  ;;  %v9317_v24 = vld [vmem:[%s14217_s4 + $0xa8] sm:$0xff] }
0x1067   : > { %6009 = vmatpush1.bf16.msra.mxu1 %v10039_v35  ;;  %6060 = vmatpush1.bf16.msra.mxu0 %v5996_v34 }
0x1068   : > { %6061 = vmatprep.subr.bf16.mxu0 %v10039_v35  ;;  %8867 = vmatprep.subr.msk.bf16.mxu1 %vm588_vm9, %v6253_v58 }
0x106a   : > { %8858 = vmatmul.mubr.msk.bf16.vlgmr.msra.gmra.mrb[100].mxu1 %vm1204_vm12, %v12378_v50 }
0x106b   : > { %6062 = vmatpush1.bf16.msra.mxu0 %v10039_v35  ;;  %6044 = vmatprep.mubr.bf16.mxu1 %v14214_v1 }
0x106c   : > { %6259 = vmatpush1.bf16.msra.mxu1 %v6254_v57  ;;  %8870 = vmatprep.subr.msk.bf16.mxu0 %vm588_vm9, %v6339_v60 }
0x106e   : > { %8860 = vmatmul.mubr.msk.bf16.vlgmr.msra.gmra.mrb[120].mxu0 %vm1204_vm12, %v12378_v50 }
0x106f   : > { %6097 = vmatprep.mubr.bf16.mxu0 %v14214_v1  ;;  %6345 = vmatpush1.bf16.msra.mxu0 %v6340_v14 }
0x1072   : > { %8859 = vmatmul.mubr.msk.bf16.gmra.mrb[104].mxu1 %vm1204_vm12, %v12408_v25 }
0x1073   : > { %6290 = vmatprep.mubr.bf16.mxu1 %v14214_v1 }
0x1076   : > { %8861 = vmatmul.mubr.msk.bf16.gmra.mrb[124].mxu0 %vm1204_vm12, %v12408_v25  ;;  %v9307_v25 = vld [vmem:[%s14217_s4 + $0x80] sm:$0xff] }
0x1077   : > { %6376 = vmatprep.mubr.bf16.mxu0 %v14214_v1 }
0x107a   : > { %8868 = vmatmul.mubr.msk.bf16.vlgmr.msra.gmra.mrb[108].mxu1 %vm584_vm10, %v9306_v38 }
0x107b   : > { %6493 = vmatprep.mubr.bf16.mxu1 %v14214_v1 }
0x107e   : > { %8871 = vmatmul.mubr.msk.bf16.vlgmr.msra.gmra.mrb[128].mxu0 %vm584_vm10, %v9306_v38  ;;  %v9319_v38 = vld [vmem:[%s14217_s4 + $0xb0] sm:$0xff] }
0x107f   : > { %6875 = vmatprep.mubr.bf16.mxu0 %v14214_v1 }
0x113d   : > { %v6036_v50 = vpop.f32.mrb[100].mxu1 }
0x113e   : > { %v6108_v55 = vmax.f32 %v6036_v50, 0.0  ;;  %v6038_v39 = vpop.f32.mrb[101].mxu1 }
0x113f   : > { %v6109_v8 = vmax.f32 %v6038_v39, 0.0  ;;  %v6040_v28 = vpop.f32.mrb[102].mxu1  ;;  %v9320_v39 = vld [vmem:[%s14217_s4 + $0x1b0] sm:$0xff] }
0x1140   : > { %v6124_v42 = vmul.f32 %v9307_v25, %v6108_v55  ;;  %v6165_v41 = vmul.f32 %v9308_v6, %v6108_v55  ;;  %v6042_v21 = vpop.f32.mrb[103].mxu1  ;;  %v6112_v63 = vmax.f32 %v6040_v28, 0.0 }
0x1141   : > { %v6125_v32 = vmul.f32 %v9309_v22, %v6109_v8  ;;  %v6166_v5 = vmul.f32 %v9310_v33, %v6109_v8  ;;  %v6089_v52 = vpop.f32.mrb[120].mxu0  ;;  %v6113_v4 = vmax.f32 %v6042_v21, 0.0  ;;  %v9322_v33 = vld [vmem:[%s14217_s4 + $0x1b8] sm:$0xff] }
0x1142   : > { %v6110_v20 = vmax.f32 %v6089_v52, 0.0  ;;  %v6091_v17 = vpop.f32.mrb[121].mxu0  ;;  %v6128_v48 = vmul.f32 %v9315_v23, %v6112_v63  ;;  %v6169_v15 = vmul.f32 %v9316_v36, %v6112_v63 }
0x1143   : > { %v6140_v10 = vadd.f32 %v6125_v32, %v6124_v42  ;;  %v6181_v0 = vadd.f32 %v6166_v5, %v6165_v41  ;;  %v6093_v9 = vpop.f32.mrb[122].mxu0  ;;  %v6111_v7 = vmax.f32 %v6091_v17, 0.0  ;;  %v6129_v58 = vmul.f32 %v9317_v24, %v6113_v4  ;;  %v9321_v42 = vld [vmem:[%s14217_s4 + $0xb8] sm:$0xff]  ;;  %v9323_v17 = vld [vmem:[%s14217_s4 + $0xc0] sm:$0xff] }
0x1144   : > { %v6126_v56 = vmul.f32 %v9311_v53, %v6110_v20  ;;  %v6167_v37 = vmul.f32 %v9312_v31, %v6110_v20  ;;  %v6095_v2 = vpop.f32.mrb[123].mxu0  ;;  %v6114_v59 = vmax.f32 %v6093_v9, 0.0  ;;  %v6170_v49 = vmul.f32 %v9318_v13, %v6113_v4  ;;  %v9324_v53 = vld [vmem:[%s14217_s4 + $0x1c0] sm:$0xff] }
0x1145   : > { %v6046_v45 = vpop.f32.mrb[104].mxu1  ;;  %v6127_v44 = vmul.f32 %v9313_v12, %v6111_v7  ;;  %v6168_v47 = vmul.f32 %v9314_v30, %v6111_v7  ;;  %v6115_v27 = vmax.f32 %v6095_v2, 0.0  ;;  %v9325_v7 = vld [vmem:[%s14217_s4 + $0xc8] sm:$0xff] }
0x1146   : > { %v6141_v11 = vadd.f32 %v6140_v10, %v6126_v56  ;;  %v6182_v46 = vadd.f32 %v6181_v0, %v6167_v37  ;;  %v6048_v16 = vpop.f32.mrb[105].mxu1  ;;  %v6116_v62 = vmax.f32 %v6046_v45, 0.0  ;;  %v6130_v50 = vmul.f32 %v9319_v38, %v6114_v59  ;;  %v8874_v38 = vld [vmem:[%s9517_s30 + $0x1e] sm:$0xff] }
0x1147   : > { %v12744_v61 = vpop.f32.mrb[106].mxu1  ;;  %v6171_v8 = vmul.f32 %v9320_v39, %v6114_v59  ;;  %v6131_v6 = vmul.f32 %v9321_v42, %v6115_v27  ;;  %v6117_v41 = vmax.f32 %v6048_v16, 0.0  ;;  %v6172_v5 = vmul.f32 %v9322_v33, %v6115_v27 }
0x1148   : > { %v6142_v18 = vadd.f32 %v6141_v11, %v6127_v44  ;;  %v6183_v19 = vadd.f32 %v6182_v46, %v6168_v47  ;;  %v12749_v3 = vpop.f32.mrb[107].mxu1  ;;  %v6132_v10 = vmul.f32 %v9323_v17, %v6116_v62  ;;  %v6173_v56 = vmul.f32 %v9324_v53, %v6116_v62  ;;  %v9326_v44 = vld [vmem:[%s14217_s4 + $0x1c8] sm:$0xff] }
0x1149   : > { %v6099_v34 = vpop.f32.mrb[124].mxu0  ;;  %v6133_v2 = vmul.f32 %v9325_v7, %v6117_v41  ;;  %v6174_v30 = vmul.f32 %v9326_v44, %v6117_v41  ;;  %v6120_v23 = vmax.f32 %v12744_v61, 0.0  ;;  %v9328_v61 = vld [vmem:[%s14217_s4 + $0x1d0] sm:$0xff]  ;;  %v6121_v24 = vmax.f32 %v12749_v3, 0.0 }
0x114a   : > { %v6143_v29 = vadd.f32 %v6142_v18, %v6128_v48  ;;  %v6184_v57 = vadd.f32 %v6183_v19, %v6169_v15  ;;  %v6101_v60 = vpop.f32.mrb[125].mxu0  ;;  %v6118_v31 = vmax.f32 %v6099_v34, 0.0  ;;  %v9327_v19 = vld [vmem:[%s14217_s4 + $0xd0] sm:$0xff]  ;;  %v6593_v53 = vcombine.high %v8874_v38, %v8874_v38 }
0x114b   : > { %v12757_v14 = vpop.f32.mrb[126].mxu0  ;;  %v6119_v4 = vmax.f32 %v6101_v60, 0.0 }
0x114c   : > { %v6144_v55 = vadd.f32 %v6143_v29, %v6129_v58  ;;  %v6185_v28 = vadd.f32 %v6184_v57, %v6170_v49  ;;  %v12765_v25 = vpop.f32.mrb[127].mxu0  ;;  %v6134_v59 = vmul.f32 %v9327_v19, %v6118_v31  ;;  %v6175_v27 = vmul.f32 %v9328_v61, %v6118_v31  ;;  %v9329_v58 = vld [vmem:[%s14217_s4 + $0xd8] sm:$0xff] }
0x114d   : > { %v12770_v21 = vpop.f32.mrb[108].mxu1  ;;  %v6135_v13 = vmul.f32 %v9329_v58, %v6119_v4  ;;  %v9330_v57 = vld [vmem:[%s14217_s4 + $0x1d8] sm:$0xff]  ;;  %v6122_v42 = vmax.f32 %v12757_v14, 0.0 }
0x114e   : > { %v6145_v22 = vadd.f32 %v6144_v55, %v6130_v50  ;;  %v6186_v32 = vadd.f32 %v6185_v28, %v6171_v8  ;;  %v6301_v52 = vmax.f32 %v12770_v21, 0.0  ;;  %v12776_v20 = vpop.f32.mrb[109].mxu1  ;;  %v6176_v60 = vmul.f32 %v9330_v57, %v6119_v4  ;;  %v9331_v50 = vld [vmem:[%s14217_s4 + $0xe0] sm:$0xff] }
0x114f   : > { %v12781_v0 = vpop.f32.mrb[110].mxu1  ;;  %v6302_v45 = vmax.f32 %v12776_v20, 0.0  ;;  %v6136_v3 = vmul.f32 %v9331_v50, %v6120_v23  ;;  %v9332_v55 = vld [vmem:[%s14217_s4 + $0x1e0] sm:$0xff] }
0x1150   : > { %v6146_v63 = vadd.f32 %v6145_v22, %v6131_v6  ;;  %v6187_v9 = vadd.f32 %v6186_v32, %v6172_v5  ;;  %v12786_v37 = vpop.f32.mrb[111].mxu1  ;;  %6395 = vrot.lane.b32.xlu1 %v6301_v52, %s9452_s8  ;;  %v6303_v62 = vmax.f32 %v12781_v0, 0.0  ;;  %v6177_v39 = vmul.f32 %v9332_v55, %v6120_v23  ;;  %v9333_v6 = vld [vmem:[%s14217_s4 + $0xe8] sm:$0xff]  ;;  %v14280_v5 = vld [vmem:[#allocation2_spill] sm:$0xff]  ;;  %v9337_v23 = vld [vmem:[%s14217_s4 + $0xf8] sm:$0xff] }
0x1151   : > { %v12795_v11 = vpop.f32.mrb[128].mxu0  ;;  %6397 = vrot.lane.b32.xlu0 %v6302_v45, %s9452_s8  ;;  %v6137_v41 = vmul.f32 %v9333_v6, %v6121_v24  ;;  %v9334_v22 = vld [vmem:[%s14217_s4 + $0x1e8] sm:$0xff]  ;;  %v6304_v33 = vmax.f32 %v12786_v37, 0.0  ;;  %v12851_v17 = vrot.slane %v8874_v38, %v14280_v5  ;;  %v12885_v61 = vrot.slane %v6593_v53, %v14280_v5 }
0x1152   : > { %v6147_v46 = vadd.f32 %v6146_v63, %v6132_v10  ;;  %v6188_v12 = vadd.f32 %v6187_v9, %v6173_v56  ;;  %v6387_v47 = vmax.f32 %v12795_v11, 0.0  ;;  %v12801_v16 = vpop.f32.mrb[129].mxu0  ;;  %v6178_v32 = vmul.f32 %v9334_v22, %v6121_v24  ;;  %v9335_v56 = vld [vmem:[%s14217_s4 + $0xf0] sm:$0xff] }
0x1153   : > { %v6388_v48 = vmax.f32 %v12801_v16, 0.0  ;;  %v12808_v36 = vpop.f32.mrb[130].mxu0  ;;  %v6123_v63 = vmax.f32 %v12765_v25, 0.0  ;;  %v6138_v31 = vmul.f32 %v9335_v56, %v6122_v42  ;;  %v6658_v6 = vrot.slane %v12885_v61, 7 }
0x1154   : > { %v6148_v15 = vadd.f32 %v6147_v46, %v6133_v2  ;;  %v6189_v18 = vadd.f32 %v6188_v12, %v6174_v30  ;;  %6421 = vrot.lane.b32.xlu1 %v6387_v47, %s9452_s8  ;;  %v12819_v34 = vpop.f32.mrb[131].mxu0  ;;  %v6389_v9 = vmax.f32 %v12808_v36, 0.0  ;;  %v9336_v2 = vld [vmem:[%s14217_s4 + $0x1f0] sm:$0xff]  ;;  %v12870_v12 = vcombine.high %v12851_v17, %v12851_v17 }
0x1155   : > { %6423 = vrot.lane.b32.xlu0 %v6388_v48, %s9452_s8  ;;  %v6179_v4 = vmul.f32 %v9336_v2, %v6122_v42  ;;  %v6390_v25 = vmax.f32 %v12819_v34, 0.0  ;;  %v12934_v22 = vld.sshfl [vmem:[%s9517_s30 + $0x26] sm:$0x3 pattern:$0x76325410] }
0x1156   : > { %v6149_v49 = vadd.f32 %v6148_v15, %v6134_v59  ;;  %v6190_v29 = vadd.f32 %v6189_v18, %v6175_v27  ;;  %v6139_v15 = vmul.f32 %v9337_v23, %v6123_v63  ;;  %v9338_v18 = vld [vmem:[%s14217_s4 + $0x1f8] sm:$0xff]  ;;  %v12882_v59 = vshrl.u32 %v12851_v17, 16 }
0x1157   : > { %v6180_v19 = vmul.f32 %v9338_v18, %v6123_v63  ;;  %v12890_v27 = vshrl.u32 %v12870_v12, 16  ;;  %v6626_v38 = vshll.u32 %v12870_v12, 16  ;;  %v6657_v42 = vrot.slane %v12870_v12, 7 }
0x1158   : > { %v6150_v8 = vadd.f32 %v6149_v49, %v6135_v13  ;;  %v6191_v28 = vadd.f32 %v6190_v29, %v6176_v60  ;;  %6399 = vrot.lane.b32.xlu1 %v6303_v62, %s9452_s8  ;;  %v6734_v13 = vrot.slane %v12882_v59, 7  ;;  %v12900_v49 = vshrl.u32 %v12885_v61, 16 }
0x1159   : > { %6401 = vrot.lane.b32.xlu0 %v6304_v33, %s9452_s8  ;;  %v12904_v29 = vcombine.high %v12885_v61, %v12885_v61  ;;  %v6735_v57 = vrot.slane %v12890_v27, 7  ;;  %v6623_v60 = vshll.u32 %v12851_v17, 16 }
0x115a   : > { %v6151_v14 = vadd.f32 %v6150_v8, %v6136_v3  ;;  %v6192_v10 = vadd.f32 %v6191_v28, %v6177_v39  ;;  %v6736_v50 = vrot.slane %v12900_v49, 7  ;;  %v6629_v3 = vshll.u32 %v12885_v61, 16 }
0x115b   : > { %v6632_v55 = vshll.u32 %v12904_v29, 16  ;;  %v9149_v39 = vpack.i.bf16 %v6626_v38, %v6623_v60  ;;  %v6656_v28 = vrot.slane %v12851_v17, 7 }
0x115c   : > { %v6152_v7 = vadd.f32 %v6151_v14, %v6137_v41  ;;  %v6193_v46 = vadd.f32 %v6192_v10, %v6178_v32  ;;  %6425 = vrot.lane.b32.xlu1 %v6389_v9, %s9452_s8  ;;  %v12931_v41 = vshrl.u32 %v12904_v29, 16  ;;  %v12938_v32 = vshrl.u32 %v12934_v22, 16 }
0x115d   : > { %6427 = vrot.lane.b32.xlu0 %v6390_v25, %s9452_s8  ;;  %v9154_v8 = vpack.i.bf16 %v6632_v55, %v6629_v3  ;;  %v6635_v14 = vshll.u32 %v12934_v22, 16  ;;  %v6990_v10 = vrot.slane %v6623_v60, 1 }
0x115e   : > { %v6153_v44 = vadd.f32 %v6152_v7, %v6138_v31  ;;  %v6194_v30 = vadd.f32 %v6193_v46, %v6179_v4  ;;  %v6737_v5 = vrot.slane %v12931_v41, 7  ;;  %v6738_v63 = vrot.slane %v12938_v32, 7 }
0x115f   : > { %v9159_v53 = vpack.i.bf16 %v6990_v10, %v6635_v14  ;;  %v6991_v10 = vrot.slane %v6626_v38, 1 }
0x1160   : > { %6715 = vrot.lane.b32.xlu1 %v12851_v17, %s9452_s8  ;;  %v12892_v24 = vadd.f32 %v6153_v44, %v6139_v15  ;;  %v12894_v58 = vadd.f32 %v6194_v30, %v6180_v19 }
0x1161   : > { %6717 = vrot.lane.b32.xlu0 %v12870_v12, %s9452_s8 }
0x1162   : > { %14281 = vst [vmem:[#allocation17_spill] sm:$0xff] %v12892_v24  ;;  %14282 = vst [vmem:[#allocation19_spill] sm:$0xff] %v12894_v58 }
0x1164   : > { %6719 = vrot.lane.b32.xlu1 %v12885_v61, %s9452_s8 }
0x1165   : > { %6739 = vrot.lane.b32.xlu0 %v6734_v13, %s9453_s9 }
0x1168   : > { %6741 = vrot.lane.b32.xlu1 %v6735_v57, %s9453_s9 }
0x1169   : > { %6743 = vrot.lane.b32.xlu0 %v6736_v50, %s9453_s9 }
0x116c   : > { %9150 = vrot.lane.b32.xlu1 %v9149_v39, %s9452_s8 }
0x116d   : > { %9155 = vrot.lane.b32.xlu0 %v9154_v8, %s9452_s8 }
0x1170   : > { %6661 = vrot.lane.b32.xlu1 %v6656_v28, %s9453_s9 }
0x1171   : > { %6663 = vrot.lane.b32.xlu0 %v6657_v42, %s9453_s9 }
0x1174   : > { %6665 = vrot.lane.b32.xlu1 %v6658_v6, %s9453_s9 }
0x1175   : > { %6721 = vrot.lane.b32.xlu0 %v12904_v29, %s9452_s8 }
0x1178   : > { %6723 = vrot.lane.b32.xlu1 %v12934_v22, %s9452_s8 }
0x1179   : > { %6745 = vrot.lane.b32.xlu0 %v6737_v5, %s9453_s9 }
0x117c   : > { %6747 = vrot.lane.b32.xlu1 %v6738_v63, %s9453_s9  ;;  %v6992_v63 = vrot.slane %v6629_v3, 1 }
0x117d   : > { %9160 = vrot.lane.b32.xlu0 %v9159_v53, %s9452_s8 }
0x11c2   : > { %v6396_v56 = vpop.permute.xlu1 %6395 }
0x11c3   : > { %v6398_v31 = vpop.permute.xlu0 %6397 }
0x11c4   : > { %v6403_v7 = vsel %vm382_vm0, %v6396_v56, %v6398_v31  ;;  %v6410_v4 = vadd.f32 %v6398_v31, %v6302_v45  ;;  %v6659_v56 = vrot.slane %v12904_v29, 7  ;;  %v6660_v31 = vrot.slane %v12934_v22, 7 }
0x11c5   : > { %v6409_v46 = vadd.f32 %v6403_v7, %v6301_v52 }
0x11c6   : > { %v6422_v2 = vpop.permute.xlu1 %6421  ;;  %v6414_v23 = vadd.f32 %v6410_v4, %v6388_v48 }
0x11c7   : > { %v6424_v44 = vpop.permute.xlu0 %6423  ;;  %v6413_v15 = vadd.f32 %v6409_v46, %v6387_v47 }
0x11c8   : > { %v6429_v19 = vsel %vm382_vm0, %v6422_v2, %v6424_v44  ;;  %v6436_v52 = vadd.f32 %v6424_v44, %v6414_v23 }
0x11c9   : > { %v6435_v48 = vadd.f32 %v6429_v19, %v6413_v15 }
0x11ca   : > { %v6400_v30 = vpop.permute.xlu1 %6399  ;;  %v6440_v37 = vmul.f32 0.25, %v6436_v52 }
0x11cb   : > { %v6402_v18 = vpop.permute.xlu0 %6401  ;;  %v6439_v8 = vmul.f32 0.25, %v6435_v48 }
0x11cc   : > { %v6404_v13 = vsel %vm382_vm0, %v6400_v30, %v6402_v18  ;;  %v6412_v20 = vadd.f32 %v6402_v18, %v6304_v33  ;;  %v9164_v30 = vpack.i.bf16 %v6992_v63, %v6991_v10  ;;  %v13054_v63 = vld [vmem:[%s14212_s2] sm:$0xff]  }
0x11cd   : > { %v6411_v21 = vadd.f32 %v6404_v13, %v6303_v62  ;;  %14283 = vst [vmem:[#allocation18_spill] sm:$0xff] %v13054_v63 }
0x11ce   : > { %v6426_v45 = vpop.permute.xlu1 %6425  ;;  %v6416_v16 = vadd.f32 %v6412_v20, %v6390_v25 }
0x11cf   : > { %v6415_v11 = vadd.f32 %v6411_v21, %v6389_v9  ;;  %v6428_v47 = vpop.permute.xlu0 %6427 }
0x11d0   : > { %v6430_v57 = vsel %vm382_vm0, %v6426_v45, %v6428_v47  ;;  %v6438_v60 = vadd.f32 %v6428_v47, %v6416_v16  ;;  %v6993_v47 = vrot.slane %v6632_v55, 1 }
0x11d1   : > { %v6437_v39 = vadd.f32 %v6430_v57, %v6415_v11 }
0x11d2   : > { %v6716_v50 = vpop.permute.xlu1 %6715  ;;  %v6442_v33 = vmul.f32 0.25, %v6438_v60  ;;  %v6994_v60 = vrot.slane %v6635_v14, 1 }
0x11d3   : > { %v6441_v28 = vmul.f32 0.25, %v6437_v39  ;;  %v6718_v0 = vpop.permute.xlu0 %6717 }
0x11d4   : > { %v6444_v62 = vpack.c.bf16 %v6442_v33, %v6440_v37  ;;  %v6725_v42 = vsel %vm382_vm0, %v6716_v50, %v6718_v0 }
0x11d5   : > { %v6443_v25 = vpack.c.bf16 %v6441_v28, %v6439_v8  ;;  %v6753_v9 = vsel %vm9605_vm3, %v12882_v59, %v6725_v42  ;;  %v9169_v42 = vpack.i.bf16 %v6994_v60, %v6993_v47 }
0x11d6   : > { %v12973_v34 = vpop.permute.xlu1 %6719  ;;  %6456 = vrot.lane.b32.xlu1 %v6444_v62, %s9453_s9  ;;  %6449 = vrot.lane.b32.xlu0 %v6444_v62, %s9452_s8 }
0x11d7   : > { %6461 = vmatprep.subr.bf16.mxu1 %v6444_v62  ;;  %v6740_v36 = vpop.permute.xlu0 %6739  ;;  %v6726_v6 = vsel %vm382_vm0, %v6718_v0, %v12973_v34 }
0x11d8   : > { %6462 = vmatpush1.bf16.msra.mxu1 %v6443_v25  ;;  %v6754_v7 = vsel %vm9605_vm3, %v12890_v27, %v6726_v6 }
0x11da   : > { %v6742_v5 = vpop.permute.xlu1 %6741  ;;  %6447 = vrot.lane.b32.xlu1 %v6443_v25, %s9452_s8  ;;  %6454 = vrot.lane.b32.xlu0 %v6443_v25, %s9453_s9 }
0x11db   : > { %v6749_v53 = vsel %vm407_vm4, %v6740_v36, %v6742_v5  ;;  %v6744_v38 = vpop.permute.xlu0 %6743 }
0x11dc   : > { %v12995_v2 = vsel %vm412_vm1, %v6753_v9, %v6749_v53  ;;  %v6750_v46 = vsel %vm407_vm4, %v6742_v5, %v6744_v38 }
0x11dd   : > { %v6778_v3 = vshrl.u32 %v12995_v2, 16  ;;  %v6781_v4 = vshll.u32 %v12995_v2, 16  ;;  %v13001_v23 = vsel %vm412_vm1, %v6754_v7, %v6750_v46 }
0x11de   : > { %v9151_v44 = vpop.permute.xlu1 %9150  ;;  %6667 = vrot.lane.b32.xlu1 %v6659_v56, %s9453_s9  ;;  %6669 = vrot.lane.b32.xlu0 %v6660_v31, %s9453_s9  ;;  %v6785_v13 = vshrl.u32 %v13001_v23, 16  ;;  %v6788_v20 = vshll.u32 %v13001_v23, 16 }
0x11df   : > { %v6780_v15 = vrot.slane %v6778_v3, 6  ;;  %v9153_v18 = vunpack.i.h.bf16 %v9151_v44  ;;  %v6783_v19 = vrot.slane %v6781_v4, 7  ;;  %v9152_v45 = vunpack.i.l.bf16 %v9151_v44  ;;  %v13007_v21 = vpop.permute.xlu0 %9155 }
0x11e0   : > { %v9157_v52 = vunpack.i.l.bf16 %v13007_v21  ;;  %v6787_v16 = vrot.slane %v6785_v13, 6  ;;  %v6790_v48 = vrot.slane %v6788_v20, 7 }
0x11e1   : > { %v6647_v57 = vsel %vm382_vm0, %v9152_v45, %v9153_v18  ;;  %v6784_v37 = vor.u32 %v6783_v19, %v6780_v15 }
0x11e2   : > { %v6662_v11 = vpop.permute.xlu1 %6661  ;;  %9165 = vrot.lane.b32.xlu1 %v9164_v30, %s9452_s8  ;;  %7014 = vrot.lane.b32.xlu0 %v12851_v17, %s9453_s9  ;;  %v6648_v50 = vsel %vm382_vm0, %v9153_v18, %v9157_v52  ;;  %v6675_v39 = vsel %vm9605_vm3, %v12851_v17, %v6647_v57  ;;  %v6791_v8 = vor.u32 %v6790_v48, %v6787_v16 }
0x11e3   : > { %v6664_v55 = vpop.permute.xlu0 %6663  ;;  %v6676_v33 = vsel %vm9605_vm3, %v12870_v12, %v6648_v50 }
0x11e4   : > { %v6671_v28 = vsel %vm407_vm4, %v6662_v11, %v6664_v55 }
0x11e5   : > { %v6682_v14 = vsel %vm412_vm1, %v6675_v39, %v6671_v28 }
0x11e6   : > { %v13028_v0 = vpop.permute.xlu1 %6665  ;;  %7016 = vrot.lane.b32.xlu1 %v12870_v12, %s9453_s9  ;;  %7018 = vrot.lane.b32.xlu0 %v12885_v61, %s9453_s9  ;;  %v6818_v36 = vsel %vm9641_vm7, %v6682_v14, %v6784_v37 }
0x11e7   : > { %v6672_v62 = vsel %vm407_vm4, %v6664_v55, %v13028_v0  ;;  %v6824_v6 = vsel %vm567_vm8, %v6818_v36, 1065369472  ;;  %v6722_v53 = vpop.permute.xlu0 %6721 }
0x11e8   : > { %v6686_v25 = vsel %vm412_vm1, %v6676_v33, %v6672_v62  ;;  %v6833_v10 = vsel %vm588_vm9, %v6824_v6, 0  ;;  %v6727_v31 = vsel %vm382_vm0, %v12973_v34, %v6722_v53 }
0x11e9   : > { %v6819_v9 = vsel %vm9641_vm7, %v6686_v25, %v6791_v8  ;;  %v6755_v46 = vsel %vm9605_vm3, %v12900_v49, %v6727_v31 }
0x11ea   : > { %v6826_v5 = vsel %vm567_vm8, %v6819_v9, 1065369472  ;;  %9170 = vrot.lane.b32.xlu1 %v9169_v42, %s9452_s8  ;;  %7020 = vrot.lane.b32.xlu0 %v12904_v29, %s9453_s9  ;;  %v6724_v56 = vpop.permute.xlu1 %6723 }
0x11eb   : > { %8877 = vmatprep.subr.msk.bf16.mxu0 %vm588_vm9, %v6826_v5  ;;  %v6746_v7 = vpop.permute.xlu0 %6745  ;;  %v6728_v3 = vsel %vm382_vm0, %v6722_v53, %v6724_v56  ;;  %v6757_v15 = vsel %vm9605_vm3, %v12938_v32, %v6724_v56 }
0x11ec   : > { %6844 = vmatpush1.bf16.msra.mxu0 %v6833_v10  ;;  %v6751_v44 = vsel %vm407_vm4, %v6744_v38, %v6746_v7  ;;  %v6756_v30 = vsel %vm9605_vm3, %v12931_v41, %v6728_v3  ;;  %v9158_v38 = vunpack.i.h.bf16 %v13007_v21 }
0x11ed   : > { %v13074_v18 = vsel %vm412_vm1, %v6755_v46, %v6751_v44 }
0x11ee   : > { %7022 = vrot.lane.b32.xlu1 %v12934_v22, %s9453_s9  ;;  %v6748_v4 = vpop.permute.xlu1 %6747  ;;  %v6792_v45 = vshrl.u32 %v13074_v18, 16  ;;  %v6795_v16 = vshll.u32 %v13074_v18, 16  ;;  %v6649_v37 = vsel %vm382_vm0, %v9157_v52, %v9158_v38 }
0x11ef   : > { %8878 = vmatmul.mubr.msk.bf16.vlgmr.msra.gmra.mrb[132].mxu0 %vm584_vm10, %v13054_v63  ;;  %v6752_v34 = vsel %vm407_vm4, %v6746_v7, %v6748_v4  ;;  %v9161_v19 = vpop.permute.xlu0 %9160  ;;  %v13080_v20 = vsel %vm412_vm1, %v6757_v15, %v6748_v4  ;;  %v6677_v21 = vsel %vm9605_vm3, %v12885_v61, %v6649_v37 }
0x11f0   : > { %6918 = vmatprep.mubr.bf16.mxu0 %v14214_v1  ;;  %v13077_v13 = vsel %vm412_vm1, %v6756_v30, %v6752_v34  ;;  %v6806_v47 = vshrl.u32 %v13080_v20, 16  ;;  %v6809_v57 = vshll.u32 %v13080_v20, 16  ;;  %v9162_v39 = vunpack.i.l.bf16 %v9161_v19 }
0x11f1   : > { %v6799_v48 = vshrl.u32 %v13077_v13, 16  ;;  %v6802_v11 = vshll.u32 %v13077_v13, 16  ;;  %v6794_v55 = vrot.slane %v6792_v45, 6  ;;  %v6797_v33 = vrot.slane %v6795_v16, 7 }
0x11f2   : > { %v6808_v14 = vrot.slane %v6806_v47, 6  ;;  %v6811_v62 = vrot.slane %v6809_v57, 7  ;;  %v6650_v36 = vsel %vm382_vm0, %v9158_v38, %v9162_v39  ;;  %v6679_v52 = vsel %vm9605_vm3, %v12934_v22, %v9162_v39 }
0x11f3   : > { %v6801_v8 = vrot.slane %v6799_v48, 6  ;;  %v6804_v28 = vrot.slane %v6802_v11, 7  ;;  %v6678_v10 = vsel %vm9605_vm3, %v12904_v29, %v6650_v36  ;;  %v6798_v31 = vor.u32 %v6797_v33, %v6794_v55  ;;  %v9340_v36 = vld [vmem:[%s14215_s3 + $0x10] sm:$0xff]  }
0x11f4   : > { %v6812_v6 = vor.u32 %v6811_v62, %v6808_v14  ;;  %v14185_v11 = vrot.slane %v12851_v17, 1  ;;  %v14184_v47 = vrot.slane %v12870_v12, 1  ;;  %v9163_v57 = vunpack.i.h.bf16 %v9161_v19 }
0x11f5   : > { %v6805_v56 = vor.u32 %v6804_v28, %v6801_v8 }
0x1248   : > { %v6457_v60 = vpop.permute.xlu1 %6456  ;;  %v6450_v50 = vpop.permute.xlu0 %6449 }
0x1249   : > { %6463 = vmatprep.subr.bf16.mxu1 %v6450_v50 }
0x124c   : > { %v6448_v42 = vpop.permute.xlu1 %6447  ;;  %v6455_v25 = vpop.permute.xlu0 %6454 }
0x124d   : > { %v6451_v9 = vsel %vm382_vm0, %v6448_v42, %v6450_v50  ;;  %v6458_v7 = vsel %vm407_vm4, %v6455_v25, %v6457_v60 }
0x124e   : > { %6464 = vmatpush1.bf16.msra.mxu1 %v6451_v9 }
0x124f   : > { %6465 = vmatprep.subr.bf16.mxu1 %v6457_v60 }
0x1250   : > { %v6668_v5 = vpop.permute.xlu1 %6667  ;;  %v6670_v53 = vpop.permute.xlu0 %6669 }
0x1251   : > { %v6673_v3 = vsel %vm407_vm4, %v13028_v0, %v6668_v5  ;;  %v6674_v4 = vsel %vm407_vm4, %v6668_v5, %v6670_v53  ;;  %v6698_v46 = vsel %vm412_vm1, %v6679_v52, %v6670_v53 }
0x1252   : > { %v6690_v44 = vsel %vm412_vm1, %v6677_v21, %v6673_v3  ;;  %v6694_v30 = vsel %vm412_vm1, %v6678_v10, %v6674_v4  ;;  %6466 = vmatpush1.bf16.msra.mxu1 %v6458_v7  ;;  %v6822_v0 = vsel %vm9641_vm7, %v6698_v46, %v6812_v6  ;;  %v14182_v7 = vrot.slane %v12904_v29, 1 }
0x1253   : > { %v6821_v15 = vsel %vm9641_vm7, %v6694_v30, %v6805_v56  ;;  %v6820_v34 = vsel %vm9641_vm7, %v6690_v44, %v6798_v31  ;;  %6467 = vmatprep.subr.bf16.mxu1 %v10039_v35  ;;  %v6832_v37 = vsel %vm567_vm8, %v6822_v0, 1065369472  ;;  %v14183_v56 = vrot.slane %v12885_v61, 1 }
0x1254   : > { %v9166_v38 = vpop.permute.xlu1 %9165  ;;  %v7015_v45 = vpop.permute.xlu0 %7014  ;;  %v6830_v16 = vsel %vm567_vm8, %v6821_v15, 1065369472  ;;  %v6828_v48 = vsel %vm567_vm8, %v6820_v34, 1065369472  ;;  %v6841_v25 = vsel %vm588_vm9, %v6832_v37, 0  ;;  %v14181_v3 = vrot.slane %v12934_v22, 1 }
0x1255   : > { %v9168_v60 = vunpack.i.h.bf16 %v9166_v38  ;;  %v9167_v50 = vunpack.i.l.bf16 %v9166_v38  ;;  %8879 = vmatprep.subr.msk.bf16.mxu0 %vm588_vm9, %v6830_v16  ;;  %v6837_v39 = vsel %vm588_vm9, %v6828_v48, 0 }
0x1256   : > { %6887 = vmatpush1.bf16.msra.mxu0 %v6837_v39  ;;  %6468 = vmatpush1.bf16.msra.mxu1 %v10039_v35 }
0x1257   : > { %v7005_v55 = vsel %vm382_vm0, %v9163_v57, %v9167_v50  ;;  %v7006_v33 = vsel %vm382_vm0, %v9167_v50, %v9168_v60  ;;  %8993 = vmatprep.subr.bf16.mxu0 %v14216_v43 }
0x1258   : > { %v7017_v8 = vpop.permute.xlu1 %7016  ;;  %v7028_v19 = vsel %vm9605_vm3, %v14185_v11, %v7005_v55  ;;  %v7029_v28 = vsel %vm9605_vm3, %v14184_v47, %v7006_v33  ;;  %v7019_v14 = vpop.permute.xlu0 %7018  ;;  %v9341_v33 = vld [vmem:[%s14215_s3 + $0x18] sm:$0xff]   ;;  %v9355_v47 = vld [vmem:[%s14133_s5 + $0x70] sm:$0xff] }
0x1259   : > { %v7024_v62 = vsel %vm407_vm4, %v7015_v45, %v7017_v8  ;;  %v7025_v42 = vsel %vm407_vm4, %v7017_v8, %v7019_v14  ;;  %8880 = vmatmul.mubr.msk.bf16.vlgmr.msra.gmra.mrb[136].mxu0 %vm584_vm10, %v13054_v63  ;;  %8872 = vmatmul.mubr.msk.bf16.vlgmr.msra.gmra.mrb[112].mxu1 %vm1204_vm12, %v9340_v36 }
0x125a   : > { %v13146_v9 = vsel %vm412_vm1, %v7028_v19, %v7024_v62  ;;  %v13149_v21 = vsel %vm412_vm1, %v7029_v28, %v7025_v42  ;;  %8994 = vmatpush3.bf16.msra.mxu0 %v6841_v25  ;;  %6503 = vmatprep.mubr.bf16.mxu1 %v14214_v1 }
0x125b   : > { %v7053_v52 = vshrl.u32 %v13146_v9, 16  ;;  %v7056_v6 = vshll.u32 %v13146_v9, 16  ;;  %v7060_v5 = vshrl.u32 %v13149_v21, 16  ;;  %v7063_v10 = vshll.u32 %v13149_v21, 16  ;;  %8995 = vmatprep.mubr.msk.bf16.mxu0 %vm9456_vm11, %v14216_v43 }
0x125c   : > { %v9171_v53 = vpop.permute.xlu1 %9170  ;;  %v7021_v31 = vpop.permute.xlu0 %7020 }
0x125d   : > { %v7055_v4 = vrot.slane %v7053_v52, 6  ;;  %v7058_v46 = vrot.slane %v7056_v6, 7  ;;  %v7062_v44 = vrot.slane %v7060_v5, 6  ;;  %v7065_v30 = vrot.slane %v7063_v10, 7 }
0x125e   : > { %v9173_v15 = vunpack.i.h.bf16 %v9171_v53  ;;  %v9172_v34 = vunpack.i.l.bf16 %v9171_v53  ;;  %v7026_v0 = vsel %vm407_vm4, %v7019_v14, %v7021_v31 }
0x125f   : > { %v7066_v38 = vor.u32 %v7065_v30, %v7062_v44  ;;  %v7059_v50 = vor.u32 %v7058_v46, %v7055_v4 }
0x1260   : > { %v7007_v45 = vsel %vm382_vm0, %v9168_v60, %v9172_v34  ;;  %v7008_v16 = vsel %vm382_vm0, %v9172_v34, %v9173_v15  ;;  %v7023_v48 = vpop.permute.xlu1 %7022  ;;  %v7032_v57 = vsel %vm9605_vm3, %v14181_v3, %v9173_v15 }
0x1261   : > { %v7030_v39 = vsel %vm9605_vm3, %v14183_v56, %v7007_v45  ;;  %v7027_v37 = vsel %vm407_vm4, %v7021_v31, %v7023_v48  ;;  %v7031_v60 = vsel %vm9605_vm3, %v14182_v7, %v7008_v16  ;;  %v13178_v55 = vsel %vm412_vm1, %v7032_v57, %v7023_v48  ;;  %8873 = vmatmul.mubr.msk.bf16.gmra.mrb[116].mxu1 %vm1204_vm12, %v9341_v33  ;;  %v9354_v56 = vld [vmem:[%s14133_s5 + $0x30] sm:$0xff] }
0x1262   : > { %v13185_v8 = vsel %vm412_vm1, %v7030_v39, %v7026_v0  ;;  %v13188_v19 = vsel %vm412_vm1, %v7031_v60, %v7027_v37  ;;  %v7081_v28 = vshrl.u32 %v13178_v55, 16  ;;  %v7084_v14 = vshll.u32 %v13178_v55, 16  ;;  %8996 = vmatmul.mubr.msk.bf16.vlgmr.msra.gmra.mrb[140].mxu0 %vm584_vm10, %v13054_v63  ;;  %7150 = vmatprep.mubr.bf16.mxu1 %v14214_v1 }
0x1263   : > { %14284 = vst [vmem:[#allocation2_spill] sm:$0xff] %v13185_v8  ;;  %14285 = vst [vmem:[#allocation20_spill] sm:$0xff] %v13188_v19  ;;  %v7067_v62 = vshrl.u32 %v13185_v8, 16  ;;  %v7070_v42 = vshll.u32 %v13185_v8, 16  ;;  %v7074_v25 = vshrl.u32 %v13188_v19, 16  ;;  %v7077_v36 = vshll.u32 %v13188_v19, 16  ;;  %7193 = vmatprep.mubr.bf16.mxu0 %v14214_v1 }
0x1264   : > { %v7083_v52 = vrot.slane %v7081_v28, 6  ;;  %v7086_v6 = vrot.slane %v7084_v14, 7  ;;  %v7094_v5 = vsel %vm9641_vm7, %v13001_v23, %v7066_v38  ;;  %v7093_v10 = vsel %vm9641_vm7, %v12995_v2, %v7059_v50 }
0x1265   : > { %v7069_v53 = vrot.slane %v7067_v62, 6  ;;  %v7072_v31 = vrot.slane %v7070_v42, 7  ;;  %v7076_v4 = vrot.slane %v7074_v25, 6  ;;  %v7079_v46 = vrot.slane %v7077_v36, 7 }
0x1266   : > { %v7087_v44 = vor.u32 %v7086_v6, %v7083_v52  ;;  %v7101_v30 = vsel %vm567_vm8, %v7094_v5, 1065369472  ;;  %v7099_v15 = vsel %vm567_vm8, %v7093_v10, 1065369472 }
0x1267   : > { %v7080_v34 = vor.u32 %v7079_v46, %v7076_v4  ;;  %8882 = vmatprep.subr.msk.bf16.mxu1 %vm588_vm9, %v7101_v30  ;;  %v7108_v0 = vsel %vm588_vm9, %v7099_v15, 0  ;;  %v7073_v45 = vor.u32 %v7072_v31, %v7069_v53  ;;  %v9342_v53 = vld [vmem:[%s14133_s5] sm:$0xff]  ;;  %v9344_v15 = vld [vmem:[%s14133_s5 + $0x8] sm:$0xff] }
0x1268   : > { %7119 = vmatpush1.bf16.msra.mxu1 %v7108_v0  ;;  %v7097_v2 = vsel %vm9641_vm7, %v13080_v20, %v7087_v44  ;;  %v9343_v4 = vld [vmem:[%s14133_s5 + $0x40] sm:$0xff]  ;;  %v9345_v0 = vld [vmem:[%s14133_s5 + $0x48] sm:$0xff] }
0x1269   : > { %8999 = vmatprep.subr.bf16.mxu1 %v14216_v43  ;;  %v7096_v23 = vsel %vm9641_vm7, %v13077_v13, %v7080_v34  ;;  %v7107_v38 = vsel %vm567_vm8, %v7097_v2, 1065369472  ;;  %v7095_v16 = vsel %vm9641_vm7, %v13074_v18, %v7073_v45 }
0x126a   : > { %v7105_v48 = vsel %vm567_vm8, %v7096_v23, 1065369472  ;;  %v7116_v57 = vsel %vm588_vm9, %v7107_v38, 0  ;;  %v7103_v50 = vsel %vm567_vm8, %v7095_v16, 1065369472  ;;  %v9346_v16 = vld [vmem:[%s14133_s5 + $0x10] sm:$0xff] }
0x126b   : > { %8883 = vmatmul.mubr.msk.bf16.vlgmr.msra.gmra.mrb[120].mxu1 %vm584_vm10, %v13054_v63  ;;  %8884 = vmatprep.subr.msk.bf16.mxu0 %vm588_vm9, %v7105_v48  ;;  %v7112_v20 = vsel %vm588_vm9, %v7103_v50, 0 }
0x126c   : > { %9000 = vmatpush3.bf16.msra.mxu1 %v7116_v57  ;;  %7162 = vmatpush1.bf16.msra.mxu0 %v7112_v20  ;;  %v9347_v57 = vld [vmem:[%s14133_s5 + $0x50] sm:$0xff] }
0x126d   : > { %9001 = vmatprep.mubr.msk.bf16.mxu1 %vm9456_vm11, %v14216_v43 }
0x126f   : > { %8885 = vmatmul.mubr.msk.bf16.vlgmr.msra.gmra.mrb[144].mxu0 %vm584_vm10, %v13054_v63 }
0x1270   : > { %7469 = vmatprep.mubr.bf16.mxu0 %v14214_v1 }
0x1273   : > { %9002 = vmatmul.mubr.msk.bf16.vlgmr.msra.gmra.mrb[124].mxu1 %vm584_vm10, %v13054_v63 }
0x1274   : > { %7522 = vmatprep.mubr.bf16.mxu1 %v14214_v1 }
0x12c2   : > { %v13236_v18 = vpop.f32.mrb[132].mxu0 }
0x12c3   : > { %v13238_v13 = vpop.f32.mrb[133].mxu0  ;;  %v14294_v63 = vmax.f32 %v13236_v18, 0.0 }
0x12c4   : > { %v14193_v39 = vmax.f32 %v13238_v13, 0.0  ;;  %v13241_v37 = vpop.f32.mrb[134].mxu0 }
0x12c5   : > { %v13243_v60 = vpop.f32.mrb[135].mxu0 }
0x12c6   : > { %7267 = vrot.lane.b32.xlu0 %v14193_v39, %s9452_s8  ;;  %v14192_v23 = vmax.f32 %v13243_v60, 0.0 }
0x132c   : > { %v13248_v33 = vpop.f32.mrb[136].mxu0  ;;  %v6495_v28 = vpop.f32.mrb[112].mxu1 }
0x132d   : > { %v6972_v14 = vmax.f32 %v13248_v33, 0.0  ;;  %v13251_v62 = vpop.f32.mrb[137].mxu0  ;;  %v6514_v42 = vmax.f32 %v6495_v28, 0.0  ;;  %v6497_v25 = vpop.f32.mrb[113].mxu1 }
0x132e   : > { %v14186_v36 = vmax.f32 %v13251_v62, 0.0  ;;  %v13254_v52 = vpop.f32.mrb[138].mxu0  ;;  %v6515_v6 = vmax.f32 %v6497_v25, 0.0  ;;  %v6499_v5 = vpop.f32.mrb[114].mxu1 }
0x132f   : > { %7269 = vrot.lane.b32.xlu1 %v6972_v14, %s9452_s8  ;;  %v13259_v10 = vpop.f32.mrb[139].mxu0  ;;  %v6522_v31 = vmul.f32 %v9342_v53, %v6514_v42  ;;  %v6551_v46 = vmul.f32 %v9343_v4, %v6514_v42  ;;  %v6516_v44 = vmax.f32 %v6499_v5, 0.0  ;;  %v6501_v30 = vpop.f32.mrb[115].mxu1  ;;  %v6977_v38 = vmax.f32 %v13254_v52, 0.0  ;;  %v9348_v42 = vld [vmem:[%s14133_s5 + $0x18] sm:$0xff] }
0x1330   : > { %7271 = vrot.lane.b32.xlu0 %v14186_v36, %s9452_s8  ;;  %v6523_v34 = vmul.f32 %v9344_v15, %v6515_v6  ;;  %v6552_v45 = vmul.f32 %v9345_v0, %v6515_v6  ;;  %v6517_v2 = vmax.f32 %v6501_v30, 0.0  ;;  %v9349_v6 = vld [vmem:[%s14133_s5 + $0x58] sm:$0xff] }
0x1331   : > { %v6524_v48 = vmul.f32 %v9346_v16, %v6516_v44  ;;  %v6553_v50 = vmul.f32 %v9347_v57, %v6516_v44 }
0x1332   : > { %v6530_v20 = vsel %vm2444_vm13, %v6523_v34, 0.0  ;;  %v6559_v28 = vsel %vm2444_vm13, %v6552_v45, 0.0  ;;  %v6525_v25 = vmul.f32 %v9348_v42, %v6517_v2  ;;  %v6554_v5 = vmul.f32 %v9349_v6, %v6517_v2 }
0x1333   : > { %7277 = vrot.lane.b32.xlu1 %v14192_v23, %s9452_s8  ;;  %v6531_v53 = vadd.f32 %v6530_v20, %v6522_v31  ;;  %v6560_v4 = vadd.f32 %v6559_v28, %v6551_v46  ;;  %v14189_v34 = vmax.f32 %v13259_v10, 0.0  ;;  %v14190_v31 = vmax.f32 %v13236_v18, 0.0 }
0x1334   : > { %7279 = vrot.lane.b32.xlu0 %v6977_v38, %s9452_s8  ;;  %v6533_v44 = vsel %vm2444_vm13, %v6525_v25, 0.0  ;;  %v6562_v30 = vsel %vm2444_vm13, %v6554_v5, 0.0  ;;  %v6505_v15 = vpop.f32.mrb[116].mxu1  ;;  %v9351_v5 = vld [vmem:[%s14133_s5 + $0x60] sm:$0xff] }
0x1335   : > { %v13301_v0 = vpop.f32.mrb[140].mxu0  ;;  %v6532_v45 = vadd.f32 %v6531_v53, %v6524_v48  ;;  %v6561_v2 = vadd.f32 %v6560_v4, %v6553_v50  ;;  %v6518_v16 = vmax.f32 %v6505_v15, 0.0  ;;  %v6507_v57 = vpop.f32.mrb[117].mxu1  ;;  %v9350_v48 = vld [vmem:[%s14133_s5 + $0x20] sm:$0xff]  ;;  %v9352_v15 = vld [vmem:[%s14133_s5 + $0x28] sm:$0xff] }
0x1336   : > { %v8997_v46 = vpop.f32.mrb[141].mxu0  ;;  %v6519_v20 = vmax.f32 %v6507_v57, 0.0  ;;  %v6509_v28 = vpop.f32.mrb[118].mxu1 }
0x1337   : > { %7281 = vrot.lane.b32.xlu1 %v14189_v34, %s9452_s8  ;;  %v6534_v42 = vadd.f32 %v6533_v44, %v6532_v45  ;;  %v6563_v25 = vadd.f32 %v6562_v30, %v6561_v2  ;;  %v13307_v6 = vpop.f32.mrb[142].mxu0  ;;  %v6526_v50 = vmul.f32 %v9350_v48, %v6518_v16  ;;  %v6555_v53 = vmul.f32 %v9351_v5, %v6518_v16  ;;  %v6511_v4 = vpop.f32.mrb[119].mxu1  ;;  %v9353_v2 = vld [vmem:[%s14133_s5 + $0x68] sm:$0xff] }
0x1338   : > { %7265 = vrot.lane.b32.xlu0 %v14190_v31, %s9452_s8  ;;  %v14188_v44 = vmax.f32 %v13301_v0, 0.0  ;;  %v8998_v30 = vpop.f32.mrb[143].mxu0  ;;  %v6527_v45 = vmul.f32 %v9352_v15, %v6519_v20  ;;  %v6556_v57 = vmul.f32 %v9353_v2, %v6519_v20  ;;  %v6520_v46 = vmax.f32 %v6509_v28, 0.0 }
0x1339   : > { %v14191_v16 = vmax.f32 %v13241_v37, 0.0  ;;  %v6535_v48 = vadd.f32 %v6534_v42, %v6526_v50  ;;  %v6564_v5 = vadd.f32 %v6563_v25, %v6555_v53  ;;  %v6521_v3 = vmax.f32 %v6511_v4, 0.0  ;;  %v9356_v25 = vld [vmem:[%s14133_s5 + $0x38] sm:$0xff] }
0x133a   : > { %v6536_v7 = vsel %vm2444_vm13, %v6527_v45, 0.0  ;;  %v6565_v30 = vsel %vm2444_vm13, %v6556_v57, 0.0  ;;  %v6528_v15 = vmul.f32 %v9354_v56, %v6520_v46  ;;  %v6557_v20 = vmul.f32 %v9355_v47, %v6520_v46  ;;  %v9357_v56 = vld [vmem:[%s14133_s5 + $0x78] sm:$0xff] }
0x133b   : > { %7275 = vrot.lane.b32.xlu1 %v14191_v16, %s9452_s8  ;;  %v6537_v28 = vadd.f32 %v6536_v7, %v6535_v48  ;;  %v6566_v42 = vadd.f32 %v6565_v30, %v6564_v5  ;;  %v6529_v50 = vmul.f32 %v9356_v25, %v6521_v3  ;;  %v6558_v53 = vmul.f32 %v9357_v56, %v6521_v3 }
0x133c   : > { %v14187_v4 = vmax.f32 %v13307_v6, 0.0  ;;  %7273 = vrot.lane.b32.xlu0 %v14188_v44, %s9452_s8 }
0x133d   : > { %v6538_v47 = vadd.f32 %v6537_v28, %v6528_v15  ;;  %v6567_v45 = vadd.f32 %v6566_v42, %v6557_v20  ;;  %v6539_v7 = vsel %vm2444_vm13, %v6529_v50, 0.0  ;;  %v6568_v2 = vsel %vm2444_vm13, %v6558_v53, 0.0 }
0x133e   : > { %v7152_v57 = vpop.f32.mrb[120].mxu1 }
0x133f   : > { %7283 = vrot.lane.b32.xlu1 %v14187_v4, %s9452_s8  ;;  %v7154_v46 = vpop.f32.mrb[121].mxu1  ;;  %v13352_v48 = vadd.f32 %v6539_v7, %v6538_v47  ;;  %v13354_v3 = vadd.f32 %v6568_v2, %v6567_v45 }
0x1340   : > { %v7156_v5 = vpop.f32.mrb[122].mxu1 }
0x1341   : > { %14286 = vst [vmem:[#allocation21_spill] sm:$0xff] %v13352_v48  ;;  %14287 = vst [vmem:[#allocation22_spill] sm:$0xff] %v13354_v3  ;;  %v7158_v30 = vpop.f32.mrb[123].mxu1  ;;  %v13370_v2 = vmax.f32 %v7156_v5, 0.0 }
0x1342   : > { %v7195_v25 = vpop.f32.mrb[144].mxu0 }
0x1343   : > { %v13356_v56 = vmax.f32 %v7195_v25, 0.0  ;;  %v7197_v15 = vpop.f32.mrb[145].mxu0 }
0x1344   : > { %v13358_v20 = vmax.f32 %v7197_v15, 0.0  ;;  %v7199_v28 = vpop.f32.mrb[146].mxu0  ;;  %v13372_v15 = vmax.f32 %v7152_v57, 0.0 }
0x1345   : > { %14288 = vst [vmem:[#allocation23_spill] sm:$0xff] %v13356_v56  ;;  %7337 = vrot.lane.b32.xlu1 %v13356_v56, %s9452_s8  ;;  %v7201_v42 = vpop.f32.mrb[147].mxu0  ;;  %v13366_v45 = vmax.f32 %v7199_v28, 0.0  ;;  %v13380_v28 = vmax.f32 %v7158_v30, 0.0  ;;  %v7268_v30 = vpop.permute.xlu0 %7267 }
0x1346   : > { %v13362_v50 = vmax.f32 %v7201_v42, 0.0  ;;  %7339 = vrot.lane.b32.xlu0 %v13358_v20, %s9452_s8  ;;  %v7238_v53 = vpop.f32.mrb[124].mxu1  ;;  %v13382_v42 = vmax.f32 %v7154_v46, 0.0 }
0x1347   : > { %v9003_v47 = vpop.f32.mrb[125].mxu1  ;;  %14289 = vst [vmem:[#allocation24_spill] sm:$0xff] %v13366_v45  ;;  %v13388_v57 = vmax.f32 %v7238_v53, 0.0 }
0x1348   : > { %v7241_v7 = vpop.f32.mrb[126].mxu1 }
0x1349   : > { %7349 = vrot.lane.b32.xlu1 %v13362_v50, %s9452_s8  ;;  %v9004_v25 = vpop.f32.mrb[127].mxu1  ;;  %v13386_v5 = vmax.f32 %v7241_v7, 0.0 }
0x134a   : > { %7347 = vrot.lane.b32.xlu0 %v13366_v45, %s9452_s8 }
0x134d   : > { %7343 = vrot.lane.b32.xlu1 %v13370_v2, %s9452_s8 }
0x134e   : > { %7333 = vrot.lane.b32.xlu0 %v13372_v15, %s9452_s8 }
0x1351   : > { %7345 = vrot.lane.b32.xlu1 %v13380_v28, %s9452_s8 }
0x1352   : > { %7335 = vrot.lane.b32.xlu0 %v13382_v42, %s9452_s8 }
0x1355   : > { %7351 = vrot.lane.b32.xlu1 %v13386_v5, %s9452_s8 }
0x1356   : > { %7341 = vrot.lane.b32.xlu0 %v13388_v57, %s9452_s8 }
0x13a1   : > { %v7270_v47 = vpop.permute.xlu1 %7269 }
0x13a2   : > { %v7272_v46 = vpop.permute.xlu0 %7271  ;;  %v7286_v40 = vsel %vm382_vm0, %v7268_v30, %v7270_v47 }
0x13a3   : > { %v7287_v53 = vsel %vm382_vm0, %v7270_v47, %v7272_v46 }
0x13a4   : > { %v7305_v16 = vadd.f32 %v7287_v53, %v6972_v14 }
0x13a5   : > { %v7278_v25 = vpop.permute.xlu1 %7277 }
0x13a6   : > { %v7280_v11 = vpop.permute.xlu0 %7279  ;;  %v7315_v48 = vadd.f32 %v7305_v16, %v13356_v56  ;;  %v14291_v16 = vmax.f32 %v13238_v13, 0.0  ;;  %v14292_v56 = vmax.f32 %v13243_v60, 0.0  ;;  %v14295_v13 = vmax.f32 %v13259_v10, 0.0 }
0x13a7   : > { %v7290_v54 = vsel %vm382_vm0, %v7278_v25, %v7280_v11 }
0x13a8   : > { %v7304_v47 = vadd.f32 %v7286_v40, %v14291_v16 }
0x13a9   : > { %v7282_v36 = vpop.permute.xlu1 %7281 }
0x13aa   : > { %v7266_v7 = vpop.permute.xlu0 %7265  ;;  %v7291_v31 = vsel %vm382_vm0, %v7280_v11, %v7282_v36  ;;  %v7309_v11 = vadd.f32 %v7290_v54, %v14292_v56  ;;  %v14296_v54 = vmax.f32 %v13301_v0, 0.0  ;;  %v7314_v56 = vadd.f32 %v7304_v47, %v13382_v42 }
0x13ab   : > { %v7310_v39 = vadd.f32 %v7291_v31, %v6977_v38  ;;  %v7285_v38 = vsel %vm382_vm0, %v7266_v7, %v7268_v30 }
0x13ac   : > { %v7303_v30 = vadd.f32 %v7285_v38, %v14294_v63 }
0x13ad   : > { %v7276_v4 = vpop.permute.xlu1 %7275  ;;  %v7320_v14 = vadd.f32 %v7310_v39, %v13366_v45 }
0x13ae   : > { %v7274_v34 = vpop.permute.xlu0 %7273  ;;  %v7289_v8 = vsel %vm382_vm0, %v7276_v4, %v7278_v25  ;;  %v14293_v4 = vmax.f32 %v13241_v37, 0.0 }
0x13af   : > { %v7288_v7 = vsel %vm382_vm0, %v7272_v46, %v7274_v34  ;;  %v7307_v60 = vadd.f32 %v7274_v34, %v14296_v54  ;;  %v14298_v34 = vmax.f32 %v13251_v62, 0.0 }
0x13b0   : > { %v7308_v25 = vadd.f32 %v7289_v8, %v14293_v4 }
0x13b1   : > { %v7284_v44 = vpop.permute.xlu1 %7283  ;;  %v7306_v0 = vadd.f32 %v7288_v7, %v14298_v34  ;;  %v7317_v4 = vadd.f32 %v7307_v60, %v13388_v57 }
0x13b2   : > { %v7318_v8 = vadd.f32 %v7308_v25, %v13370_v2 }
0x13b7   : > { %v7338_v23 = vpop.permute.xlu1 %7337 }
0x13b8   : > { %v7340_v3 = vpop.permute.xlu0 %7339 }
0x13b9   : > { %v13403_v58 = vsel %vm382_vm0, %v7338_v23, %v7340_v3 }
0x13ba   : > { %14290 = vst [vmem:[#allocation25_spill] sm:$0xff] %v13403_v58  ;;  %v7373_v33 = vadd.f32 %v13403_v58, %v7315_v48  ;;  %v7292_v48 = vsel %vm382_vm0, %v7282_v36, %v7284_v44  ;;  %v7319_v36 = vadd.f32 %v7309_v11, %v13380_v28 }
0x13bb   : > { %v7350_v24 = vpop.permute.xlu1 %7349  ;;  %v7311_v40 = vadd.f32 %v7292_v48, %v14295_v13 }
0x13bc   : > { %v7348_v53 = vpop.permute.xlu0 %7347  ;;  %v7383_v45 = vmul.f32 0.25, %v7373_v33  ;;  %v14297_v33 = vmax.f32 %v13307_v6, 0.0  ;;  %v7313_v6 = vadd.f32 %v7303_v30, %v13372_v15 }
0x13bd   : > { %v13412_v52 = vsel %vm382_vm0, %v7348_v53, %v7350_v24 }
0x13be   : > { %v7378_v31 = vadd.f32 %v13412_v52, %v7320_v14  ;;  %v7312_v18 = vadd.f32 %v7284_v44, %v14297_v33  ;;  %v7321_v44 = vadd.f32 %v7311_v40, %v13362_v50  ;;  %v14300_v40 = vrot.slane %v12870_v12, 1 }
0x13bf   : > { %v7344_v39 = vpop.permute.xlu1 %7343 }
0x13c0   : > { %v7388_v58 = vmul.f32 0.25, %v7378_v31  ;;  %v7334_v19 = vpop.permute.xlu0 %7333  ;;  %v7322_v25 = vadd.f32 %v7312_v18, %v13386_v5 }
0x13c2   : > { %v7393_v14 = vpack.c.bf16 %v7388_v58, %v7383_v45 }
0x13c3   : > { %v7346_v37 = vpop.permute.xlu1 %7345 }
0x13c4   : > { %v13436_v63 = vsel %vm382_vm0, %v7344_v39, %v7346_v37  ;;  %v13439_v10 = vsel %vm382_vm0, %v7346_v37, %v7348_v53  ;;  %v7336_v58 = vpop.permute.xlu0 %7335  ;;  %7423 = vrot.lane.b32.xlu0 %v7393_v14, %s9453_s9  ;;  %7405 = vrot.lane.b32.xlu1 %v7393_v14, %s9452_s8  ;;  %v7316_v39 = vadd.f32 %v7306_v0, %v13358_v20 }
0x13c5   : > { %v7376_v45 = vadd.f32 %v13436_v63, %v7318_v8  ;;  %v7377_v46 = vadd.f32 %v13439_v10, %v7319_v36  ;;  %v13450_v38 = vsel %vm382_vm0, %v7334_v19, %v7336_v58  ;;  %v13453_v53 = vsel %vm382_vm0, %v7336_v58, %v7338_v23 }
0x13c6   : > { %v7371_v47 = vadd.f32 %v13450_v38, %v7313_v6  ;;  %v7372_v62 = vadd.f32 %v13453_v53, %v7314_v56  ;;  %v14299_v19 = vrot.slane %v12851_v17, 1  ;;  %v14301_v56 = vrot.slane %v12885_v61, 1 }
0x13c7   : > { %v7386_v31 = vmul.f32 0.25, %v7376_v45  ;;  %v7387_v16 = vmul.f32 0.25, %v7377_v46  ;;  %v13457_v11 = vpop.permute.xlu1 %7351  ;;  %v14302_v61 = vrot.slane %v12904_v29, 1 }
0x13c8   : > { %v13463_v48 = vsel %vm382_vm0, %v7350_v24, %v13457_v11  ;;  %7651 = vrot.lane.b32.xlu0 %v14299_v19, %s9452_s8  ;;  %v13468_v23 = vpop.permute.xlu0 %7341  ;;  %v7381_v30 = vmul.f32 0.25, %v7371_v47  ;;  %v7382_v7 = vmul.f32 0.25, %v7372_v62  ;;  %7653 = vrot.lane.b32.xlu1 %v14300_v40, %s9452_s8  ;;  %v7380_v54 = vadd.f32 %v13457_v11, %v7322_v25 }
0x13c9   : > { %v7379_v13 = vadd.f32 %v13463_v48, %v7321_v44  ;;  %v13478_v24 = vsel %vm382_vm0, %v7340_v3, %v13468_v23  ;;  %v7375_v17 = vadd.f32 %v13468_v23, %v7317_v4  ;;  %v7641_v40 = vrot.slane %v12882_v59, 1 }
0x13ca   : > { %v7391_v60 = vpack.c.bf16 %v7386_v31, %v7381_v30  ;;  %v7374_v37 = vadd.f32 %v13478_v24, %v7316_v39  ;;  %v7392_v36 = vpack.c.bf16 %v7387_v16, %v7382_v7  ;;  %v7390_v12 = vmul.f32 0.25, %v7380_v54 }
0x13cb   : > { %v7389_v8 = vmul.f32 0.25, %v7379_v13  ;;  %v7385_v18 = vmul.f32 0.25, %v7375_v17 }
0x13cc   : > { %7655 = vrot.lane.b32.xlu0 %v14301_v56, %s9452_s8  ;;  %v7384_v33 = vmul.f32 0.25, %v7374_v37  ;;  %7437 = vmatprep.subr.bf16.mxu0 %v7392_v36  ;;  %v7642_v37 = vrot.slane %v12890_v27, 1 }
0x13cd   : > { %7421 = vrot.lane.b32.xlu1 %v7392_v36, %s9453_s9  ;;  %7438 = vmatpush1.bf16.msra.mxu0 %v7391_v60  ;;  %v7395_v58 = vpack.c.bf16 %v7390_v12, %v7385_v18  ;;  %v13529_v18 = vld [vmem:[%s14215_s3] sm:$0xff]  }
0x13ce   : > { %v7394_v3 = vpack.c.bf16 %v7389_v8, %v7384_v33 }
0x13d0   : > { %7403 = vrot.lane.b32.xlu0 %v7392_v36, %s9452_s8  ;;  %7490 = vmatprep.subr.bf16.mxu1 %v7394_v3 }
0x13d1   : > { %7419 = vrot.lane.b32.xlu1 %v7391_v60, %s9453_s9  ;;  %7491 = vmatpush1.bf16.msra.mxu1 %v7393_v14  ;;  %v14303_v14 = vrot.slane %v12934_v22, 1 }
0x13d4   : > { %7401 = vrot.lane.b32.xlu0 %v7391_v60, %s9452_s8 }
0x13d5   : > { %7427 = vrot.lane.b32.xlu1 %v7395_v58, %s9453_s9 }
0x13d8   : > { %7409 = vrot.lane.b32.xlu0 %v7395_v58, %s9452_s8 }
0x13d9   : > { %7407 = vrot.lane.b32.xlu1 %v7394_v3, %s9452_s8 }
0x13dc   : > { %7425 = vrot.lane.b32.xlu0 %v7394_v3, %s9453_s9 }
0x13dd   : > { %7670 = vrot.lane.b32.xlu1 %v12882_v59, %s9453_s9 }
0x13e0   : > { %7672 = vrot.lane.b32.xlu0 %v12890_v27, %s9453_s9 }
0x13e1   : > { %7674 = vrot.lane.b32.xlu1 %v12900_v49, %s9453_s9 }
0x13e4   : > { %7657 = vrot.lane.b32.xlu0 %v14302_v61, %s9452_s8 }
0x13e5   : > { %7659 = vrot.lane.b32.xlu1 %v14303_v14, %s9452_s8 }
0x13e8   : > { %7676 = vrot.lane.b32.xlu0 %v12931_v41, %s9453_s9 }
0x13e9   : > { %7678 = vrot.lane.b32.xlu1 %v12938_v32, %s9453_s9 }
0x1436   : > { %v7424_v34 = vpop.permute.xlu0 %7423  ;;  %v7406_v0 = vpop.permute.xlu1 %7405 }
0x143a   : > { %v7652_v45 = vpop.permute.xlu0 %7651  ;;  %v7654_v46 = vpop.permute.xlu1 %7653 }
0x143b   : > { %v7661_v8 = vsel %vm382_vm0, %v7652_v45, %v7654_v46 }
0x143c   : > { %v7684_v33 = vsel %vm9605_vm3, %v7641_v40, %v7661_v8  ;;  %v13559_v40 = vld [vmem:[%s14215_s3 + $0x8] sm:$0xff]  }
0x143e   : > { %v7656_v6 = vpop.permute.xlu0 %7655 }
0x143f   : > { %v7422_v44 = vpop.permute.xlu1 %7421  ;;  %v7662_v36 = vsel %vm382_vm0, %v7654_v46, %v7656_v6 }
0x1440   : > { %v7430_v4 = vsel %vm407_vm4, %v7422_v44, %v7424_v34  ;;  %v7685_v27 = vsel %vm9605_vm3, %v7642_v37, %v7662_v36 }
0x1442   : > { %v7404_v31 = vpop.permute.xlu0 %7403 }
0x1443   : > { %v7420_v16 = vpop.permute.xlu1 %7419  ;;  %v7412_v29 = vsel %vm382_vm0, %v7404_v31, %v7406_v0 }
0x1444   : > { %7439 = vmatprep.subr.bf16.mxu0 %v7412_v29  ;;  %v7429_v19 = vsel %vm407_vm4, %v7420_v16, %v7422_v44  ;;  %v7644_v44 = vrot.slane %v12931_v41, 1 }
0x1446   : > { %v7402_v47 = vpop.permute.xlu0 %7401 }
0x1447   : > { %v7411_v22 = vsel %vm382_vm0, %v7402_v47, %v7404_v31  ;;  %v7428_v62 = vpop.permute.xlu1 %7427 }
0x1448   : > { %7440 = vmatpush1.bf16.msra.mxu0 %v7411_v22  ;;  %v7643_v22 = vrot.slane %v12900_v49, 1 }
0x1449   : > { %7441 = vmatprep.subr.bf16.mxu0 %v7430_v4 }
0x144a   : > { %v7410_v25 = vpop.permute.xlu0 %7409 }
0x144b   : > { %v7408_v39 = vpop.permute.xlu1 %7407 }
0x144c   : > { %v7413_v30 = vsel %vm382_vm0, %v7406_v0, %v7408_v39  ;;  %7442 = vmatpush1.bf16.msra.mxu0 %v7429_v19  ;;  %v7414_v7 = vsel %vm382_vm0, %v7408_v39, %v7410_v25  ;;  %v7645_v0 = vrot.slane %v12938_v32, 1 }
0x144d   : > { %7492 = vmatprep.subr.bf16.mxu1 %v7414_v7  ;;  %7443 = vmatprep.subr.bf16.mxu0 %v10039_v35 }
0x144e   : > { %7493 = vmatpush1.bf16.msra.mxu1 %v7413_v30  ;;  %v7426_v13 = vpop.permute.xlu0 %7425 }
0x144f   : > { %v7671_v54 = vpop.permute.xlu1 %7670  ;;  %v7431_v17 = vsel %vm407_vm4, %v7424_v34, %v7426_v13  ;;  %v7432_v60 = vsel %vm407_vm4, %v7426_v13, %v7428_v62 }
0x1450   : > { %7444 = vmatpush1.bf16.msra.mxu0 %v10039_v35  ;;  %7494 = vmatprep.subr.bf16.mxu1 %v7432_v60 }
0x1452   : > { %7495 = vmatpush1.bf16.msra.mxu1 %v7431_v17  ;;  %v7673_v56 = vpop.permute.xlu0 %7672 }
0x1453   : > { %v7675_v59 = vpop.permute.xlu1 %7674  ;;  %v7680_v12 = vsel %vm407_vm4, %v7671_v54, %v7673_v56  ;;  %8887 = vmatmul.mubr.msk.bf16.vlgmr.msra.gmra.mrb[148].mxu0 %vm1204_vm12, %v13529_v18  ;;  %7496 = vmatprep.subr.bf16.mxu1 %v10039_v35 }
0x1454   : > { %v7681_v3 = vsel %vm407_vm4, %v7673_v56, %v7675_v59  ;;  %v7691_v58 = vsel %vm412_vm1, %v7684_v33, %v7680_v12  ;;  %7479 = vmatprep.mubr.bf16.mxu0 %v14214_v1 }
0x1455   : > { %v7694_v61 = vsel %vm412_vm1, %v7685_v27, %v7681_v3  ;;  %v7704_v14 = vshrl.u32 %v7691_v58, 16  ;;  %v7707_v34 = vshll.u32 %v7691_v58, 16 }
0x1456   : > { %v7711_v45 = vshrl.u32 %v7694_v61, 16  ;;  %v7714_v46 = vshll.u32 %v7694_v61, 16  ;;  %7497 = vmatpush1.bf16.msra.mxu1 %v10039_v35  ;;  %v7658_v31 = vpop.permute.xlu0 %7657 }
0x1457   : > { %v7706_v16 = vrot.slane %v7704_v14, 6  ;;  %v7709_v29 = vrot.slane %v7707_v34, 7  ;;  %v7660_v47 = vpop.permute.xlu1 %7659  ;;  %v7663_v25 = vsel %vm382_vm0, %v7656_v6, %v7658_v31 }
0x1458   : > { %v7713_v62 = vrot.slane %v7711_v45, 6  ;;  %v7716_v4 = vrot.slane %v7714_v46, 7  ;;  %v7664_v19 = vsel %vm382_vm0, %v7658_v31, %v7660_v47  ;;  %v7688_v32 = vsel %vm9605_vm3, %v7645_v0, %v7660_v47  ;;  %v14305_v47 = vld [vmem:[#allocation20_spill] sm:$0xff] }
0x1459   : > { %v7710_v39 = vor.u32 %v7709_v29, %v7706_v16  ;;  %8889 = vmatmul.mubr.msk.bf16.vlgmr.msra.gmra.mrb[128].mxu1 %vm1204_vm12, %v13529_v18  ;;  %v7687_v30 = vsel %vm9605_vm3, %v7644_v44, %v7664_v19  ;;  %v7686_v49 = vsel %vm9605_vm3, %v7643_v22, %v7663_v25  ;;  %v14304_v29 = vld [vmem:[#allocation18_spill] sm:$0xff] }
0x145a   : > { %v7717_v41 = vor.u32 %v7716_v4, %v7713_v62  ;;  %v7677_v7 = vpop.permute.xlu0 %7676  ;;  %7532 = vmatprep.mubr.bf16.mxu1 %v14214_v1  ;;  %v14306_v4 = vld [vmem:[#allocation2_spill] sm:$0xff] }
0x145b   : > { %v7679_v6 = vpop.permute.xlu1 %7678  ;;  %v7682_v13 = vsel %vm407_vm4, %v7675_v59, %v7677_v7  ;;  %8888 = vmatmul.mubr.msk.bf16.gmra.mrb[152].mxu0 %vm1204_vm12, %v13559_v40  ;;  %v7744_v54 = vsel %vm9641_vm7, %v13146_v9, %v7710_v39 }
0x145c   : > { %v7703_v17 = vsel %vm412_vm1, %v7688_v32, %v7679_v6  ;;  %v7683_v51 = vsel %vm407_vm4, %v7677_v7, %v7679_v6  ;;  %v7697_v60 = vsel %vm412_vm1, %v7686_v49, %v7682_v13  ;;  %v7745_v8 = vsel %vm9641_vm7, %v13149_v21, %v7717_v41  ;;  %7801 = vmatprep.mubr.bf16.mxu0 %v14214_v1  ;;  %v9360_v6 = vld [vmem:[%s14217_s4] sm:$0xff] }
0x145d   : > { %v7732_v37 = vshrl.u32 %v7703_v17, 16  ;;  %v7735_v36 = vshll.u32 %v7703_v17, 16  ;;  %v7700_v56 = vsel %vm412_vm1, %v7687_v30, %v7683_v51  ;;  %v7718_v33 = vshrl.u32 %v7697_v60, 16 }
0x145e   : > { %v7721_v59 = vshll.u32 %v7697_v60, 16  ;;  %v7725_v12 = vshrl.u32 %v7700_v56, 16  ;;  %v7728_v9 = vshll.u32 %v7700_v56, 16  ;;  %v7752_v27 = vsel %vm567_vm8, %v7745_v8, 1065369472  ;;  %v9362_v60 = vld [vmem:[%s14217_s4 + $0x8] sm:$0xff] }
0x145f   : > { %v7734_v3 = vrot.slane %v7732_v37, 6  ;;  %v7737_v58 = vrot.slane %v7735_v36, 7  ;;  %v7720_v61 = vrot.slane %v7718_v33, 6  ;;  %8891 = vmatprep.subr.msk.bf16.mxu0 %vm588_vm9, %v7752_v27  ;;  %v7750_v14 = vsel %vm567_vm8, %v7744_v54, 1065369472  ;;  %v9361_v54 = vld [vmem:[%s14217_s4 + $0x100] sm:$0xff] }
0x1460   : > { %v7723_v21 = vrot.slane %v7721_v59, 7  ;;  %v7727_v34 = vrot.slane %v7725_v12, 6  ;;  %v7730_v0 = vrot.slane %v7728_v9, 7  ;;  %v7759_v45 = vsel %vm588_vm9, %v7750_v14, 0  ;;  %v9363_v37 = vld [vmem:[%s14217_s4 + $0x108] sm:$0xff]  ;;  %v9364_v14 = vld [vmem:[%s14217_s4 + $0x10] sm:$0xff] }
0x1461   : > { %v7738_v46 = vor.u32 %v7737_v58, %v7734_v3  ;;  %7770 = vmatpush1.bf16.msra.mxu0 %v7759_v45  ;;  %8890 = vmatmul.mubr.msk.bf16.gmra.mrb[132].mxu1 %vm1204_vm12, %v13559_v40 }
0x1462   : > { %v7724_v44 = vor.u32 %v7723_v21, %v7720_v61  ;;  %v7731_v31 = vor.u32 %v7730_v0, %v7727_v34  ;;  %9005 = vmatprep.subr.bf16.mxu0 %v14216_v43  ;;  %7844 = vmatprep.mubr.bf16.mxu1 %v14214_v1  ;;  %v9365_v34 = vld [vmem:[%s14217_s4 + $0x110] sm:$0xff] }
0x1463   : > { %v7748_v16 = vsel %vm9641_vm7, %v13178_v55, %v7738_v46 }
0x1464   : > { %8892 = vmatmul.mubr.msk.bf16.vlgmr.msra.gmra.mrb[156].mxu0 %vm584_vm10, %v14304_v29  ;;  %v7747_v22 = vsel %vm9641_vm7, %v14305_v47, %v7731_v31  ;;  %v7758_v62 = vsel %vm567_vm8, %v7748_v16, 1065369472  ;;  %v7746_v25 = vsel %vm9641_vm7, %v14306_v4, %v7724_v44  ;;  %v9366_v44 = vld [vmem:[%s14217_s4 + $0x18] sm:$0xff] }
0x1465   : > { %v7756_v19 = vsel %vm567_vm8, %v7747_v22, 1065369472  ;;  %v7767_v39 = vsel %vm588_vm9, %v7758_v62, 0  ;;  %v7754_v32 = vsel %vm567_vm8, %v7746_v25, 1065369472  ;;  %9007 = vmatprep.mubr.msk.bf16.mxu0 %vm9456_vm11, %v14216_v43  ;;  %v9367_v16 = vld [vmem:[%s14217_s4 + $0x118] sm:$0xff] }
0x1466   : > { %8893 = vmatprep.subr.msk.bf16.mxu1 %vm588_vm9, %v7756_v19  ;;  %9006 = vmatpush3.bf16.msra.mxu0 %v7767_v39  ;;  %v7763_v55 = vsel %vm588_vm9, %v7754_v32, 0  ;;  %v14307_v19 = vld [vmem:[#allocation23_spill] sm:$0xff]  ;;  %v14308_v39 = vld [vmem:[#allocation25_spill] sm:$0xff] }
0x1467   : > { %7813 = vmatpush1.bf16.msra.mxu1 %v7763_v55  ;;  %v13641_v32 = vadd.f32 %v14308_v39, %v14307_v19  ;;  %v9368_v55 = vld [vmem:[%s14217_s4 + $0x20] sm:$0xff] }
0x146a   : > { %8894 = vmatmul.mubr.msk.bf16.vlgmr.msra.gmra.mrb[136].mxu1 %vm584_vm10, %v14304_v29 }
0x146b   : > { %8072 = vmatprep.mubr.bf16.mxu1 %v14214_v1 }
0x146c   : > { %9008 = vmatmul.mubr.msk.bf16.vlgmr.msra.gmra.mrb[160].mxu0 %vm584_vm10, %v14304_v29 }
0x146d   : > { %8125 = vmatprep.mubr.bf16.mxu0 %v14214_v1 }
0x1526   : > { %v7471_v41 = vpop.f32.mrb[148].mxu0 }
0x1527   : > { %v7543_v30 = vmax.f32 %v7471_v41, 0.0  ;;  %v7473_v7 = vpop.f32.mrb[149].mxu0 }
0x1528   : > { %v7544_v43 = vmax.f32 %v7473_v7, 0.0  ;;  %v7475_v49 = vpop.f32.mrb[150].mxu0 }
0x1529   : > { %v7559_v13 = vmul.f32 %v9360_v6, %v7543_v30  ;;  %v7600_v17 = vmul.f32 %v9361_v54, %v7543_v30  ;;  %v7477_v51 = vpop.f32.mrb[151].mxu0  ;;  %v7547_v3 = vmax.f32 %v7475_v49, 0.0 }
0x152a   : > { %v7560_v8 = vmul.f32 %v9362_v60, %v7544_v43  ;;  %v7601_v36 = vmul.f32 %v9363_v37, %v7544_v43  ;;  %v7548_v4 = vmax.f32 %v7477_v51, 0.0  ;;  %v9369_v43 = vld [vmem:[%s14217_s4 + $0x120] sm:$0xff] }
0x152b   : > { %v7563_v41 = vmul.f32 %v9368_v55, %v7547_v3  ;;  %v7604_v49 = vmul.f32 %v9369_v43, %v7547_v3  ;;  %v13676_v3 = vadd.f32 %v13478_v24, %v13358_v20  ;;  %v9374_v20 = vld [vmem:[%s14217_s4 + $0x40] sm:$0xff]  ;;  %v9375_v24 = vld [vmem:[%s14217_s4 + $0x38] sm:$0xff] }
0x152c   : > { %v7575_v56 = vadd.f32 %v7560_v8, %v7559_v13  ;;  %v7616_v33 = vadd.f32 %v7601_v36, %v7600_v17  ;;  %v7524_v59 = vpop.f32.mrb[128].mxu1  ;;  %v14309_v13 = vld [vmem:[#allocation24_spill] sm:$0xff]  ;;  %v7911_v17 = vadd.f32 %v13436_v63, %v13370_v2  ;;  %v7912_v2 = vadd.f32 %v13439_v10, %v13380_v28 }
0x152d   : > { %v7545_v12 = vmax.f32 %v7524_v59, 0.0  ;;  %v7526_v9 = vpop.f32.mrb[129].mxu1  ;;  %v13651_v54 = vadd.f32 %v13412_v52, %v14309_v13  ;;  %v9371_v52 = vld [vmem:[%s14217_s4 + $0x128] sm:$0xff]  ;;  %v7906_v63 = vadd.f32 %v13450_v38, %v13372_v15  ;;  %v9373_v15 = vld [vmem:[%s14217_s4 + $0x130] sm:$0xff] }
0x152e   : > { %v7546_v27 = vmax.f32 %v7526_v9, 0.0  ;;  %v13619_v58 = vpop.f32.mrb[152].mxu0  ;;  %v7528_v61 = vpop.f32.mrb[130].mxu1  ;;  %v7605_v59 = vmul.f32 %v9371_v52, %v7548_v4  ;;  %v7907_v9 = vadd.f32 %v13453_v53, %v13382_v42 }
0x152f   : > { %v7561_v21 = vmul.f32 %v9364_v14, %v7545_v12  ;;  %v7602_v0 = vmul.f32 %v9365_v34, %v7545_v12  ;;  %v13627_v45 = vpop.f32.mrb[153].mxu0  ;;  %v7530_v46 = vpop.f32.mrb[131].mxu1  ;;  %v7549_v6 = vmax.f32 %v7528_v61, 0.0  ;;  %v7551_v51 = vmax.f32 %v13619_v58, 0.0  ;;  %v9372_v14 = vld [vmem:[%s14217_s4 + $0x30] sm:$0xff] }
0x1530   : > { %v7562_v31 = vmul.f32 %v9366_v44, %v7546_v27  ;;  %v7603_v29 = vmul.f32 %v9367_v16, %v7546_v27  ;;  %v13635_v47 = vpop.f32.mrb[154].mxu0  ;;  %v7550_v60 = vmax.f32 %v7530_v46, 0.0  ;;  %v7552_v53 = vmax.f32 %v13627_v45, 0.0  ;;  %v9376_v16 = vld [vmem:[%s14217_s4 + $0x138] sm:$0xff]  ;;  %v9377_v45 = vld [vmem:[%s14217_s4 + $0x140] sm:$0xff] }
0x1531   : > { %v7576_v22 = vadd.f32 %v7575_v56, %v7561_v21  ;;  %v7617_v62 = vadd.f32 %v7616_v33, %v7602_v0  ;;  %v13637_v25 = vpop.f32.mrb[155].mxu0  ;;  %v9370_v56 = vld [vmem:[%s14217_s4 + $0x28] sm:$0xff]  ;;  %v7565_v21 = vmul.f32 %v9372_v14, %v7549_v6  ;;  %v7606_v28 = vmul.f32 %v9373_v15, %v7549_v6 }
0x1532   : > { %v7564_v33 = vmul.f32 %v9370_v56, %v7548_v4  ;;  %v7567_v38 = vmul.f32 %v9374_v20, %v7551_v51  ;;  %v7566_v34 = vmul.f32 %v9375_v24, %v7550_v60  ;;  %v7608_v4 = vmul.f32 %v9377_v45, %v7551_v51  ;;  %v9378_v6 = vld [vmem:[%s14217_s4 + $0x48] sm:$0xff] }
0x1533   : > { %v7577_v30 = vadd.f32 %v7576_v22, %v7562_v31  ;;  %v7618_v7 = vadd.f32 %v7617_v62, %v7603_v29  ;;  %v7607_v29 = vmul.f32 %v9376_v16, %v7550_v60  ;;  %v7568_v13 = vmul.f32 %v9378_v6, %v7552_v53 }
0x1534   : > { %v13656_v8 = vpop.f32.mrb[132].mxu1 }
0x1535   : > { %v7578_v37 = vadd.f32 %v7577_v30, %v7563_v41  ;;  %v7619_v36 = vadd.f32 %v7618_v7, %v7604_v49  ;;  %v13664_v12 = vpop.f32.mrb[133].mxu1  ;;  %v7553_v39 = vmax.f32 %v13656_v8, 0.0  ;;  %v7914_v8 = vadd.f32 %v13463_v48, %v13362_v50 }
0x1536   : > { %v13672_v27 = vpop.f32.mrb[134].mxu1  ;;  %v7554_v51 = vmax.f32 %v13664_v12, 0.0  ;;  %v9380_v12 = vld [vmem:[%s14217_s4 + $0x50] sm:$0xff] }
0x1537   : > { %v7579_v58 = vadd.f32 %v7578_v37, %v7564_v33  ;;  %v7620_v61 = vadd.f32 %v7619_v36, %v7605_v59  ;;  %v7803_v10 = vpop.f32.mrb[156].mxu0  ;;  %v13684_v42 = vpop.f32.mrb[135].mxu1  ;;  %v9379_v37 = vld [vmem:[%s14217_s4 + $0x148] sm:$0xff] }
0x1538   : > { %v7896_v0 = vmax.f32 %v7803_v10, 0.0  ;;  %v7805_v46 = vpop.f32.mrb[157].mxu0  ;;  %v7609_v36 = vmul.f32 %v9379_v37, %v7552_v53  ;;  %v9383_v10 = vld [vmem:[%s14217_s4 + $0x158] sm:$0xff] }
0x1539   : > { %v7580_v44 = vadd.f32 %v7579_v58, %v7565_v21  ;;  %v7621_v31 = vadd.f32 %v7620_v61, %v7606_v28  ;;  %v7897_v22 = vmax.f32 %v7805_v46, 0.0  ;;  %v7807_v62 = vpop.f32.mrb[158].mxu0  ;;  %v7611_v20 = vmul.f32 %v9383_v10, %v7554_v51 }
0x153a   : > { %v13699_v19 = vadd.f32 %v7906_v63, %v7896_v0  ;;  %v7901_v55 = vmax.f32 %v7807_v62, 0.0  ;;  %7936 = vrot.lane.b32.xlu0 %v7896_v0, %s9452_s8  ;;  %v7809_v41 = vpop.f32.mrb[159].mxu0  ;;  %v7556_v63 = vmax.f32 %v13637_v25, 0.0  ;;  %v9382_v25 = vld [vmem:[%s14217_s4 + $0x58] sm:$0xff] }
0x153b   : > { %v7581_v30 = vadd.f32 %v7580_v44, %v7566_v34  ;;  %v7622_v7 = vadd.f32 %v7621_v31, %v7607_v29  ;;  %v13703_v43 = vadd.f32 %v7907_v9, %v7897_v22  ;;  %v7902_v49 = vmax.f32 %v7809_v41, 0.0  ;;  %v9384_v29 = vld [vmem:[%s14217_s4 + $0x60] sm:$0xff] }
0x153c   : > { %v13708_v60 = vadd.f32 %v7911_v17, %v7901_v55  ;;  %7946 = vrot.lane.b32.xlu1 %v7901_v55, %s9452_s8  ;;  %v7555_v17 = vmax.f32 %v13635_v47, 0.0  ;;  %v7569_v9 = vmul.f32 %v9380_v12, %v7553_v39  ;;  %v7570_v28 = vmul.f32 %v9382_v25, %v7554_v51 }
0x153d   : > { %v7582_v56 = vadd.f32 %v7581_v30, %v7567_v38  ;;  %v7623_v33 = vadd.f32 %v7622_v7, %v7608_v4  ;;  %v13717_v52 = vadd.f32 %v7912_v2, %v7902_v49  ;;  %v7846_v59 = vpop.f32.mrb[136].mxu1  ;;  %v9381_v2 = vld [vmem:[%s14217_s4 + $0x150] sm:$0xff]  ;;  %v7557_v55 = vmax.f32 %v13672_v27, 0.0  ;;  %v9386_v30 = vld [vmem:[%s14217_s4 + $0x68] sm:$0xff] }
0x153e   : > { %v7898_v50 = vmax.f32 %v7846_v59, 0.0  ;;  %7938 = vrot.lane.b32.xlu0 %v7897_v22, %s9452_s8  ;;  %v7848_v48 = vpop.f32.mrb[137].mxu1  ;;  %v7610_v61 = vmul.f32 %v9381_v2, %v7553_v39  ;;  %v7571_v22 = vmul.f32 %v9384_v29, %v7555_v17  ;;  %v7572_v7 = vmul.f32 %v9386_v30, %v7556_v63  ;;  %v9388_v27 = vld [vmem:[%s14217_s4 + $0x70] sm:$0xff] }
0x153f   : > { %v7583_v58 = vadd.f32 %v7582_v56, %v7568_v13  ;;  %v7624_v14 = vadd.f32 %v7623_v33, %v7609_v36  ;;  %v7899_v21 = vmax.f32 %v7848_v48, 0.0  ;;  %v7850_v47 = vpop.f32.mrb[138].mxu1  ;;  %v13728_v15 = vpop.f32.mrb[160].mxu0  ;;  %v7558_v51 = vmax.f32 %v13684_v42, 0.0  ;;  %v9389_v36 = vld [vmem:[%s14217_s4 + $0x170] sm:$0xff] }
0x1540   : > { %v13737_v38 = vadd.f32 %v13641_v32, %v7898_v50  ;;  %v7903_v53 = vmax.f32 %v7850_v47, 0.0  ;;  %7948 = vrot.lane.b32.xlu1 %v7902_v49, %s9452_s8  ;;  %v7852_v24 = vpop.f32.mrb[139].mxu1  ;;  %v9009_v34 = vpop.f32.mrb[161].mxu0  ;;  %v9385_v32 = vld [vmem:[%s14217_s4 + $0x160] sm:$0xff]  ;;  %v7614_v56 = vmul.f32 %v9389_v36, %v7557_v55  ;;  %v7900_v59 = vmax.f32 %v13728_v15, 0.0 }
0x1541   : > { %v7584_v0 = vadd.f32 %v7583_v58, %v7569_v9  ;;  %v7625_v46 = vadd.f32 %v7624_v14, %v7610_v61  ;;  %v13741_v44 = vadd.f32 %v13676_v3, %v7899_v21  ;;  %v7904_v31 = vmax.f32 %v7852_v24, 0.0  ;;  %v13743_v16 = vpop.f32.mrb[162].mxu0  ;;  %v9391_v9 = vld [vmem:[%s14217_s4 + $0x178] sm:$0xff] }
0x1542   : > { %v7612_v62 = vmul.f32 %v9385_v32, %v7555_v17  ;;  %v13752_v45 = vadd.f32 %v13651_v54, %v7903_v53  ;;  %7942 = vrot.lane.b32.xlu0 %v7899_v21, %s9452_s8  ;;  %v9010_v3 = vpop.f32.mrb[163].mxu0  ;;  %v9387_v54 = vld [vmem:[%s14217_s4 + $0x168] sm:$0xff]  ;;  %v7905_v48 = vmax.f32 %v13743_v16, 0.0 }
0x1543   : > { %v7585_v4 = vadd.f32 %v7584_v0, %v7570_v28  ;;  %v7626_v39 = vadd.f32 %v7625_v46, %v7611_v20  ;;  %v13756_v41 = vadd.f32 %v7914_v8, %v7904_v31  ;;  %v7613_v49 = vmul.f32 %v9387_v54, %v7556_v63  ;;  %v9390_v63 = vld [vmem:[%s14217_s4 + $0x78] sm:$0xff] }
0x1544   : > { %7940 = vrot.lane.b32.xlu1 %v7898_v50, %s9452_s8  ;;  %v7573_v8 = vmul.f32 %v9388_v27, %v7557_v55  ;;  %v7574_v12 = vmul.f32 %v9390_v63, %v7558_v51  ;;  %v7615_v50 = vmul.f32 %v9391_v9, %v7558_v51  ;;  %v7915_v3 = vadd.f32 %v13457_v11, %v13386_v5 }
0x1545   : > { %v7586_v6 = vadd.f32 %v7585_v4, %v7571_v22  ;;  %v7627_v13 = vadd.f32 %v7626_v39, %v7612_v62 }
0x1546   : > { %7950 = vrot.lane.b32.xlu0 %v7903_v53, %s9452_s8  ;;  %v7925_v30 = vadd.f32 %v7915_v3, %v7905_v48 }
0x1547   : > { %v7587_v37 = vadd.f32 %v7586_v6, %v7572_v7  ;;  %v7628_v33 = vadd.f32 %v7627_v13, %v7613_v49 }
0x1548   : > { %7952 = vrot.lane.b32.xlu1 %v7904_v31, %s9452_s8 }
0x1549   : > { %v7588_v17 = vadd.f32 %v7587_v37, %v7573_v8  ;;  %v7629_v42 = vadd.f32 %v7628_v33, %v7614_v56 }
0x154a   : > { %7944 = vrot.lane.b32.xlu0 %v7900_v59, %s9452_s8 }
0x154b   : > { %v13783_v58 = vadd.f32 %v7588_v17, %v7574_v12  ;;  %v13785_v2 = vadd.f32 %v7629_v42, %v7615_v50  ;;  %v8907_v17 = vld.sshfl [vmem:[%s10342_s15 + $0x38] sm:$0x33 pattern:$0x76325410] }
0x154c   : > { %7954 = vrot.lane.b32.xlu1 %v7905_v48, %s9452_s8  ;;  %v8353_v9 = vcombine.high %v8907_v17, %v8907_v17 }
0x15ac   : > { %v7937_v61 = vpop.permute.xlu0 %7936 }
0x15ae   : > { %v7947_v14 = vpop.permute.xlu1 %7946 }
0x15b0   : > { %v7939_v21 = vpop.permute.xlu0 %7938 }
0x15b1   : > { %v7956_v47 = vsel %vm382_vm0, %v7937_v61, %v7939_v21 }
0x15b2   : > { %v7974_v15 = vadd.f32 %v7956_v47, %v13699_v19  ;;  %v7949_v25 = vpop.permute.xlu1 %7948  ;;  %v7910_v19 = vadd.f32 %v13468_v23, %v13388_v57  ;;  %v8903_v47 = vld.sshfl [vmem:[%s10342_s15 + $0x30] sm:$0x33 pattern:$0x76325410] }
0x15b3   : > { %v7960_v28 = vsel %vm382_vm0, %v7947_v14, %v7949_v25 }
0x15b4   : > { %v7979_v10 = vadd.f32 %v7960_v28, %v13708_v60  ;;  %v7943_v20 = vpop.permute.xlu0 %7942  ;;  %v7984_v53 = vmul.f32 0.25, %v7974_v15  ;;  %v7920_v4 = vadd.f32 %v7910_v19, %v7900_v59  ;;  %v8363_v28 = vshrl.u32 %v8353_v9, 16 }
0x15b6   : > { %v7989_v24 = vmul.f32 0.25, %v7979_v10  ;;  %v7941_v34 = vpop.permute.xlu1 %7940  ;;  %v8366_v10 = vshll.u32 %v8353_v9, 16  ;;  %v9396_v9 = vld [vmem:[%s14217_s4 + $0x188] sm:$0xff] }
0x15b7   : > { %v7957_v0 = vsel %vm382_vm0, %v7939_v21, %v7941_v34  ;;  %v7958_v46 = vsel %vm382_vm0, %v7941_v34, %v7943_v20 }
0x15b8   : > { %v7994_v31 = vpack.c.bf16 %v7989_v24, %v7984_v53  ;;  %v7975_v16 = vadd.f32 %v7957_v0, %v13703_v43  ;;  %v7951_v29 = vpop.permute.xlu0 %7950  ;;  %v7976_v32 = vadd.f32 %v7958_v46, %v13737_v38 }
0x15b9   : > { %v7961_v22 = vsel %vm382_vm0, %v7949_v25, %v7951_v29  ;;  %v8355_v25 = vshrl.u32 %v8907_v17, 16 }
0x15ba   : > { %v7980_v60 = vadd.f32 %v7961_v22, %v13717_v52  ;;  %8004 = vrot.lane.b32.xlu0 %v7994_v31, %s9452_s8  ;;  %8022 = vrot.lane.b32.xlu1 %v7994_v31, %s9453_s9  ;;  %v7953_v62 = vpop.permute.xlu1 %7952  ;;  %v7985_v39 = vmul.f32 0.25, %v7975_v16  ;;  %v7986_v7 = vmul.f32 0.25, %v7976_v32  ;;  %v8365_v22 = vrot.slane %v8363_v28, 6 }
0x15bb   : > { %v7962_v43 = vsel %vm382_vm0, %v7951_v29, %v7953_v62  ;;  %v8357_v29 = vrot.slane %v8355_v25, 6  ;;  %v8368_v32 = vrot.slane %v8366_v10, 7  ;;  %v9397_v10 = vld [vmem:[%s14217_s4 + $0x90] sm:$0xff] }
0x15bc   : > { %v7990_v55 = vmul.f32 0.25, %v7980_v60  ;;  %v7981_v57 = vadd.f32 %v7962_v43, %v13752_v45  ;;  %v7945_v23 = vpop.permute.xlu0 %7944 }
0x15bd   : > { %v7959_v38 = vsel %vm382_vm0, %v7943_v20, %v7945_v23  ;;  %v7978_v52 = vadd.f32 %v7945_v23, %v7920_v4  ;;  %v8358_v20 = vshll.u32 %v8907_v17, 16 }
0x15be   : > { %v7995_v54 = vpack.c.bf16 %v7990_v55, %v7985_v39  ;;  %v7991_v49 = vmul.f32 0.25, %v7981_v57  ;;  %v7977_v6 = vadd.f32 %v7959_v38, %v13741_v44  ;;  %v7955_v13 = vpop.permute.xlu1 %7954 }
0x15bf   : > { %v7963_v5 = vsel %vm382_vm0, %v7953_v62, %v7955_v13  ;;  %v7983_v11 = vadd.f32 %v7955_v13, %v7925_v30  ;;  %v7988_v45 = vmul.f32 0.25, %v7978_v52  ;;  %v8360_v60 = vrot.slane %v8358_v20, 7 }
0x15c0   : > { %v7996_v51 = vpack.c.bf16 %v7991_v49, %v7986_v7  ;;  %v7982_v27 = vadd.f32 %v7963_v5, %v13756_v41  ;;  %8006 = vrot.lane.b32.xlu0 %v7995_v54, %s9452_s8  ;;  %8040 = vmatprep.subr.bf16.mxu1 %v7995_v54  ;;  %v7987_v37 = vmul.f32 0.25, %v7977_v6  ;;  %v8904_v41 = vld.sshfl [vmem:[%s10342_s15 + $0x34] sm:$0x33 pattern:$0x76325410]  ;;  %v8369_v30 = vor.u32 %v8368_v32, %v8365_v22 }
0x15c1   : > { %v7993_v8 = vmul.f32 0.25, %v7983_v11  ;;  %8024 = vrot.lane.b32.xlu1 %v7995_v54, %s9453_s9  ;;  %8041 = vmatpush1.bf16.msra.mxu1 %v7994_v31  ;;  %v8267_v33 = vcombine.high %v8904_v41, %v8904_v41  ;;  %v8269_v48 = vshrl.u32 %v8904_v41, 16  ;;  %v8272_v61 = vshll.u32 %v8904_v41, 16 }
0x15c2   : > { %v7992_v36 = vmul.f32 0.25, %v7982_v27  ;;  %v8256_v31 = vcombine.high %v8903_v47, %v8903_v47  ;;  %v8361_v38 = vor.u32 %v8360_v60, %v8357_v29 }
0x15c3   : > { %v7998_v44 = vpack.c.bf16 %v7993_v8, %v7988_v45  ;;  %v8277_v63 = vshrl.u32 %v8267_v33, 16  ;;  %v8280_v12 = vshll.u32 %v8267_v33, 16  ;;  %v8271_v53 = vrot.slane %v8269_v48, 6 }
0x15c4   : > { %v7997_v56 = vpack.c.bf16 %v7992_v36, %v7987_v37  ;;  %v8274_v24 = vrot.slane %v8272_v61, 7  ;;  %v8373_v11 = vsel %vm9641_vm7, %v8267_v33, %v8369_v30  ;;  %v9392_v37 = vld [vmem:[%s14212_s2 + $0x8] sm:$0xff]  }
0x15c5   : > { %8008 = vrot.lane.b32.xlu1 %v7996_v51, %s9452_s8  ;;  %8012 = vrot.lane.b32.xlu0 %v7998_v44, %s9452_s8  ;;  %v8279_v21 = vrot.slane %v8277_v63, 6  ;;  %v8282_v15 = vrot.slane %v8280_v12, 7  ;;  %v8377_v45 = vsel %vm567_vm8, %v8373_v11, 1065369472  ;;  %v9395_v63 = vld [vmem:[%s14217_s4 + $0x88] sm:$0xff] }
0x15c6   : > { %8093 = vmatprep.subr.bf16.mxu0 %v7997_v56  ;;  %v8275_v62 = vor.u32 %v8274_v24, %v8271_v53  ;;  %v9398_v53 = vld [vmem:[%s14217_s4 + $0x190] sm:$0xff] }
0x15c7   : > { %8094 = vmatpush1.bf16.msra.mxu0 %v7996_v51  ;;  %v8283_v16 = vor.u32 %v8282_v15, %v8279_v21 }
0x15c8   : > { %v8286_v52 = vsel %vm9641_vm7, %v8903_v47, %v8275_v62  ;;  %v9401_v62 = vld [vmem:[%s14217_s4 + $0xa0] sm:$0xff] }
0x15c9   : > { %8010 = vrot.lane.b32.xlu1 %v7997_v56, %s9452_s8  ;;  %8026 = vrot.lane.b32.xlu0 %v7996_v51, %s9453_s9  ;;  %v8287_v57 = vsel %vm9641_vm7, %v8256_v31, %v8283_v16  ;;  %v8289_v5 = vsel %vm567_vm8, %v8286_v52, 1065369472  ;;  %v8372_v51 = vsel %vm9641_vm7, %v8904_v41, %v8361_v38  ;;  %v9400_v31 = vld [vmem:[%s14217_s4 + $0x198] sm:$0xff] }
0x15ca   : > { %v8291_v13 = vsel %vm567_vm8, %v8287_v57, 1065369472  ;;  %v8292_v27 = vsel %vm588_vm9, %v8289_v5, 0  ;;  %v8375_v8 = vsel %vm567_vm8, %v8372_v51, 1065369472 }
0x15cb   : > { %v8378_v26 = vsel %vm588_vm9, %v8375_v8, 0 }
0x15cd   : > { %8030 = vrot.lane.b32.xlu1 %v7998_v44, %s9453_s9  ;;  %8028 = vrot.lane.b32.xlu0 %v7997_v56, %s9453_s9 }
0x162c   : > { %v8005_v59 = vpop.permute.xlu0 %8004  ;;  %v8023_v42 = vpop.permute.xlu1 %8022 }
0x1632   : > { %v8007_v50 = vpop.permute.xlu0 %8006 }
0x1633   : > { %v8025_v14 = vpop.permute.xlu1 %8024  ;;  %v8014_v19 = vsel %vm382_vm0, %v8005_v59, %v8007_v50  ;;  %v9394_v59 = vld [vmem:[%s14217_s4 + $0x180] sm:$0xff] }
0x1634   : > { %v8032_v23 = vsel %vm407_vm4, %v8023_v42, %v8025_v14 }
0x1637   : > { %v8009_v34 = vpop.permute.xlu1 %8008  ;;  %v8013_v0 = vpop.permute.xlu0 %8012 }
0x1638   : > { %v8015_v46 = vsel %vm382_vm0, %v8007_v50, %v8009_v34 }
0x1639   : > { %8042 = vmatprep.subr.bf16.mxu1 %v8015_v46 }
0x163a   : > { %8043 = vmatpush1.bf16.msra.mxu1 %v8014_v19 }
0x163b   : > { %v8011_v3 = vpop.permute.xlu1 %8010  ;;  %v8027_v4 = vpop.permute.xlu0 %8026 }
0x163c   : > { %v8016_v43 = vsel %vm382_vm0, %v8009_v34, %v8011_v3  ;;  %v8017_v39 = vsel %vm382_vm0, %v8011_v3, %v8013_v0  ;;  %v8033_v55 = vsel %vm407_vm4, %v8025_v14, %v8027_v4  ;;  %v9399_v0 = vld [vmem:[%s14217_s4 + $0x98] sm:$0xff] }
0x163d   : > { %8095 = vmatprep.subr.bf16.mxu0 %v8017_v39  ;;  %8044 = vmatprep.subr.bf16.mxu1 %v8033_v55  ;;  %v9402_v55 = vld [vmem:[%s14217_s4 + $0x1a0] sm:$0xff] }
0x163e   : > { %8096 = vmatpush1.bf16.msra.mxu0 %v8016_v43  ;;  %8045 = vmatpush1.bf16.msra.mxu1 %v8032_v23 }
0x163f   : > { %v8031_v7 = vpop.permute.xlu1 %8030  ;;  %v8029_v54 = vpop.permute.xlu0 %8028  ;;  %8046 = vmatprep.subr.bf16.mxu1 %v10039_v35 }
0x1640   : > { %v8034_v49 = vsel %vm407_vm4, %v8027_v4, %v8029_v54  ;;  %v8035_v6 = vsel %vm407_vm4, %v8029_v54, %v8031_v7 }
0x1641   : > { %8097 = vmatprep.subr.bf16.mxu0 %v8035_v6 }
0x1642   : > { %8047 = vmatpush1.bf16.msra.mxu1 %v10039_v35  ;;  %8098 = vmatpush1.bf16.msra.mxu0 %v8034_v49  ;;  %v9403_v49 = vld [vmem:[%s14217_s4 + $0xa8] sm:$0xff] }
0x1643   : > { %8099 = vmatprep.subr.bf16.mxu0 %v10039_v35  ;;  %8905 = vmatprep.subr.msk.bf16.mxu1 %vm588_vm9, %v8291_v13  ;;  %v9404_v13 = vld [vmem:[%s14217_s4 + $0x1a8] sm:$0xff] }
0x1645   : > { %8896 = vmatmul.mubr.msk.bf16.vlgmr.msra.gmra.mrb[140].mxu1 %vm1204_vm12, %v13529_v18 }
0x1646   : > { %8100 = vmatpush1.bf16.msra.mxu0 %v10039_v35  ;;  %8082 = vmatprep.mubr.bf16.mxu1 %v14214_v1 }
0x1647   : > { %8297 = vmatpush1.bf16.msra.mxu1 %v8292_v27  ;;  %8908 = vmatprep.subr.msk.bf16.mxu0 %vm588_vm9, %v8377_v45 }
0x1649   : > { %8898 = vmatmul.mubr.msk.bf16.vlgmr.msra.gmra.mrb[164].mxu0 %vm1204_vm12, %v13529_v18 }
0x164a   : > { %8135 = vmatprep.mubr.bf16.mxu0 %v14214_v1  ;;  %8383 = vmatpush1.bf16.msra.mxu0 %v8378_v26  ;;  %v9405_v26 = vld [vmem:[%s14217_s4 + $0xb0] sm:$0xff] }
0x164d   : > { %8897 = vmatmul.mubr.msk.bf16.gmra.mrb[144].mxu1 %vm1204_vm12, %v13559_v40 }
0x164e   : > { %8328 = vmatprep.mubr.bf16.mxu1 %v14214_v1 }
0x1651   : > { %8899 = vmatmul.mubr.msk.bf16.gmra.mrb[168].mxu0 %vm1204_vm12, %v13559_v40  ;;  %v9393_v40 = vld [vmem:[%s14217_s4 + $0x80] sm:$0xff] }
0x1652   : > { %8414 = vmatprep.mubr.bf16.mxu0 %v14214_v1 }
0x1655   : > { %8906 = vmatmul.mubr.msk.bf16.vlgmr.msra.gmra.mrb[148].mxu1 %vm584_vm10, %v9392_v37 }
0x1656   : > { %8531 = vmatprep.mubr.bf16.mxu1 %v14214_v1 }
0x1659   : > { %8909 = vmatmul.mubr.msk.bf16.vlgmr.msra.gmra.mrb[172].mxu0 %vm584_vm10, %v9392_v37 }
0x1718   : > { %v8074_v18 = vpop.f32.mrb[140].mxu1 }
0x1719   : > { %v8146_v36 = vmax.f32 %v8074_v18, 0.0  ;;  %v8076_v44 = vpop.f32.mrb[141].mxu1  ;;  %v9406_v18 = vld [vmem:[%s14217_s4 + $0x1b0] sm:$0xff] }
0x171a   : > { %v8147_v56 = vmax.f32 %v8076_v44, 0.0  ;;  %v8078_v41 = vpop.f32.mrb[142].mxu1 }
0x171b   : > { %v8162_v33 = vmul.f32 %v9393_v40, %v8146_v36  ;;  %v8203_v17 = vmul.f32 %v9394_v59, %v8146_v36  ;;  %v8080_v42 = vpop.f32.mrb[143].mxu1  ;;  %v8150_v25 = vmax.f32 %v8078_v41, 0.0  ;;  %v9407_v41 = vld [vmem:[%s14217_s4 + $0xb8] sm:$0xff] }
0x171c   : > { %v8163_v12 = vmul.f32 %v9395_v63, %v8147_v56  ;;  %v8204_v50 = vmul.f32 %v9396_v9, %v8147_v56  ;;  %v8127_v48 = vpop.f32.mrb[164].mxu0  ;;  %v8151_v32 = vmax.f32 %v8080_v42, 0.0  ;;  %v9408_v42 = vld [vmem:[%s14217_s4 + $0x1b8] sm:$0xff] }
0x171d   : > { %v8148_v61 = vmax.f32 %v8127_v48, 0.0  ;;  %v8129_v14 = vpop.f32.mrb[165].mxu0  ;;  %v8166_v3 = vmul.f32 %v9401_v62, %v8150_v25  ;;  %v8207_v57 = vmul.f32 %v9402_v55, %v8150_v25  ;;  %v9413_v62 = vld [vmem:[%s14217_s4 + $0xd0] sm:$0xff] }
0x171e   : > { %v8178_v21 = vadd.f32 %v8163_v12, %v8162_v33  ;;  %v8219_v47 = vadd.f32 %v8204_v50, %v8203_v17  ;;  %v8149_v15 = vmax.f32 %v8129_v14, 0.0  ;;  %v8131_v28 = vpop.f32.mrb[166].mxu0  ;;  %v8167_v6 = vmul.f32 %v9403_v49, %v8151_v32  ;;  %v9409_v50 = vld [vmem:[%s14217_s4 + $0xc0] sm:$0xff]  ;;  %v9416_v49 = vld [vmem:[%s14217_s4 + $0x1d8] sm:$0xff] }
0x171f   : > { %v8164_v20 = vmul.f32 %v9397_v10, %v8148_v61  ;;  %v8205_v24 = vmul.f32 %v9398_v53, %v8148_v61  ;;  %v8133_v34 = vpop.f32.mrb[167].mxu0  ;;  %v8152_v23 = vmax.f32 %v8131_v28, 0.0  ;;  %v8208_v5 = vmul.f32 %v9404_v13, %v8151_v32 }
0x1720   : > { %v8165_v46 = vmul.f32 %v9399_v0, %v8149_v15  ;;  %v8206_v16 = vmul.f32 %v9400_v31, %v8149_v15  ;;  %v8084_v29 = vpop.f32.mrb[144].mxu1  ;;  %v8153_v38 = vmax.f32 %v8133_v34, 0.0  ;;  %v9412_v0 = vld [vmem:[%s14217_s4 + $0x1c8] sm:$0xff] }
0x1721   : > { %v8179_v19 = vadd.f32 %v8178_v21, %v8164_v20  ;;  %v8220_v22 = vadd.f32 %v8219_v47, %v8205_v24  ;;  %v8086_v60 = vpop.f32.mrb[145].mxu1  ;;  %v8154_v51 = vmax.f32 %v8084_v29, 0.0  ;;  %v8168_v37 = vmul.f32 %v9405_v26, %v8152_v23  ;;  %v9410_v21 = vld [vmem:[%s14217_s4 + $0x1c0] sm:$0xff]  ;;  %v9411_v20 = vld [vmem:[%s14217_s4 + $0xc8] sm:$0xff] }
0x1722   : > { %v13894_v4 = vpop.f32.mrb[146].mxu1  ;;  %v8209_v36 = vmul.f32 %v9406_v18, %v8152_v23  ;;  %v8155_v56 = vmax.f32 %v8086_v60, 0.0  ;;  %v8169_v40 = vmul.f32 %v9407_v41, %v8153_v38  ;;  %v8210_v63 = vmul.f32 %v9408_v42, %v8153_v38  ;;  %v9415_v38 = vld [vmem:[%s14217_s4 + $0xd8] sm:$0xff]  ;;  %v9419_v18 = vld [vmem:[%s14217_s4 + $0xe8] sm:$0xff] }
0x1723   : > { %v8180_v43 = vadd.f32 %v8179_v19, %v8165_v46  ;;  %v8221_v39 = vadd.f32 %v8220_v22, %v8206_v16  ;;  %v13899_v30 = vpop.f32.mrb[147].mxu1  ;;  %v8170_v48 = vmul.f32 %v9409_v50, %v8154_v51  ;;  %v8211_v47 = vmul.f32 %v9410_v21, %v8154_v51  ;;  %v9418_v51 = vld [vmem:[%s14217_s4 + $0x1e0] sm:$0xff] }
0x1724   : > { %v8137_v52 = vpop.f32.mrb[168].mxu0  ;;  %v8171_v53 = vmul.f32 %v9411_v20, %v8155_v56  ;;  %v8212_v46 = vmul.f32 %v9412_v0, %v8155_v56  ;;  %v8158_v22 = vmax.f32 %v13894_v4, 0.0  ;;  %v8159_v23 = vmax.f32 %v13899_v30, 0.0  ;;  %v9417_v30 = vld [vmem:[%s14217_s4 + $0xe0] sm:$0xff]  ;;  %v9420_v56 = vld [vmem:[%s14217_s4 + $0x1e8] sm:$0xff] }
0x1725   : > { %v8181_v7 = vadd.f32 %v8180_v43, %v8166_v3  ;;  %v8222_v54 = vadd.f32 %v8221_v39, %v8207_v57  ;;  %v8139_v11 = vpop.f32.mrb[169].mxu0  ;;  %v8156_v28 = vmax.f32 %v8137_v52, 0.0  ;;  %v9414_v39 = vld [vmem:[%s14217_s4 + $0x1d0] sm:$0xff] }
0x1726   : > { %v13907_v27 = vpop.f32.mrb[170].mxu0  ;;  %v8157_v24 = vmax.f32 %v8139_v11, 0.0  ;;  %v8216_v41 = vmul.f32 %v9420_v56, %v8159_v23  ;;  %v14319_v56 = vld [vmem:[#allocation15_spill] sm:$0xff] }
0x1727   : > { %v8182_v45 = vadd.f32 %v8181_v7, %v8167_v6  ;;  %v8223_v8 = vadd.f32 %v8222_v54, %v8208_v5  ;;  %v13915_v44 = vpop.f32.mrb[171].mxu0  ;;  %v8172_v3 = vmul.f32 %v9413_v62, %v8156_v28  ;;  %v8213_v55 = vmul.f32 %v9414_v39, %v8156_v28 }
0x1728   : > { %v13920_v33 = vpop.f32.mrb[148].mxu1  ;;  %v8173_v52 = vmul.f32 %v9415_v38, %v8157_v24  ;;  %v8214_v6 = vmul.f32 %v9416_v49, %v8157_v24  ;;  %v8174_v5 = vmul.f32 %v9417_v30, %v8158_v22 }
0x1729   : > { %v8183_v59 = vadd.f32 %v8182_v45, %v8168_v37  ;;  %v8224_v17 = vadd.f32 %v8223_v8, %v8209_v36  ;;  %v8339_v12 = vmax.f32 %v13920_v33, 0.0  ;;  %v13926_v9 = vpop.f32.mrb[149].mxu1  ;;  %v8215_v45 = vmul.f32 %v9418_v51, %v8158_v22  ;;  %v14312_v51 = vld [vmem:[#allocation5_spill] sm:$0xff] }
0x172a   : > { %v8340_v61 = vmax.f32 %v13926_v9, 0.0  ;;  %v13932_v14 = vpop.f32.mrb[150].mxu1  ;;  %v8160_v37 = vmax.f32 %v13907_v27, 0.0  ;;  %v8175_v36 = vmul.f32 %v9419_v18, %v8159_v23  ;;  %v14317_v18 = vld [vmem:[#allocation11_spill] sm:$0xff] }
0x172b   : > { %v8184_v15 = vadd.f32 %v8183_v59, %v8169_v40  ;;  %v8225_v25 = vadd.f32 %v8224_v17, %v8210_v63  ;;  %8433 = vrot.lane.b32.xlu0 %v8339_v12, %s9452_s8  ;;  %v13940_v10 = vpop.f32.mrb[151].mxu1  ;;  %v8341_v13 = vmax.f32 %v13932_v14, 0.0  ;;  %v8161_v17 = vmax.f32 %v13915_v44, 0.0  ;;  %v9421_v63 = vld [vmem:[%s14217_s4 + $0xf0] sm:$0xff] }
0x172c   : > { %8435 = vrot.lane.b32.xlu1 %v8340_v61, %s9452_s8  ;;  %v13948_v34 = vpop.f32.mrb[172].mxu0  ;;  %v8342_v11 = vmax.f32 %v13940_v10, 0.0  ;;  %v8176_v50 = vmul.f32 %v9421_v63, %v8160_v37  ;;  %v9422_v14 = vld [vmem:[%s14217_s4 + $0x1f0] sm:$0xff]  ;;  %v9424_v10 = vld [vmem:[%s14217_s4 + $0x1f8] sm:$0xff]  ;;  %v14326_v63 = vld [vmem:[#allocation19_spill] sm:$0xff] }
0x172d   : > { %v8185_v31 = vadd.f32 %v8184_v15, %v8170_v48  ;;  %v8226_v16 = vadd.f32 %v8225_v25, %v8211_v47  ;;  %v8425_v29 = vmax.f32 %v13948_v34, 0.0  ;;  %v13954_v19 = vpop.f32.mrb[173].mxu0  ;;  %v8217_v21 = vmul.f32 %v9422_v14, %v8160_v37  ;;  %v9423_v25 = vld [vmem:[%s14217_s4 + $0xf8] sm:$0xff]  ;;  %v14316_v37 = vld [vmem:[#allocation10_spill] sm:$0xff] }
0x172e   : > { %v8426_v32 = vmax.f32 %v13954_v19, 0.0  ;;  %v13958_v60 = vpop.f32.mrb[174].mxu0  ;;  %v8177_v28 = vmul.f32 %v9423_v25, %v8161_v17  ;;  %v8218_v20 = vmul.f32 %v9424_v10, %v8161_v17  ;;  %v14323_v17 = vld [vmem:[#allocation17_spill] sm:$0xff] }
0x172f   : > { %v8186_v43 = vadd.f32 %v8185_v31, %v8171_v53  ;;  %v8227_v57 = vadd.f32 %v8226_v16, %v8212_v46  ;;  %8459 = vrot.lane.b32.xlu0 %v8425_v29, %s9452_s8  ;;  %v13969_v4 = vpop.f32.mrb[175].mxu0  ;;  %v8427_v27 = vmax.f32 %v13958_v60, 0.0 }
0x1730   : > { %8461 = vrot.lane.b32.xlu1 %v8426_v32, %s9452_s8  ;;  %v8428_v42 = vmax.f32 %v13969_v4, 0.0 }
0x1731   : > { %v8187_v7 = vadd.f32 %v8186_v43, %v8172_v3  ;;  %v8228_v54 = vadd.f32 %v8227_v57, %v8213_v55 }
0x1733   : > { %v8188_v8 = vadd.f32 %v8187_v7, %v8173_v52  ;;  %v8229_v26 = vadd.f32 %v8228_v54, %v8214_v6  ;;  %8437 = vrot.lane.b32.xlu0 %v8341_v13, %s9452_s8 }
0x1734   : > { %8439 = vrot.lane.b32.xlu1 %v8342_v11, %s9452_s8 }
0x1735   : > { %v8189_v40 = vadd.f32 %v8188_v8, %v8174_v5  ;;  %v8230_v59 = vadd.f32 %v8229_v26, %v8215_v45  ;;  %v14313_v45 = vld [vmem:[#allocation9_spill] sm:$0xff]  ;;  %v14314_v8 = vld [vmem:[#allocation6_spill] sm:$0xff]  ;;  %v14315_v26 = vld [vmem:[#allocation8_spill] sm:$0xff] }
0x1737   : > { %v8190_v48 = vadd.f32 %v8189_v40, %v8175_v36  ;;  %v8231_v47 = vadd.f32 %v8230_v59, %v8216_v41  ;;  %8463 = vrot.lane.b32.xlu0 %v8427_v27, %s9452_s8  ;;  %v14318_v36 = vld [vmem:[#allocation7_spill] sm:$0xff]  ;;  %v14320_v41 = vld [vmem:[#allocation13_spill] sm:$0xff]  ;;  %v14321_v40 = vld [vmem:[#allocation14_spill] sm:$0xff] }
0x1738   : > { %8465 = vrot.lane.b32.xlu1 %v8428_v42, %s9452_s8  ;;  %v14322_v59 = vld [vmem:[#allocation16_spill] sm:$0xff] }
0x1739   : > { %v8191_v44 = vadd.f32 %v8190_v48, %v8176_v50  ;;  %v8232_v15 = vadd.f32 %v8231_v47, %v8217_v21  ;;  %v14327_v50 = vld [vmem:[#allocation22_spill] sm:$0xff] }
0x173b   : > { %v8192_v53 = vadd.f32 %v8191_v44, %v8177_v28  ;;  %v8233_v24 = vadd.f32 %v8232_v15, %v8218_v20 }
0x179d   : > { %v8434_v0 = vpop.permute.xlu0 %8433 }
0x179e   : > { %v8436_v46 = vpop.permute.xlu1 %8435 }
0x179f   : > { %v8441_v31 = vsel %vm382_vm0, %v8434_v0, %v8436_v46  ;;  %v8448_v16 = vadd.f32 %v8436_v46, %v8340_v61 }
0x17a0   : > { %v8447_v22 = vadd.f32 %v8441_v31, %v8339_v12 }
0x17a1   : > { %v8460_v19 = vpop.permute.xlu0 %8459  ;;  %v8452_v62 = vadd.f32 %v8448_v16, %v8426_v32 }
0x17a2   : > { %v8462_v60 = vpop.permute.xlu1 %8461  ;;  %v8451_v43 = vadd.f32 %v8447_v22, %v8425_v29 }
0x17a3   : > { %v8467_v55 = vsel %vm382_vm0, %v8460_v19, %v8462_v60  ;;  %v8474_v38 = vadd.f32 %v8462_v60, %v8452_v62 }
0x17a4   : > { %v8473_v52 = vadd.f32 %v8467_v55, %v8451_v43 }
0x17a5   : > { %v8438_v3 = vpop.permute.xlu0 %8437  ;;  %v8478_v49 = vmul.f32 0.25, %v8474_v38 }
0x17a6   : > { %v8440_v39 = vpop.permute.xlu1 %8439  ;;  %v8477_v29 = vmul.f32 0.25, %v8473_v52 }
0x17a7   : > { %v8442_v57 = vsel %vm382_vm0, %v8438_v3, %v8440_v39  ;;  %v8450_v4 = vadd.f32 %v8440_v39, %v8342_v11  ;;  %v14311_v11 = vld [vmem:[#allocation4_spill] sm:$0xff] }
0x17a8   : > { %v8449_v23 = vadd.f32 %v8442_v57, %v8341_v13  ;;  %v14310_v13 = vld [vmem:[#allocation3_spill] sm:$0xff] }
0x17a9   : > { %v8464_v9 = vpop.permute.xlu0 %8463  ;;  %v8454_v61 = vadd.f32 %v8450_v4, %v8428_v42  ;;  %v14325_v42 = vld [vmem:[#allocation21_spill] sm:$0xff] }
0x17aa   : > { %v8453_v7 = vadd.f32 %v8449_v23, %v8427_v27  ;;  %v8466_v33 = vpop.permute.xlu1 %8465  ;;  %v14324_v27 = vld [vmem:[#allocation12_spill] sm:$0xff] }
0x17ab   : > { %v8468_v12 = vsel %vm382_vm0, %v8464_v9, %v8466_v33  ;;  %v8476_v32 = vadd.f32 %v8466_v33, %v8454_v61 }
0x17ac   : > { %v8475_v54 = vadd.f32 %v8468_v12, %v8453_v7 }
0x17ad   : > { %v8480_v34 = vmul.f32 0.25, %v8476_v32 }
0x17ae   : > { %v8479_v6 = vmul.f32 0.25, %v8475_v54 }
0x17af   : > { %v8482_v30 = vpack.c.bf16 %v8480_v34, %v8478_v49 }
0x17b0   : > { %v8481_v5 = vpack.c.bf16 %v8479_v6, %v8477_v29 }
0x17b1   : > { %8487 = vrot.lane.b32.xlu1 %v8482_v30, %s9452_s8  ;;  %8499 = vmatprep.subr.bf16.mxu1 %v8482_v30 }
0x17b2   : > { %8485 = vrot.lane.b32.xlu0 %v8481_v5, %s9452_s8  ;;  %8500 = vmatpush1.bf16.msra.mxu1 %v8481_v5 }
0x17b5   : > { %8494 = vrot.lane.b32.xlu1 %v8482_v30, %s9453_s9 }
0x17b6   : > { %8492 = vrot.lane.b32.xlu0 %v8481_v5, %s9453_s9 }
0x17d5   : > { %1384 = vadd.xlane.f32.xlu0 %v14310_v13 }
0x17d9   : > { %1442 = vadd.xlane.f32.xlu1 %v14311_v11  ;;  %2021 = vadd.xlane.f32.xlu0 %v14312_v51 }
0x17dd   : > { %2456 = vadd.xlane.f32.xlu1 %v14313_v45  ;;  %2079 = vadd.xlane.f32.xlu0 %v14314_v8 }
0x17e1   : > { %3514 = vadd.xlane.f32.xlu1 %v14315_v26  ;;  %2494 = vadd.xlane.f32.xlu0 %v14316_v37 }
0x17e5   : > { %4117 = vadd.xlane.f32.xlu1 %v14317_v18  ;;  %3555 = vadd.xlane.f32.xlu0 %v14318_v36 }
0x17e9   : > { %4503 = vadd.xlane.f32.xlu1 %v14319_v56  ;;  %4158 = vadd.xlane.f32.xlu0 %v14320_v41 }
0x17ed   : > { %5552 = vadd.xlane.f32.xlu1 %v14321_v40  ;;  %4532 = vadd.xlane.f32.xlu0 %v14322_v59 }
0x17f1   : > { %6155 = vadd.xlane.f32.xlu1 %v14323_v17  ;;  %5593 = vadd.xlane.f32.xlu0 %v14324_v27 }
0x17f5   : > { %6541 = vadd.xlane.f32.xlu1 %v14325_v42  ;;  %6196 = vadd.xlane.f32.xlu0 %v14326_v63 }
0x17f9   : > { %7590 = vadd.xlane.f32.xlu1 %v13783_v58  ;;  %6570 = vadd.xlane.f32.xlu0 %v14327_v50  ;;  %v9425_v58 = vld [vmem:[%s14215_s3 + $0x10] sm:$0xff]  }
0x17fd   : > { %8193 = vadd.xlane.f32.xlu1 %v8192_v53  ;;  %7631 = vadd.xlane.f32.xlu0 %v13785_v2  ;;  %v9426_v2 = vld [vmem:[%s14215_s3 + $0x18] sm:$0xff]  }
0x1801   : > { %8234 = vadd.xlane.f32.xlu0 %v8233_v24 }
0x1823   : > { %v8488_v48 = vpop.permute.xlu1 %8487 }
0x1824   : > { %v8486_v14 = vpop.permute.xlu0 %8485  ;;  %8501 = vmatprep.subr.bf16.mxu1 %v8488_v48 }
0x1825   : > { %v8489_v21 = vsel %vm382_vm0, %v8486_v14, %v8488_v48 }
0x1826   : > { %8502 = vmatpush1.bf16.msra.mxu1 %v8489_v21 }
0x1827   : > { %v8495_v47 = vpop.permute.xlu1 %8494 }
0x1828   : > { %v8493_v44 = vpop.permute.xlu0 %8492  ;;  %8503 = vmatprep.subr.bf16.mxu1 %v8495_v47 }
0x1829   : > { %v8496_v15 = vsel %vm407_vm4, %v8493_v44, %v8495_v47 }
0x182a   : > { %8504 = vmatpush1.bf16.msra.mxu1 %v8496_v15 }
0x182b   : > { %8505 = vmatprep.subr.bf16.mxu1 %v10039_v35 }
0x182e   : > { %8506 = vmatpush1.bf16.msra.mxu1 %v10039_v35 }
0x1831   : > { %8910 = vmatmul.mubr.msk.bf16.vlgmr.msra.gmra.mrb[152].mxu1 %vm1204_vm12, %v9425_v58 }
0x1832   : > { %8541 = vmatprep.mubr.bf16.mxu1 %v14214_v1 }
0x1839   : > { %8911 = vmatmul.mubr.msk.bf16.gmra.mrb[156].mxu1 %vm1204_vm12, %v9426_v2 }
0x1862   : > { %v1385_v25 = vpop.xlane.xlu0 %1384 }
0x1863   : > { %v1386_v28 = vrot.slane %v1385_v25, 4 }
0x1865   : > { %v1387_v10 = vadd.f32 %v1386_v28, %v1385_v25 }
0x1866   : > { %v1443_v20 = vpop.xlane.xlu1 %1442  ;;  %v2022_v53 = vpop.xlane.xlu0 %2021 }
0x1867   : > { %v1388_v35 = vrot.slane %v1387_v10, 2  ;;  %v1444_v24 = vrot.slane %v1443_v20, 4  ;;  %v2023_v0 = vrot.slane %v2022_v53, 4 }
0x1869   : > { %v1445_v46 = vadd.f32 %v1444_v24, %v1443_v20  ;;  %v2024_v31 = vadd.f32 %v2023_v0, %v2022_v53  ;;  %v1389_v16 = vadd.f32 %v1388_v35, %v1387_v10 }
0x186a   : > { %v2457_v19 = vpop.xlane.xlu1 %2456  ;;  %v2080_v22 = vpop.xlane.xlu0 %2079 }
0x186b   : > { %v1446_v1 = vrot.slane %v1445_v46, 2  ;;  %v2025_v60 = vrot.slane %v2024_v31, 2  ;;  %v2458_v62 = vrot.slane %v2457_v19, 4  ;;  %v2081_v3 = vrot.slane %v2080_v22, 4 }
0x186c   : > { %v1390_v43 = vrot.slane %v1389_v16, 1 }
0x186d   : > { %v2459_v39 = vadd.f32 %v2458_v62, %v2457_v19  ;;  %v2082_v55 = vadd.f32 %v2081_v3, %v2080_v22  ;;  %v1447_v57 = vadd.f32 %v1446_v1, %v1445_v46  ;;  %v2026_v4 = vadd.f32 %v2025_v60, %v2024_v31 }
0x186e   : > { %v3515_v23 = vpop.xlane.xlu1 %3514  ;;  %v2495_v38 = vpop.xlane.xlu0 %2494  ;;  %v1391_v9 = vadd.f32 %v1390_v43, %v1389_v16 }
0x186f   : > { %v2460_v61 = vrot.slane %v2459_v39, 2  ;;  %v2083_v52 = vrot.slane %v2082_v55, 2  ;;  %v3516_v7 = vrot.slane %v3515_v23, 4  ;;  %v2496_v33 = vrot.slane %v2495_v38, 4 }
0x1870   : > { %9012 = vpush %v1391_v9  ;;  %v1448_v12 = vrot.slane %v1447_v57, 1  ;;  %v2027_v32 = vrot.slane %v2026_v4, 1 }
0x1871   : > { %v3517_v54 = vadd.f32 %v3516_v7, %v3515_v23  ;;  %v2497_v49 = vadd.f32 %v2496_v33, %v2495_v38  ;;  %v2084_v34 = vadd.f32 %v2083_v52, %v2082_v55  ;;  %v2461_v29 = vadd.f32 %v2460_v61, %v2459_v39 }
0x1872   : > { %v4118_v6 = vpop.xlane.xlu1 %4117  ;;  %v3556_v30 = vpop.xlane.xlu0 %3555  ;;  %v1449_v5 = vadd.f32 %v1448_v12, %v1447_v57  ;;  %v2028_v13 = vadd.f32 %v2027_v32, %v2026_v4 }
0x1873   : > { %v3518_v11 = vrot.slane %v3517_v54, 2  ;;  %v2498_v51 = vrot.slane %v2497_v49, 2  ;;  %v4119_v45 = vrot.slane %v4118_v6, 4  ;;  %v3557_v8 = vrot.slane %v3556_v30, 4 }
0x1874   : > { %9014 = vpush %v1449_v5  ;;  %v2085_v26 = vrot.slane %v2084_v34, 1  ;;  %v2462_v37 = vrot.slane %v2461_v29, 1 }
0x1875   : > { %v4120_v18 = vadd.f32 %v4119_v45, %v4118_v6  ;;  %v3558_v36 = vadd.f32 %v3557_v8, %v3556_v30  ;;  %9016 = vpush %v2028_v13  ;;  %v2499_v56 = vadd.f32 %v2498_v51, %v2497_v49  ;;  %v3519_v41 = vadd.f32 %v3518_v11, %v3517_v54 }
0x1876   : > { %v4504_v40 = vpop.xlane.xlu1 %4503  ;;  %v4159_v59 = vpop.xlane.xlu0 %4158  ;;  %v2086_v17 = vadd.f32 %v2085_v26, %v2084_v34  ;;  %v2463_v27 = vadd.f32 %v2462_v37, %v2461_v29 }
0x1877   : > { %v4121_v42 = vrot.slane %v4120_v18, 2  ;;  %v3559_v63 = vrot.slane %v3558_v36, 2  ;;  %v4505_v50 = vrot.slane %v4504_v40, 4  ;;  %v4160_v48 = vrot.slane %v4159_v59, 4 }
0x1878   : > { %9018 = vpush %v2086_v17  ;;  %v2500_v14 = vrot.slane %v2499_v56, 1  ;;  %v3520_v21 = vrot.slane %v3519_v41, 1 }
0x1879   : > { %v4506_v47 = vadd.f32 %v4505_v50, %v4504_v40  ;;  %v4161_v44 = vadd.f32 %v4160_v48, %v4159_v59  ;;  %9020 = vpush %v2463_v27  ;;  %v3560_v15 = vadd.f32 %v3559_v63, %v3558_v36  ;;  %v4122_v58 = vadd.f32 %v4121_v42, %v4120_v18 }
0x187a   : > { %v5553_v2 = vpop.xlane.xlu1 %5552  ;;  %v4533_v25 = vpop.xlane.xlu0 %4532  ;;  %v2501_v28 = vadd.f32 %v2500_v14, %v2499_v56  ;;  %v3521_v10 = vadd.f32 %v3520_v21, %v3519_v41 }
0x187b   : > { %v4507_v20 = vrot.slane %v4506_v47, 2  ;;  %v4162_v53 = vrot.slane %v4161_v44, 2  ;;  %v5554_v35 = vrot.slane %v5553_v2, 4  ;;  %v4534_v24 = vrot.slane %v4533_v25, 4 }
0x187c   : > { %9022 = vpush %v2501_v28  ;;  %v3561_v0 = vrot.slane %v3560_v15, 1  ;;  %v4123_v46 = vrot.slane %v4122_v58, 1 }
0x187d   : > { %v5555_v31 = vadd.f32 %v5554_v35, %v5553_v2  ;;  %v4535_v16 = vadd.f32 %v4534_v24, %v4533_v25  ;;  %9024 = vpush %v3521_v10  ;;  %v4163_v19 = vadd.f32 %v4162_v53, %v4161_v44  ;;  %v4508_v22 = vadd.f32 %v4507_v20, %v4506_v47 }
0x187e   : > { %v6156_v1 = vpop.xlane.xlu1 %6155  ;;  %v5594_v60 = vpop.xlane.xlu0 %5593  ;;  %v3562_v62 = vadd.f32 %v3561_v0, %v3560_v15  ;;  %v4124_v3 = vadd.f32 %v4123_v46, %v4122_v58 }
0x187f   : > { %v5556_v43 = vrot.slane %v5555_v31, 2  ;;  %v4536_v39 = vrot.slane %v4535_v16, 2  ;;  %v6157_v55 = vrot.slane %v6156_v1, 4  ;;  %v5595_v57 = vrot.slane %v5594_v60, 4 }
0x1880   : > { %9026 = vpush %v3562_v62  ;;  %v4164_v4 = vrot.slane %v4163_v19, 1  ;;  %v4509_v23 = vrot.slane %v4508_v22, 1 }
0x1881   : > { %v6158_v38 = vadd.f32 %v6157_v55, %v6156_v1  ;;  %v5596_v9 = vadd.f32 %v5595_v57, %v5594_v60  ;;  %9028 = vpush %v4124_v3  ;;  %v4537_v61 = vadd.f32 %v4536_v39, %v4535_v16  ;;  %v5557_v52 = vadd.f32 %v5556_v43, %v5555_v31 }
0x1882   : > { %v6542_v7 = vpop.xlane.xlu1 %6541  ;;  %v6197_v33 = vpop.xlane.xlu0 %6196  ;;  %v4165_v12 = vadd.f32 %v4164_v4, %v4163_v19  ;;  %v4510_v32 = vadd.f32 %v4509_v23, %v4508_v22 }
0x1883   : > { %v6159_v54 = vrot.slane %v6158_v38, 2  ;;  %v5597_v49 = vrot.slane %v5596_v9, 2  ;;  %v6543_v34 = vrot.slane %v6542_v7, 4  ;;  %v6198_v29 = vrot.slane %v6197_v33, 4 }
0x1884   : > { %9030 = vpush %v4165_v12  ;;  %v4538_v6 = vrot.slane %v4537_v61, 1  ;;  %v5558_v30 = vrot.slane %v5557_v52, 1 }
0x1885   : > { %v6544_v5 = vadd.f32 %v6543_v34, %v6542_v7  ;;  %v6199_v13 = vadd.f32 %v6198_v29, %v6197_v33  ;;  %9032 = vpush %v4510_v32  ;;  %v5598_v11 = vadd.f32 %v5597_v49, %v5596_v9  ;;  %v6160_v51 = vadd.f32 %v6159_v54, %v6158_v38  ;;  %v9427_v34 = vld [vmem:[%s14133_s5 + $0x8] sm:$0xff] }
0x1886   : > { %v7591_v45 = vpop.xlane.xlu1 %7590  ;;  %v6571_v8 = vpop.xlane.xlu0 %6570  ;;  %v4539_v26 = vadd.f32 %v4538_v6, %v4537_v61  ;;  %v5559_v37 = vadd.f32 %v5558_v30, %v5557_v52  ;;  %v9428_v6 = vld [vmem:[%s14133_s5 + $0x48] sm:$0xff] }
0x1887   : > { %v6545_v18 = vrot.slane %v6544_v5, 2  ;;  %v6200_v36 = vrot.slane %v6199_v13, 2  ;;  %v7592_v56 = vrot.slane %v7591_v45, 4  ;;  %v6572_v41 = vrot.slane %v6571_v8, 4 }
0x1888   : > { %9034 = vpush %v4539_v26  ;;  %v5599_v40 = vrot.slane %v5598_v11, 1  ;;  %v6161_v59 = vrot.slane %v6160_v51, 1 }
0x1889   : > { %v7593_v17 = vadd.f32 %v7592_v56, %v7591_v45  ;;  %v6573_v27 = vadd.f32 %v6572_v41, %v6571_v8  ;;  %9036 = vpush %v5559_v37  ;;  %v6201_v42 = vadd.f32 %v6200_v36, %v6199_v13  ;;  %v6546_v63 = vadd.f32 %v6545_v18, %v6544_v5  ;;  %v9429_v13 = vld [vmem:[%s14133_s5] sm:$0xff]  ;;  %v9431_v37 = vld [vmem:[%s14133_s5 + $0x18] sm:$0xff] }
0x188a   : > { %v8194_v50 = vpop.xlane.xlu1 %8193  ;;  %v7632_v48 = vpop.xlane.xlu0 %7631  ;;  %v5600_v14 = vadd.f32 %v5599_v40, %v5598_v11  ;;  %v6162_v21 = vadd.f32 %v6161_v59, %v6160_v51  ;;  %v9430_v51 = vld [vmem:[%s14133_s5 + $0x40] sm:$0xff]  ;;  %v9432_v36 = vld [vmem:[%s14133_s5 + $0x58] sm:$0xff]  ;;  %v9433_v59 = vld [vmem:[%s14133_s5 + $0x10] sm:$0xff] }
0x188b   : > { %v7594_v47 = vrot.slane %v7593_v17, 2  ;;  %v6574_v44 = vrot.slane %v6573_v27, 2  ;;  %v8195_v15 = vrot.slane %v8194_v50, 4  ;;  %v7633_v58 = vrot.slane %v7632_v48, 4 }
0x188c   : > { %9038 = vpush %v5600_v14  ;;  %v6202_v2 = vrot.slane %v6201_v42, 1  ;;  %v6547_v25 = vrot.slane %v6546_v63, 1 }
0x188d   : > { %v8196_v28 = vadd.f32 %v8195_v15, %v8194_v50  ;;  %v7634_v10 = vadd.f32 %v7633_v58, %v7632_v48  ;;  %9040 = vpush %v6162_v21  ;;  %v6575_v20 = vadd.f32 %v6574_v44, %v6573_v27  ;;  %v7595_v53 = vadd.f32 %v7594_v47, %v7593_v17  ;;  %v9434_v27 = vld [vmem:[%s14133_s5 + $0x50] sm:$0xff] }
0x188e   : > { %v8235_v35 = vpop.xlane.xlu0 %8234  ;;  %v6203_v24 = vadd.f32 %v6202_v2, %v6201_v42  ;;  %v6548_v0 = vadd.f32 %v6547_v25, %v6546_v63 }
0x188f   : > { %v8197_v46 = vrot.slane %v8196_v28, 2  ;;  %v7635_v31 = vrot.slane %v7634_v10, 2  ;;  %v8236_v16 = vrot.slane %v8235_v35, 4  ;;  %v6576_v19 = vrot.slane %v6575_v20, 1 }
0x1890   : > { %9042 = vpush %v6203_v24  ;;  %v7596_v22 = vrot.slane %v7595_v53, 1  ;;  %v9437_v24 = vld [vmem:[%s14133_s5 + $0x28] sm:$0xff] }
0x1891   : > { %v8237_v1 = vadd.f32 %v8236_v16, %v8235_v35  ;;  %9044 = vpush %v6548_v0  ;;  %v6577_v60 = vadd.f32 %v6576_v19, %v6575_v20  ;;  %v7636_v62 = vadd.f32 %v7635_v31, %v7634_v10  ;;  %v8198_v3 = vadd.f32 %v8197_v46, %v8196_v28  ;;  %v9435_v28 = vld [vmem:[%s14133_s5 + $0x20] sm:$0xff]  ;;  %v9438_v46 = vld [vmem:[%s14133_s5 + $0x68] sm:$0xff] }
0x1892   : > { %v7597_v43 = vadd.f32 %v7596_v22, %v7595_v53  ;;  %v9436_v20 = vld [vmem:[%s14133_s5 + $0x60] sm:$0xff] }
0x1893   : > { %v8238_v39 = vrot.slane %v8237_v1, 2  ;;  %9046 = vpush %v6577_v60  ;;  %v7637_v55 = vrot.slane %v7636_v62, 1  ;;  %v8199_v57 = vrot.slane %v8198_v3, 1 }
0x1894   : > { %9048 = vpush %v7597_v43 }
0x1895   : > { %v7638_v4 = vadd.f32 %v7637_v55, %v7636_v62  ;;  %v8200_v23 = vadd.f32 %v8199_v57, %v8198_v3  ;;  %v8239_v38 = vadd.f32 %v8238_v39, %v8237_v1  ;;  %v9439_v3 = vld [vmem:[%s14133_s5 + $0x30] sm:$0xff] }
0x1896   : > { %v9440_v39 = vld [vmem:[%s14133_s5 + $0x70] sm:$0xff] }
0x1897   : > { %9050 = vpush %v7638_v4  ;;  %v8240_v9 = vrot.slane %v8239_v38, 1 }
0x1898   : > { %9052 = vpush %v8200_v23  ;;  %v9441_v23 = vld [vmem:[%s14133_s5 + $0x38] sm:$0xff] }
0x1899   : > { %v8241_v61 = vadd.f32 %v8240_v9, %v8239_v38  ;;  %v9442_v9 = vld [vmem:[%s14133_s5 + $0x78] sm:$0xff] }
0x189b   : > { %9054 = vpush %v8241_v61 }
0x18a1   : > { %s9013_s30 = spop %9012 }
0x18a5   : > { %s9015_s19 = spop %9014 }
0x18a6   : > { %s9017_s20 = spop %9016 }
0x18a7   : > { %s2030_s11 = sadd.f32 %s9017_s20, %s9013_s30 }
0x18a9   : > { %s9019_s21 = spop %9018 }
0x18aa   : > { %s9021_s22 = spop %9020  ;;  %s2088_s12 = sadd.f32 %s9019_s21, %s9015_s19 }
0x18ab   : > { %s2465_s14 = sadd.f32 %s9021_s22, %s2030_s11 }
0x18ad   : > { %s9023_s23 = spop %9022 }
0x18ae   : > { %s9025_s8 = spop %9024  ;;  %s2503_s16 = sadd.f32 %s9023_s23, %s2088_s12 }
0x18b1   : > { %s9027_s9 = spop %9026 }
0x18b2   : > { %s9029_s27 = spop %9028 }
0x18b3   : > { %s4126_s15 = sadd.f32 %s9029_s27, %s9025_s8 }
0x18b5   : > { %s9031_s28 = spop %9030 }
0x18b6   : > { %s9033_s29 = spop %9032  ;;  %s4167_s18 = sadd.f32 %s9031_s28, %s9027_s9 }
0x18b7   : > { %s4512_s1 = sadd.f32 %s9033_s29, %s4126_s15 }
0x18b9   : > { %s9035_s10 = spop %9034 }
0x18ba   : > { %s9037_s13 = spop %9036  ;;  %s4541_s2 = sadd.f32 %s9035_s10, %s4167_s18 }
0x18bb   : > { %s8702_s10 = sshll.u32 %s14332_s25, 3 }
0x18bd   : > { %s9039_s26 = spop %9038 }
0x18be   : > { %s9041_s17 = spop %9040 }
0x18bf   : > { %s6164_s4 = sadd.f32 %s9041_s17, %s9037_s13  ;;  %s306_s13 = scalar_lea.vmem %s14135_s7, %s8702_s10 }
0x18c1   : > { %s9043_s0 = spop %9042 }
0x18c2   : > { %s9045_s3 = spop %9044  ;;  %s6205_s20 = sadd.f32 %s9043_s0, %s9039_s26 }
0x18c3   : > { %s6550_s22 = sadd.f32 %s9045_s3, %s6164_s4 }
0x18c4   : > { %s9047_s21 = spop %9046 }
0x18c5   : > { %s9049_s23 = spop %9048  ;;  %s6579_s8 = sadd.f32 %s9047_s21, %s6205_s20 }
0x18c8   : > { %s9051_s9 = spop %9050 }
0x18c9   : > { %s9053_s27 = spop %9052 }
0x18cc   : > { %s9055_s0 = spop %9054 }
0x1904   : > { %v8533_v52 = vpop.f32.mrb[152].mxu1 }
0x1905   : > { %v8552_v7 = vmax.f32 %v8533_v52, 0.0  ;;  %v8535_v33 = vpop.f32.mrb[153].mxu1 }
0x1906   : > { %v8553_v12 = vmax.f32 %v8535_v33, 0.0  ;;  %v8537_v32 = vpop.f32.mrb[154].mxu1 }
0x1907   : > { %v8554_v54 = vmax.f32 %v8537_v32, 0.0  ;;  %v8539_v49 = vpop.f32.mrb[155].mxu1  ;;  %v8560_v11 = vmul.f32 %v9429_v13, %v8552_v7  ;;  %v8589_v45 = vmul.f32 %v9430_v51, %v8552_v7 }
0x1908   : > { %v8561_v29 = vmul.f32 %v9427_v34, %v8553_v12  ;;  %v8590_v30 = vmul.f32 %v9428_v6, %v8553_v12  ;;  %v8555_v5 = vmax.f32 %v8539_v49, 0.0 }
0x1909   : > { %v8562_v17 = vmul.f32 %v9433_v59, %v8554_v54  ;;  %v8591_v42 = vmul.f32 %v9434_v27, %v8554_v54  ;;  %v323_v59 = vld [vmem:[%s14134_s6] sm:$0xff]  ;;  %v4543_v27 = vstv %s4512_s1  ;;  %s8202_s1 = sadd.f32 %s9053_s27, %s9049_s23 }
0x190a   : > { %v8568_v8 = vsel %vm2444_vm13, %v8561_v29, 0.0  ;;  %v8597_v26 = vsel %vm2444_vm13, %v8590_v30, 0.0  ;;  %v8563_v18 = vmul.f32 %v9431_v37, %v8555_v5  ;;  %v8592_v56 = vmul.f32 %v9432_v36, %v8555_v5 }
0x190b   : > { %v8569_v41 = vadd.f32 %v8568_v8, %v8560_v11  ;;  %v8598_v40 = vadd.f32 %v8597_v26, %v8589_v45  ;;  %v14328_v36 = vlaneseq }
0x190c   : > { %v8543_v63 = vpop.f32.mrb[156].mxu1  ;;  %v8571_v47 = vsel %vm2444_vm13, %v8563_v18, 0.0  ;;  %v8600_v44 = vsel %vm2444_vm13, %v8592_v56, 0.0 }
0x190d   : > { %v8570_v50 = vadd.f32 %v8569_v41, %v8562_v17  ;;  %v8599_v48 = vadd.f32 %v8598_v40, %v8591_v42  ;;  %v8556_v14 = vmax.f32 %v8543_v63, 0.0  ;;  %v8545_v21 = vpop.f32.mrb[157].mxu1  ;;  %v322_v56 = vand.u32 127, %v14328_v36 }
0x190e   : > { %v8557_v15 = vmax.f32 %v8545_v21, 0.0  ;;  %v8547_v58 = vpop.f32.mrb[158].mxu1  ;;  %v2505_v41 = vstv %s2465_s14  ;;  %v2509_v40 = vstv %s2503_s16  ;;  %v6581_v21 = vstv %s6550_s22 }
0x190f   : > { %v8572_v2 = vadd.f32 %v8571_v47, %v8570_v50  ;;  %v8601_v25 = vadd.f32 %v8600_v44, %v8599_v48  ;;  %v8564_v10 = vmul.f32 %v9435_v28, %v8556_v14  ;;  %v8593_v53 = vmul.f32 %v9436_v20, %v8556_v14  ;;  %v8549_v35 = vpop.f32.mrb[159].mxu1 }
0x1910   : > { %v8565_v0 = vmul.f32 %v9437_v24, %v8557_v15  ;;  %v8594_v31 = vmul.f32 %v9438_v46, %v8557_v15  ;;  %v8558_v16 = vmax.f32 %v8547_v58, 0.0  ;;  %v8559_v19 = vmax.f32 %v8549_v35, 0.0 }
0x1911   : > { %v8573_v22 = vadd.f32 %v8572_v2, %v8564_v10  ;;  %v8602_v1 = vadd.f32 %v8601_v25, %v8593_v53  ;;  %vm2504_vm14 = vcmp.eq.s32.totalorder %v322_v56, 0  ;;  %vm2508_vm15 = vcmp.eq.s32.totalorder %v322_v56, 1 }
0x1912   : > { %v8574_v60 = vsel %vm2444_vm13, %v8565_v0, 0.0  ;;  %v8603_v62 = vsel %vm2444_vm13, %v8594_v31, 0.0  ;;  %v8566_v43 = vmul.f32 %v9439_v3, %v8558_v16  ;;  %v8595_v55 = vmul.f32 %v9440_v39, %v8558_v16 }
0x1913   : > { %v8575_v57 = vadd.f32 %v8574_v60, %v8573_v22  ;;  %v8604_v4 = vadd.f32 %v8603_v62, %v8602_v1  ;;  %v8567_v38 = vmul.f32 %v9441_v23, %v8559_v19  ;;  %v8596_v61 = vmul.f32 %v9442_v9, %v8559_v19 }
0x1914   : > { %v2506_v17 = vsel %vm2504_vm14, %v2505_v41, 0.0  ;;  %vm4542_vm0 = vcmp.eq.s32.totalorder %v322_v56, 2  ;;  %v2510_v42 = vsel %vm2508_vm15, %v2509_v40, 0.0  ;;  %vm4546_vm1 = vcmp.eq.s32.totalorder %v322_v56, 3 }
0x1915   : > { %v8576_v52 = vadd.f32 %v8575_v57, %v8566_v43  ;;  %v8605_v7 = vadd.f32 %v8604_v4, %v8595_v55  ;;  %v8577_v33 = vsel %vm2444_vm13, %v8567_v38, 0.0  ;;  %v8606_v12 = vsel %vm2444_vm13, %v8596_v61, 0.0 }
0x1916   : > { %v2507_v63 = vadd.f32 %v2506_v17, %v323_v59  ;;  %v4547_v50 = vstv %s4541_s2  ;;  %v4544_v48 = vsel %vm4542_vm0, %v4543_v27, 0.0  ;;  %vm6580_vm2 = vcmp.eq.s32.totalorder %v322_v56, 4  ;;  %s8243_s2 = sadd.f32 %s9055_s0, %s9051_s9 }
0x1917   : > { %v8578_v32 = vadd.f32 %v8577_v33, %v8576_v52  ;;  %v8607_v54 = vadd.f32 %v8606_v12, %v8605_v7  ;;  %v4548_v47 = vsel %vm4546_vm1, %v4547_v50, 0.0  ;;  %vm6584_vm3 = vcmp.eq.s32.totalorder %v322_v56, 5 }
0x1918   : > { %v2511_v14 = vadd.f32 %v2510_v42, %v2507_v63  ;;  %v6585_v15 = vstv %s6579_s8  ;;  %v6582_v58 = vsel %vm6580_vm2, %v6581_v21, 0.0  ;;  %vm8618_vm4 = vcmp.eq.s32.totalorder %v322_v56, 6 }
0x1919   : > { %8579 = vadd.xlane.f32.xlu1 %v8578_v32  ;;  %8608 = vadd.xlane.f32.xlu0 %v8607_v54  ;;  %v6586_v25 = vsel %vm6584_vm3, %v6585_v15, 0.0  ;;  %vm8622_vm5 = vcmp.eq.s32.totalorder %v322_v56, 7 }
0x191a   : > { %v4545_v44 = vadd.f32 %v4544_v48, %v2511_v14 }
0x191c   : > { %v4549_v2 = vadd.f32 %v4548_v47, %v4545_v44 }
0x191e   : > { %v6583_v28 = vadd.f32 %v6582_v58, %v4549_v2 }
0x1920   : > { %v6587_v10 = vadd.f32 %v6586_v25, %v6583_v28 }
0x19a6   : > { %v8580_v49 = vpop.xlane.xlu1 %8579  ;;  %v8609_v34 = vpop.xlane.xlu0 %8608 }
0x19a7   : > { %v8581_v29 = vrot.slane %v8580_v49, 4  ;;  %v8610_v6 = vrot.slane %v8609_v34, 4 }
0x19a9   : > { %v8582_v30 = vadd.f32 %v8581_v29, %v8580_v49  ;;  %v8611_v5 = vadd.f32 %v8610_v6, %v8609_v34 }
0x19ab   : > { %v8583_v13 = vrot.slane %v8582_v30, 2  ;;  %v8612_v11 = vrot.slane %v8611_v5, 2 }
0x19ad   : > { %v8584_v51 = vadd.f32 %v8583_v13, %v8582_v30  ;;  %v8613_v45 = vadd.f32 %v8612_v11, %v8611_v5 }
0x19af   : > { %v8585_v8 = vrot.slane %v8584_v51, 1  ;;  %v8614_v26 = vrot.slane %v8613_v45, 1 }
0x19b1   : > { %v8586_v37 = vadd.f32 %v8585_v8, %v8584_v51  ;;  %v8615_v18 = vadd.f32 %v8614_v26, %v8613_v45 }
0x19b3   : > { %9056 = vpush %v8586_v37 }
0x19b4   : > { %9058 = vpush %v8615_v18 }
0x19e4   : > { %s9057_s3 = spop %9056 }
0x19e5   : > { %s8588_s4 = sadd.f32 %s9057_s3, %s8202_s1  ;;  %s9059_s28 = spop %9058 }
0x19e6   : > { %s8617_s29 = sadd.f32 %s9059_s28, %s8243_s2 }
0x19e7   : > { %v8619_v20 = vstv %s8588_s4 }
0x19e8   : > { %v8620_v53 = vsel %vm8618_vm4, %v8619_v20, 0.0  ;;  %v8623_v35 = vstv %s8617_s29 }
0x19e9   : > { %v8621_v24 = vadd.f32 %v8620_v53, %v6587_v10  ;;  %v8624_v0 = vsel %vm8622_vm5, %v8623_v35, 0.0 }
0x19eb   : > { %v8625_v46 = vadd.f32 %v8624_v0, %v8621_v24 }
0x19ed   : > { %8626 = vst [vmem:[%s306_s13] sm:$0xff] %v8625_v46 }
0x19ee PF: > { %s17_s24 = sadd.s32 1, %s9449_s24  }
0x19ef   : > { %p14_p5 = scmp.ge.s32.totalorder %s17_s24, 4  }
0x19f1   :  { %16 = sbr.rel (!%p14_p5) target bundleno = 6 (0x6), region = 91 }

</bundles_post_ra>
